<compile_context>
chip_gen: v7x
topology: tpu7x:2x2x1
jax: 0.10.0
libtpu: 0.0.40
codegen_flags: <defaults>
</compile_context>

<pallas_src>
import functools
import math

import jax
import jax.numpy as jnp
from jax.experimental import pallas as pl
from jax.experimental.pallas import tpu as pltpu

D_MODEL = 32
NHEAD = 2
HEAD_DIM = D_MODEL // NHEAD
NUM_LAYERS = 2
FF_DIM = 2048          # nn.Transformer default dim_feedforward
EPS = 1e-5             # nn.Transformer default layer_norm_eps
VOCAB_SIZE = 64
NEG_BIG = -1e30        # finite stand-in for -inf

# canonical weight ordering shared by the wrapper and the kernel unpack
ENC_KEYS = ("wqkv", "bqkv", "wo", "bo", "n1w", "n1b",
            "w1", "b1", "w2", "b2", "n2w", "n2b")
DEC_KEYS = ("wqkv", "bqkv", "wo", "bo", "n1w", "n1b",
            "wcq", "bcq", "wckv", "bckv", "wco", "bco",
            "n2w", "n2b", "w1", "b1", "w2", "b2", "n3w", "n3b")


# ------------------------- in-kernel helpers (values, not refs) -------------------------

def _linear(x, w, b, relu=False):
    """y = act(x @ w + b); w is bf16 (in, out), accumulation f32, b is f32 (1, out)."""
    y = jnp.dot(x.astype(w.dtype), w, preferred_element_type=jnp.float32) + b
    if relu:
        y = jnp.maximum(y, 0.0)
    return y


def _layernorm(z, g, b):
    """LayerNorm over last dim, biased variance, eps=1e-5 (f32 math)."""
    mu = jnp.mean(z, axis=-1, keepdims=True)
    zc = z - mu
    var = jnp.mean(zc * zc, axis=-1, keepdims=True)
    return zc * jax.lax.rsqrt(var + EPS) * g + b


def _embed(ids_col, emb, n):
    """Row gather emb[ids] done as a one-hot matmul (no XLA gather needed).

    ids_col: (n, 1) int32; emb: (V, D) f32 -> (n, D) f32.
    """
    iota_v = jax.lax.broadcasted_iota(jnp.int32, (n, VOCAB_SIZE), 1)
    onehot = (ids_col == iota_v).astype(jnp.float32)
    return jnp.dot(onehot, emb, preferred_element_type=jnp.float32)


def _attention(q, k, v, wo, bo, scr, s_q, s_kv, causal):
    """Multi-head attention + output projection, all in VMEM.

    q: (Sq, D) f32 (already scaled by 1/sqrt(head_dim) via folded weights)
    k, v: (Skv, D) f32;  wo: (D, D) bf16;  bo: (1, D) f32.
    Per-head outputs are stored into the (>=Sq, D) f32 scratch at their channel
    slice; a single out-projection dot runs after the head loop.
    """
    if causal:
        rows = jax.lax.broadcasted_iota(jnp.int32, (s_q, s_kv), 0)
        cols = jax.lax.broadcasted_iota(jnp.int32, (s_q, s_kv), 1)
        neg = jnp.where(cols > rows, jnp.float32(NEG_BIG), jnp.float32(0.0))
    for h in range(NHEAD):
        sl = slice(h * HEAD_DIM, (h + 1) * HEAD_DIM)
        qh = q[:, sl].astype(jnp.bfloat16)          # (Sq, dh)
        kh = k[:, sl].astype(jnp.bfloat16)          # (Skv, dh)
        vh = v[:, sl].astype(jnp.bfloat16)
        # contract last dims directly (no explicit transpose of k)
        s = jax.lax.dot_general(qh, kh, (((1,), (1,)), ((), ())),
                                preferred_element_type=jnp.float32)   # (Sq, Skv)
        if causal:
            s = s + neg
        m = jnp.max(s, axis=-1, keepdims=True)
        p = jnp.exp(s - m)
        p = p * pl.reciprocal(jnp.sum(p, axis=-1, keepdims=True), approx=True)
        oh = jnp.dot(p.astype(jnp.bfloat16), vh,
                     preferred_element_type=jnp.float32)              # (Sq, dh)
        scr[0:s_q, sl] = oh                                           # channel-slice store
    heads = scr[0:s_q, :].astype(jnp.bfloat16)                        # (Sq, D)
    return jnp.dot(heads, wo, preferred_element_type=jnp.float32) + bo


def _encoder_layer(x, w, scr, S):
    qkv = _linear(x, w["wqkv"], w["bqkv"])                   # fused QKV -> (S, 3D)
    q = qkv[:, 0 * D_MODEL:1 * D_MODEL]
    k = qkv[:, 1 * D_MODEL:2 * D_MODEL]
    v = qkv[:, 2 * D_MODEL:3 * D_MODEL]
    sa = _attention(q, k, v, w["wo"], w["bo"], scr, S, S, causal=False)
    x1 = _layernorm(x + sa, w["n1w"], w["n1b"])
    h = _linear(x1, w["w1"], w["b1"], relu=True)             # (S, 2048) stays in VMEM
    ff = _linear(h, w["w2"], w["b2"])
    return _layernorm(x1 + ff, w["n2w"], w["n2b"])


def _decoder_layer(y, mem, w, scr, T, S):
    # causal self-attention (mask generated in-kernel)
    qkv = _linear(y, w["wqkv"], w["bqkv"])
    q = qkv[:, 0 * D_MODEL:1 * D_MODEL]
    k = qkv[:, 1 * D_MODEL:2 * D_MODEL]
    v = qkv[:, 2 * D_MODEL:3 * D_MODEL]
    sa = _attention(q, k, v, w["wo"], w["bo"], scr, T, T, causal=True)
    y1 = _layernorm(y + sa, w["n1w"], w["n1b"])
    # cross-attention (no mask)
    qc = _linear(y1, w["wcq"], w["bcq"])                     # (T, D)
    kvc = _linear(mem, w["wckv"], w["bckv"])                 # fused KV -> (S, 2D)
    kc = kvc[:, :D_MODEL]
    vc = kvc[:, D_MODEL:]
    ca = _attention(qc, kc, vc, w["wco"], w["bco"], scr, T, S, causal=False)
    y2 = _layernorm(y1 + ca, w["n2w"], w["n2b"])
    # FFN
    h = _linear(y2, w["w1"], w["b1"], relu=True)
    ff = _linear(h, w["w2"], w["b2"])
    return _layernorm(y2 + ff, w["n3w"], w["n3b"])


# ------------------------- the single fused Pallas kernel -------------------------

def _tiny_llm_kernel(src_ref, tgt_ref, emb_ref, *refs, S, T):
    # refs layout (see tiny_llm_forward): 12 stacked enc weights, enc final LN (2),
    # 20 stacked dec weights, dec final LN (2), head (2), then out_ref, attn scratch.
    n_e, n_d = len(ENC_KEYS), len(DEC_KEYS)
    enc_w = dict(zip(ENC_KEYS, refs[:n_e]))
    enc_nw, enc_nb = refs[n_e], refs[n_e + 1]
    dec_w = dict(zip(DEC_KEYS, refs[n_e + 2:n_e + 2 + n_d]))
    dec_nw, dec_nb = refs[n_e + 2 + n_d], refs[n_e + 3 + n_d]
    w_out, b_out = refs[n_e + 4 + n_d], refs[n_e + 5 + n_d]
    o_ref = refs[n_e + 6 + n_d]
    scr = refs[n_e + 7 + n_d]

    emb = emb_ref[...]                                   # (V, D) f32
    x = _embed(src_ref[0], emb, S)                       # (S, D) f32
    y = _embed(tgt_ref[0], emb, T)                       # (T, D) f32

    # encoder stack (src_mask is all-False in the reference module => no masking)
    for l in range(NUM_LAYERS):
        wl = {kk: enc_w[kk][l] for kk in ENC_KEYS}       # static layer index
        x = _encoder_layer(x, wl, scr, S)
    mem = _layernorm(x, enc_nw[...], enc_nb[...])        # final encoder LayerNorm

    # decoder stack (causal self-attn, unmasked cross-attn)
    for l in range(NUM_LAYERS):
        wl = {kk: dec_w[kk][l] for kk in DEC_KEYS}
        y = _decoder_layer(y, mem, wl, scr, T, S)
    yn = _layernorm(y, dec_nw[...], dec_nb[...])         # final decoder LayerNorm

    o_ref[0] = _linear(yn, w_out[...], b_out[...]).astype(o_ref.dtype)


# ------------------------- pallas_call wrapper -------------------------

def _full_spec(arr):
    return pl.BlockSpec(arr.shape, lambda b: (0,) * arr.ndim)


def tiny_llm_forward(params, src, tgt):
    B, S = src.shape
    _, T = tgt.shape
    src3 = src.astype(jnp.int32).reshape(B, S, 1)   # metadata-only reshape
    tgt3 = tgt.astype(jnp.int32).reshape(B, T, 1)

    weights = (tuple(params["enc"][k] for k in ENC_KEYS)
               + (params["enc_norm_w"], params["enc_norm_b"])
               + tuple(params["dec"][k] for k in DEC_KEYS)
               + (params["dec_norm_w"], params["dec_norm_b"])
               + (params["fc_out_w"], params["fc_out_b"]))

    in_specs = ([pl.BlockSpec((1, S, 1), lambda b: (b, 0, 0)),
                 pl.BlockSpec((1, T, 1), lambda b: (b, 0, 0)),
                 _full_spec(params["embedding"])]
                + [_full_spec(w) for w in weights])

    return pl.pallas_call(
        functools.partial(_tiny_llm_kernel, S=S, T=T),
        out_shape=jax.ShapeDtypeStruct((B, T, VOCAB_SIZE), jnp.float32),
        grid=(B,),
        in_specs=in_specs,
        out_specs=pl.BlockSpec((1, T, VOCAB_SIZE), lambda b: (b, 0, 0)),
        scratch_shapes=[pltpu.VMEM((max(S, T), D_MODEL), jnp.float32)],
        compiler_params=pltpu.CompilerParams(dimension_semantics=("parallel",)),
    )(src3, tgt3, params["embedding"], *weights)


# ------------------------- parameter init (torch layout) & one-time prep -------------------------

def _init_params(key):
    """Parameters in torch layout: linear weights are (out_features, in_features)."""
    def nrm(k, shape, scale=0.02):
        return scale * jax.random.normal(k, shape, jnp.float32)

    keys = iter(jax.random.split(key, 256))

    def attn_params():
        return {
            "in_proj_w": nrm(next(keys), (3 * D_MODEL, D_MODEL)),
            "in_proj_b": jnp.zeros((3 * D_MODEL,), jnp.float32),
            "out_proj_w": nrm(next(keys), (D_MODEL, D_MODEL)),
            "out_proj_b": jnp.zeros((D_MODEL,), jnp.float32),
        }

    def ln():
        return jnp.ones((D_MODEL,), jnp.float32), jnp.zeros((D_MODEL,), jnp.float32)

    def enc_layer():
        n1w, n1b = ln(); n2w, n2b = ln()
        return {
            "self_attn": attn_params(),
            "norm1_w": n1w, "norm1_b": n1b,
            "lin1_w": nrm(next(keys), (FF_DIM, D_MODEL)),
            "lin1_b": jnp.zeros((FF_DIM,), jnp.float32),
            "lin2_w": nrm(next(keys), (D_MODEL, FF_DIM)),
            "lin2_b": jnp.zeros((D_MODEL,), jnp.float32),
            "norm2_w": n2w, "norm2_b": n2b,
        }

    def dec_layer():
        n1w, n1b = ln(); n2w, n2b = ln(); n3w, n3b = ln()
        return {
            "self_attn": attn_params(),
            "cross_attn": attn_params(),
            "norm1_w": n1w, "norm1_b": n1b,
            "norm2_w": n2w, "norm2_b": n2b,
            "lin1_w": nrm(next(keys), (FF_DIM, D_MODEL)),
            "lin1_b": jnp.zeros((FF_DIM,), jnp.float32),
            "lin2_w": nrm(next(keys), (D_MODEL, FF_DIM)),
            "lin2_b": jnp.zeros((D_MODEL,), jnp.float32),
            "norm3_w": n3w, "norm3_b": n3b,
        }

    enc_nw, enc_nb = ln()
    dec_nw, dec_nb = ln()
    return {
        "embedding": nrm(next(keys), (VOCAB_SIZE, D_MODEL), scale=1.0),
        "encoder_layers": [enc_layer() for _ in range(NUM_LAYERS)],
        "decoder_layers": [dec_layer() for _ in range(NUM_LAYERS)],
        "enc_norm_w": enc_nw, "enc_norm_b": enc_nb,
        "dec_norm_w": dec_nw, "dec_norm_b": dec_nb,
        "fc_out_w": nrm(next(keys), (VOCAB_SIZE, D_MODEL)),
        "fc_out_b": jnp.zeros((VOCAB_SIZE,), jnp.float32),
    }


def prepare_params(tp):
    """One-time conversion: transpose to (in, out), fuse QKV / KV, fold 1/sqrt(dh)
    into the Q projection, cast MXU weights to bf16, reshape biases / LN params to
    (1, N), and STACK per-layer weights along a leading layer axis."""
    scale = 1.0 / math.sqrt(HEAD_DIM)
    mm = jnp.bfloat16  # MXU operand dtype; accumulation stays f32

    def row(b):
        return b.reshape(1, -1).astype(jnp.float32)

    def self_attn(ap):
        w = ap["in_proj_w"].T                      # (D, 3D)
        b = ap["in_proj_b"]
        w = w.at[:, :D_MODEL].multiply(scale)      # fold score scale into Wq
        b = b.at[:D_MODEL].multiply(scale)         # ... and bq
        return {"wqkv": w.astype(mm), "bqkv": row(b),
                "wo": ap["out_proj_w"].T.astype(mm), "bo": row(ap["out_proj_b"])}

    def cross_attn(ap):
        wq = ap["in_proj_w"][:D_MODEL].T * scale   # (D, D), scale folded
        bq = ap["in_proj_b"][:D_MODEL] * scale
        wkv = ap["in_proj_w"][D_MODEL:].T          # (D, 2D)
        bkv = ap["in_proj_b"][D_MODEL:]
        return {"wcq": wq.astype(mm), "bcq": row(bq),
                "wckv": wkv.astype(mm), "bckv": row(bkv),
                "wco": ap["out_proj_w"].T.astype(mm), "bco": row(ap["out_proj_b"])}

    def ffn(lp):
        return {"w1": lp["lin1_w"].T.astype(mm), "b1": row(lp["lin1_b"]),
                "w2": lp["lin2_w"].T.astype(mm), "b2": row(lp["lin2_b"])}

    def enc(lp):
        return {**self_attn(lp["self_attn"]), **ffn(lp),
                "n1w": row(lp["norm1_w"]), "n1b": row(lp["norm1_b"]),
                "n2w": row(lp["norm2_w"]), "n2b": row(lp["norm2_b"])}

    def dec(lp):
        return {**self_attn(lp["self_attn"]), **cross_attn(lp["cross_attn"]), **ffn(lp),
                "n1w": row(lp["norm1_w"]), "n1b": row(lp["norm1_b"]),
                "n2w": row(lp["norm2_w"]), "n2b": row(lp["norm2_b"]),
                "n3w": row(lp["norm3_w"]), "n3b": row(lp["norm3_b"])}

    enc_layers = [enc(l) for l in tp["encoder_layers"]]
    dec_layers = [dec(l) for l in tp["decoder_layers"]]

    def stack(layers, keys):
        return {k: jnp.stack([l[k] for l in layers], axis=0) for k in keys}

    return {
        "embedding": tp["embedding"].astype(jnp.float32),
        "enc": stack(enc_layers, ENC_KEYS),
        "dec": stack(dec_layers, DEC_KEYS),
        "enc_norm_w": row(tp["enc_norm_w"]), "enc_norm_b": row(tp["enc_norm_b"]),
        "dec_norm_w": row(tp["dec_norm_w"]), "dec_norm_b": row(tp["dec_norm_b"]),
        "fc_out_w": tp["fc_out_w"].T.astype(mm), "fc_out_b": row(tp["fc_out_b"]),
    }


if __name__ == "__main__":
    key = jax.random.PRNGKey(0)
    kp, ks, kt = jax.random.split(key, 3)
    params_torch = _init_params(kp)
    params = prepare_params(params_torch)   # one-time layout prep (no per-call transposes)

    B, S, T = 2, 8, 8
    src = jax.random.randint(ks, (B, S), 0, VOCAB_SIZE, dtype=jnp.int32)
    tgt = jax.random.randint(kt, (B, T), 0, VOCAB_SIZE, dtype=jnp.int32)

    fwd = jax.jit(tiny_llm_forward)
    logits = fwd(params, src, tgt)
    logits = jax.block_until_ready(logits)

    assert logits.shape == (B, T, VOCAB_SIZE)
    assert bool(jnp.all(jnp.isfinite(logits)))
    print("KERNEL_OK")
</pallas_src>

<mosaic_0001>
module attributes {stable_mosaic.version = 11 : i64} {
  func.func @_tiny_llm_kernel(%arg0: i32, %arg1: memref<1x8x1xi32, #tpu.memory_space<vmem>>, %arg2: memref<1x8x1xi32, #tpu.memory_space<vmem>>, %arg3: memref<64x32xf32, #tpu.memory_space<vmem>>, %arg4: memref<2x32x96xbf16, #tpu.memory_space<vmem>>, %arg5: memref<2x1x96xf32, #tpu.memory_space<vmem>>, %arg6: memref<2x32x32xbf16, #tpu.memory_space<vmem>>, %arg7: memref<2x1x32xf32, #tpu.memory_space<vmem>>, %arg8: memref<2x1x32xf32, #tpu.memory_space<vmem>>, %arg9: memref<2x1x32xf32, #tpu.memory_space<vmem>>, %arg10: memref<2x32x2048xbf16, #tpu.memory_space<vmem>>, %arg11: memref<2x1x2048xf32, #tpu.memory_space<vmem>>, %arg12: memref<2x2048x32xbf16, #tpu.memory_space<vmem>>, %arg13: memref<2x1x32xf32, #tpu.memory_space<vmem>>, %arg14: memref<2x1x32xf32, #tpu.memory_space<vmem>>, %arg15: memref<2x1x32xf32, #tpu.memory_space<vmem>>, %arg16: memref<1x32xf32, #tpu.memory_space<vmem>>, %arg17: memref<1x32xf32, #tpu.memory_space<vmem>>, %arg18: memref<2x32x96xbf16, #tpu.memory_space<vmem>>, %arg19: memref<2x1x96xf32, #tpu.memory_space<vmem>>, %arg20: memref<2x32x32xbf16, #tpu.memory_space<vmem>>, %arg21: memref<2x1x32xf32, #tpu.memory_space<vmem>>, %arg22: memref<2x1x32xf32, #tpu.memory_space<vmem>>, %arg23: memref<2x1x32xf32, #tpu.memory_space<vmem>>, %arg24: memref<2x32x32xbf16, #tpu.memory_space<vmem>>, %arg25: memref<2x1x32xf32, #tpu.memory_space<vmem>>, %arg26: memref<2x32x64xbf16, #tpu.memory_space<vmem>>, %arg27: memref<2x1x64xf32, #tpu.memory_space<vmem>>, %arg28: memref<2x32x32xbf16, #tpu.memory_space<vmem>>, %arg29: memref<2x1x32xf32, #tpu.memory_space<vmem>>, %arg30: memref<2x1x32xf32, #tpu.memory_space<vmem>>, %arg31: memref<2x1x32xf32, #tpu.memory_space<vmem>>, %arg32: memref<2x32x2048xbf16, #tpu.memory_space<vmem>>, %arg33: memref<2x1x2048xf32, #tpu.memory_space<vmem>>, %arg34: memref<2x2048x32xbf16, #tpu.memory_space<vmem>>, %arg35: memref<2x1x32xf32, #tpu.memory_space<vmem>>, %arg36: memref<2x1x32xf32, #tpu.memory_space<vmem>>, %arg37: memref<2x1x32xf32, #tpu.memory_space<vmem>>, %arg38: memref<1x32xf32, #tpu.memory_space<vmem>>, %arg39: memref<1x32xf32, #tpu.memory_space<vmem>>, %arg40: memref<32x64xbf16, #tpu.memory_space<vmem>>, %arg41: memref<1x64xf32, #tpu.memory_space<vmem>>, %arg42: memref<1x8x64xf32, #tpu.memory_space<vmem>>, %arg43: memref<8x32xf32, #tpu.memory_space<vmem>>) attributes {dimension_semantics = [#tpu.dimension_semantics<parallel>], iteration_bounds = array<i64: 2>, scalar_prefetch = 0 : i64, scratch_operands = 1 : i64, tpu.core_type = #tpu.core_type<tc>, window_params = [{transform_indices = @transform_0, window_bounds = array<i64: 1, 8, 1>}, {transform_indices = @transform_1, window_bounds = array<i64: 1, 8, 1>}, {pipeline_mode = #tpu.pipeline_mode<synchronous>, transform_indices = @transform_2, window_bounds = array<i64: 64, 32>}, {pipeline_mode = #tpu.pipeline_mode<synchronous>, transform_indices = @transform_3, window_bounds = array<i64: 2, 32, 96>}, {pipeline_mode = #tpu.pipeline_mode<synchronous>, transform_indices = @transform_4, window_bounds = array<i64: 2, 1, 96>}, {pipeline_mode = #tpu.pipeline_mode<synchronous>, transform_indices = @transform_5, window_bounds = array<i64: 2, 32, 32>}, {pipeline_mode = #tpu.pipeline_mode<synchronous>, transform_indices = @transform_6, window_bounds = array<i64: 2, 1, 32>}, {pipeline_mode = #tpu.pipeline_mode<synchronous>, transform_indices = @transform_7, window_bounds = array<i64: 2, 1, 32>}, {pipeline_mode = #tpu.pipeline_mode<synchronous>, transform_indices = @transform_8, window_bounds = array<i64: 2, 1, 32>}, {pipeline_mode = #tpu.pipeline_mode<synchronous>, transform_indices = @transform_9, window_bounds = array<i64: 2, 32, 2048>}, {pipeline_mode = #tpu.pipeline_mode<synchronous>, transform_indices = @transform_10, window_bounds = array<i64: 2, 1, 2048>}, {pipeline_mode = #tpu.pipeline_mode<synchronous>, transform_indices = @transform_11, window_bounds = array<i64: 2, 2048, 32>}, {pipeline_mode = #tpu.pipeline_mode<synchronous>, transform_indices = @transform_12, window_bounds = array<i64: 2, 1, 32>}, {pipeline_mode = #tpu.pipeline_mode<synchronous>, transform_indices = @transform_13, window_bounds = array<i64: 2, 1, 32>}, {pipeline_mode = #tpu.pipeline_mode<synchronous>, transform_indices = @transform_14, window_bounds = array<i64: 2, 1, 32>}, {pipeline_mode = #tpu.pipeline_mode<synchronous>, transform_indices = @transform_15, window_bounds = array<i64: 1, 32>}, {pipeline_mode = #tpu.pipeline_mode<synchronous>, transform_indices = @transform_16, window_bounds = array<i64: 1, 32>}, {pipeline_mode = #tpu.pipeline_mode<synchronous>, transform_indices = @transform_17, window_bounds = array<i64: 2, 32, 96>}, {pipeline_mode = #tpu.pipeline_mode<synchronous>, transform_indices = @transform_18, window_bounds = array<i64: 2, 1, 96>}, {pipeline_mode = #tpu.pipeline_mode<synchronous>, transform_indices = @transform_19, window_bounds = array<i64: 2, 32, 32>}, {pipeline_mode = #tpu.pipeline_mode<synchronous>, transform_indices = @transform_20, window_bounds = array<i64: 2, 1, 32>}, {pipeline_mode = #tpu.pipeline_mode<synchronous>, transform_indices = @transform_21, window_bounds = array<i64: 2, 1, 32>}, {pipeline_mode = #tpu.pipeline_mode<synchronous>, transform_indices = @transform_22, window_bounds = array<i64: 2, 1, 32>}, {pipeline_mode = #tpu.pipeline_mode<synchronous>, transform_indices = @transform_23, window_bounds = array<i64: 2, 32, 32>}, {pipeline_mode = #tpu.pipeline_mode<synchronous>, transform_indices = @transform_24, window_bounds = array<i64: 2, 1, 32>}, {pipeline_mode = #tpu.pipeline_mode<synchronous>, transform_indices = @transform_25, window_bounds = array<i64: 2, 32, 64>}, {pipeline_mode = #tpu.pipeline_mode<synchronous>, transform_indices = @transform_26, window_bounds = array<i64: 2, 1, 64>}, {pipeline_mode = #tpu.pipeline_mode<synchronous>, transform_indices = @transform_27, window_bounds = array<i64: 2, 32, 32>}, {pipeline_mode = #tpu.pipeline_mode<synchronous>, transform_indices = @transform_28, window_bounds = array<i64: 2, 1, 32>}, {pipeline_mode = #tpu.pipeline_mode<synchronous>, transform_indices = @transform_29, window_bounds = array<i64: 2, 1, 32>}, {pipeline_mode = #tpu.pipeline_mode<synchronous>, transform_indices = @transform_30, window_bounds = array<i64: 2, 1, 32>}, {pipeline_mode = #tpu.pipeline_mode<synchronous>, transform_indices = @transform_31, window_bounds = array<i64: 2, 32, 2048>}, {pipeline_mode = #tpu.pipeline_mode<synchronous>, transform_indices = @transform_32, window_bounds = array<i64: 2, 1, 2048>}, {pipeline_mode = #tpu.pipeline_mode<synchronous>, transform_indices = @transform_33, window_bounds = array<i64: 2, 2048, 32>}, {pipeline_mode = #tpu.pipeline_mode<synchronous>, transform_indices = @transform_34, window_bounds = array<i64: 2, 1, 32>}, {pipeline_mode = #tpu.pipeline_mode<synchronous>, transform_indices = @transform_35, window_bounds = array<i64: 2, 1, 32>}, {pipeline_mode = #tpu.pipeline_mode<synchronous>, transform_indices = @transform_36, window_bounds = array<i64: 2, 1, 32>}, {pipeline_mode = #tpu.pipeline_mode<synchronous>, transform_indices = @transform_37, window_bounds = array<i64: 1, 32>}, {pipeline_mode = #tpu.pipeline_mode<synchronous>, transform_indices = @transform_38, window_bounds = array<i64: 1, 32>}, {pipeline_mode = #tpu.pipeline_mode<synchronous>, transform_indices = @transform_39, window_bounds = array<i64: 32, 64>}, {pipeline_mode = #tpu.pipeline_mode<synchronous>, transform_indices = @transform_40, window_bounds = array<i64: 1, 64>}, {transform_indices = @transform_41, window_bounds = array<i64: 1, 8, 64>}]} {
    %c0 = arith.constant 0 : index
    %c0_0 = arith.constant 0 : index
    %0 = vector.load %arg3[%c0, %c0_0] : memref<64x32xf32, #tpu.memory_space<vmem>>, vector<64x32xf32>
    %c0_1 = arith.constant 0 : index
    %c0_2 = arith.constant 0 : index
    %c0_3 = arith.constant 0 : index
    %1 = vector.load %arg1[%c0_1, %c0_2, %c0_3] : memref<1x8x1xi32, #tpu.memory_space<vmem>>, vector<1x8x1xi32>
    %2 = vector.shape_cast %1 : vector<1x8x1xi32> to vector<8x1xi32>
    %3 = tpu.iota {dimensions = array<i32: 1>} : vector<8x64xi32>
    %4 = vector.broadcast %2 : vector<8x1xi32> to vector<8x64xi32>
    %5 = arith.cmpi eq, %4, %3 : vector<8x64xi32>
    %6 = arith.extui %5 : vector<8x64xi1> to vector<8x64xi32>
    %7 = arith.sitofp %6 : vector<8x64xi32> to vector<8x64xf32>
    %cst = arith.constant dense<0.000000e+00> : vector<8x32xf32>
    %8 = tpu.matmul %7, %0, %cst {dimension_numbers = #tpu.dot_dimension_numbers<[1], [0], [0], [1], [0, 0, 1, 1], [], []>} : vector<8x64xf32>, vector<64x32xf32>, vector<8x32xf32> -> vector<8x32xf32>
    %c0_4 = arith.constant 0 : index
    %c0_5 = arith.constant 0 : index
    %c0_6 = arith.constant 0 : index
    %9 = vector.load %arg2[%c0_4, %c0_5, %c0_6] : memref<1x8x1xi32, #tpu.memory_space<vmem>>, vector<1x8x1xi32>
    %10 = vector.shape_cast %9 : vector<1x8x1xi32> to vector<8x1xi32>
    %11 = tpu.iota {dimensions = array<i32: 1>} : vector<8x64xi32>
    %12 = vector.broadcast %10 : vector<8x1xi32> to vector<8x64xi32>
    %13 = arith.cmpi eq, %12, %11 : vector<8x64xi32>
    %14 = arith.extui %13 : vector<8x64xi1> to vector<8x64xi32>
    %15 = arith.sitofp %14 : vector<8x64xi32> to vector<8x64xf32>
    %cst_7 = arith.constant dense<0.000000e+00> : vector<8x32xf32>
    %16 = tpu.matmul %15, %0, %cst_7 {dimension_numbers = #tpu.dot_dimension_numbers<[1], [0], [0], [1], [0, 0, 1, 1], [], []>} : vector<8x64xf32>, vector<64x32xf32>, vector<8x32xf32> -> vector<8x32xf32>
    %c0_8 = arith.constant 0 : index
    %c0_9 = arith.constant 0 : index
    %c0_10 = arith.constant 0 : index
    %17 = vector.load %arg4[%c0_8, %c0_9, %c0_10] : memref<2x32x96xbf16, #tpu.memory_space<vmem>>, vector<1x32x96xbf16>
    %18 = vector.shape_cast %17 : vector<1x32x96xbf16> to vector<32x96xbf16>
    %c0_11 = arith.constant 0 : index
    %c0_12 = arith.constant 0 : index
    %c0_13 = arith.constant 0 : index
    %19 = vector.load %arg5[%c0_11, %c0_12, %c0_13] : memref<2x1x96xf32, #tpu.memory_space<vmem>>, vector<1x1x96xf32>
    %20 = vector.shape_cast %19 : vector<1x1x96xf32> to vector<1x96xf32>
    %c0_14 = arith.constant 0 : index
    %c0_15 = arith.constant 0 : index
    %c0_16 = arith.constant 0 : index
    %21 = vector.load %arg6[%c0_14, %c0_15, %c0_16] : memref<2x32x32xbf16, #tpu.memory_space<vmem>>, vector<1x32x32xbf16>
    %22 = vector.shape_cast %21 : vector<1x32x32xbf16> to vector<32x32xbf16>
    %c0_17 = arith.constant 0 : index
    %c0_18 = arith.constant 0 : index
    %c0_19 = arith.constant 0 : index
    %23 = vector.load %arg7[%c0_17, %c0_18, %c0_19] : memref<2x1x32xf32, #tpu.memory_space<vmem>>, vector<1x1x32xf32>
    %24 = vector.shape_cast %23 : vector<1x1x32xf32> to vector<1x32xf32>
    %c0_20 = arith.constant 0 : index
    %c0_21 = arith.constant 0 : index
    %c0_22 = arith.constant 0 : index
    %25 = vector.load %arg8[%c0_20, %c0_21, %c0_22] : memref<2x1x32xf32, #tpu.memory_space<vmem>>, vector<1x1x32xf32>
    %26 = vector.shape_cast %25 : vector<1x1x32xf32> to vector<1x32xf32>
    %c0_23 = arith.constant 0 : index
    %c0_24 = arith.constant 0 : index
    %c0_25 = arith.constant 0 : index
    %27 = vector.load %arg9[%c0_23, %c0_24, %c0_25] : memref<2x1x32xf32, #tpu.memory_space<vmem>>, vector<1x1x32xf32>
    %28 = vector.shape_cast %27 : vector<1x1x32xf32> to vector<1x32xf32>
    %c0_26 = arith.constant 0 : index
    %c0_27 = arith.constant 0 : index
    %c0_28 = arith.constant 0 : index
    %29 = vector.load %arg10[%c0_26, %c0_27, %c0_28] : memref<2x32x2048xbf16, #tpu.memory_space<vmem>>, vector<1x32x2048xbf16>
    %30 = vector.shape_cast %29 : vector<1x32x2048xbf16> to vector<32x2048xbf16>
    %c0_29 = arith.constant 0 : index
    %c0_30 = arith.constant 0 : index
    %c0_31 = arith.constant 0 : index
    %31 = vector.load %arg11[%c0_29, %c0_30, %c0_31] : memref<2x1x2048xf32, #tpu.memory_space<vmem>>, vector<1x1x2048xf32>
    %32 = vector.shape_cast %31 : vector<1x1x2048xf32> to vector<1x2048xf32>
    %c0_32 = arith.constant 0 : index
    %c0_33 = arith.constant 0 : index
    %c0_34 = arith.constant 0 : index
    %33 = vector.load %arg12[%c0_32, %c0_33, %c0_34] : memref<2x2048x32xbf16, #tpu.memory_space<vmem>>, vector<1x2048x32xbf16>
    %34 = vector.shape_cast %33 : vector<1x2048x32xbf16> to vector<2048x32xbf16>
    %c0_35 = arith.constant 0 : index
    %c0_36 = arith.constant 0 : index
    %c0_37 = arith.constant 0 : index
    %35 = vector.load %arg13[%c0_35, %c0_36, %c0_37] : memref<2x1x32xf32, #tpu.memory_space<vmem>>, vector<1x1x32xf32>
    %36 = vector.shape_cast %35 : vector<1x1x32xf32> to vector<1x32xf32>
    %c0_38 = arith.constant 0 : index
    %c0_39 = arith.constant 0 : index
    %c0_40 = arith.constant 0 : index
    %37 = vector.load %arg14[%c0_38, %c0_39, %c0_40] : memref<2x1x32xf32, #tpu.memory_space<vmem>>, vector<1x1x32xf32>
    %38 = vector.shape_cast %37 : vector<1x1x32xf32> to vector<1x32xf32>
    %c0_41 = arith.constant 0 : index
    %c0_42 = arith.constant 0 : index
    %c0_43 = arith.constant 0 : index
    %39 = vector.load %arg15[%c0_41, %c0_42, %c0_43] : memref<2x1x32xf32, #tpu.memory_space<vmem>>, vector<1x1x32xf32>
    %40 = vector.shape_cast %39 : vector<1x1x32xf32> to vector<1x32xf32>
    %41 = arith.truncf %8 : vector<8x32xf32> to vector<8x32xbf16>
    %cst_44 = arith.constant dense<0.000000e+00> : vector<8x96xf32>
    %42 = tpu.matmul %41, %18, %cst_44 {dimension_numbers = #tpu.dot_dimension_numbers<[1], [0], [0], [1], [0, 0, 1, 1], [], []>} : vector<8x32xbf16>, vector<32x96xbf16>, vector<8x96xf32> -> vector<8x96xf32>
    %43 = vector.broadcast %20 : vector<1x96xf32> to vector<8x96xf32>
    %44 = arith.addf %42, %43 : vector<8x96xf32>
    %45 = vector.extract_strided_slice %44 {offsets = [0, 0], sizes = [8, 32], strides = [1, 1]} : vector<8x96xf32> to vector<8x32xf32>
    %46 = vector.extract_strided_slice %44 {offsets = [0, 32], sizes = [8, 32], strides = [1, 1]} : vector<8x96xf32> to vector<8x32xf32>
    %47 = vector.extract_strided_slice %44 {offsets = [0, 64], sizes = [8, 32], strides = [1, 1]} : vector<8x96xf32> to vector<8x32xf32>
    %48 = vector.extract_strided_slice %45 {offsets = [0, 0], sizes = [8, 16], strides = [1, 1]} : vector<8x32xf32> to vector<8x16xf32>
    %49 = arith.truncf %48 : vector<8x16xf32> to vector<8x16xbf16>
    %50 = vector.extract_strided_slice %46 {offsets = [0, 0], sizes = [8, 16], strides = [1, 1]} : vector<8x32xf32> to vector<8x16xf32>
    %51 = arith.truncf %50 : vector<8x16xf32> to vector<8x16xbf16>
    %52 = vector.extract_strided_slice %47 {offsets = [0, 0], sizes = [8, 16], strides = [1, 1]} : vector<8x32xf32> to vector<8x16xf32>
    %53 = arith.truncf %52 : vector<8x16xf32> to vector<8x16xbf16>
    %cst_45 = arith.constant dense<0.000000e+00> : vector<8x8xf32>
    %54 = tpu.matmul %49, %51, %cst_45 {dimension_numbers = #tpu.dot_dimension_numbers<[1], [1], [0], [0], [0, 0, 1, 0], [], []>} : vector<8x16xbf16>, vector<8x16xbf16>, vector<8x8xf32> -> vector<8x8xf32>
    %cst_46 = arith.constant dense<0xFF800000> : vector<8xf32>
    %55 = vector.multi_reduction <maximumf>, %54, %cst_46 [1] : vector<8x8xf32> to vector<8xf32>
    %56 = vector.shape_cast %55 : vector<8xf32> to vector<8x1xf32>
    %57 = vector.broadcast %56 : vector<8x1xf32> to vector<8x8xf32>
    %58 = arith.subf %54, %57 : vector<8x8xf32>
    %59 = math.exp %58 : vector<8x8xf32>
    %cst_47 = arith.constant dense<0.000000e+00> : vector<8xf32>
    %60 = vector.multi_reduction <add>, %59, %cst_47 [1] : vector<8x8xf32> to vector<8xf32>
    %61 = vector.shape_cast %60 : vector<8xf32> to vector<8x1xf32>
    %62 = tpu.reciprocal %61 {approx = true} : vector<8x1xf32> -> vector<8x1xf32>
    %63 = vector.broadcast %62 : vector<8x1xf32> to vector<8x8xf32>
    %64 = arith.mulf %59, %63 : vector<8x8xf32>
    %65 = arith.truncf %64 : vector<8x8xf32> to vector<8x8xbf16>
    %cst_48 = arith.constant dense<0.000000e+00> : vector<8x16xf32>
    %66 = tpu.matmul %65, %53, %cst_48 {dimension_numbers = #tpu.dot_dimension_numbers<[1], [0], [0], [1], [0, 0, 1, 1], [], []>} : vector<8x8xbf16>, vector<8x16xbf16>, vector<8x16xf32> -> vector<8x16xf32>
    %c0_49 = arith.constant 0 : index
    %c0_50 = arith.constant 0 : index
    %67 = vector.load %arg43[%c0_49, %c0_50] : memref<8x32xf32, #tpu.memory_space<vmem>>, vector<8x16xf32>
    tpu.vector_store %arg43[%c0_49, %c0_50], %66 {strides = array<i32>} : memref<8x32xf32, #tpu.memory_space<vmem>>, vector<8x16xf32>,
    %68 = vector.extract_strided_slice %45 {offsets = [0, 16], sizes = [8, 16], strides = [1, 1]} : vector<8x32xf32> to vector<8x16xf32>
    %69 = arith.truncf %68 : vector<8x16xf32> to vector<8x16xbf16>
    %70 = vector.extract_strided_slice %46 {offsets = [0, 16], sizes = [8, 16], strides = [1, 1]} : vector<8x32xf32> to vector<8x16xf32>
    %71 = arith.truncf %70 : vector<8x16xf32> to vector<8x16xbf16>
    %72 = vector.extract_strided_slice %47 {offsets = [0, 16], sizes = [8, 16], strides = [1, 1]} : vector<8x32xf32> to vector<8x16xf32>
    %73 = arith.truncf %72 : vector<8x16xf32> to vector<8x16xbf16>
    %cst_51 = arith.constant dense<0.000000e+00> : vector<8x8xf32>
    %74 = tpu.matmul %69, %71, %cst_51 {dimension_numbers = #tpu.dot_dimension_numbers<[1], [1], [0], [0], [0, 0, 1, 0], [], []>} : vector<8x16xbf16>, vector<8x16xbf16>, vector<8x8xf32> -> vector<8x8xf32>
    %cst_52 = arith.constant dense<0xFF800000> : vector<8xf32>
    %75 = vector.multi_reduction <maximumf>, %74, %cst_52 [1] : vector<8x8xf32> to vector<8xf32>
    %76 = vector.shape_cast %75 : vector<8xf32> to vector<8x1xf32>
    %77 = vector.broadcast %76 : vector<8x1xf32> to vector<8x8xf32>
    %78 = arith.subf %74, %77 : vector<8x8xf32>
    %79 = math.exp %78 : vector<8x8xf32>
    %cst_53 = arith.constant dense<0.000000e+00> : vector<8xf32>
    %80 = vector.multi_reduction <add>, %79, %cst_53 [1] : vector<8x8xf32> to vector<8xf32>
    %81 = vector.shape_cast %80 : vector<8xf32> to vector<8x1xf32>
    %82 = tpu.reciprocal %81 {approx = true} : vector<8x1xf32> -> vector<8x1xf32>
    %83 = vector.broadcast %82 : vector<8x1xf32> to vector<8x8xf32>
    %84 = arith.mulf %79, %83 : vector<8x8xf32>
    %85 = arith.truncf %84 : vector<8x8xf32> to vector<8x8xbf16>
    %cst_54 = arith.constant dense<0.000000e+00> : vector<8x16xf32>
    %86 = tpu.matmul %85, %73, %cst_54 {dimension_numbers = #tpu.dot_dimension_numbers<[1], [0], [0], [1], [0, 0, 1, 1], [], []>} : vector<8x8xbf16>, vector<8x16xbf16>, vector<8x16xf32> -> vector<8x16xf32>
    %c0_55 = arith.constant 0 : index
    %c16 = arith.constant 16 : index
    %87 = vector.load %arg43[%c0_55, %c16] : memref<8x32xf32, #tpu.memory_space<vmem>>, vector<8x16xf32>
    tpu.vector_store %arg43[%c0_55, %c16], %86 {strides = array<i32>} : memref<8x32xf32, #tpu.memory_space<vmem>>, vector<8x16xf32>,
    %c0_56 = arith.constant 0 : index
    %c0_57 = arith.constant 0 : index
    %88 = vector.load %arg43[%c0_56, %c0_57] : memref<8x32xf32, #tpu.memory_space<vmem>>, vector<8x32xf32>
    %89 = arith.truncf %88 : vector<8x32xf32> to vector<8x32xbf16>
    %cst_58 = arith.constant dense<0.000000e+00> : vector<8x32xf32>
    %90 = tpu.matmul %89, %22, %cst_58 {dimension_numbers = #tpu.dot_dimension_numbers<[1], [0], [0], [1], [0, 0, 1, 1], [], []>} : vector<8x32xbf16>, vector<32x32xbf16>, vector<8x32xf32> -> vector<8x32xf32>
    %91 = vector.broadcast %24 : vector<1x32xf32> to vector<8x32xf32>
    %92 = arith.addf %90, %91 : vector<8x32xf32>
    %93 = arith.addf %8, %92 : vector<8x32xf32>
    %cst_59 = arith.constant dense<0.000000e+00> : vector<8xf32>
    %94 = vector.multi_reduction <add>, %93, %cst_59 [1] : vector<8x32xf32> to vector<8xf32>
    %95 = vector.shape_cast %94 : vector<8xf32> to vector<8x1xf32>
    %cst_60 = arith.constant 3.200000e+01 : f32
    %96 = vector.broadcast %cst_60 : f32 to vector<8x1xf32>
    %97 = arith.divf %95, %96 : vector<8x1xf32>
    %98 = vector.broadcast %97 : vector<8x1xf32> to vector<8x32xf32>
    %99 = arith.subf %93, %98 : vector<8x32xf32>
    %100 = arith.mulf %99, %99 : vector<8x32xf32>
    %cst_61 = arith.constant dense<0.000000e+00> : vector<8xf32>
    %101 = vector.multi_reduction <add>, %100, %cst_61 [1] : vector<8x32xf32> to vector<8xf32>
    %102 = vector.shape_cast %101 : vector<8xf32> to vector<8x1xf32>
    %cst_62 = arith.constant 3.200000e+01 : f32
    %103 = vector.broadcast %cst_62 : f32 to vector<8x1xf32>
    %104 = arith.divf %102, %103 : vector<8x1xf32>
    %cst_63 = arith.constant 9.99999974E-6 : f32
    %105 = vector.broadcast %cst_63 : f32 to vector<8x1xf32>
    %106 = arith.addf %104, %105 : vector<8x1xf32>
    %107 = math.rsqrt %106 : vector<8x1xf32>
    %108 = vector.broadcast %107 : vector<8x1xf32> to vector<8x32xf32>
    %109 = arith.mulf %99, %108 : vector<8x32xf32>
    %110 = vector.broadcast %26 : vector<1x32xf32> to vector<8x32xf32>
    %111 = arith.mulf %109, %110 : vector<8x32xf32>
    %112 = vector.broadcast %28 : vector<1x32xf32> to vector<8x32xf32>
    %113 = arith.addf %111, %112 : vector<8x32xf32>
    %114 = arith.truncf %113 : vector<8x32xf32> to vector<8x32xbf16>
    %cst_64 = arith.constant dense<0.000000e+00> : vector<8x2048xf32>
    %115 = tpu.matmul %114, %30, %cst_64 {dimension_numbers = #tpu.dot_dimension_numbers<[1], [0], [0], [1], [0, 0, 1, 1], [], []>} : vector<8x32xbf16>, vector<32x2048xbf16>, vector<8x2048xf32> -> vector<8x2048xf32>
    %116 = vector.broadcast %32 : vector<1x2048xf32> to vector<8x2048xf32>
    %117 = arith.addf %115, %116 : vector<8x2048xf32>
    %cst_65 = arith.constant 0.000000e+00 : f32
    %118 = vector.broadcast %cst_65 : f32 to vector<8x2048xf32>
    %119 = arith.maximumf %117, %118 : vector<8x2048xf32>
    %120 = arith.truncf %119 : vector<8x2048xf32> to vector<8x2048xbf16>
    %cst_66 = arith.constant dense<0.000000e+00> : vector<8x32xf32>
    %121 = tpu.matmul %120, %34, %cst_66 {dimension_numbers = #tpu.dot_dimension_numbers<[1], [0], [0], [1], [0, 0, 1, 1], [], []>} : vector<8x2048xbf16>, vector<2048x32xbf16>, vector<8x32xf32> -> vector<8x32xf32>
    %122 = vector.broadcast %36 : vector<1x32xf32> to vector<8x32xf32>
    %123 = arith.addf %121, %122 : vector<8x32xf32>
    %124 = arith.addf %113, %123 : vector<8x32xf32>
    %cst_67 = arith.constant dense<0.000000e+00> : vector<8xf32>
    %125 = vector.multi_reduction <add>, %124, %cst_67 [1] : vector<8x32xf32> to vector<8xf32>
    %126 = vector.shape_cast %125 : vector<8xf32> to vector<8x1xf32>
    %cst_68 = arith.constant 3.200000e+01 : f32
    %127 = vector.broadcast %cst_68 : f32 to vector<8x1xf32>
    %128 = arith.divf %126, %127 : vector<8x1xf32>
    %129 = vector.broadcast %128 : vector<8x1xf32> to vector<8x32xf32>
    %130 = arith.subf %124, %129 : vector<8x32xf32>
    %131 = arith.mulf %130, %130 : vector<8x32xf32>
    %cst_69 = arith.constant dense<0.000000e+00> : vector<8xf32>
    %132 = vector.multi_reduction <add>, %131, %cst_69 [1] : vector<8x32xf32> to vector<8xf32>
    %133 = vector.shape_cast %132 : vector<8xf32> to vector<8x1xf32>
    %cst_70 = arith.constant 3.200000e+01 : f32
    %134 = vector.broadcast %cst_70 : f32 to vector<8x1xf32>
    %135 = arith.divf %133, %134 : vector<8x1xf32>
    %cst_71 = arith.constant 9.99999974E-6 : f32
    %136 = vector.broadcast %cst_71 : f32 to vector<8x1xf32>
    %137 = arith.addf %135, %136 : vector<8x1xf32>
    %138 = math.rsqrt %137 : vector<8x1xf32>
    %139 = vector.broadcast %138 : vector<8x1xf32> to vector<8x32xf32>
    %140 = arith.mulf %130, %139 : vector<8x32xf32>
    %141 = vector.broadcast %38 : vector<1x32xf32> to vector<8x32xf32>
    %142 = arith.mulf %140, %141 : vector<8x32xf32>
    %143 = vector.broadcast %40 : vector<1x32xf32> to vector<8x32xf32>
    %144 = arith.addf %142, %143 : vector<8x32xf32>
    %c1 = arith.constant 1 : index
    %c0_72 = arith.constant 0 : index
    %c0_73 = arith.constant 0 : index
    %145 = vector.load %arg4[%c1, %c0_72, %c0_73] : memref<2x32x96xbf16, #tpu.memory_space<vmem>>, vector<1x32x96xbf16>
    %146 = vector.shape_cast %145 : vector<1x32x96xbf16> to vector<32x96xbf16>
    %c1_74 = arith.constant 1 : index
    %c0_75 = arith.constant 0 : index
    %c0_76 = arith.constant 0 : index
    %147 = vector.load %arg5[%c1_74, %c0_75, %c0_76] : memref<2x1x96xf32, #tpu.memory_space<vmem>>, vector<1x1x96xf32>
    %148 = vector.shape_cast %147 : vector<1x1x96xf32> to vector<1x96xf32>
    %c1_77 = arith.constant 1 : index
    %c0_78 = arith.constant 0 : index
    %c0_79 = arith.constant 0 : index
    %149 = vector.load %arg6[%c1_77, %c0_78, %c0_79] : memref<2x32x32xbf16, #tpu.memory_space<vmem>>, vector<1x32x32xbf16>
    %150 = vector.shape_cast %149 : vector<1x32x32xbf16> to vector<32x32xbf16>
    %c1_80 = arith.constant 1 : index
    %c0_81 = arith.constant 0 : index
    %c0_82 = arith.constant 0 : index
    %151 = vector.load %arg7[%c1_80, %c0_81, %c0_82] : memref<2x1x32xf32, #tpu.memory_space<vmem>>, vector<1x1x32xf32>
    %152 = vector.shape_cast %151 : vector<1x1x32xf32> to vector<1x32xf32>
    %c1_83 = arith.constant 1 : index
    %c0_84 = arith.constant 0 : index
    %c0_85 = arith.constant 0 : index
    %153 = vector.load %arg8[%c1_83, %c0_84, %c0_85] : memref<2x1x32xf32, #tpu.memory_space<vmem>>, vector<1x1x32xf32>
    %154 = vector.shape_cast %153 : vector<1x1x32xf32> to vector<1x32xf32>
    %c1_86 = arith.constant 1 : index
    %c0_87 = arith.constant 0 : index
    %c0_88 = arith.constant 0 : index
    %155 = vector.load %arg9[%c1_86, %c0_87, %c0_88] : memref<2x1x32xf32, #tpu.memory_space<vmem>>, vector<1x1x32xf32>
    %156 = vector.shape_cast %155 : vector<1x1x32xf32> to vector<1x32xf32>
    %c1_89 = arith.constant 1 : index
    %c0_90 = arith.constant 0 : index
    %c0_91 = arith.constant 0 : index
    %157 = vector.load %arg10[%c1_89, %c0_90, %c0_91] : memref<2x32x2048xbf16, #tpu.memory_space<vmem>>, vector<1x32x2048xbf16>
    %158 = vector.shape_cast %157 : vector<1x32x2048xbf16> to vector<32x2048xbf16>
    %c1_92 = arith.constant 1 : index
    %c0_93 = arith.constant 0 : index
    %c0_94 = arith.constant 0 : index
    %159 = vector.load %arg11[%c1_92, %c0_93, %c0_94] : memref<2x1x2048xf32, #tpu.memory_space<vmem>>, vector<1x1x2048xf32>
    %160 = vector.shape_cast %159 : vector<1x1x2048xf32> to vector<1x2048xf32>
    %c1_95 = arith.constant 1 : index
    %c0_96 = arith.constant 0 : index
    %c0_97 = arith.constant 0 : index
    %161 = vector.load %arg12[%c1_95, %c0_96, %c0_97] : memref<2x2048x32xbf16, #tpu.memory_space<vmem>>, vector<1x2048x32xbf16>
    %162 = vector.shape_cast %161 : vector<1x2048x32xbf16> to vector<2048x32xbf16>
    %c1_98 = arith.constant 1 : index
    %c0_99 = arith.constant 0 : index
    %c0_100 = arith.constant 0 : index
    %163 = vector.load %arg13[%c1_98, %c0_99, %c0_100] : memref<2x1x32xf32, #tpu.memory_space<vmem>>, vector<1x1x32xf32>
    %164 = vector.shape_cast %163 : vector<1x1x32xf32> to vector<1x32xf32>
    %c1_101 = arith.constant 1 : index
    %c0_102 = arith.constant 0 : index
    %c0_103 = arith.constant 0 : index
    %165 = vector.load %arg14[%c1_101, %c0_102, %c0_103] : memref<2x1x32xf32, #tpu.memory_space<vmem>>, vector<1x1x32xf32>
    %166 = vector.shape_cast %165 : vector<1x1x32xf32> to vector<1x32xf32>
    %c1_104 = arith.constant 1 : index
    %c0_105 = arith.constant 0 : index
    %c0_106 = arith.constant 0 : index
    %167 = vector.load %arg15[%c1_104, %c0_105, %c0_106] : memref<2x1x32xf32, #tpu.memory_space<vmem>>, vector<1x1x32xf32>
    %168 = vector.shape_cast %167 : vector<1x1x32xf32> to vector<1x32xf32>
    %169 = arith.truncf %144 : vector<8x32xf32> to vector<8x32xbf16>
    %cst_107 = arith.constant dense<0.000000e+00> : vector<8x96xf32>
    %170 = tpu.matmul %169, %146, %cst_107 {dimension_numbers = #tpu.dot_dimension_numbers<[1], [0], [0], [1], [0, 0, 1, 1], [], []>} : vector<8x32xbf16>, vector<32x96xbf16>, vector<8x96xf32> -> vector<8x96xf32>
    %171 = vector.broadcast %148 : vector<1x96xf32> to vector<8x96xf32>
    %172 = arith.addf %170, %171 : vector<8x96xf32>
    %173 = vector.extract_strided_slice %172 {offsets = [0, 0], sizes = [8, 32], strides = [1, 1]} : vector<8x96xf32> to vector<8x32xf32>
    %174 = vector.extract_strided_slice %172 {offsets = [0, 32], sizes = [8, 32], strides = [1, 1]} : vector<8x96xf32> to vector<8x32xf32>
    %175 = vector.extract_strided_slice %172 {offsets = [0, 64], sizes = [8, 32], strides = [1, 1]} : vector<8x96xf32> to vector<8x32xf32>
    %176 = vector.extract_strided_slice %173 {offsets = [0, 0], sizes = [8, 16], strides = [1, 1]} : vector<8x32xf32> to vector<8x16xf32>
    %177 = arith.truncf %176 : vector<8x16xf32> to vector<8x16xbf16>
    %178 = vector.extract_strided_slice %174 {offsets = [0, 0], sizes = [8, 16], strides = [1, 1]} : vector<8x32xf32> to vector<8x16xf32>
    %179 = arith.truncf %178 : vector<8x16xf32> to vector<8x16xbf16>
    %180 = vector.extract_strided_slice %175 {offsets = [0, 0], sizes = [8, 16], strides = [1, 1]} : vector<8x32xf32> to vector<8x16xf32>
    %181 = arith.truncf %180 : vector<8x16xf32> to vector<8x16xbf16>
    %cst_108 = arith.constant dense<0.000000e+00> : vector<8x8xf32>
    %182 = tpu.matmul %177, %179, %cst_108 {dimension_numbers = #tpu.dot_dimension_numbers<[1], [1], [0], [0], [0, 0, 1, 0], [], []>} : vector<8x16xbf16>, vector<8x16xbf16>, vector<8x8xf32> -> vector<8x8xf32>
    %cst_109 = arith.constant dense<0xFF800000> : vector<8xf32>
    %183 = vector.multi_reduction <maximumf>, %182, %cst_109 [1] : vector<8x8xf32> to vector<8xf32>
    %184 = vector.shape_cast %183 : vector<8xf32> to vector<8x1xf32>
    %185 = vector.broadcast %184 : vector<8x1xf32> to vector<8x8xf32>
    %186 = arith.subf %182, %185 : vector<8x8xf32>
    %187 = math.exp %186 : vector<8x8xf32>
    %cst_110 = arith.constant dense<0.000000e+00> : vector<8xf32>
    %188 = vector.multi_reduction <add>, %187, %cst_110 [1] : vector<8x8xf32> to vector<8xf32>
    %189 = vector.shape_cast %188 : vector<8xf32> to vector<8x1xf32>
    %190 = tpu.reciprocal %189 {approx = true} : vector<8x1xf32> -> vector<8x1xf32>
    %191 = vector.broadcast %190 : vector<8x1xf32> to vector<8x8xf32>
    %192 = arith.mulf %187, %191 : vector<8x8xf32>
    %193 = arith.truncf %192 : vector<8x8xf32> to vector<8x8xbf16>
    %cst_111 = arith.constant dense<0.000000e+00> : vector<8x16xf32>
    %194 = tpu.matmul %193, %181, %cst_111 {dimension_numbers = #tpu.dot_dimension_numbers<[1], [0], [0], [1], [0, 0, 1, 1], [], []>} : vector<8x8xbf16>, vector<8x16xbf16>, vector<8x16xf32> -> vector<8x16xf32>
    %c0_112 = arith.constant 0 : index
    %c0_113 = arith.constant 0 : index
    %195 = vector.load %arg43[%c0_112, %c0_113] : memref<8x32xf32, #tpu.memory_space<vmem>>, vector<8x16xf32>
    tpu.vector_store %arg43[%c0_112, %c0_113], %194 {strides = array<i32>} : memref<8x32xf32, #tpu.memory_space<vmem>>, vector<8x16xf32>,
    %196 = vector.extract_strided_slice %173 {offsets = [0, 16], sizes = [8, 16], strides = [1, 1]} : vector<8x32xf32> to vector<8x16xf32>
    %197 = arith.truncf %196 : vector<8x16xf32> to vector<8x16xbf16>
    %198 = vector.extract_strided_slice %174 {offsets = [0, 16], sizes = [8, 16], strides = [1, 1]} : vector<8x32xf32> to vector<8x16xf32>
    %199 = arith.truncf %198 : vector<8x16xf32> to vector<8x16xbf16>
    %200 = vector.extract_strided_slice %175 {offsets = [0, 16], sizes = [8, 16], strides = [1, 1]} : vector<8x32xf32> to vector<8x16xf32>
    %201 = arith.truncf %200 : vector<8x16xf32> to vector<8x16xbf16>
    %cst_114 = arith.constant dense<0.000000e+00> : vector<8x8xf32>
    %202 = tpu.matmul %197, %199, %cst_114 {dimension_numbers = #tpu.dot_dimension_numbers<[1], [1], [0], [0], [0, 0, 1, 0], [], []>} : vector<8x16xbf16>, vector<8x16xbf16>, vector<8x8xf32> -> vector<8x8xf32>
    %cst_115 = arith.constant dense<0xFF800000> : vector<8xf32>
    %203 = vector.multi_reduction <maximumf>, %202, %cst_115 [1] : vector<8x8xf32> to vector<8xf32>
    %204 = vector.shape_cast %203 : vector<8xf32> to vector<8x1xf32>
    %205 = vector.broadcast %204 : vector<8x1xf32> to vector<8x8xf32>
    %206 = arith.subf %202, %205 : vector<8x8xf32>
    %207 = math.exp %206 : vector<8x8xf32>
    %cst_116 = arith.constant dense<0.000000e+00> : vector<8xf32>
    %208 = vector.multi_reduction <add>, %207, %cst_116 [1] : vector<8x8xf32> to vector<8xf32>
    %209 = vector.shape_cast %208 : vector<8xf32> to vector<8x1xf32>
    %210 = tpu.reciprocal %209 {approx = true} : vector<8x1xf32> -> vector<8x1xf32>
    %211 = vector.broadcast %210 : vector<8x1xf32> to vector<8x8xf32>
    %212 = arith.mulf %207, %211 : vector<8x8xf32>
    %213 = arith.truncf %212 : vector<8x8xf32> to vector<8x8xbf16>
    %cst_117 = arith.constant dense<0.000000e+00> : vector<8x16xf32>
    %214 = tpu.matmul %213, %201, %cst_117 {dimension_numbers = #tpu.dot_dimension_numbers<[1], [0], [0], [1], [0, 0, 1, 1], [], []>} : vector<8x8xbf16>, vector<8x16xbf16>, vector<8x16xf32> -> vector<8x16xf32>
    %c0_118 = arith.constant 0 : index
    %c16_119 = arith.constant 16 : index
    %215 = vector.load %arg43[%c0_118, %c16_119] : memref<8x32xf32, #tpu.memory_space<vmem>>, vector<8x16xf32>
    tpu.vector_store %arg43[%c0_118, %c16_119], %214 {strides = array<i32>} : memref<8x32xf32, #tpu.memory_space<vmem>>, vector<8x16xf32>,
    %c0_120 = arith.constant 0 : index
    %c0_121 = arith.constant 0 : index
    %216 = vector.load %arg43[%c0_120, %c0_121] : memref<8x32xf32, #tpu.memory_space<vmem>>, vector<8x32xf32>
    %217 = arith.truncf %216 : vector<8x32xf32> to vector<8x32xbf16>
    %cst_122 = arith.constant dense<0.000000e+00> : vector<8x32xf32>
    %218 = tpu.matmul %217, %150, %cst_122 {dimension_numbers = #tpu.dot_dimension_numbers<[1], [0], [0], [1], [0, 0, 1, 1], [], []>} : vector<8x32xbf16>, vector<32x32xbf16>, vector<8x32xf32> -> vector<8x32xf32>
    %219 = vector.broadcast %152 : vector<1x32xf32> to vector<8x32xf32>
    %220 = arith.addf %218, %219 : vector<8x32xf32>
    %221 = arith.addf %144, %220 : vector<8x32xf32>
    %cst_123 = arith.constant dense<0.000000e+00> : vector<8xf32>
    %222 = vector.multi_reduction <add>, %221, %cst_123 [1] : vector<8x32xf32> to vector<8xf32>
    %223 = vector.shape_cast %222 : vector<8xf32> to vector<8x1xf32>
    %cst_124 = arith.constant 3.200000e+01 : f32
    %224 = vector.broadcast %cst_124 : f32 to vector<8x1xf32>
    %225 = arith.divf %223, %224 : vector<8x1xf32>
    %226 = vector.broadcast %225 : vector<8x1xf32> to vector<8x32xf32>
    %227 = arith.subf %221, %226 : vector<8x32xf32>
    %228 = arith.mulf %227, %227 : vector<8x32xf32>
    %cst_125 = arith.constant dense<0.000000e+00> : vector<8xf32>
    %229 = vector.multi_reduction <add>, %228, %cst_125 [1] : vector<8x32xf32> to vector<8xf32>
    %230 = vector.shape_cast %229 : vector<8xf32> to vector<8x1xf32>
    %cst_126 = arith.constant 3.200000e+01 : f32
    %231 = vector.broadcast %cst_126 : f32 to vector<8x1xf32>
    %232 = arith.divf %230, %231 : vector<8x1xf32>
    %cst_127 = arith.constant 9.99999974E-6 : f32
    %233 = vector.broadcast %cst_127 : f32 to vector<8x1xf32>
    %234 = arith.addf %232, %233 : vector<8x1xf32>
    %235 = math.rsqrt %234 : vector<8x1xf32>
    %236 = vector.broadcast %235 : vector<8x1xf32> to vector<8x32xf32>
    %237 = arith.mulf %227, %236 : vector<8x32xf32>
    %238 = vector.broadcast %154 : vector<1x32xf32> to vector<8x32xf32>
    %239 = arith.mulf %237, %238 : vector<8x32xf32>
    %240 = vector.broadcast %156 : vector<1x32xf32> to vector<8x32xf32>
    %241 = arith.addf %239, %240 : vector<8x32xf32>
    %242 = arith.truncf %241 : vector<8x32xf32> to vector<8x32xbf16>
    %cst_128 = arith.constant dense<0.000000e+00> : vector<8x2048xf32>
    %243 = tpu.matmul %242, %158, %cst_128 {dimension_numbers = #tpu.dot_dimension_numbers<[1], [0], [0], [1], [0, 0, 1, 1], [], []>} : vector<8x32xbf16>, vector<32x2048xbf16>, vector<8x2048xf32> -> vector<8x2048xf32>
    %244 = vector.broadcast %160 : vector<1x2048xf32> to vector<8x2048xf32>
    %245 = arith.addf %243, %244 : vector<8x2048xf32>
    %cst_129 = arith.constant 0.000000e+00 : f32
    %246 = vector.broadcast %cst_129 : f32 to vector<8x2048xf32>
    %247 = arith.maximumf %245, %246 : vector<8x2048xf32>
    %248 = arith.truncf %247 : vector<8x2048xf32> to vector<8x2048xbf16>
    %cst_130 = arith.constant dense<0.000000e+00> : vector<8x32xf32>
    %249 = tpu.matmul %248, %162, %cst_130 {dimension_numbers = #tpu.dot_dimension_numbers<[1], [0], [0], [1], [0, 0, 1, 1], [], []>} : vector<8x2048xbf16>, vector<2048x32xbf16>, vector<8x32xf32> -> vector<8x32xf32>
    %250 = vector.broadcast %164 : vector<1x32xf32> to vector<8x32xf32>
    %251 = arith.addf %249, %250 : vector<8x32xf32>
    %252 = arith.addf %241, %251 : vector<8x32xf32>
    %cst_131 = arith.constant dense<0.000000e+00> : vector<8xf32>
    %253 = vector.multi_reduction <add>, %252, %cst_131 [1] : vector<8x32xf32> to vector<8xf32>
    %254 = vector.shape_cast %253 : vector<8xf32> to vector<8x1xf32>
    %cst_132 = arith.constant 3.200000e+01 : f32
    %255 = vector.broadcast %cst_132 : f32 to vector<8x1xf32>
    %256 = arith.divf %254, %255 : vector<8x1xf32>
    %257 = vector.broadcast %256 : vector<8x1xf32> to vector<8x32xf32>
    %258 = arith.subf %252, %257 : vector<8x32xf32>
    %259 = arith.mulf %258, %258 : vector<8x32xf32>
    %cst_133 = arith.constant dense<0.000000e+00> : vector<8xf32>
    %260 = vector.multi_reduction <add>, %259, %cst_133 [1] : vector<8x32xf32> to vector<8xf32>
    %261 = vector.shape_cast %260 : vector<8xf32> to vector<8x1xf32>
    %cst_134 = arith.constant 3.200000e+01 : f32
    %262 = vector.broadcast %cst_134 : f32 to vector<8x1xf32>
    %263 = arith.divf %261, %262 : vector<8x1xf32>
    %cst_135 = arith.constant 9.99999974E-6 : f32
    %264 = vector.broadcast %cst_135 : f32 to vector<8x1xf32>
    %265 = arith.addf %263, %264 : vector<8x1xf32>
    %266 = math.rsqrt %265 : vector<8x1xf32>
    %267 = vector.broadcast %266 : vector<8x1xf32> to vector<8x32xf32>
    %268 = arith.mulf %258, %267 : vector<8x32xf32>
    %269 = vector.broadcast %166 : vector<1x32xf32> to vector<8x32xf32>
    %270 = arith.mulf %268, %269 : vector<8x32xf32>
    %271 = vector.broadcast %168 : vector<1x32xf32> to vector<8x32xf32>
    %272 = arith.addf %270, %271 : vector<8x32xf32>
    %c0_136 = arith.constant 0 : index
    %c0_137 = arith.constant 0 : index
    %273 = vector.load %arg16[%c0_136, %c0_137] : memref<1x32xf32, #tpu.memory_space<vmem>>, vector<1x32xf32>
    %c0_138 = arith.constant 0 : index
    %c0_139 = arith.constant 0 : index
    %274 = vector.load %arg17[%c0_138, %c0_139] : memref<1x32xf32, #tpu.memory_space<vmem>>, vector<1x32xf32>
    %cst_140 = arith.constant dense<0.000000e+00> : vector<8xf32>
    %275 = vector.multi_reduction <add>, %272, %cst_140 [1] : vector<8x32xf32> to vector<8xf32>
    %276 = vector.shape_cast %275 : vector<8xf32> to vector<8x1xf32>
    %cst_141 = arith.constant 3.200000e+01 : f32
    %277 = vector.broadcast %cst_141 : f32 to vector<8x1xf32>
    %278 = arith.divf %276, %277 : vector<8x1xf32>
    %279 = vector.broadcast %278 : vector<8x1xf32> to vector<8x32xf32>
    %280 = arith.subf %272, %279 : vector<8x32xf32>
    %281 = arith.mulf %280, %280 : vector<8x32xf32>
    %cst_142 = arith.constant dense<0.000000e+00> : vector<8xf32>
    %282 = vector.multi_reduction <add>, %281, %cst_142 [1] : vector<8x32xf32> to vector<8xf32>
    %283 = vector.shape_cast %282 : vector<8xf32> to vector<8x1xf32>
    %cst_143 = arith.constant 3.200000e+01 : f32
    %284 = vector.broadcast %cst_143 : f32 to vector<8x1xf32>
    %285 = arith.divf %283, %284 : vector<8x1xf32>
    %cst_144 = arith.constant 9.99999974E-6 : f32
    %286 = vector.broadcast %cst_144 : f32 to vector<8x1xf32>
    %287 = arith.addf %285, %286 : vector<8x1xf32>
    %288 = math.rsqrt %287 : vector<8x1xf32>
    %289 = vector.broadcast %288 : vector<8x1xf32> to vector<8x32xf32>
    %290 = arith.mulf %280, %289 : vector<8x32xf32>
    %291 = vector.broadcast %273 : vector<1x32xf32> to vector<8x32xf32>
    %292 = arith.mulf %290, %291 : vector<8x32xf32>
    %293 = vector.broadcast %274 : vector<1x32xf32> to vector<8x32xf32>
    %294 = arith.addf %292, %293 : vector<8x32xf32>
    %c0_145 = arith.constant 0 : index
    %c0_146 = arith.constant 0 : index
    %c0_147 = arith.constant 0 : index
    %295 = vector.load %arg18[%c0_145, %c0_146, %c0_147] : memref<2x32x96xbf16, #tpu.memory_space<vmem>>, vector<1x32x96xbf16>
    %296 = vector.shape_cast %295 : vector<1x32x96xbf16> to vector<32x96xbf16>
    %c0_148 = arith.constant 0 : index
    %c0_149 = arith.constant 0 : index
    %c0_150 = arith.constant 0 : index
    %297 = vector.load %arg19[%c0_148, %c0_149, %c0_150] : memref<2x1x96xf32, #tpu.memory_space<vmem>>, vector<1x1x96xf32>
    %298 = vector.shape_cast %297 : vector<1x1x96xf32> to vector<1x96xf32>
    %c0_151 = arith.constant 0 : index
    %c0_152 = arith.constant 0 : index
    %c0_153 = arith.constant 0 : index
    %299 = vector.load %arg20[%c0_151, %c0_152, %c0_153] : memref<2x32x32xbf16, #tpu.memory_space<vmem>>, vector<1x32x32xbf16>
    %300 = vector.shape_cast %299 : vector<1x32x32xbf16> to vector<32x32xbf16>
    %c0_154 = arith.constant 0 : index
    %c0_155 = arith.constant 0 : index
    %c0_156 = arith.constant 0 : index
    %301 = vector.load %arg21[%c0_154, %c0_155, %c0_156] : memref<2x1x32xf32, #tpu.memory_space<vmem>>, vector<1x1x32xf32>
    %302 = vector.shape_cast %301 : vector<1x1x32xf32> to vector<1x32xf32>
    %c0_157 = arith.constant 0 : index
    %c0_158 = arith.constant 0 : index
    %c0_159 = arith.constant 0 : index
    %303 = vector.load %arg22[%c0_157, %c0_158, %c0_159] : memref<2x1x32xf32, #tpu.memory_space<vmem>>, vector<1x1x32xf32>
    %304 = vector.shape_cast %303 : vector<1x1x32xf32> to vector<1x32xf32>
    %c0_160 = arith.constant 0 : index
    %c0_161 = arith.constant 0 : index
    %c0_162 = arith.constant 0 : index
    %305 = vector.load %arg23[%c0_160, %c0_161, %c0_162] : memref<2x1x32xf32, #tpu.memory_space<vmem>>, vector<1x1x32xf32>
    %306 = vector.shape_cast %305 : vector<1x1x32xf32> to vector<1x32xf32>
    %c0_163 = arith.constant 0 : index
    %c0_164 = arith.constant 0 : index
    %c0_165 = arith.constant 0 : index
    %307 = vector.load %arg24[%c0_163, %c0_164, %c0_165] : memref<2x32x32xbf16, #tpu.memory_space<vmem>>, vector<1x32x32xbf16>
    %308 = vector.shape_cast %307 : vector<1x32x32xbf16> to vector<32x32xbf16>
    %c0_166 = arith.constant 0 : index
    %c0_167 = arith.constant 0 : index
    %c0_168 = arith.constant 0 : index
    %309 = vector.load %arg25[%c0_166, %c0_167, %c0_168] : memref<2x1x32xf32, #tpu.memory_space<vmem>>, vector<1x1x32xf32>
    %310 = vector.shape_cast %309 : vector<1x1x32xf32> to vector<1x32xf32>
    %c0_169 = arith.constant 0 : index
    %c0_170 = arith.constant 0 : index
    %c0_171 = arith.constant 0 : index
    %311 = vector.load %arg26[%c0_169, %c0_170, %c0_171] : memref<2x32x64xbf16, #tpu.memory_space<vmem>>, vector<1x32x64xbf16>
    %312 = vector.shape_cast %311 : vector<1x32x64xbf16> to vector<32x64xbf16>
    %c0_172 = arith.constant 0 : index
    %c0_173 = arith.constant 0 : index
    %c0_174 = arith.constant 0 : index
    %313 = vector.load %arg27[%c0_172, %c0_173, %c0_174] : memref<2x1x64xf32, #tpu.memory_space<vmem>>, vector<1x1x64xf32>
    %314 = vector.shape_cast %313 : vector<1x1x64xf32> to vector<1x64xf32>
    %c0_175 = arith.constant 0 : index
    %c0_176 = arith.constant 0 : index
    %c0_177 = arith.constant 0 : index
    %315 = vector.load %arg28[%c0_175, %c0_176, %c0_177] : memref<2x32x32xbf16, #tpu.memory_space<vmem>>, vector<1x32x32xbf16>
    %316 = vector.shape_cast %315 : vector<1x32x32xbf16> to vector<32x32xbf16>
    %c0_178 = arith.constant 0 : index
    %c0_179 = arith.constant 0 : index
    %c0_180 = arith.constant 0 : index
    %317 = vector.load %arg29[%c0_178, %c0_179, %c0_180] : memref<2x1x32xf32, #tpu.memory_space<vmem>>, vector<1x1x32xf32>
    %318 = vector.shape_cast %317 : vector<1x1x32xf32> to vector<1x32xf32>
    %c0_181 = arith.constant 0 : index
    %c0_182 = arith.constant 0 : index
    %c0_183 = arith.constant 0 : index
    %319 = vector.load %arg30[%c0_181, %c0_182, %c0_183] : memref<2x1x32xf32, #tpu.memory_space<vmem>>, vector<1x1x32xf32>
    %320 = vector.shape_cast %319 : vector<1x1x32xf32> to vector<1x32xf32>
    %c0_184 = arith.constant 0 : index
    %c0_185 = arith.constant 0 : index
    %c0_186 = arith.constant 0 : index
    %321 = vector.load %arg31[%c0_184, %c0_185, %c0_186] : memref<2x1x32xf32, #tpu.memory_space<vmem>>, vector<1x1x32xf32>
    %322 = vector.shape_cast %321 : vector<1x1x32xf32> to vector<1x32xf32>
    %c0_187 = arith.constant 0 : index
    %c0_188 = arith.constant 0 : index
    %c0_189 = arith.constant 0 : index
    %323 = vector.load %arg32[%c0_187, %c0_188, %c0_189] : memref<2x32x2048xbf16, #tpu.memory_space<vmem>>, vector<1x32x2048xbf16>
    %324 = vector.shape_cast %323 : vector<1x32x2048xbf16> to vector<32x2048xbf16>
    %c0_190 = arith.constant 0 : index
    %c0_191 = arith.constant 0 : index
    %c0_192 = arith.constant 0 : index
    %325 = vector.load %arg33[%c0_190, %c0_191, %c0_192] : memref<2x1x2048xf32, #tpu.memory_space<vmem>>, vector<1x1x2048xf32>
    %326 = vector.shape_cast %325 : vector<1x1x2048xf32> to vector<1x2048xf32>
    %c0_193 = arith.constant 0 : index
    %c0_194 = arith.constant 0 : index
    %c0_195 = arith.constant 0 : index
    %327 = vector.load %arg34[%c0_193, %c0_194, %c0_195] : memref<2x2048x32xbf16, #tpu.memory_space<vmem>>, vector<1x2048x32xbf16>
    %328 = vector.shape_cast %327 : vector<1x2048x32xbf16> to vector<2048x32xbf16>
    %c0_196 = arith.constant 0 : index
    %c0_197 = arith.constant 0 : index
    %c0_198 = arith.constant 0 : index
    %329 = vector.load %arg35[%c0_196, %c0_197, %c0_198] : memref<2x1x32xf32, #tpu.memory_space<vmem>>, vector<1x1x32xf32>
    %330 = vector.shape_cast %329 : vector<1x1x32xf32> to vector<1x32xf32>
    %c0_199 = arith.constant 0 : index
    %c0_200 = arith.constant 0 : index
    %c0_201 = arith.constant 0 : index
    %331 = vector.load %arg36[%c0_199, %c0_200, %c0_201] : memref<2x1x32xf32, #tpu.memory_space<vmem>>, vector<1x1x32xf32>
    %332 = vector.shape_cast %331 : vector<1x1x32xf32> to vector<1x32xf32>
    %c0_202 = arith.constant 0 : index
    %c0_203 = arith.constant 0 : index
    %c0_204 = arith.constant 0 : index
    %333 = vector.load %arg37[%c0_202, %c0_203, %c0_204] : memref<2x1x32xf32, #tpu.memory_space<vmem>>, vector<1x1x32xf32>
    %334 = vector.shape_cast %333 : vector<1x1x32xf32> to vector<1x32xf32>
    %335 = arith.truncf %16 : vector<8x32xf32> to vector<8x32xbf16>
    %cst_205 = arith.constant dense<0.000000e+00> : vector<8x96xf32>
    %336 = tpu.matmul %335, %296, %cst_205 {dimension_numbers = #tpu.dot_dimension_numbers<[1], [0], [0], [1], [0, 0, 1, 1], [], []>} : vector<8x32xbf16>, vector<32x96xbf16>, vector<8x96xf32> -> vector<8x96xf32>
    %337 = vector.broadcast %298 : vector<1x96xf32> to vector<8x96xf32>
    %338 = arith.addf %336, %337 : vector<8x96xf32>
    %339 = vector.extract_strided_slice %338 {offsets = [0, 0], sizes = [8, 32], strides = [1, 1]} : vector<8x96xf32> to vector<8x32xf32>
    %340 = vector.extract_strided_slice %338 {offsets = [0, 32], sizes = [8, 32], strides = [1, 1]} : vector<8x96xf32> to vector<8x32xf32>
    %341 = vector.extract_strided_slice %338 {offsets = [0, 64], sizes = [8, 32], strides = [1, 1]} : vector<8x96xf32> to vector<8x32xf32>
    %342 = tpu.iota {dimensions = array<i32: 0>} : vector<8x8xi32>
    %343 = tpu.iota {dimensions = array<i32: 1>} : vector<8x8xi32>
    %344 = arith.cmpi sgt, %343, %342 : vector<8x8xi32>
    %cst_206 = arith.constant -1.000000e+30 : f32
    %cst_207 = arith.constant 0.000000e+00 : f32
    %345 = vector.broadcast %cst_206 : f32 to vector<8x8xf32>
    %346 = vector.broadcast %cst_207 : f32 to vector<8x8xf32>
    %347 = arith.select %344, %345, %346 : vector<8x8xi1>, vector<8x8xf32>
    %348 = vector.extract_strided_slice %339 {offsets = [0, 0], sizes = [8, 16], strides = [1, 1]} : vector<8x32xf32> to vector<8x16xf32>
    %349 = arith.truncf %348 : vector<8x16xf32> to vector<8x16xbf16>
    %350 = vector.extract_strided_slice %340 {offsets = [0, 0], sizes = [8, 16], strides = [1, 1]} : vector<8x32xf32> to vector<8x16xf32>
    %351 = arith.truncf %350 : vector<8x16xf32> to vector<8x16xbf16>
    %352 = vector.extract_strided_slice %341 {offsets = [0, 0], sizes = [8, 16], strides = [1, 1]} : vector<8x32xf32> to vector<8x16xf32>
    %353 = arith.truncf %352 : vector<8x16xf32> to vector<8x16xbf16>
    %cst_208 = arith.constant dense<0.000000e+00> : vector<8x8xf32>
    %354 = tpu.matmul %349, %351, %cst_208 {dimension_numbers = #tpu.dot_dimension_numbers<[1], [1], [0], [0], [0, 0, 1, 0], [], []>} : vector<8x16xbf16>, vector<8x16xbf16>, vector<8x8xf32> -> vector<8x8xf32>
    %355 = arith.addf %354, %347 : vector<8x8xf32>
    %cst_209 = arith.constant dense<0xFF800000> : vector<8xf32>
    %356 = vector.multi_reduction <maximumf>, %355, %cst_209 [1] : vector<8x8xf32> to vector<8xf32>
    %357 = vector.shape_cast %356 : vector<8xf32> to vector<8x1xf32>
    %358 = vector.broadcast %357 : vector<8x1xf32> to vector<8x8xf32>
    %359 = arith.subf %355, %358 : vector<8x8xf32>
    %360 = math.exp %359 : vector<8x8xf32>
    %cst_210 = arith.constant dense<0.000000e+00> : vector<8xf32>
    %361 = vector.multi_reduction <add>, %360, %cst_210 [1] : vector<8x8xf32> to vector<8xf32>
    %362 = vector.shape_cast %361 : vector<8xf32> to vector<8x1xf32>
    %363 = tpu.reciprocal %362 {approx = true} : vector<8x1xf32> -> vector<8x1xf32>
    %364 = vector.broadcast %363 : vector<8x1xf32> to vector<8x8xf32>
    %365 = arith.mulf %360, %364 : vector<8x8xf32>
    %366 = arith.truncf %365 : vector<8x8xf32> to vector<8x8xbf16>
    %cst_211 = arith.constant dense<0.000000e+00> : vector<8x16xf32>
    %367 = tpu.matmul %366, %353, %cst_211 {dimension_numbers = #tpu.dot_dimension_numbers<[1], [0], [0], [1], [0, 0, 1, 1], [], []>} : vector<8x8xbf16>, vector<8x16xbf16>, vector<8x16xf32> -> vector<8x16xf32>
    %c0_212 = arith.constant 0 : index
    %c0_213 = arith.constant 0 : index
    %368 = vector.load %arg43[%c0_212, %c0_213] : memref<8x32xf32, #tpu.memory_space<vmem>>, vector<8x16xf32>
    tpu.vector_store %arg43[%c0_212, %c0_213], %367 {strides = array<i32>} : memref<8x32xf32, #tpu.memory_space<vmem>>, vector<8x16xf32>,
    %369 = vector.extract_strided_slice %339 {offsets = [0, 16], sizes = [8, 16], strides = [1, 1]} : vector<8x32xf32> to vector<8x16xf32>
    %370 = arith.truncf %369 : vector<8x16xf32> to vector<8x16xbf16>
    %371 = vector.extract_strided_slice %340 {offsets = [0, 16], sizes = [8, 16], strides = [1, 1]} : vector<8x32xf32> to vector<8x16xf32>
    %372 = arith.truncf %371 : vector<8x16xf32> to vector<8x16xbf16>
    %373 = vector.extract_strided_slice %341 {offsets = [0, 16], sizes = [8, 16], strides = [1, 1]} : vector<8x32xf32> to vector<8x16xf32>
    %374 = arith.truncf %373 : vector<8x16xf32> to vector<8x16xbf16>
    %cst_214 = arith.constant dense<0.000000e+00> : vector<8x8xf32>
    %375 = tpu.matmul %370, %372, %cst_214 {dimension_numbers = #tpu.dot_dimension_numbers<[1], [1], [0], [0], [0, 0, 1, 0], [], []>} : vector<8x16xbf16>, vector<8x16xbf16>, vector<8x8xf32> -> vector<8x8xf32>
    %376 = arith.addf %375, %347 : vector<8x8xf32>
    %cst_215 = arith.constant dense<0xFF800000> : vector<8xf32>
    %377 = vector.multi_reduction <maximumf>, %376, %cst_215 [1] : vector<8x8xf32> to vector<8xf32>
    %378 = vector.shape_cast %377 : vector<8xf32> to vector<8x1xf32>
    %379 = vector.broadcast %378 : vector<8x1xf32> to vector<8x8xf32>
    %380 = arith.subf %376, %379 : vector<8x8xf32>
    %381 = math.exp %380 : vector<8x8xf32>
    %cst_216 = arith.constant dense<0.000000e+00> : vector<8xf32>
    %382 = vector.multi_reduction <add>, %381, %cst_216 [1] : vector<8x8xf32> to vector<8xf32>
    %383 = vector.shape_cast %382 : vector<8xf32> to vector<8x1xf32>
    %384 = tpu.reciprocal %383 {approx = true} : vector<8x1xf32> -> vector<8x1xf32>
    %385 = vector.broadcast %384 : vector<8x1xf32> to vector<8x8xf32>
    %386 = arith.mulf %381, %385 : vector<8x8xf32>
    %387 = arith.truncf %386 : vector<8x8xf32> to vector<8x8xbf16>
    %cst_217 = arith.constant dense<0.000000e+00> : vector<8x16xf32>
    %388 = tpu.matmul %387, %374, %cst_217 {dimension_numbers = #tpu.dot_dimension_numbers<[1], [0], [0], [1], [0, 0, 1, 1], [], []>} : vector<8x8xbf16>, vector<8x16xbf16>, vector<8x16xf32> -> vector<8x16xf32>
    %c0_218 = arith.constant 0 : index
    %c16_219 = arith.constant 16 : index
    %389 = vector.load %arg43[%c0_218, %c16_219] : memref<8x32xf32, #tpu.memory_space<vmem>>, vector<8x16xf32>
    tpu.vector_store %arg43[%c0_218, %c16_219], %388 {strides = array<i32>} : memref<8x32xf32, #tpu.memory_space<vmem>>, vector<8x16xf32>,
    %c0_220 = arith.constant 0 : index
    %c0_221 = arith.constant 0 : index
    %390 = vector.load %arg43[%c0_220, %c0_221] : memref<8x32xf32, #tpu.memory_space<vmem>>, vector<8x32xf32>
    %391 = arith.truncf %390 : vector<8x32xf32> to vector<8x32xbf16>
    %cst_222 = arith.constant dense<0.000000e+00> : vector<8x32xf32>
    %392 = tpu.matmul %391, %300, %cst_222 {dimension_numbers = #tpu.dot_dimension_numbers<[1], [0], [0], [1], [0, 0, 1, 1], [], []>} : vector<8x32xbf16>, vector<32x32xbf16>, vector<8x32xf32> -> vector<8x32xf32>
    %393 = vector.broadcast %302 : vector<1x32xf32> to vector<8x32xf32>
    %394 = arith.addf %392, %393 : vector<8x32xf32>
    %395 = arith.addf %16, %394 : vector<8x32xf32>
    %cst_223 = arith.constant dense<0.000000e+00> : vector<8xf32>
    %396 = vector.multi_reduction <add>, %395, %cst_223 [1] : vector<8x32xf32> to vector<8xf32>
    %397 = vector.shape_cast %396 : vector<8xf32> to vector<8x1xf32>
    %cst_224 = arith.constant 3.200000e+01 : f32
    %398 = vector.broadcast %cst_224 : f32 to vector<8x1xf32>
    %399 = arith.divf %397, %398 : vector<8x1xf32>
    %400 = vector.broadcast %399 : vector<8x1xf32> to vector<8x32xf32>
    %401 = arith.subf %395, %400 : vector<8x32xf32>
    %402 = arith.mulf %401, %401 : vector<8x32xf32>
    %cst_225 = arith.constant dense<0.000000e+00> : vector<8xf32>
    %403 = vector.multi_reduction <add>, %402, %cst_225 [1] : vector<8x32xf32> to vector<8xf32>
    %404 = vector.shape_cast %403 : vector<8xf32> to vector<8x1xf32>
    %cst_226 = arith.constant 3.200000e+01 : f32
    %405 = vector.broadcast %cst_226 : f32 to vector<8x1xf32>
    %406 = arith.divf %404, %405 : vector<8x1xf32>
    %cst_227 = arith.constant 9.99999974E-6 : f32
    %407 = vector.broadcast %cst_227 : f32 to vector<8x1xf32>
    %408 = arith.addf %406, %407 : vector<8x1xf32>
    %409 = math.rsqrt %408 : vector<8x1xf32>
    %410 = vector.broadcast %409 : vector<8x1xf32> to vector<8x32xf32>
    %411 = arith.mulf %401, %410 : vector<8x32xf32>
    %412 = vector.broadcast %304 : vector<1x32xf32> to vector<8x32xf32>
    %413 = arith.mulf %411, %412 : vector<8x32xf32>
    %414 = vector.broadcast %306 : vector<1x32xf32> to vector<8x32xf32>
    %415 = arith.addf %413, %414 : vector<8x32xf32>
    %416 = arith.truncf %415 : vector<8x32xf32> to vector<8x32xbf16>
    %cst_228 = arith.constant dense<0.000000e+00> : vector<8x32xf32>
    %417 = tpu.matmul %416, %308, %cst_228 {dimension_numbers = #tpu.dot_dimension_numbers<[1], [0], [0], [1], [0, 0, 1, 1], [], []>} : vector<8x32xbf16>, vector<32x32xbf16>, vector<8x32xf32> -> vector<8x32xf32>
    %418 = vector.broadcast %310 : vector<1x32xf32> to vector<8x32xf32>
    %419 = arith.addf %417, %418 : vector<8x32xf32>
    %420 = arith.truncf %294 : vector<8x32xf32> to vector<8x32xbf16>
    %cst_229 = arith.constant dense<0.000000e+00> : vector<8x64xf32>
    %421 = tpu.matmul %420, %312, %cst_229 {dimension_numbers = #tpu.dot_dimension_numbers<[1], [0], [0], [1], [0, 0, 1, 1], [], []>} : vector<8x32xbf16>, vector<32x64xbf16>, vector<8x64xf32> -> vector<8x64xf32>
    %422 = vector.broadcast %314 : vector<1x64xf32> to vector<8x64xf32>
    %423 = arith.addf %421, %422 : vector<8x64xf32>
    %424 = vector.extract_strided_slice %423 {offsets = [0, 0], sizes = [8, 32], strides = [1, 1]} : vector<8x64xf32> to vector<8x32xf32>
    %425 = vector.extract_strided_slice %423 {offsets = [0, 32], sizes = [8, 32], strides = [1, 1]} : vector<8x64xf32> to vector<8x32xf32>
    %426 = vector.extract_strided_slice %419 {offsets = [0, 0], sizes = [8, 16], strides = [1, 1]} : vector<8x32xf32> to vector<8x16xf32>
    %427 = arith.truncf %426 : vector<8x16xf32> to vector<8x16xbf16>
    %428 = vector.extract_strided_slice %424 {offsets = [0, 0], sizes = [8, 16], strides = [1, 1]} : vector<8x32xf32> to vector<8x16xf32>
    %429 = arith.truncf %428 : vector<8x16xf32> to vector<8x16xbf16>
    %430 = vector.extract_strided_slice %425 {offsets = [0, 0], sizes = [8, 16], strides = [1, 1]} : vector<8x32xf32> to vector<8x16xf32>
    %431 = arith.truncf %430 : vector<8x16xf32> to vector<8x16xbf16>
    %cst_230 = arith.constant dense<0.000000e+00> : vector<8x8xf32>
    %432 = tpu.matmul %427, %429, %cst_230 {dimension_numbers = #tpu.dot_dimension_numbers<[1], [1], [0], [0], [0, 0, 1, 0], [], []>} : vector<8x16xbf16>, vector<8x16xbf16>, vector<8x8xf32> -> vector<8x8xf32>
    %cst_231 = arith.constant dense<0xFF800000> : vector<8xf32>
    %433 = vector.multi_reduction <maximumf>, %432, %cst_231 [1] : vector<8x8xf32> to vector<8xf32>
    %434 = vector.shape_cast %433 : vector<8xf32> to vector<8x1xf32>
    %435 = vector.broadcast %434 : vector<8x1xf32> to vector<8x8xf32>
    %436 = arith.subf %432, %435 : vector<8x8xf32>
    %437 = math.exp %436 : vector<8x8xf32>
    %cst_232 = arith.constant dense<0.000000e+00> : vector<8xf32>
    %438 = vector.multi_reduction <add>, %437, %cst_232 [1] : vector<8x8xf32> to vector<8xf32>
    %439 = vector.shape_cast %438 : vector<8xf32> to vector<8x1xf32>
    %440 = tpu.reciprocal %439 {approx = true} : vector<8x1xf32> -> vector<8x1xf32>
    %441 = vector.broadcast %440 : vector<8x1xf32> to vector<8x8xf32>
    %442 = arith.mulf %437, %441 : vector<8x8xf32>
    %443 = arith.truncf %442 : vector<8x8xf32> to vector<8x8xbf16>
    %cst_233 = arith.constant dense<0.000000e+00> : vector<8x16xf32>
    %444 = tpu.matmul %443, %431, %cst_233 {dimension_numbers = #tpu.dot_dimension_numbers<[1], [0], [0], [1], [0, 0, 1, 1], [], []>} : vector<8x8xbf16>, vector<8x16xbf16>, vector<8x16xf32> -> vector<8x16xf32>
    %c0_234 = arith.constant 0 : index
    %c0_235 = arith.constant 0 : index
    %445 = vector.load %arg43[%c0_234, %c0_235] : memref<8x32xf32, #tpu.memory_space<vmem>>, vector<8x16xf32>
    tpu.vector_store %arg43[%c0_234, %c0_235], %444 {strides = array<i32>} : memref<8x32xf32, #tpu.memory_space<vmem>>, vector<8x16xf32>,
    %446 = vector.extract_strided_slice %419 {offsets = [0, 16], sizes = [8, 16], strides = [1, 1]} : vector<8x32xf32> to vector<8x16xf32>
    %447 = arith.truncf %446 : vector<8x16xf32> to vector<8x16xbf16>
    %448 = vector.extract_strided_slice %424 {offsets = [0, 16], sizes = [8, 16], strides = [1, 1]} : vector<8x32xf32> to vector<8x16xf32>
    %449 = arith.truncf %448 : vector<8x16xf32> to vector<8x16xbf16>
    %450 = vector.extract_strided_slice %425 {offsets = [0, 16], sizes = [8, 16], strides = [1, 1]} : vector<8x32xf32> to vector<8x16xf32>
    %451 = arith.truncf %450 : vector<8x16xf32> to vector<8x16xbf16>
    %cst_236 = arith.constant dense<0.000000e+00> : vector<8x8xf32>
    %452 = tpu.matmul %447, %449, %cst_236 {dimension_numbers = #tpu.dot_dimension_numbers<[1], [1], [0], [0], [0, 0, 1, 0], [], []>} : vector<8x16xbf16>, vector<8x16xbf16>, vector<8x8xf32> -> vector<8x8xf32>
    %cst_237 = arith.constant dense<0xFF800000> : vector<8xf32>
    %453 = vector.multi_reduction <maximumf>, %452, %cst_237 [1] : vector<8x8xf32> to vector<8xf32>
    %454 = vector.shape_cast %453 : vector<8xf32> to vector<8x1xf32>
    %455 = vector.broadcast %454 : vector<8x1xf32> to vector<8x8xf32>
    %456 = arith.subf %452, %455 : vector<8x8xf32>
    %457 = math.exp %456 : vector<8x8xf32>
    %cst_238 = arith.constant dense<0.000000e+00> : vector<8xf32>
    %458 = vector.multi_reduction <add>, %457, %cst_238 [1] : vector<8x8xf32> to vector<8xf32>
    %459 = vector.shape_cast %458 : vector<8xf32> to vector<8x1xf32>
    %460 = tpu.reciprocal %459 {approx = true} : vector<8x1xf32> -> vector<8x1xf32>
    %461 = vector.broadcast %460 : vector<8x1xf32> to vector<8x8xf32>
    %462 = arith.mulf %457, %461 : vector<8x8xf32>
    %463 = arith.truncf %462 : vector<8x8xf32> to vector<8x8xbf16>
    %cst_239 = arith.constant dense<0.000000e+00> : vector<8x16xf32>
    %464 = tpu.matmul %463, %451, %cst_239 {dimension_numbers = #tpu.dot_dimension_numbers<[1], [0], [0], [1], [0, 0, 1, 1], [], []>} : vector<8x8xbf16>, vector<8x16xbf16>, vector<8x16xf32> -> vector<8x16xf32>
    %c0_240 = arith.constant 0 : index
    %c16_241 = arith.constant 16 : index
    %465 = vector.load %arg43[%c0_240, %c16_241] : memref<8x32xf32, #tpu.memory_space<vmem>>, vector<8x16xf32>
    tpu.vector_store %arg43[%c0_240, %c16_241], %464 {strides = array<i32>} : memref<8x32xf32, #tpu.memory_space<vmem>>, vector<8x16xf32>,
    %c0_242 = arith.constant 0 : index
    %c0_243 = arith.constant 0 : index
    %466 = vector.load %arg43[%c0_242, %c0_243] : memref<8x32xf32, #tpu.memory_space<vmem>>, vector<8x32xf32>
    %467 = arith.truncf %466 : vector<8x32xf32> to vector<8x32xbf16>
    %cst_244 = arith.constant dense<0.000000e+00> : vector<8x32xf32>
    %468 = tpu.matmul %467, %316, %cst_244 {dimension_numbers = #tpu.dot_dimension_numbers<[1], [0], [0], [1], [0, 0, 1, 1], [], []>} : vector<8x32xbf16>, vector<32x32xbf16>, vector<8x32xf32> -> vector<8x32xf32>
    %469 = vector.broadcast %318 : vector<1x32xf32> to vector<8x32xf32>
    %470 = arith.addf %468, %469 : vector<8x32xf32>
    %471 = arith.addf %415, %470 : vector<8x32xf32>
    %cst_245 = arith.constant dense<0.000000e+00> : vector<8xf32>
    %472 = vector.multi_reduction <add>, %471, %cst_245 [1] : vector<8x32xf32> to vector<8xf32>
    %473 = vector.shape_cast %472 : vector<8xf32> to vector<8x1xf32>
    %cst_246 = arith.constant 3.200000e+01 : f32
    %474 = vector.broadcast %cst_246 : f32 to vector<8x1xf32>
    %475 = arith.divf %473, %474 : vector<8x1xf32>
    %476 = vector.broadcast %475 : vector<8x1xf32> to vector<8x32xf32>
    %477 = arith.subf %471, %476 : vector<8x32xf32>
    %478 = arith.mulf %477, %477 : vector<8x32xf32>
    %cst_247 = arith.constant dense<0.000000e+00> : vector<8xf32>
    %479 = vector.multi_reduction <add>, %478, %cst_247 [1] : vector<8x32xf32> to vector<8xf32>
    %480 = vector.shape_cast %479 : vector<8xf32> to vector<8x1xf32>
    %cst_248 = arith.constant 3.200000e+01 : f32
    %481 = vector.broadcast %cst_248 : f32 to vector<8x1xf32>
    %482 = arith.divf %480, %481 : vector<8x1xf32>
    %cst_249 = arith.constant 9.99999974E-6 : f32
    %483 = vector.broadcast %cst_249 : f32 to vector<8x1xf32>
    %484 = arith.addf %482, %483 : vector<8x1xf32>
    %485 = math.rsqrt %484 : vector<8x1xf32>
    %486 = vector.broadcast %485 : vector<8x1xf32> to vector<8x32xf32>
    %487 = arith.mulf %477, %486 : vector<8x32xf32>
    %488 = vector.broadcast %320 : vector<1x32xf32> to vector<8x32xf32>
    %489 = arith.mulf %487, %488 : vector<8x32xf32>
    %490 = vector.broadcast %322 : vector<1x32xf32> to vector<8x32xf32>
    %491 = arith.addf %489, %490 : vector<8x32xf32>
    %492 = arith.truncf %491 : vector<8x32xf32> to vector<8x32xbf16>
    %cst_250 = arith.constant dense<0.000000e+00> : vector<8x2048xf32>
    %493 = tpu.matmul %492, %324, %cst_250 {dimension_numbers = #tpu.dot_dimension_numbers<[1], [0], [0], [1], [0, 0, 1, 1], [], []>} : vector<8x32xbf16>, vector<32x2048xbf16>, vector<8x2048xf32> -> vector<8x2048xf32>
    %494 = vector.broadcast %326 : vector<1x2048xf32> to vector<8x2048xf32>
    %495 = arith.addf %493, %494 : vector<8x2048xf32>
    %cst_251 = arith.constant 0.000000e+00 : f32
    %496 = vector.broadcast %cst_251 : f32 to vector<8x2048xf32>
    %497 = arith.maximumf %495, %496 : vector<8x2048xf32>
    %498 = arith.truncf %497 : vector<8x2048xf32> to vector<8x2048xbf16>
    %cst_252 = arith.constant dense<0.000000e+00> : vector<8x32xf32>
    %499 = tpu.matmul %498, %328, %cst_252 {dimension_numbers = #tpu.dot_dimension_numbers<[1], [0], [0], [1], [0, 0, 1, 1], [], []>} : vector<8x2048xbf16>, vector<2048x32xbf16>, vector<8x32xf32> -> vector<8x32xf32>
    %500 = vector.broadcast %330 : vector<1x32xf32> to vector<8x32xf32>
    %501 = arith.addf %499, %500 : vector<8x32xf32>
    %502 = arith.addf %491, %501 : vector<8x32xf32>
    %cst_253 = arith.constant dense<0.000000e+00> : vector<8xf32>
    %503 = vector.multi_reduction <add>, %502, %cst_253 [1] : vector<8x32xf32> to vector<8xf32>
    %504 = vector.shape_cast %503 : vector<8xf32> to vector<8x1xf32>
    %cst_254 = arith.constant 3.200000e+01 : f32
    %505 = vector.broadcast %cst_254 : f32 to vector<8x1xf32>
    %506 = arith.divf %504, %505 : vector<8x1xf32>
    %507 = vector.broadcast %506 : vector<8x1xf32> to vector<8x32xf32>
    %508 = arith.subf %502, %507 : vector<8x32xf32>
    %509 = arith.mulf %508, %508 : vector<8x32xf32>
    %cst_255 = arith.constant dense<0.000000e+00> : vector<8xf32>
    %510 = vector.multi_reduction <add>, %509, %cst_255 [1] : vector<8x32xf32> to vector<8xf32>
    %511 = vector.shape_cast %510 : vector<8xf32> to vector<8x1xf32>
    %cst_256 = arith.constant 3.200000e+01 : f32
    %512 = vector.broadcast %cst_256 : f32 to vector<8x1xf32>
    %513 = arith.divf %511, %512 : vector<8x1xf32>
    %cst_257 = arith.constant 9.99999974E-6 : f32
    %514 = vector.broadcast %cst_257 : f32 to vector<8x1xf32>
    %515 = arith.addf %513, %514 : vector<8x1xf32>
    %516 = math.rsqrt %515 : vector<8x1xf32>
    %517 = vector.broadcast %516 : vector<8x1xf32> to vector<8x32xf32>
    %518 = arith.mulf %508, %517 : vector<8x32xf32>
    %519 = vector.broadcast %332 : vector<1x32xf32> to vector<8x32xf32>
    %520 = arith.mulf %518, %519 : vector<8x32xf32>
    %521 = vector.broadcast %334 : vector<1x32xf32> to vector<8x32xf32>
    %522 = arith.addf %520, %521 : vector<8x32xf32>
    %c1_258 = arith.constant 1 : index
    %c0_259 = arith.constant 0 : index
    %c0_260 = arith.constant 0 : index
    %523 = vector.load %arg18[%c1_258, %c0_259, %c0_260] : memref<2x32x96xbf16, #tpu.memory_space<vmem>>, vector<1x32x96xbf16>
    %524 = vector.shape_cast %523 : vector<1x32x96xbf16> to vector<32x96xbf16>
    %c1_261 = arith.constant 1 : index
    %c0_262 = arith.constant 0 : index
    %c0_263 = arith.constant 0 : index
    %525 = vector.load %arg19[%c1_261, %c0_262, %c0_263] : memref<2x1x96xf32, #tpu.memory_space<vmem>>, vector<1x1x96xf32>
    %526 = vector.shape_cast %525 : vector<1x1x96xf32> to vector<1x96xf32>
    %c1_264 = arith.constant 1 : index
    %c0_265 = arith.constant 0 : index
    %c0_266 = arith.constant 0 : index
    %527 = vector.load %arg20[%c1_264, %c0_265, %c0_266] : memref<2x32x32xbf16, #tpu.memory_space<vmem>>, vector<1x32x32xbf16>
    %528 = vector.shape_cast %527 : vector<1x32x32xbf16> to vector<32x32xbf16>
    %c1_267 = arith.constant 1 : index
    %c0_268 = arith.constant 0 : index
    %c0_269 = arith.constant 0 : index
    %529 = vector.load %arg21[%c1_267, %c0_268, %c0_269] : memref<2x1x32xf32, #tpu.memory_space<vmem>>, vector<1x1x32xf32>
    %530 = vector.shape_cast %529 : vector<1x1x32xf32> to vector<1x32xf32>
    %c1_270 = arith.constant 1 : index
    %c0_271 = arith.constant 0 : index
    %c0_272 = arith.constant 0 : index
    %531 = vector.load %arg22[%c1_270, %c0_271, %c0_272] : memref<2x1x32xf32, #tpu.memory_space<vmem>>, vector<1x1x32xf32>
    %532 = vector.shape_cast %531 : vector<1x1x32xf32> to vector<1x32xf32>
    %c1_273 = arith.constant 1 : index
    %c0_274 = arith.constant 0 : index
    %c0_275 = arith.constant 0 : index
    %533 = vector.load %arg23[%c1_273, %c0_274, %c0_275] : memref<2x1x32xf32, #tpu.memory_space<vmem>>, vector<1x1x32xf32>
    %534 = vector.shape_cast %533 : vector<1x1x32xf32> to vector<1x32xf32>
    %c1_276 = arith.constant 1 : index
    %c0_277 = arith.constant 0 : index
    %c0_278 = arith.constant 0 : index
    %535 = vector.load %arg24[%c1_276, %c0_277, %c0_278] : memref<2x32x32xbf16, #tpu.memory_space<vmem>>, vector<1x32x32xbf16>
    %536 = vector.shape_cast %535 : vector<1x32x32xbf16> to vector<32x32xbf16>
    %c1_279 = arith.constant 1 : index
    %c0_280 = arith.constant 0 : index
    %c0_281 = arith.constant 0 : index
    %537 = vector.load %arg25[%c1_279, %c0_280, %c0_281] : memref<2x1x32xf32, #tpu.memory_space<vmem>>, vector<1x1x32xf32>
    %538 = vector.shape_cast %537 : vector<1x1x32xf32> to vector<1x32xf32>
    %c1_282 = arith.constant 1 : index
    %c0_283 = arith.constant 0 : index
    %c0_284 = arith.constant 0 : index
    %539 = vector.load %arg26[%c1_282, %c0_283, %c0_284] : memref<2x32x64xbf16, #tpu.memory_space<vmem>>, vector<1x32x64xbf16>
    %540 = vector.shape_cast %539 : vector<1x32x64xbf16> to vector<32x64xbf16>
    %c1_285 = arith.constant 1 : index
    %c0_286 = arith.constant 0 : index
    %c0_287 = arith.constant 0 : index
    %541 = vector.load %arg27[%c1_285, %c0_286, %c0_287] : memref<2x1x64xf32, #tpu.memory_space<vmem>>, vector<1x1x64xf32>
    %542 = vector.shape_cast %541 : vector<1x1x64xf32> to vector<1x64xf32>
    %c1_288 = arith.constant 1 : index
    %c0_289 = arith.constant 0 : index
    %c0_290 = arith.constant 0 : index
    %543 = vector.load %arg28[%c1_288, %c0_289, %c0_290] : memref<2x32x32xbf16, #tpu.memory_space<vmem>>, vector<1x32x32xbf16>
    %544 = vector.shape_cast %543 : vector<1x32x32xbf16> to vector<32x32xbf16>
    %c1_291 = arith.constant 1 : index
    %c0_292 = arith.constant 0 : index
    %c0_293 = arith.constant 0 : index
    %545 = vector.load %arg29[%c1_291, %c0_292, %c0_293] : memref<2x1x32xf32, #tpu.memory_space<vmem>>, vector<1x1x32xf32>
    %546 = vector.shape_cast %545 : vector<1x1x32xf32> to vector<1x32xf32>
    %c1_294 = arith.constant 1 : index
    %c0_295 = arith.constant 0 : index
    %c0_296 = arith.constant 0 : index
    %547 = vector.load %arg30[%c1_294, %c0_295, %c0_296] : memref<2x1x32xf32, #tpu.memory_space<vmem>>, vector<1x1x32xf32>
    %548 = vector.shape_cast %547 : vector<1x1x32xf32> to vector<1x32xf32>
    %c1_297 = arith.constant 1 : index
    %c0_298 = arith.constant 0 : index
    %c0_299 = arith.constant 0 : index
    %549 = vector.load %arg31[%c1_297, %c0_298, %c0_299] : memref<2x1x32xf32, #tpu.memory_space<vmem>>, vector<1x1x32xf32>
    %550 = vector.shape_cast %549 : vector<1x1x32xf32> to vector<1x32xf32>
    %c1_300 = arith.constant 1 : index
    %c0_301 = arith.constant 0 : index
    %c0_302 = arith.constant 0 : index
    %551 = vector.load %arg32[%c1_300, %c0_301, %c0_302] : memref<2x32x2048xbf16, #tpu.memory_space<vmem>>, vector<1x32x2048xbf16>
    %552 = vector.shape_cast %551 : vector<1x32x2048xbf16> to vector<32x2048xbf16>
    %c1_303 = arith.constant 1 : index
    %c0_304 = arith.constant 0 : index
    %c0_305 = arith.constant 0 : index
    %553 = vector.load %arg33[%c1_303, %c0_304, %c0_305] : memref<2x1x2048xf32, #tpu.memory_space<vmem>>, vector<1x1x2048xf32>
    %554 = vector.shape_cast %553 : vector<1x1x2048xf32> to vector<1x2048xf32>
    %c1_306 = arith.constant 1 : index
    %c0_307 = arith.constant 0 : index
    %c0_308 = arith.constant 0 : index
    %555 = vector.load %arg34[%c1_306, %c0_307, %c0_308] : memref<2x2048x32xbf16, #tpu.memory_space<vmem>>, vector<1x2048x32xbf16>
    %556 = vector.shape_cast %555 : vector<1x2048x32xbf16> to vector<2048x32xbf16>
    %c1_309 = arith.constant 1 : index
    %c0_310 = arith.constant 0 : index
    %c0_311 = arith.constant 0 : index
    %557 = vector.load %arg35[%c1_309, %c0_310, %c0_311] : memref<2x1x32xf32, #tpu.memory_space<vmem>>, vector<1x1x32xf32>
    %558 = vector.shape_cast %557 : vector<1x1x32xf32> to vector<1x32xf32>
    %c1_312 = arith.constant 1 : index
    %c0_313 = arith.constant 0 : index
    %c0_314 = arith.constant 0 : index
    %559 = vector.load %arg36[%c1_312, %c0_313, %c0_314] : memref<2x1x32xf32, #tpu.memory_space<vmem>>, vector<1x1x32xf32>
    %560 = vector.shape_cast %559 : vector<1x1x32xf32> to vector<1x32xf32>
    %c1_315 = arith.constant 1 : index
    %c0_316 = arith.constant 0 : index
    %c0_317 = arith.constant 0 : index
    %561 = vector.load %arg37[%c1_315, %c0_316, %c0_317] : memref<2x1x32xf32, #tpu.memory_space<vmem>>, vector<1x1x32xf32>
    %562 = vector.shape_cast %561 : vector<1x1x32xf32> to vector<1x32xf32>
    %563 = arith.truncf %522 : vector<8x32xf32> to vector<8x32xbf16>
    %cst_318 = arith.constant dense<0.000000e+00> : vector<8x96xf32>
    %564 = tpu.matmul %563, %524, %cst_318 {dimension_numbers = #tpu.dot_dimension_numbers<[1], [0], [0], [1], [0, 0, 1, 1], [], []>} : vector<8x32xbf16>, vector<32x96xbf16>, vector<8x96xf32> -> vector<8x96xf32>
    %565 = vector.broadcast %526 : vector<1x96xf32> to vector<8x96xf32>
    %566 = arith.addf %564, %565 : vector<8x96xf32>
    %567 = vector.extract_strided_slice %566 {offsets = [0, 0], sizes = [8, 32], strides = [1, 1]} : vector<8x96xf32> to vector<8x32xf32>
    %568 = vector.extract_strided_slice %566 {offsets = [0, 32], sizes = [8, 32], strides = [1, 1]} : vector<8x96xf32> to vector<8x32xf32>
    %569 = vector.extract_strided_slice %566 {offsets = [0, 64], sizes = [8, 32], strides = [1, 1]} : vector<8x96xf32> to vector<8x32xf32>
    %570 = tpu.iota {dimensions = array<i32: 0>} : vector<8x8xi32>
    %571 = tpu.iota {dimensions = array<i32: 1>} : vector<8x8xi32>
    %572 = arith.cmpi sgt, %571, %570 : vector<8x8xi32>
    %cst_319 = arith.constant -1.000000e+30 : f32
    %cst_320 = arith.constant 0.000000e+00 : f32
    %573 = vector.broadcast %cst_319 : f32 to vector<8x8xf32>
    %574 = vector.broadcast %cst_320 : f32 to vector<8x8xf32>
    %575 = arith.select %572, %573, %574 : vector<8x8xi1>, vector<8x8xf32>
    %576 = vector.extract_strided_slice %567 {offsets = [0, 0], sizes = [8, 16], strides = [1, 1]} : vector<8x32xf32> to vector<8x16xf32>
    %577 = arith.truncf %576 : vector<8x16xf32> to vector<8x16xbf16>
    %578 = vector.extract_strided_slice %568 {offsets = [0, 0], sizes = [8, 16], strides = [1, 1]} : vector<8x32xf32> to vector<8x16xf32>
    %579 = arith.truncf %578 : vector<8x16xf32> to vector<8x16xbf16>
    %580 = vector.extract_strided_slice %569 {offsets = [0, 0], sizes = [8, 16], strides = [1, 1]} : vector<8x32xf32> to vector<8x16xf32>
    %581 = arith.truncf %580 : vector<8x16xf32> to vector<8x16xbf16>
    %cst_321 = arith.constant dense<0.000000e+00> : vector<8x8xf32>
    %582 = tpu.matmul %577, %579, %cst_321 {dimension_numbers = #tpu.dot_dimension_numbers<[1], [1], [0], [0], [0, 0, 1, 0], [], []>} : vector<8x16xbf16>, vector<8x16xbf16>, vector<8x8xf32> -> vector<8x8xf32>
    %583 = arith.addf %582, %575 : vector<8x8xf32>
    %cst_322 = arith.constant dense<0xFF800000> : vector<8xf32>
    %584 = vector.multi_reduction <maximumf>, %583, %cst_322 [1] : vector<8x8xf32> to vector<8xf32>
    %585 = vector.shape_cast %584 : vector<8xf32> to vector<8x1xf32>
    %586 = vector.broadcast %585 : vector<8x1xf32> to vector<8x8xf32>
    %587 = arith.subf %583, %586 : vector<8x8xf32>
    %588 = math.exp %587 : vector<8x8xf32>
    %cst_323 = arith.constant dense<0.000000e+00> : vector<8xf32>
    %589 = vector.multi_reduction <add>, %588, %cst_323 [1] : vector<8x8xf32> to vector<8xf32>
    %590 = vector.shape_cast %589 : vector<8xf32> to vector<8x1xf32>
    %591 = tpu.reciprocal %590 {approx = true} : vector<8x1xf32> -> vector<8x1xf32>
    %592 = vector.broadcast %591 : vector<8x1xf32> to vector<8x8xf32>
    %593 = arith.mulf %588, %592 : vector<8x8xf32>
    %594 = arith.truncf %593 : vector<8x8xf32> to vector<8x8xbf16>
    %cst_324 = arith.constant dense<0.000000e+00> : vector<8x16xf32>
    %595 = tpu.matmul %594, %581, %cst_324 {dimension_numbers = #tpu.dot_dimension_numbers<[1], [0], [0], [1], [0, 0, 1, 1], [], []>} : vector<8x8xbf16>, vector<8x16xbf16>, vector<8x16xf32> -> vector<8x16xf32>
    %c0_325 = arith.constant 0 : index
    %c0_326 = arith.constant 0 : index
    %596 = vector.load %arg43[%c0_325, %c0_326] : memref<8x32xf32, #tpu.memory_space<vmem>>, vector<8x16xf32>
    tpu.vector_store %arg43[%c0_325, %c0_326], %595 {strides = array<i32>} : memref<8x32xf32, #tpu.memory_space<vmem>>, vector<8x16xf32>,
    %597 = vector.extract_strided_slice %567 {offsets = [0, 16], sizes = [8, 16], strides = [1, 1]} : vector<8x32xf32> to vector<8x16xf32>
    %598 = arith.truncf %597 : vector<8x16xf32> to vector<8x16xbf16>
    %599 = vector.extract_strided_slice %568 {offsets = [0, 16], sizes = [8, 16], strides = [1, 1]} : vector<8x32xf32> to vector<8x16xf32>
    %600 = arith.truncf %599 : vector<8x16xf32> to vector<8x16xbf16>
    %601 = vector.extract_strided_slice %569 {offsets = [0, 16], sizes = [8, 16], strides = [1, 1]} : vector<8x32xf32> to vector<8x16xf32>
    %602 = arith.truncf %601 : vector<8x16xf32> to vector<8x16xbf16>
    %cst_327 = arith.constant dense<0.000000e+00> : vector<8x8xf32>
    %603 = tpu.matmul %598, %600, %cst_327 {dimension_numbers = #tpu.dot_dimension_numbers<[1], [1], [0], [0], [0, 0, 1, 0], [], []>} : vector<8x16xbf16>, vector<8x16xbf16>, vector<8x8xf32> -> vector<8x8xf32>
    %604 = arith.addf %603, %575 : vector<8x8xf32>
    %cst_328 = arith.constant dense<0xFF800000> : vector<8xf32>
    %605 = vector.multi_reduction <maximumf>, %604, %cst_328 [1] : vector<8x8xf32> to vector<8xf32>
    %606 = vector.shape_cast %605 : vector<8xf32> to vector<8x1xf32>
    %607 = vector.broadcast %606 : vector<8x1xf32> to vector<8x8xf32>
    %608 = arith.subf %604, %607 : vector<8x8xf32>
    %609 = math.exp %608 : vector<8x8xf32>
    %cst_329 = arith.constant dense<0.000000e+00> : vector<8xf32>
    %610 = vector.multi_reduction <add>, %609, %cst_329 [1] : vector<8x8xf32> to vector<8xf32>
    %611 = vector.shape_cast %610 : vector<8xf32> to vector<8x1xf32>
    %612 = tpu.reciprocal %611 {approx = true} : vector<8x1xf32> -> vector<8x1xf32>
    %613 = vector.broadcast %612 : vector<8x1xf32> to vector<8x8xf32>
    %614 = arith.mulf %609, %613 : vector<8x8xf32>
    %615 = arith.truncf %614 : vector<8x8xf32> to vector<8x8xbf16>
    %cst_330 = arith.constant dense<0.000000e+00> : vector<8x16xf32>
    %616 = tpu.matmul %615, %602, %cst_330 {dimension_numbers = #tpu.dot_dimension_numbers<[1], [0], [0], [1], [0, 0, 1, 1], [], []>} : vector<8x8xbf16>, vector<8x16xbf16>, vector<8x16xf32> -> vector<8x16xf32>
    %c0_331 = arith.constant 0 : index
    %c16_332 = arith.constant 16 : index
    %617 = vector.load %arg43[%c0_331, %c16_332] : memref<8x32xf32, #tpu.memory_space<vmem>>, vector<8x16xf32>
    tpu.vector_store %arg43[%c0_331, %c16_332], %616 {strides = array<i32>} : memref<8x32xf32, #tpu.memory_space<vmem>>, vector<8x16xf32>,
    %c0_333 = arith.constant 0 : index
    %c0_334 = arith.constant 0 : index
    %618 = vector.load %arg43[%c0_333, %c0_334] : memref<8x32xf32, #tpu.memory_space<vmem>>, vector<8x32xf32>
    %619 = arith.truncf %618 : vector<8x32xf32> to vector<8x32xbf16>
    %cst_335 = arith.constant dense<0.000000e+00> : vector<8x32xf32>
    %620 = tpu.matmul %619, %528, %cst_335 {dimension_numbers = #tpu.dot_dimension_numbers<[1], [0], [0], [1], [0, 0, 1, 1], [], []>} : vector<8x32xbf16>, vector<32x32xbf16>, vector<8x32xf32> -> vector<8x32xf32>
    %621 = vector.broadcast %530 : vector<1x32xf32> to vector<8x32xf32>
    %622 = arith.addf %620, %621 : vector<8x32xf32>
    %623 = arith.addf %522, %622 : vector<8x32xf32>
    %cst_336 = arith.constant dense<0.000000e+00> : vector<8xf32>
    %624 = vector.multi_reduction <add>, %623, %cst_336 [1] : vector<8x32xf32> to vector<8xf32>
    %625 = vector.shape_cast %624 : vector<8xf32> to vector<8x1xf32>
    %cst_337 = arith.constant 3.200000e+01 : f32
    %626 = vector.broadcast %cst_337 : f32 to vector<8x1xf32>
    %627 = arith.divf %625, %626 : vector<8x1xf32>
    %628 = vector.broadcast %627 : vector<8x1xf32> to vector<8x32xf32>
    %629 = arith.subf %623, %628 : vector<8x32xf32>
    %630 = arith.mulf %629, %629 : vector<8x32xf32>
    %cst_338 = arith.constant dense<0.000000e+00> : vector<8xf32>
    %631 = vector.multi_reduction <add>, %630, %cst_338 [1] : vector<8x32xf32> to vector<8xf32>
    %632 = vector.shape_cast %631 : vector<8xf32> to vector<8x1xf32>
    %cst_339 = arith.constant 3.200000e+01 : f32
    %633 = vector.broadcast %cst_339 : f32 to vector<8x1xf32>
    %634 = arith.divf %632, %633 : vector<8x1xf32>
    %cst_340 = arith.constant 9.99999974E-6 : f32
    %635 = vector.broadcast %cst_340 : f32 to vector<8x1xf32>
    %636 = arith.addf %634, %635 : vector<8x1xf32>
    %637 = math.rsqrt %636 : vector<8x1xf32>
    %638 = vector.broadcast %637 : vector<8x1xf32> to vector<8x32xf32>
    %639 = arith.mulf %629, %638 : vector<8x32xf32>
    %640 = vector.broadcast %532 : vector<1x32xf32> to vector<8x32xf32>
    %641 = arith.mulf %639, %640 : vector<8x32xf32>
    %642 = vector.broadcast %534 : vector<1x32xf32> to vector<8x32xf32>
    %643 = arith.addf %641, %642 : vector<8x32xf32>
    %644 = arith.truncf %643 : vector<8x32xf32> to vector<8x32xbf16>
    %cst_341 = arith.constant dense<0.000000e+00> : vector<8x32xf32>
    %645 = tpu.matmul %644, %536, %cst_341 {dimension_numbers = #tpu.dot_dimension_numbers<[1], [0], [0], [1], [0, 0, 1, 1], [], []>} : vector<8x32xbf16>, vector<32x32xbf16>, vector<8x32xf32> -> vector<8x32xf32>
    %646 = vector.broadcast %538 : vector<1x32xf32> to vector<8x32xf32>
    %647 = arith.addf %645, %646 : vector<8x32xf32>
    %648 = arith.truncf %294 : vector<8x32xf32> to vector<8x32xbf16>
    %cst_342 = arith.constant dense<0.000000e+00> : vector<8x64xf32>
    %649 = tpu.matmul %648, %540, %cst_342 {dimension_numbers = #tpu.dot_dimension_numbers<[1], [0], [0], [1], [0, 0, 1, 1], [], []>} : vector<8x32xbf16>, vector<32x64xbf16>, vector<8x64xf32> -> vector<8x64xf32>
    %650 = vector.broadcast %542 : vector<1x64xf32> to vector<8x64xf32>
    %651 = arith.addf %649, %650 : vector<8x64xf32>
    %652 = vector.extract_strided_slice %651 {offsets = [0, 0], sizes = [8, 32], strides = [1, 1]} : vector<8x64xf32> to vector<8x32xf32>
    %653 = vector.extract_strided_slice %651 {offsets = [0, 32], sizes = [8, 32], strides = [1, 1]} : vector<8x64xf32> to vector<8x32xf32>
    %654 = vector.extract_strided_slice %647 {offsets = [0, 0], sizes = [8, 16], strides = [1, 1]} : vector<8x32xf32> to vector<8x16xf32>
    %655 = arith.truncf %654 : vector<8x16xf32> to vector<8x16xbf16>
    %656 = vector.extract_strided_slice %652 {offsets = [0, 0], sizes = [8, 16], strides = [1, 1]} : vector<8x32xf32> to vector<8x16xf32>
    %657 = arith.truncf %656 : vector<8x16xf32> to vector<8x16xbf16>
    %658 = vector.extract_strided_slice %653 {offsets = [0, 0], sizes = [8, 16], strides = [1, 1]} : vector<8x32xf32> to vector<8x16xf32>
    %659 = arith.truncf %658 : vector<8x16xf32> to vector<8x16xbf16>
    %cst_343 = arith.constant dense<0.000000e+00> : vector<8x8xf32>
    %660 = tpu.matmul %655, %657, %cst_343 {dimension_numbers = #tpu.dot_dimension_numbers<[1], [1], [0], [0], [0, 0, 1, 0], [], []>} : vector<8x16xbf16>, vector<8x16xbf16>, vector<8x8xf32> -> vector<8x8xf32>
    %cst_344 = arith.constant dense<0xFF800000> : vector<8xf32>
    %661 = vector.multi_reduction <maximumf>, %660, %cst_344 [1] : vector<8x8xf32> to vector<8xf32>
    %662 = vector.shape_cast %661 : vector<8xf32> to vector<8x1xf32>
    %663 = vector.broadcast %662 : vector<8x1xf32> to vector<8x8xf32>
    %664 = arith.subf %660, %663 : vector<8x8xf32>
    %665 = math.exp %664 : vector<8x8xf32>
    %cst_345 = arith.constant dense<0.000000e+00> : vector<8xf32>
    %666 = vector.multi_reduction <add>, %665, %cst_345 [1] : vector<8x8xf32> to vector<8xf32>
    %667 = vector.shape_cast %666 : vector<8xf32> to vector<8x1xf32>
    %668 = tpu.reciprocal %667 {approx = true} : vector<8x1xf32> -> vector<8x1xf32>
    %669 = vector.broadcast %668 : vector<8x1xf32> to vector<8x8xf32>
    %670 = arith.mulf %665, %669 : vector<8x8xf32>
    %671 = arith.truncf %670 : vector<8x8xf32> to vector<8x8xbf16>
    %cst_346 = arith.constant dense<0.000000e+00> : vector<8x16xf32>
    %672 = tpu.matmul %671, %659, %cst_346 {dimension_numbers = #tpu.dot_dimension_numbers<[1], [0], [0], [1], [0, 0, 1, 1], [], []>} : vector<8x8xbf16>, vector<8x16xbf16>, vector<8x16xf32> -> vector<8x16xf32>
    %c0_347 = arith.constant 0 : index
    %c0_348 = arith.constant 0 : index
    %673 = vector.load %arg43[%c0_347, %c0_348] : memref<8x32xf32, #tpu.memory_space<vmem>>, vector<8x16xf32>
    tpu.vector_store %arg43[%c0_347, %c0_348], %672 {strides = array<i32>} : memref<8x32xf32, #tpu.memory_space<vmem>>, vector<8x16xf32>,
    %674 = vector.extract_strided_slice %647 {offsets = [0, 16], sizes = [8, 16], strides = [1, 1]} : vector<8x32xf32> to vector<8x16xf32>
    %675 = arith.truncf %674 : vector<8x16xf32> to vector<8x16xbf16>
    %676 = vector.extract_strided_slice %652 {offsets = [0, 16], sizes = [8, 16], strides = [1, 1]} : vector<8x32xf32> to vector<8x16xf32>
    %677 = arith.truncf %676 : vector<8x16xf32> to vector<8x16xbf16>
    %678 = vector.extract_strided_slice %653 {offsets = [0, 16], sizes = [8, 16], strides = [1, 1]} : vector<8x32xf32> to vector<8x16xf32>
    %679 = arith.truncf %678 : vector<8x16xf32> to vector<8x16xbf16>
    %cst_349 = arith.constant dense<0.000000e+00> : vector<8x8xf32>
    %680 = tpu.matmul %675, %677, %cst_349 {dimension_numbers = #tpu.dot_dimension_numbers<[1], [1], [0], [0], [0, 0, 1, 0], [], []>} : vector<8x16xbf16>, vector<8x16xbf16>, vector<8x8xf32> -> vector<8x8xf32>
    %cst_350 = arith.constant dense<0xFF800000> : vector<8xf32>
    %681 = vector.multi_reduction <maximumf>, %680, %cst_350 [1] : vector<8x8xf32> to vector<8xf32>
    %682 = vector.shape_cast %681 : vector<8xf32> to vector<8x1xf32>
    %683 = vector.broadcast %682 : vector<8x1xf32> to vector<8x8xf32>
    %684 = arith.subf %680, %683 : vector<8x8xf32>
    %685 = math.exp %684 : vector<8x8xf32>
    %cst_351 = arith.constant dense<0.000000e+00> : vector<8xf32>
    %686 = vector.multi_reduction <add>, %685, %cst_351 [1] : vector<8x8xf32> to vector<8xf32>
    %687 = vector.shape_cast %686 : vector<8xf32> to vector<8x1xf32>
    %688 = tpu.reciprocal %687 {approx = true} : vector<8x1xf32> -> vector<8x1xf32>
    %689 = vector.broadcast %688 : vector<8x1xf32> to vector<8x8xf32>
    %690 = arith.mulf %685, %689 : vector<8x8xf32>
    %691 = arith.truncf %690 : vector<8x8xf32> to vector<8x8xbf16>
    %cst_352 = arith.constant dense<0.000000e+00> : vector<8x16xf32>
    %692 = tpu.matmul %691, %679, %cst_352 {dimension_numbers = #tpu.dot_dimension_numbers<[1], [0], [0], [1], [0, 0, 1, 1], [], []>} : vector<8x8xbf16>, vector<8x16xbf16>, vector<8x16xf32> -> vector<8x16xf32>
    %c0_353 = arith.constant 0 : index
    %c16_354 = arith.constant 16 : index
    %693 = vector.load %arg43[%c0_353, %c16_354] : memref<8x32xf32, #tpu.memory_space<vmem>>, vector<8x16xf32>
    tpu.vector_store %arg43[%c0_353, %c16_354], %692 {strides = array<i32>} : memref<8x32xf32, #tpu.memory_space<vmem>>, vector<8x16xf32>,
    %c0_355 = arith.constant 0 : index
    %c0_356 = arith.constant 0 : index
    %694 = vector.load %arg43[%c0_355, %c0_356] : memref<8x32xf32, #tpu.memory_space<vmem>>, vector<8x32xf32>
    %695 = arith.truncf %694 : vector<8x32xf32> to vector<8x32xbf16>
    %cst_357 = arith.constant dense<0.000000e+00> : vector<8x32xf32>
    %696 = tpu.matmul %695, %544, %cst_357 {dimension_numbers = #tpu.dot_dimension_numbers<[1], [0], [0], [1], [0, 0, 1, 1], [], []>} : vector<8x32xbf16>, vector<32x32xbf16>, vector<8x32xf32> -> vector<8x32xf32>
    %697 = vector.broadcast %546 : vector<1x32xf32> to vector<8x32xf32>
    %698 = arith.addf %696, %697 : vector<8x32xf32>
    %699 = arith.addf %643, %698 : vector<8x32xf32>
    %cst_358 = arith.constant dense<0.000000e+00> : vector<8xf32>
    %700 = vector.multi_reduction <add>, %699, %cst_358 [1] : vector<8x32xf32> to vector<8xf32>
    %701 = vector.shape_cast %700 : vector<8xf32> to vector<8x1xf32>
    %cst_359 = arith.constant 3.200000e+01 : f32
    %702 = vector.broadcast %cst_359 : f32 to vector<8x1xf32>
    %703 = arith.divf %701, %702 : vector<8x1xf32>
    %704 = vector.broadcast %703 : vector<8x1xf32> to vector<8x32xf32>
    %705 = arith.subf %699, %704 : vector<8x32xf32>
    %706 = arith.mulf %705, %705 : vector<8x32xf32>
    %cst_360 = arith.constant dense<0.000000e+00> : vector<8xf32>
    %707 = vector.multi_reduction <add>, %706, %cst_360 [1] : vector<8x32xf32> to vector<8xf32>
    %708 = vector.shape_cast %707 : vector<8xf32> to vector<8x1xf32>
    %cst_361 = arith.constant 3.200000e+01 : f32
    %709 = vector.broadcast %cst_361 : f32 to vector<8x1xf32>
    %710 = arith.divf %708, %709 : vector<8x1xf32>
    %cst_362 = arith.constant 9.99999974E-6 : f32
    %711 = vector.broadcast %cst_362 : f32 to vector<8x1xf32>
    %712 = arith.addf %710, %711 : vector<8x1xf32>
    %713 = math.rsqrt %712 : vector<8x1xf32>
    %714 = vector.broadcast %713 : vector<8x1xf32> to vector<8x32xf32>
    %715 = arith.mulf %705, %714 : vector<8x32xf32>
    %716 = vector.broadcast %548 : vector<1x32xf32> to vector<8x32xf32>
    %717 = arith.mulf %715, %716 : vector<8x32xf32>
    %718 = vector.broadcast %550 : vector<1x32xf32> to vector<8x32xf32>
    %719 = arith.addf %717, %718 : vector<8x32xf32>
    %720 = arith.truncf %719 : vector<8x32xf32> to vector<8x32xbf16>
    %cst_363 = arith.constant dense<0.000000e+00> : vector<8x2048xf32>
    %721 = tpu.matmul %720, %552, %cst_363 {dimension_numbers = #tpu.dot_dimension_numbers<[1], [0], [0], [1], [0, 0, 1, 1], [], []>} : vector<8x32xbf16>, vector<32x2048xbf16>, vector<8x2048xf32> -> vector<8x2048xf32>
    %722 = vector.broadcast %554 : vector<1x2048xf32> to vector<8x2048xf32>
    %723 = arith.addf %721, %722 : vector<8x2048xf32>
    %cst_364 = arith.constant 0.000000e+00 : f32
    %724 = vector.broadcast %cst_364 : f32 to vector<8x2048xf32>
    %725 = arith.maximumf %723, %724 : vector<8x2048xf32>
    %726 = arith.truncf %725 : vector<8x2048xf32> to vector<8x2048xbf16>
    %cst_365 = arith.constant dense<0.000000e+00> : vector<8x32xf32>
    %727 = tpu.matmul %726, %556, %cst_365 {dimension_numbers = #tpu.dot_dimension_numbers<[1], [0], [0], [1], [0, 0, 1, 1], [], []>} : vector<8x2048xbf16>, vector<2048x32xbf16>, vector<8x32xf32> -> vector<8x32xf32>
    %728 = vector.broadcast %558 : vector<1x32xf32> to vector<8x32xf32>
    %729 = arith.addf %727, %728 : vector<8x32xf32>
    %730 = arith.addf %719, %729 : vector<8x32xf32>
    %cst_366 = arith.constant dense<0.000000e+00> : vector<8xf32>
    %731 = vector.multi_reduction <add>, %730, %cst_366 [1] : vector<8x32xf32> to vector<8xf32>
    %732 = vector.shape_cast %731 : vector<8xf32> to vector<8x1xf32>
    %cst_367 = arith.constant 3.200000e+01 : f32
    %733 = vector.broadcast %cst_367 : f32 to vector<8x1xf32>
    %734 = arith.divf %732, %733 : vector<8x1xf32>
    %735 = vector.broadcast %734 : vector<8x1xf32> to vector<8x32xf32>
    %736 = arith.subf %730, %735 : vector<8x32xf32>
    %737 = arith.mulf %736, %736 : vector<8x32xf32>
    %cst_368 = arith.constant dense<0.000000e+00> : vector<8xf32>
    %738 = vector.multi_reduction <add>, %737, %cst_368 [1] : vector<8x32xf32> to vector<8xf32>
    %739 = vector.shape_cast %738 : vector<8xf32> to vector<8x1xf32>
    %cst_369 = arith.constant 3.200000e+01 : f32
    %740 = vector.broadcast %cst_369 : f32 to vector<8x1xf32>
    %741 = arith.divf %739, %740 : vector<8x1xf32>
    %cst_370 = arith.constant 9.99999974E-6 : f32
    %742 = vector.broadcast %cst_370 : f32 to vector<8x1xf32>
    %743 = arith.addf %741, %742 : vector<8x1xf32>
    %744 = math.rsqrt %743 : vector<8x1xf32>
    %745 = vector.broadcast %744 : vector<8x1xf32> to vector<8x32xf32>
    %746 = arith.mulf %736, %745 : vector<8x32xf32>
    %747 = vector.broadcast %560 : vector<1x32xf32> to vector<8x32xf32>
    %748 = arith.mulf %746, %747 : vector<8x32xf32>
    %749 = vector.broadcast %562 : vector<1x32xf32> to vector<8x32xf32>
    %750 = arith.addf %748, %749 : vector<8x32xf32>
    %c0_371 = arith.constant 0 : index
    %c0_372 = arith.constant 0 : index
    %751 = vector.load %arg38[%c0_371, %c0_372] : memref<1x32xf32, #tpu.memory_space<vmem>>, vector<1x32xf32>
    %c0_373 = arith.constant 0 : index
    %c0_374 = arith.constant 0 : index
    %752 = vector.load %arg39[%c0_373, %c0_374] : memref<1x32xf32, #tpu.memory_space<vmem>>, vector<1x32xf32>
    %cst_375 = arith.constant dense<0.000000e+00> : vector<8xf32>
    %753 = vector.multi_reduction <add>, %750, %cst_375 [1] : vector<8x32xf32> to vector<8xf32>
    %754 = vector.shape_cast %753 : vector<8xf32> to vector<8x1xf32>
    %cst_376 = arith.constant 3.200000e+01 : f32
    %755 = vector.broadcast %cst_376 : f32 to vector<8x1xf32>
    %756 = arith.divf %754, %755 : vector<8x1xf32>
    %757 = vector.broadcast %756 : vector<8x1xf32> to vector<8x32xf32>
    %758 = arith.subf %750, %757 : vector<8x32xf32>
    %759 = arith.mulf %758, %758 : vector<8x32xf32>
    %cst_377 = arith.constant dense<0.000000e+00> : vector<8xf32>
    %760 = vector.multi_reduction <add>, %759, %cst_377 [1] : vector<8x32xf32> to vector<8xf32>
    %761 = vector.shape_cast %760 : vector<8xf32> to vector<8x1xf32>
    %cst_378 = arith.constant 3.200000e+01 : f32
    %762 = vector.broadcast %cst_378 : f32 to vector<8x1xf32>
    %763 = arith.divf %761, %762 : vector<8x1xf32>
    %cst_379 = arith.constant 9.99999974E-6 : f32
    %764 = vector.broadcast %cst_379 : f32 to vector<8x1xf32>
    %765 = arith.addf %763, %764 : vector<8x1xf32>
    %766 = math.rsqrt %765 : vector<8x1xf32>
    %767 = vector.broadcast %766 : vector<8x1xf32> to vector<8x32xf32>
    %768 = arith.mulf %758, %767 : vector<8x32xf32>
    %769 = vector.broadcast %751 : vector<1x32xf32> to vector<8x32xf32>
    %770 = arith.mulf %768, %769 : vector<8x32xf32>
    %771 = vector.broadcast %752 : vector<1x32xf32> to vector<8x32xf32>
    %772 = arith.addf %770, %771 : vector<8x32xf32>
    %c0_380 = arith.constant 0 : index
    %c0_381 = arith.constant 0 : index
    %773 = vector.load %arg40[%c0_380, %c0_381] : memref<32x64xbf16, #tpu.memory_space<vmem>>, vector<32x64xbf16>
    %c0_382 = arith.constant 0 : index
    %c0_383 = arith.constant 0 : index
    %774 = vector.load %arg41[%c0_382, %c0_383] : memref<1x64xf32, #tpu.memory_space<vmem>>, vector<1x64xf32>
    %775 = arith.truncf %772 : vector<8x32xf32> to vector<8x32xbf16>
    %cst_384 = arith.constant dense<0.000000e+00> : vector<8x64xf32>
    %776 = tpu.matmul %775, %773, %cst_384 {dimension_numbers = #tpu.dot_dimension_numbers<[1], [0], [0], [1], [0, 0, 1, 1], [], []>} : vector<8x32xbf16>, vector<32x64xbf16>, vector<8x64xf32> -> vector<8x64xf32>
    %777 = vector.broadcast %774 : vector<1x64xf32> to vector<8x64xf32>
    %778 = arith.addf %776, %777 : vector<8x64xf32>
    %c0_385 = arith.constant 0 : index
    %c0_386 = arith.constant 0 : index
    %c0_387 = arith.constant 0 : index
    %779 = vector.load %arg42[%c0_385, %c0_386, %c0_387] : memref<1x8x64xf32, #tpu.memory_space<vmem>>, vector<1x8x64xf32>
    %780 = vector.shape_cast %779 : vector<1x8x64xf32> to vector<8x64xf32>
    %781 = vector.shape_cast %778 : vector<8x64xf32> to vector<1x8x64xf32>
    tpu.vector_store %arg42[%c0_385, %c0_386, %c0_387], %781 {strides = array<i32>} : memref<1x8x64xf32, #tpu.memory_space<vmem>>, vector<1x8x64xf32>,
    return
  }
  func.func @transform_0(%arg0: i32) -> (i32, i32, i32) {
    %c0_i32 = arith.constant 0 : i32
    %c0_i32_0 = arith.constant 0 : i32
    %c0_i32_1 = arith.constant 0 : i32
    return %arg0, %c0_i32, %c0_i32_0 : i32, i32, i32
  }
  func.func @transform_1(%arg0: i32) -> (i32, i32, i32) {
    %c0_i32 = arith.constant 0 : i32
    %c0_i32_0 = arith.constant 0 : i32
    %c0_i32_1 = arith.constant 0 : i32
    return %arg0, %c0_i32, %c0_i32_0 : i32, i32, i32
  }
  func.func @transform_2(%arg0: i32) -> (i32, i32) {
    %c0_i32 = arith.constant 0 : i32
    %c0_i32_0 = arith.constant 0 : i32
    %c0_i32_1 = arith.constant 0 : i32
    return %c0_i32, %c0_i32_0 : i32, i32
  }
  func.func @transform_3(%arg0: i32) -> (i32, i32, i32) {
    %c0_i32 = arith.constant 0 : i32
    %c0_i32_0 = arith.constant 0 : i32
    %c0_i32_1 = arith.constant 0 : i32
    %c0_i32_2 = arith.constant 0 : i32
    return %c0_i32, %c0_i32_0, %c0_i32_1 : i32, i32, i32
  }
  func.func @transform_4(%arg0: i32) -> (i32, i32, i32) {
    %c0_i32 = arith.constant 0 : i32
    %c0_i32_0 = arith.constant 0 : i32
    %c0_i32_1 = arith.constant 0 : i32
    %c0_i32_2 = arith.constant 0 : i32
    return %c0_i32, %c0_i32_0, %c0_i32_1 : i32, i32, i32
  }
  func.func @transform_5(%arg0: i32) -> (i32, i32, i32) {
    %c0_i32 = arith.constant 0 : i32
    %c0_i32_0 = arith.constant 0 : i32
    %c0_i32_1 = arith.constant 0 : i32
    %c0_i32_2 = arith.constant 0 : i32
    return %c0_i32, %c0_i32_0, %c0_i32_1 : i32, i32, i32
  }
  func.func @transform_6(%arg0: i32) -> (i32, i32, i32) {
    %c0_i32 = arith.constant 0 : i32
    %c0_i32_0 = arith.constant 0 : i32
    %c0_i32_1 = arith.constant 0 : i32
    %c0_i32_2 = arith.constant 0 : i32
    return %c0_i32, %c0_i32_0, %c0_i32_1 : i32, i32, i32
  }
  func.func @transform_7(%arg0: i32) -> (i32, i32, i32) {
    %c0_i32 = arith.constant 0 : i32
    %c0_i32_0 = arith.constant 0 : i32
    %c0_i32_1 = arith.constant 0 : i32
    %c0_i32_2 = arith.constant 0 : i32
    return %c0_i32, %c0_i32_0, %c0_i32_1 : i32, i32, i32
  }
  func.func @transform_8(%arg0: i32) -> (i32, i32, i32) {
    %c0_i32 = arith.constant 0 : i32
    %c0_i32_0 = arith.constant 0 : i32
    %c0_i32_1 = arith.constant 0 : i32
    %c0_i32_2 = arith.constant 0 : i32
    return %c0_i32, %c0_i32_0, %c0_i32_1 : i32, i32, i32
  }
  func.func @transform_9(%arg0: i32) -> (i32, i32, i32) {
    %c0_i32 = arith.constant 0 : i32
    %c0_i32_0 = arith.constant 0 : i32
    %c0_i32_1 = arith.constant 0 : i32
    %c0_i32_2 = arith.constant 0 : i32
    return %c0_i32, %c0_i32_0, %c0_i32_1 : i32, i32, i32
  }
  func.func @transform_10(%arg0: i32) -> (i32, i32, i32) {
    %c0_i32 = arith.constant 0 : i32
    %c0_i32_0 = arith.constant 0 : i32
    %c0_i32_1 = arith.constant 0 : i32
    %c0_i32_2 = arith.constant 0 : i32
    return %c0_i32, %c0_i32_0, %c0_i32_1 : i32, i32, i32
  }
  func.func @transform_11(%arg0: i32) -> (i32, i32, i32) {
    %c0_i32 = arith.constant 0 : i32
    %c0_i32_0 = arith.constant 0 : i32
    %c0_i32_1 = arith.constant 0 : i32
    %c0_i32_2 = arith.constant 0 : i32
    return %c0_i32, %c0_i32_0, %c0_i32_1 : i32, i32, i32
  }
  func.func @transform_12(%arg0: i32) -> (i32, i32, i32) {
    %c0_i32 = arith.constant 0 : i32
    %c0_i32_0 = arith.constant 0 : i32
    %c0_i32_1 = arith.constant 0 : i32
    %c0_i32_2 = arith.constant 0 : i32
    return %c0_i32, %c0_i32_0, %c0_i32_1 : i32, i32, i32
  }
  func.func @transform_13(%arg0: i32) -> (i32, i32, i32) {
    %c0_i32 = arith.constant 0 : i32
    %c0_i32_0 = arith.constant 0 : i32
    %c0_i32_1 = arith.constant 0 : i32
    %c0_i32_2 = arith.constant 0 : i32
    return %c0_i32, %c0_i32_0, %c0_i32_1 : i32, i32, i32
  }
  func.func @transform_14(%arg0: i32) -> (i32, i32, i32) {
    %c0_i32 = arith.constant 0 : i32
    %c0_i32_0 = arith.constant 0 : i32
    %c0_i32_1 = arith.constant 0 : i32
    %c0_i32_2 = arith.constant 0 : i32
    return %c0_i32, %c0_i32_0, %c0_i32_1 : i32, i32, i32
  }
  func.func @transform_15(%arg0: i32) -> (i32, i32) {
    %c0_i32 = arith.constant 0 : i32
    %c0_i32_0 = arith.constant 0 : i32
    %c0_i32_1 = arith.constant 0 : i32
    return %c0_i32, %c0_i32_0 : i32, i32
  }
  func.func @transform_16(%arg0: i32) -> (i32, i32) {
    %c0_i32 = arith.constant 0 : i32
    %c0_i32_0 = arith.constant 0 : i32
    %c0_i32_1 = arith.constant 0 : i32
    return %c0_i32, %c0_i32_0 : i32, i32
  }
  func.func @transform_17(%arg0: i32) -> (i32, i32, i32) {
    %c0_i32 = arith.constant 0 : i32
    %c0_i32_0 = arith.constant 0 : i32
    %c0_i32_1 = arith.constant 0 : i32
    %c0_i32_2 = arith.constant 0 : i32
    return %c0_i32, %c0_i32_0, %c0_i32_1 : i32, i32, i32
  }
  func.func @transform_18(%arg0: i32) -> (i32, i32, i32) {
    %c0_i32 = arith.constant 0 : i32
    %c0_i32_0 = arith.constant 0 : i32
    %c0_i32_1 = arith.constant 0 : i32
    %c0_i32_2 = arith.constant 0 : i32
    return %c0_i32, %c0_i32_0, %c0_i32_1 : i32, i32, i32
  }
  func.func @transform_19(%arg0: i32) -> (i32, i32, i32) {
    %c0_i32 = arith.constant 0 : i32
    %c0_i32_0 = arith.constant 0 : i32
    %c0_i32_1 = arith.constant 0 : i32
    %c0_i32_2 = arith.constant 0 : i32
    return %c0_i32, %c0_i32_0, %c0_i32_1 : i32, i32, i32
  }
  func.func @transform_20(%arg0: i32) -> (i32, i32, i32) {
    %c0_i32 = arith.constant 0 : i32
    %c0_i32_0 = arith.constant 0 : i32
    %c0_i32_1 = arith.constant 0 : i32
    %c0_i32_2 = arith.constant 0 : i32
    return %c0_i32, %c0_i32_0, %c0_i32_1 : i32, i32, i32
  }
  func.func @transform_21(%arg0: i32) -> (i32, i32, i32) {
    %c0_i32 = arith.constant 0 : i32
    %c0_i32_0 = arith.constant 0 : i32
    %c0_i32_1 = arith.constant 0 : i32
    %c0_i32_2 = arith.constant 0 : i32
    return %c0_i32, %c0_i32_0, %c0_i32_1 : i32, i32, i32
  }
  func.func @transform_22(%arg0: i32) -> (i32, i32, i32) {
    %c0_i32 = arith.constant 0 : i32
    %c0_i32_0 = arith.constant 0 : i32
    %c0_i32_1 = arith.constant 0 : i32
    %c0_i32_2 = arith.constant 0 : i32
    return %c0_i32, %c0_i32_0, %c0_i32_1 : i32, i32, i32
  }
  func.func @transform_23(%arg0: i32) -> (i32, i32, i32) {
    %c0_i32 = arith.constant 0 : i32
    %c0_i32_0 = arith.constant 0 : i32
    %c0_i32_1 = arith.constant 0 : i32
    %c0_i32_2 = arith.constant 0 : i32
    return %c0_i32, %c0_i32_0, %c0_i32_1 : i32, i32, i32
  }
  func.func @transform_24(%arg0: i32) -> (i32, i32, i32) {
    %c0_i32 = arith.constant 0 : i32
    %c0_i32_0 = arith.constant 0 : i32
    %c0_i32_1 = arith.constant 0 : i32
    %c0_i32_2 = arith.constant 0 : i32
    return %c0_i32, %c0_i32_0, %c0_i32_1 : i32, i32, i32
  }
  func.func @transform_25(%arg0: i32) -> (i32, i32, i32) {
    %c0_i32 = arith.constant 0 : i32
    %c0_i32_0 = arith.constant 0 : i32
    %c0_i32_1 = arith.constant 0 : i32
    %c0_i32_2 = arith.constant 0 : i32
    return %c0_i32, %c0_i32_0, %c0_i32_1 : i32, i32, i32
  }
  func.func @transform_26(%arg0: i32) -> (i32, i32, i32) {
    %c0_i32 = arith.constant 0 : i32
    %c0_i32_0 = arith.constant 0 : i32
    %c0_i32_1 = arith.constant 0 : i32
    %c0_i32_2 = arith.constant 0 : i32
    return %c0_i32, %c0_i32_0, %c0_i32_1 : i32, i32, i32
  }
  func.func @transform_27(%arg0: i32) -> (i32, i32, i32) {
    %c0_i32 = arith.constant 0 : i32
    %c0_i32_0 = arith.constant 0 : i32
    %c0_i32_1 = arith.constant 0 : i32
    %c0_i32_2 = arith.constant 0 : i32
    return %c0_i32, %c0_i32_0, %c0_i32_1 : i32, i32, i32
  }
  func.func @transform_28(%arg0: i32) -> (i32, i32, i32) {
    %c0_i32 = arith.constant 0 : i32
    %c0_i32_0 = arith.constant 0 : i32
    %c0_i32_1 = arith.constant 0 : i32
    %c0_i32_2 = arith.constant 0 : i32
    return %c0_i32, %c0_i32_0, %c0_i32_1 : i32, i32, i32
  }
  func.func @transform_29(%arg0: i32) -> (i32, i32, i32) {
    %c0_i32 = arith.constant 0 : i32
    %c0_i32_0 = arith.constant 0 : i32
    %c0_i32_1 = arith.constant 0 : i32
    %c0_i32_2 = arith.constant 0 : i32
    return %c0_i32, %c0_i32_0, %c0_i32_1 : i32, i32, i32
  }
  func.func @transform_30(%arg0: i32) -> (i32, i32, i32) {
    %c0_i32 = arith.constant 0 : i32
    %c0_i32_0 = arith.constant 0 : i32
    %c0_i32_1 = arith.constant 0 : i32
    %c0_i32_2 = arith.constant 0 : i32
    return %c0_i32, %c0_i32_0, %c0_i32_1 : i32, i32, i32
  }
  func.func @transform_31(%arg0: i32) -> (i32, i32, i32) {
    %c0_i32 = arith.constant 0 : i32
    %c0_i32_0 = arith.constant 0 : i32
    %c0_i32_1 = arith.constant 0 : i32
    %c0_i32_2 = arith.constant 0 : i32
    return %c0_i32, %c0_i32_0, %c0_i32_1 : i32, i32, i32
  }
  func.func @transform_32(%arg0: i32) -> (i32, i32, i32) {
    %c0_i32 = arith.constant 0 : i32
    %c0_i32_0 = arith.constant 0 : i32
    %c0_i32_1 = arith.constant 0 : i32
    %c0_i32_2 = arith.constant 0 : i32
    return %c0_i32, %c0_i32_0, %c0_i32_1 : i32, i32, i32
  }
  func.func @transform_33(%arg0: i32) -> (i32, i32, i32) {
    %c0_i32 = arith.constant 0 : i32
    %c0_i32_0 = arith.constant 0 : i32
    %c0_i32_1 = arith.constant 0 : i32
    %c0_i32_2 = arith.constant 0 : i32
    return %c0_i32, %c0_i32_0, %c0_i32_1 : i32, i32, i32
  }
  func.func @transform_34(%arg0: i32) -> (i32, i32, i32) {
    %c0_i32 = arith.constant 0 : i32
    %c0_i32_0 = arith.constant 0 : i32
    %c0_i32_1 = arith.constant 0 : i32
    %c0_i32_2 = arith.constant 0 : i32
    return %c0_i32, %c0_i32_0, %c0_i32_1 : i32, i32, i32
  }
  func.func @transform_35(%arg0: i32) -> (i32, i32, i32) {
    %c0_i32 = arith.constant 0 : i32
    %c0_i32_0 = arith.constant 0 : i32
    %c0_i32_1 = arith.constant 0 : i32
    %c0_i32_2 = arith.constant 0 : i32
    return %c0_i32, %c0_i32_0, %c0_i32_1 : i32, i32, i32
  }
  func.func @transform_36(%arg0: i32) -> (i32, i32, i32) {
    %c0_i32 = arith.constant 0 : i32
    %c0_i32_0 = arith.constant 0 : i32
    %c0_i32_1 = arith.constant 0 : i32
    %c0_i32_2 = arith.constant 0 : i32
    return %c0_i32, %c0_i32_0, %c0_i32_1 : i32, i32, i32
  }
  func.func @transform_37(%arg0: i32) -> (i32, i32) {
    %c0_i32 = arith.constant 0 : i32
    %c0_i32_0 = arith.constant 0 : i32
    %c0_i32_1 = arith.constant 0 : i32
    return %c0_i32, %c0_i32_0 : i32, i32
  }
  func.func @transform_38(%arg0: i32) -> (i32, i32) {
    %c0_i32 = arith.constant 0 : i32
    %c0_i32_0 = arith.constant 0 : i32
    %c0_i32_1 = arith.constant 0 : i32
    return %c0_i32, %c0_i32_0 : i32, i32
  }
  func.func @transform_39(%arg0: i32) -> (i32, i32) {
    %c0_i32 = arith.constant 0 : i32
    %c0_i32_0 = arith.constant 0 : i32
    %c0_i32_1 = arith.constant 0 : i32
    return %c0_i32, %c0_i32_0 : i32, i32
  }
  func.func @transform_40(%arg0: i32) -> (i32, i32) {
    %c0_i32 = arith.constant 0 : i32
    %c0_i32_0 = arith.constant 0 : i32
    %c0_i32_1 = arith.constant 0 : i32
    return %c0_i32, %c0_i32_0 : i32, i32
  }
  func.func @transform_41(%arg0: i32) -> (i32, i32, i32) {
    %c0_i32 = arith.constant 0 : i32
    %c0_i32_0 = arith.constant 0 : i32
    %c0_i32_1 = arith.constant 0 : i32
    return %arg0, %c0_i32, %c0_i32_0 : i32, i32, i32
  }
}

</mosaic_0001>

<bundles_post_ra>
// kernel: tiny_llm_forward.1
= control target key start
LH: loop header
LB: loop body
LE: loop exit
PB: predicated region body
PF: predicated region fallthrough
CT: control target
= control target key end

     0   :  { %s15613_s6 = smov 1   ;;  %s15614_s10 = smov 2   ;;  %s17446_s0 = inlined_call_operand.smem [shape: u32[42], index: -1, kind: input, shape index: {}] }
   0x1   :  { %s15673_s5 = sld [smem:[%s17446_s0]]   ;;  %s15615_s14 = smov 3  }
   0x2   :  { %s15678_s9 = sld [smem:[%s17446_s0 + %s15613_s6]]   ;;  %s15616_s18 = smov 4  }
   0x3   :  { %s15683_s13 = sld [smem:[%s17446_s0 + %s15614_s10]]   ;;  %s15617_s22 = smov 5  }
   0x4   :  { %s15688_s17 = sld [smem:[%s17446_s0 + %s15615_s14]]   ;;  %s15618_s26 = smov 6  }
   0x5   :  { %s15693_s21 = sld [smem:[%s17446_s0 + %s15616_s18]]   ;;  %s15619_s30 = smov 7  }
   0x6   :  { %s15698_s25 = sld [smem:[%s17446_s0 + %s15617_s22]]   ;;  %s15620_s4 = smov 8  }
   0x7   :  { %17506 = sst [smem:[#allocation6_spill]] %s15673_s5  ;;  %s15621_s10 = smov 9  }
   0x8   :  { %17507 = sst [smem:[#allocation7_spill]] %s15678_s9  ;;  %s15622_s15 = smov 10  }
   0x9   :  { %17508 = sst [smem:[#allocation8_spill]] %s15683_s13  ;;  %s15623_s20 = smov 11  }
   0xa   :  { %17509 = sst [smem:[#allocation9_spill]] %s15688_s17  ;;  %s15625_s1 = smov 13  }
   0xb   :  { %17510 = sst [smem:[#allocation10_spill]] %s15693_s21  ;;  %s15626_s7 = smov 14  }
   0xc   :  { %17511 = sst [smem:[#allocation11_spill]] %s15698_s25  ;;  %s15628_s22 = smov 16  }
   0xd   :  { %s15703_s29 = sld [smem:[%s17446_s0 + %s15618_s26]]   ;;  %s15624_s26 = smov 12  }
   0xe   :  { %s15708_s3 = sld [smem:[%s17446_s0 + %s15619_s30]]   ;;  %s15629_s28 = smov 17  }
   0xf   :  { %s15713_s8 = sld [smem:[%s17446_s0 + %s15620_s4]]  }
  0x10   :  { %s15718_s14 = sld [smem:[%s17446_s0 + %s15621_s10]]  }
  0x11   :  { %s15723_s19 = sld [smem:[%s17446_s0 + %s15622_s15]]   ;;  %s15627_s15 = smov 15  }
  0x12   :  { %s15728_s24 = sld [smem:[%s17446_s0 + %s15623_s20]]  }
  0x13   :  { %17512 = sst [smem:[#allocation12_spill]] %s15703_s29 }
  0x14   :  { %17513 = sst [smem:[#allocation13_spill]] %s15708_s3 }
  0x15   :  { %17514 = sst [smem:[#allocation14_spill]] %s15713_s8 }
  0x16   :  { %17515 = sst [smem:[#allocation15_spill]] %s15718_s14 }
  0x17   :  { %17516 = sst [smem:[#allocation16_spill]] %s15723_s19 }
  0x18   :  { %17517 = sst [smem:[#allocation17_spill]] %s15728_s24 }
  0x19   :  { %s15733_s30 = sld [smem:[%s17446_s0 + %s15624_s26]]  }
  0x1a   :  { %s15738_s6 = sld [smem:[%s17446_s0 + %s15625_s1]]  }
  0x1b   :  { %s15743_s12 = sld [smem:[%s17446_s0 + %s15626_s7]]   ;;  %s15630_s7 = smov 18  }
  0x1c   :  { %s15748_s20 = sld [smem:[%s17446_s0 + %s15627_s15]]   ;;  %s15631_s15 = smov 19  }
  0x1d   :  { %s15753_s27 = sld [smem:[%s17446_s0 + %s15628_s22]]   ;;  %s15632_s22 = smov 20  }
  0x1e   :  { %s15758_s4 = sld [smem:[%s17446_s0 + %s15629_s28]]   ;;  %s15633_s28 = smov 21  }
  0x1f   :  { %17518 = sst [smem:[#allocation18_spill]] %s15733_s30 }
  0x20   :  { %17519 = sst [smem:[#allocation19_spill]] %s15738_s6 }
  0x21   :  { %17520 = sst [smem:[#allocation20_spill]] %s15743_s12 }
  0x22   :  { %17521 = sst [smem:[#allocation21_spill]] %s15748_s20 }
  0x23   :  { %17522 = sst [smem:[#allocation22_spill]] %s15753_s27 }
  0x24   :  { %17523 = sst [smem:[#allocation23_spill]] %s15758_s4 }
  0x25   :  { %s15763_s12 = sld [smem:[%s17446_s0 + %s15630_s7]]   ;;  %s15634_s7 = smov 22  }
  0x26   :  { %s15768_s20 = sld [smem:[%s17446_s0 + %s15631_s15]]   ;;  %s15635_s15 = smov 23  }
  0x27   :  { %s15773_s27 = sld [smem:[%s17446_s0 + %s15632_s22]]   ;;  %s15636_s22 = smov 24  }
  0x28   :  { %s15778_s4 = sld [smem:[%s17446_s0 + %s15633_s28]]   ;;  %s15637_s28 = smov 25  }
  0x2b   :  { %17524 = sst [smem:[#allocation24_spill]] %s15763_s12 }
  0x2c   :  { %17525 = sst [smem:[#allocation25_spill]] %s15768_s20 }
  0x2d   :  { %17526 = sst [smem:[#allocation26_spill]] %s15773_s27 }
  0x2e   :  { %17527 = sst [smem:[#allocation27_spill]] %s15778_s4 }
  0x2f   :  { %s15783_s12 = sld [smem:[%s17446_s0 + %s15634_s7]]   ;;  %s15638_s7 = smov 26  }
  0x30   :  { %s15788_s20 = sld [smem:[%s17446_s0 + %s15635_s15]]   ;;  %s15639_s15 = smov 27  }
  0x31   :  { %s15793_s27 = sld [smem:[%s17446_s0 + %s15636_s22]]   ;;  %s15640_s22 = smov 28  }
  0x32   :  { %s15798_s4 = sld [smem:[%s17446_s0 + %s15637_s28]]   ;;  %s15641_s28 = smov 29  }
  0x35   :  { %17528 = sst [smem:[#allocation28_spill]] %s15783_s12 }
  0x36   :  { %17529 = sst [smem:[#allocation29_spill]] %s15788_s20 }
  0x37   :  { %17530 = sst [smem:[#allocation30_spill]] %s15793_s27 }
  0x38   :  { %17531 = sst [smem:[#allocation31_spill]] %s15798_s4 }
  0x39   :  { %s15803_s12 = sld [smem:[%s17446_s0 + %s15638_s7]]   ;;  %s15642_s7 = smov 30  }
  0x3a   :  { %s15808_s20 = sld [smem:[%s17446_s0 + %s15639_s15]]   ;;  %s15643_s15 = smov 31  }
  0x3b   :  { %s15813_s27 = sld [smem:[%s17446_s0 + %s15640_s22]]   ;;  %s15644_s22 = smov 32  }
  0x3c   :  { %s15818_s4 = sld [smem:[%s17446_s0 + %s15641_s28]]   ;;  %s15645_s28 = smov 33  }
  0x3f   :  { %17532 = sst [smem:[#allocation32_spill]] %s15803_s12 }
  0x40   :  { %17533 = sst [smem:[#allocation33_spill]] %s15808_s20 }
  0x41   :  { %17534 = sst [smem:[#allocation34_spill]] %s15813_s27 }
  0x42   :  { %17535 = sst [smem:[#allocation35_spill]] %s15818_s4 }
  0x43   :  { %s15823_s12 = sld [smem:[%s17446_s0 + %s15642_s7]]   ;;  %s15646_s7 = smov 34  }
  0x44   :  { %s15828_s20 = sld [smem:[%s17446_s0 + %s15643_s15]]   ;;  %s15647_s15 = smov 35  }
  0x45   :  { %s15833_s27 = sld [smem:[%s17446_s0 + %s15644_s22]]   ;;  %s15648_s22 = smov 36  }
  0x46   :  { %s15838_s4 = sld [smem:[%s17446_s0 + %s15645_s28]]   ;;  %s15649_s28 = smov 37  }
  0x49   :  { %17536 = sst [smem:[#allocation36_spill]] %s15823_s12 }
  0x4a   :  { %17537 = sst [smem:[#allocation37_spill]] %s15828_s20 }
  0x4b   :  { %17538 = sst [smem:[#allocation38_spill]] %s15833_s27 }
  0x4c   :  { %17539 = sst [smem:[#allocation39_spill]] %s15838_s4 }
  0x4d   :  { %s15843_s12 = sld [smem:[%s17446_s0 + %s15646_s7]]   ;;  %s15650_s7 = smov 38  }
  0x4e   :  { %s15848_s20 = sld [smem:[%s17446_s0 + %s15647_s15]]   ;;  %s15651_s15 = smov 39  }
  0x4f   :  { %s15853_s27 = sld [smem:[%s17446_s0 + %s15648_s22]]   ;;  %s15652_s22 = smov 40  }
  0x50   :  { %s15858_s4 = sld [smem:[%s17446_s0 + %s15649_s28]]   ;;  %s15653_s28 = smov 41  }
  0x53   :  { %17540 = sst [smem:[#allocation40_spill]] %s15843_s12 }
  0x54   :  { %17541 = sst [smem:[#allocation41_spill]] %s15848_s20 }
  0x55   :  { %17542 = sst [smem:[#allocation42_spill]] %s15853_s27 }
  0x56   :  { %17543 = sst [smem:[#allocation43_spill]] %s15858_s4 }
  0x57   :  { %s15863_s12 = sld [smem:[%s17446_s0 + %s15650_s7]]  }
  0x58   :  { %s15868_s20 = sld [smem:[%s17446_s0 + %s15651_s15]]  }
  0x59   :  { %s15873_s27 = sld [smem:[%s17446_s0 + %s15652_s22]]  }
  0x5a   :  { %s15878_s4 = sld [smem:[%s17446_s0 + %s15653_s28]]  }
  0x5d   :  { %17544 = sst [smem:[#allocation44_spill]] %s15863_s12 }
  0x5f   :  { %17545 = sst [smem:[#allocation45_spill]] %s15873_s27 }
  0x60   :  { %17546 = sst [smem:[#allocation46_spill]] %s15878_s4 }
  0x61   :  { %88 = vsyncpa [#allocation4], 0 }
  0x62   :  { %90 = vsyncpa [#allocation4 + $0x1], 0  ;;  %s15880_s7 = smov 0   ;;  %s15882_s10 = smov 0  }
  0x63   :  { %s15884_s11 = smov 0   ;;  %s15886_s15 = smov 0  }
  0x64 LB: > { %s17547_s30 = sld [smem:[#allocation18_spill]]  ;;  %s17548_s29 = sld [smem:[#allocation12_spill]]  ;;  %s15611_s15 = sphi %s15886_s15, %s17613_s15   ;;  %s15607_s11 = sphi %s15884_s11, %s17615_s11   ;;  %s15603_s10 = sphi %s15882_s10, %s17617_s10   ;;  %s15599_s7 = sphi %s15880_s7, %s17616_s7  }
  0x65   : > { %s17549_s25 = sld [smem:[#allocation11_spill]]  ;;  %s17550_s24 = sld [smem:[#allocation17_spill]] }
  0x66   : > { %s17551_s21 = sld [smem:[#allocation10_spill]]  ;;  %s17552_s6 = sld [smem:[#allocation19_spill]] }
  0x67   : > { %s17553_s19 = sld [smem:[#allocation16_spill]]  ;;  %s17554_s17 = sld [smem:[#allocation9_spill]] }
  0x68   : > { %s17555_s14 = sld [smem:[#allocation15_spill]]  ;;  %s17556_s13 = sld [smem:[#allocation8_spill]] }
  0x69   : > { %s17557_s8 = sld [smem:[#allocation14_spill]]  ;;  %s17558_s3 = sld [smem:[#allocation13_spill]] }
  0x6a   : > { %17559 = sst [smem:[#allocation47_spill]] %s15599_s7  ;;  %s15901_s0 = sadd.s32 4294967295, %s15611_s15  }
  0x6b   : > { %17560 = sst [smem:[#allocation48_spill]] %s15607_s11  ;;  %s12277_s16 = sadd.s32 4294967294, %s15611_s15  }
  0x6c   : > { %17561 = sst [smem:[#allocation49_spill]] %s15901_s0  ;;  %s15905_s18 = sadd.s32 1, %s15611_s15  }
  0x6d   : > { %17562 = sst [smem:[#allocation50_spill]] %s15905_s18  ;;  %s974_s22 = sadd.s32 1, %s15607_s11 }
  0x6e   : > { %s971_s23 = ssub.s32 %s15611_s15, %s15905_s18  ;;  %p984_p0 = scmp.ne.s32.totalorder %s15607_s11, %s15603_s10 }
  0x6f   : > { %p972_p1 = scmp.eq.s32.totalorder %s971_s23, 0  ;;  %p985_p2 = scmp.eq.s32.totalorder %s15901_s0, 1 }
  0x70   : > { %p990_p3 = scmp.ne.s32.totalorder %s15603_s10, %s15599_s7  ;;  %p991_p4 = scmp.eq.s32.totalorder %s12277_s16, 1 }
  0x71   : > { %s15916_s26 = scalar_select %p972_p1, %s15607_s11, %s974_s22  }
  0x72   : > { %p15918_p5 = por %p985_p2, %p984_p0  ;;  %p15922_p6 = por %p991_p4, %p990_p3 }
  0x73   : > { %17563 = sst [smem:[#allocation51_spill]] %s15916_s26  ;;  %p12280_p7 = scmp.ge.s32.totalorder %s15611_s15, 1 }
  0x74   : > { %s17564_s28 = scalar_select %p15918_p5, 1, 0 }
  0x75   : > { %s17566_s1 = scalar_select %p15922_p6, 1, 0 }
  0x76   : > { %17565 = sst [smem:[#allocation52_spill]] %s17564_s28  ;;  %p1140_p8 = scmp.lt.s32.totalorder %s15611_s15, 3 }
  0x77   : > { %17567 = sst [smem:[#allocation53_spill]] %s17566_s1 }
  0x78   : > { %p1141_p9 = pnand %p12280_p7, %p1140_p8 }
  0x79   : > { %p1243_p10 = scmp.lt.s32.totalorder (!%p1141_p9), %s15901_s0, 1  ;;  %v1252_v0 = vld [vmem:[%s17556_s13] sm:$0xff] (!%p1141_p9)  ;;  %v1253_v1 = vld [vmem:[%s17556_s13 + $0x8] sm:$0xff] (!%p1141_p9)  ;;  %v1254_v2 = vld [vmem:[%s17556_s13 + $0x10] sm:$0xff] (!%p1141_p9)  ;;  %v15654_v3 = vmov (!%p1141_p9), 0   ;;  %s17568_s5 = sld [smem:[#allocation6_spill]] (!%p1141_p9)  ;;  %v1261_v15 = vlaneseq (!%p1141_p9) }
  0x7a   : > { %1144 = sbr.rel (%p1141_p9) target bundleno = 14329 (0x37f9), region = 184  ;;  %14934 = vset.pattern.permute.xlu0 (!%p1141_p9), %v15654_v3  ;;  %s17569_s9 = sld [smem:[#allocation7_spill]] (!%p1141_p9)  ;;  %v15655_v4 = vmov (!%p1141_p9), 0.0|0.0   ;;  %v14821_v5 = vpack.c.bf16 (!%p1141_p9), %v1253_v1, %v1252_v0  ;;  %v1255_v6 = vld [vmem:[%s17556_s13 + $0x18] sm:$0xff] (!%p1141_p9)  ;;  %v1256_v7 = vld [vmem:[%s17556_s13 + $0x20] sm:$0xff] (!%p1141_p9)  ;;  %v1257_v9 = vld [vmem:[%s17556_s13 + $0x28] sm:$0xff] (!%p1141_p9) }
  0x7b   : > { %14820 = vmatprep.subr.bf16.mxu0 (!%p1141_p9), %v15655_v4  ;;  %14832 = vmatprep.subr.bf16.mxu1 (!%p1141_p9), %v15655_v4  ;;  %v14824_v8 = vpack.c.bf16 (!%p1141_p9), %v1255_v6, %v1254_v2  ;;  %v1258_v11 = vld [vmem:[%s17556_s13 + $0x30] sm:$0xff] (!%p1141_p9)  ;;  %v14827_v12 = vpack.c.bf16 (!%p1141_p9), %v1257_v9, %v1256_v7  ;;  %v1259_v13 = vld [vmem:[%s17556_s13 + $0x38] sm:$0xff] (!%p1141_p9)  ;;  %vm15656_vm0 = vmmov (!%p1141_p9), 0   ;;  %v15657_v16 = vmov (!%p1141_p9), 0.0   ;;  %v14935_v19 = vld [vmem:[%s17554_s17] sm:$0xff] (!%p1141_p9)   ;;  %s17578_s13 = smov (!%p1141_p9), 96  }
  0x7c   : > { %14822 = vmatpush3.bf16.msra.mxu0 (!%p1141_p9), %v14821_v5  ;;  %14834 = vmatpush3.bf16.msra.mxu1 (!%p1141_p9), %v14821_v5  ;;  %v14830_v17 = vpack.c.bf16 (!%p1141_p9), %v1259_v13, %v1258_v11  ;;  %v15946_v18 = vand.u32 (!%p1141_p9), 127, %v1261_v15  ;;  %vm1269_vm1 = vcmask (!%p1141_p9), 523264   ;;  %v14936_v24 = vld [vmem:[%s17554_s17 + $0x8] sm:$0xff] (!%p1141_p9)   ;;  %vm1747_vm4 = vcmask (!%p1141_p9), 261120   ;;  %v12288_v30 = vld [vmem:[%s17551_s21] ss:$0 sm:$0xff] (!%p1141_p9) }
  0x7d   : > { %14823 = vmatprep.subr.bf16.mxu0 (!%p1141_p9), %v15655_v4  ;;  %14835 = vmatprep.subr.bf16.mxu1 (!%p1141_p9), %v15655_v4  ;;  %vm1795_vm5 = vcmask (!%p1141_p9), 130048   ;;  %vm1842_vm6 = vcmask (!%p1141_p9), 64512   ;;  %vm1860_vm7 = vcmask (!%p1141_p9), 1043456   ;;  %v14937_v11 = vld [vmem:[%s17549_s25] sm:$0xff] (!%p1141_p9)   ;;  %vm2019_vm8 = vcmask (!%p1141_p9), 261248   ;;  %s17591_s26 = sld [smem:[#allocation37_spill]] (!%p1141_p9) }
  0x7e   : > { %14534 = vmatprep.mubr.msk.f32.mxu0 (!%p1141_p9), %vm15656_vm0, %v15657_v16  ;;  %14553 = vmatprep.mubr.msk.f32.mxu1 (!%p1141_p9), %vm15656_vm0, %v15657_v16  ;;  %s17592_s11 = sld [smem:[#allocation35_spill]] (!%p1141_p9)  ;;  %s17594_s1 = sld [smem:[#allocation36_spill]] (!%p1141_p9) }
  0x7f   : > { %s17603_s7 = sld [smem:[#allocation42_spill]] (!%p1141_p9) }
  0x80   : > { %14825 = vmatpush3.bf16.msra.mxu0 (!%p1141_p9), %v14824_v8  ;;  %14837 = vmatpush3.bf16.msra.mxu1 (!%p1141_p9), %v14824_v8 }
  0x81   : > { %s1244_s2 = scalar_select %p1243_p10, %s15901_s0, 1  ;;  %14826 = vmatprep.subr.bf16.mxu0 %v15655_v4  ;;  %14838 = vmatprep.subr.bf16.mxu1 %v15655_v4 }
  0x83   : > { %s12282_s16 = sshll.u32 %s1244_s2, 3  ;;  %s17468_s2 = smov 112  }
  0x84   : > { %s1246_s22 = scalar_lea.vmem %s17568_s5, %s12282_s16  ;;  %s1250_s23 = scalar_lea.vmem %s17569_s9, %s12282_s16  ;;  %14828 = vmatpush3.bf16.msra.mxu0 %v14827_v12  ;;  %14840 = vmatpush3.bf16.msra.mxu1 %v14827_v12  ;;  %v14938_v12 = vld [vmem:[%s17549_s25 + $0x8] sm:$0xff]  }
  0x85   : > { %v1260_v10 = vld [vmem:[%s1246_s22] sm:$0xff]  ;;  %14829 = vmatprep.subr.bf16.mxu0 %v15655_v4  ;;  %14841 = vmatprep.subr.bf16.mxu1 %v15655_v4  ;;  %s17476_s16 = smov 96   ;;  %s17478_s22 = smov 80  }
  0x86   : > { %1264 = vperm.xlu0 %14934, %v1260_v10   ;;  %v1343_v14 = vld [vmem:[%s1250_s23] sm:$0xff]  ;;  %s17474_s23 = smov 64   ;;  %s17574_s5 = smov 16  }
  0x87   : > { %s17577_s9 = smov 80   ;;  %s17593_s18 = smov %s17592_s11 }
  0x88   : > { %14831 = vmatpush3.bf16.msra.mxu0 %v14830_v17  ;;  %14843 = vmatpush3.bf16.msra.mxu1 %v14830_v17  ;;  %s17604_s12 = smov %s17603_s7 }
  0x89   : > { %14556 = vmatprep.subr.bf16.mxu0 %v15657_v16  ;;  %14564 = vmatprep.subr.bf16.mxu1 %v15657_v16 }
  0x8a   : > { %1345 = vperm.xlu0 %14934, %v1343_v14  }
 0x105   : > { %v1265_v20 = vpop.permute.xlu0 %1264 }
 0x106   : > { %vm1266_vm2 = vcmp.eq.s32.totalorder %v1265_v20, %v15946_v18 }
 0x107   : > { %v12284_v21 = vsel %vm1266_vm2, 1.0, %v15657_v16 }
 0x108   : > { %14535 = vmatmul.mubr.msk.f32.vlgmr.msra.gmra.mrb[0].mxu0 %vm1269_vm1, %v12284_v21 }
 0x109   : > { %v1346_v22 = vpop.permute.xlu0 %1345  ;;  %14557 = vmatpush3.bf16.msra.mxu0 %v14935_v19  ;;  %14560 = vmatprep.mubr.msk.bf16.mxu0 %vm15656_vm0, %v15657_v16 }
 0x10a   : > { %vm1347_vm3 = vcmp.eq.s32.totalorder %v1346_v22, %v15946_v18  ;;  %14558 = vmatprep.subr.bf16.mxu0 %v15657_v16 }
 0x10b   : > { %v12286_v23 = vsel %vm1347_vm3, 1.0, %v15657_v16 }
 0x10c   : > { %14554 = vmatmul.mubr.msk.f32.vlgmr.msra.gmra.mrb[0].mxu1 %vm1269_vm1, %v12286_v23 }
 0x10d   : > { %14566 = vmatprep.mubr.msk.bf16.mxu1 %vm15656_vm0, %v15657_v16  ;;  %14559 = vmatpush3.bf16.msra.mxu0 %v14936_v24 }
 0x10e   : > { %14570 = vmatprep.subr.bf16.mxu0 %v15657_v16 }
 0x1db   : > { %v15964_v25 = vpop.f32.mrb[0].mxu0 }
 0x1dc   : > { %v1728_v26 = vpack.c.bf16 %v15964_v25, %v15964_v25  ;;  %v14536_v27 = vpop.f32.mrb[1].mxu0 }
 0x1de   : > { %14561 = vmatmul.mubr.msk.bf16.vlgmr.msra.gmra.mrb[4].mxu0 %vm1747_vm4, %v1728_v26 }
 0x1df   : > { %v15969_v28 = vpop.f32.mrb[0].mxu1  ;;  %14572 = vmatprep.mubr.msk.bf16.mxu0 %vm15656_vm0, %v15657_v16 }
 0x1e0   : > { %v14555_v29 = vpop.f32.mrb[1].mxu1 }
 0x1e1   : > { %v12296_v29 = vld [vmem:[%s17548_s29] ss:$0 sm:$0xff] }
 0x2b1   : > { %v1785_v31 = vpop.f32.mrb[4].mxu0 }
 0x2b2   : > { %v1786_v32 = vadd.f32 %v12288_v30, %v1785_v31  ;;  %v14562_v33 = vpop.f32.mrb[5].mxu0 }
 0x2b3   : > { %v1788_v34 = vpop.f32.mrb[6].mxu0 }
 0x2b4   : > { %v1791_v35 = vpack.c.bf16 %v1786_v32, %v1786_v32  ;;  %v14563_v36 = vpop.f32.mrb[7].mxu0 }
 0x2b6   : > { %1905 = vrot.lane.b32.xlu0 %v1791_v35, %s17468_s2  ;;  %1793 = vrot.lane.b32.xlu1 %v1791_v35, %s17476_s16  ;;  %s17470_s2 = smov 48  }
 0x2ba   : > { %1907 = vrot.lane.b32.xlu1 %v1791_v35, %s17478_s22 }
 0x328   : > { %v1794_v37 = vpop.permute.xlu1 %1793  ;;  %v1906_v41 = vpop.permute.xlu0 %1905 }
 0x329   : > { %v1800_v38 = vsel %vm1795_vm5, %v1794_v37, 0 }
 0x32a   : > { %14565 = vmatpush3.bf16.xpose.msra.mxu1 %v1800_v38 }
 0x32b   : > { %14576 = vmatprep.subr.bf16.mxu1 %v15657_v16 }
 0x32c   : > { %v1908_v39 = vpop.permute.xlu1 %1907 }
 0x32d   : > { %v1913_v40 = vsel %vm1795_vm5, %v1908_v39, 0 }
 0x331   : > { %14567 = vmatmul.mubr.msk.bf16.vlgmr.msra.gmra.mrb[4].mxu1 %vm1795_vm5, %v1791_v35 }
 0x332   : > { %14577 = vmatpush3.bf16.xpose.msra.mxu1 %v1913_v40  ;;  %14578 = vmatprep.mubr.msk.bf16.mxu1 %vm15656_vm0, %v15657_v16 }
 0x333   : > { %14588 = vmatprep.subr.bf16.mxu1 %v15657_v16 }
 0x339   : > { %14579 = vmatmul.mubr.msk.bf16.vlgmr.msra.gmra.mrb[8].mxu1 %vm1795_vm5, %v1906_v41 }
 0x33a   : > { %14592 = vmatprep.mubr.msk.bf16.mxu1 %vm15656_vm0, %v15657_v16  ;;  %14589 = vmatpush3.bf16.msra.mxu1 %v14937_v11  ;;  %v1461_v11 = vld [vmem:[%s17555_s14 + $0xd0] sm:$0xff] }
 0x33b   : > { %14590 = vmatprep.subr.bf16.mxu1 %v15657_v16 }
 0x33e   : > { %14591 = vmatpush3.bf16.msra.mxu1 %v14938_v12  ;;  %v1454_v12 = vld [vmem:[%s17555_s14 + $0x98] sm:$0xff] }
 0x404   : > { %v1836_v42 = vpop.f32.mrb[4].mxu1 }
 0x405   : > { %v14568_v43 = vpop.f32.mrb[5].mxu1  ;;  %v1843_v44 = vsel %vm1842_vm6, %v1836_v42, -inf }
 0x406   : > { %1844 = vmax.xlane.f32.xlu1 %v1843_v44  ;;  %v1839_v45 = vpop.f32.mrb[6].mxu1  ;;  %v1443_v43 = vld [vmem:[%s17555_s14 + $0x40] sm:$0xff]  ;;  %v1436_v44 = vld [vmem:[%s17555_s14 + $0x8] sm:$0xff] }
 0x407   : > { %v14569_v46 = vpop.f32.mrb[7].mxu1 }
 0x408   : > { %v1444_v46 = vld [vmem:[%s17555_s14 + $0x48] sm:$0xff] }
 0x40c   : > { %v1949_v47 = vpop.f32.mrb[8].mxu1 }
 0x40d   : > { %v14580_v48 = vpop.f32.mrb[9].mxu1  ;;  %v1955_v49 = vsel %vm1842_vm6, %v1949_v47, -inf }
 0x40e   : > { %1956 = vmax.xlane.f32.xlu0 %v1955_v49  ;;  %v1952_v50 = vpop.f32.mrb[10].mxu1  ;;  %v12305_v48 = vcombine.high %v1436_v44, %v1444_v46  ;;  %v1451_v49 = vld [vmem:[%s17555_s14 + $0x80] sm:$0xff] }
 0x40f   : > { %v14581_v51 = vpop.f32.mrb[11].mxu1  ;;  %v1459_v50 = vld [vmem:[%s17555_s14 + $0xc0] sm:$0xff] }
 0x410   : > { %2400 = vmatprep.subr.bf16.mxu1 %v12305_v48  ;;  %v1452_v51 = vld [vmem:[%s17555_s14 + $0x88] sm:$0xff]  ;;  %v1458_v48 = vld [vmem:[%s17555_s14 + $0xb8] sm:$0xff] }
 0x493   : > { %v1845_v52 = vpop.xlane.xlu1 %1844 }
 0x494   : > { %v1846_v53 = vsub.f32 %v1836_v42, %v1845_v52  ;;  %v1435_v42 = vld [vmem:[%s17555_s14] sm:$0xff]  ;;  %v12319_v52 = vcombine.high %v1451_v49, %v1459_v50 }
 0x495   : > { %v12303_v45 = vcombine.high %v1435_v42, %v1443_v43 }
 0x496   : > { %v1847_v54 = vmul.f32 1.442695, %v1846_v53  ;;  %v1460_v53 = vld [vmem:[%s17555_s14 + $0xc8] sm:$0xff] }
 0x498   : > { %15477 = vpow2.f32 %v1847_v54  ;;  %v12318_v54 = vcombine.low %v1451_v49, %v1459_v50  ;;  %v1466_v49 = vld [vmem:[%s17555_s14 + $0xf8] sm:$0xff] }
 0x49b   : > { %v1957_v55 = vpop.xlane.xlu0 %1956 }
 0x49c   : > { %v1958_v56 = vsub.f32 %v1949_v47, %v1957_v55  ;;  %v12304_v47 = vcombine.low %v1436_v44, %v1444_v46  ;;  %v12320_v55 = vcombine.low %v1452_v51, %v1460_v53 }
 0x49e   : > { %v1959_v57 = vmul.f32 1.442695, %v1958_v56  ;;  %v12321_v56 = vcombine.high %v1452_v51, %v1460_v53  ;;  %v12333_v53 = vcombine.high %v1458_v48, %v1466_v49 }
 0x4a0   : > { %15479 = vpow2.f32 %v1959_v57  ;;  %v1437_v57 = vld [vmem:[%s17555_s14 + $0x10] sm:$0xff] }
 0x4a2   : > { %v15478_v58 = vpop.eup %15477 }
 0x4a3   : > { %v1849_v59 = vsel %vm1842_vm6, %v15478_v58, 0.0 }
 0x4a4   : > { %1850 = vadd.xlane.f32.xlu0 %v1849_v59  ;;  %v1438_v59 = vld [vmem:[%s17555_s14 + $0x18] sm:$0xff] }
 0x4aa   : > { %v15480_v60 = vpop.eup %15479 }
 0x4ab   : > { %v1961_v61 = vsel %vm1842_vm6, %v15480_v60, 0.0 }
 0x4ac   : > { %1962 = vadd.xlane.f32.xlu1 %v1961_v61  ;;  %v1446_v61 = vld [vmem:[%s17555_s14 + $0x58] sm:$0xff] }
 0x4ba   : > { %1855 = vrot.lane.b32.xlu0 %v1791_v35, %s17474_s23  ;;  %s17571_s23 = smov 112  }
 0x4bd   : > { %1967 = vrot.lane.b32.xlu1 %v1791_v35, %s17470_s2  ;;  %s17472_s2 = smov 16  }
 0x531   : > { %v1851_v62 = vpop.xlane.xlu0 %1850 }
 0x532   : > { %15481 = vrcp.f32 %v1851_v62 }
 0x535   : > { %v1856_v63 = vpop.permute.xlu0 %1855 }
 0x536   : > { %v1862_v0 = vsel %vm1860_vm7, %v1856_v63, 0  ;;  %v12308_v63 = vcombine.low %v1438_v59, %v1446_v61 }
 0x537   : > { %14571 = vmatpush3.bf16.msra.mxu0 %v1862_v0  ;;  %v12309_v0 = vcombine.high %v1438_v59, %v1446_v61  ;;  %v14942_v59 = vld [vmem:[%s17550_s24 + $0x80] sm:$0xff]   ;;  %v14944_v61 = vld [vmem:[%s17550_s24 + $0xc8] sm:$0xff]  }
 0x538   : > { %14582 = vmatprep.subr.bf16.mxu0 %v15657_v16 }
 0x539   : > { %v1963_v1 = vpop.xlane.xlu1 %1962 }
 0x53a   : > { %15483 = vrcp.f32 %v1963_v1 }
 0x53c   : > { %v15482_v2 = vpop.eup %15481 }
 0x53d   : > { %v1853_v4 = vmul.f32 %v15482_v2, %v15478_v58  ;;  %v1968_v5 = vpop.permute.xlu1 %1967  ;;  %v1445_v58 = vld [vmem:[%s17555_s14 + $0x50] sm:$0xff] }
 0x53e   : > { %v1973_v7 = vsel %vm1860_vm7, %v1968_v5, 0  ;;  %v12306_v62 = vcombine.low %v1437_v57, %v1445_v58 }
 0x53f   : > { %v1854_v6 = vpack.c.bf16 %v1853_v4, %v1853_v4 }
 0x541   : > { %14573 = vmatmul.mubr.msk.bf16.vlgmr.msra.gmra.mrb[8].mxu0 %vm1842_vm6, %v1854_v6  ;;  %v12300_v6 = vld [vmem:[%s17558_s3] ss:$0 sm:$0xff] }
 0x542   : > { %14583 = vmatpush3.bf16.msra.mxu0 %v1973_v7  ;;  %14584 = vmatprep.mubr.msk.bf16.mxu0 %vm15656_vm0, %v15657_v16 }
 0x543   : > { %2359 = vmatprep.subr.bf16.mxu0 %v12303_v45 }
 0x544   : > { %v15484_v8 = vpop.eup %15483 }
 0x545   : > { %v1965_v9 = vmul.f32 %v15484_v8, %v15480_v60  ;;  %v12307_v60 = vcombine.high %v1437_v57, %v1445_v58  ;;  %v12301_v8 = vld [vmem:[%s17557_s8] ss:$0 sm:$0xff] }
 0x546   : > { %v14940_v57 = vld [vmem:[%s17550_s24 + $0xc0] sm:$0xff]  }
 0x547   : > { %v1966_v10 = vpack.c.bf16 %v1965_v9, %v1965_v9  ;;  %v14941_v58 = vld [vmem:[%s17550_s24] sm:$0xff]  }
 0x549   : > { %14585 = vmatmul.mubr.msk.bf16.vlgmr.msra.gmra.mrb[12].mxu0 %vm1842_vm6, %v1966_v10  ;;  %v1453_v10 = vld [vmem:[%s17555_s14 + $0x90] sm:$0xff] }
 0x54a   : > { %2391 = vmatprep.mubr.bf16.mxu0 %v15654_v3 }
 0x614   : > { %v1898_v13 = vpop.f32.mrb[8].mxu0 }
 0x615   : > { %1904 = vst.msk [vmem:[#allocation2] sm:$0xff] %vm1795_vm5, %v1898_v13  ;;  %v14574_v14 = vpop.f32.mrb[9].mxu0  ;;  %v1462_v13 = vld [vmem:[%s17555_s14 + $0xd8] sm:$0xff] }
 0x616   : > { %v1901_v17 = vpop.f32.mrb[10].mxu0 }
 0x617   : > { %v14575_v19 = vpop.f32.mrb[11].mxu0 }
 0x618   : > { %v12323_v19 = vcombine.high %v1453_v10, %v1461_v11 }
 0x61c   : > { %v2009_v20 = vpop.f32.mrb[12].mxu0 }
 0x61d   : > { %2016 = vrot.lane.b32.xlu1 %v2009_v20, %s17472_s2  ;;  %v14586_v21 = vpop.f32.mrb[13].mxu0  ;;  %v12325_v20 = vcombine.high %v1454_v12, %v1462_v13  ;;  %s17570_s2 = sld [smem:[#allocation20_spill]] }
 0x61e   : > { %v2012_v22 = vpop.f32.mrb[14].mxu0  ;;  %v1439_v21 = vld [vmem:[%s17555_s14 + $0x20] sm:$0xff] }
 0x61f   : > { %v14587_v23 = vpop.f32.mrb[15].mxu0  ;;  %v1447_v22 = vld [vmem:[%s17555_s14 + $0x60] sm:$0xff] }
 0x620   : > { %v1440_v23 = vld [vmem:[%s17555_s14 + $0x28] sm:$0xff] }
 0x68f   : > { %v2017_v24 = vpop.permute.xlu1 %2016 }
 0x690   : > { %2020 = vst.msk [vmem:[#allocation2] sm:$0xff] %vm2019_vm8, %v2017_v24  ;;  %v1448_v24 = vld [vmem:[%s17555_s14 + $0x68] sm:$0xff] }
 0x697   : > { %v2021_v26 = vld [vmem:[#allocation2] sm:$0xff] }
 0x698   : > { %v2022_v27 = vpack.c.bf16 %v2021_v26, %v2021_v26  ;;  %v12322_v26 = vcombine.low %v1453_v10, %v1461_v11  ;;  %v14956_v10 = vld [vmem:[%s17550_s24 + $0xe0] sm:$0xff]  }
 0x699   : > { %v14957_v11 = vld [vmem:[%s17550_s24 + $0x20] sm:$0xff]  }
 0x69a   : > { %14593 = vmatmul.mubr.msk.bf16.vlgmr.msra.gmra.mrb[12].mxu1 %vm1747_vm4, %v2022_v27  ;;  %v12324_v27 = vcombine.low %v1454_v12, %v1462_v13  ;;  %v14958_v12 = vld [vmem:[%s17550_s24 + $0xa0] sm:$0xff]   ;;  %v14959_v13 = vld [vmem:[%s17550_s24 + $0x68] sm:$0xff]  }
 0x69b   : > { %2432 = vmatprep.mubr.bf16.mxu1 %v15654_v3  ;;  %2401 = vmatpush1.bf16.msra.mxu1 %v12304_v47  ;;  %v1465_v47 = vld [vmem:[%s17555_s14 + $0xf0] sm:$0xff] }
 0x69c   : > { %2402 = vmatprep.subr.bf16.mxu1 %v12321_v56  ;;  %v14939_v56 = vld [vmem:[%s17550_s24 + $0x40] sm:$0xff]  }
 0x69f   : > { %2403 = vmatpush1.bf16.msra.mxu1 %v12320_v55  ;;  %v12332_v55 = vcombine.low %v1458_v48, %v1466_v49 }
 0x6a0   : > { %2482 = vmatprep.subr.bf16.mxu1 %v12309_v0  ;;  %v14947_v0 = vld [vmem:[%s17550_s24 + $0x50] sm:$0xff]  }
 0x76d   : > { %v2078_v30 = vpop.f32.mrb[12].mxu1 }
 0x76e   : > { %v2079_v31 = vadd.f32 %v12296_v29, %v2078_v30  ;;  %v14594_v32 = vpop.f32.mrb[13].mxu1  ;;  %v12311_v29 = vcombine.high %v1439_v21, %v1447_v22  ;;  %v12313_v30 = vcombine.high %v1440_v23, %v1448_v24 }
 0x76f   : > { %v2081_v33 = vpop.f32.mrb[14].mxu1  ;;  %v1463_v32 = vld [vmem:[%s17555_s14 + $0xe0] sm:$0xff] }
 0x770   : > { %v14595_v34 = vpop.f32.mrb[15].mxu1  ;;  %v2084_v35 = vadd.f32 %v2079_v31, %v15964_v25  ;;  %v12302_v25 = vcombine.low %v1435_v42, %v1443_v43  ;;  %v1455_v31 = vld [vmem:[%s17555_s14 + $0xa0] sm:$0xff]  ;;  %v1456_v33 = vld [vmem:[%s17555_s14 + $0xa8] sm:$0xff]  ;;  %v1450_v42 = vld [vmem:[%s17555_s14 + $0x78] sm:$0xff] }
 0x771   : > { %v1464_v34 = vld [vmem:[%s17555_s14 + $0xe8] sm:$0xff]  ;;  %v12326_v43 = vcombine.low %v1455_v31, %v1463_v32 }
 0x772   : > { %v2085_v36 = vsel %vm1747_vm4, %v2084_v35, 0.0  ;;  %2360 = vmatpush1.bf16.msra.mxu0 %v12302_v25  ;;  %v12328_v44 = vcombine.low %v1456_v33, %v1464_v34  ;;  %v1457_v25 = vld [vmem:[%s17555_s14 + $0xb0] sm:$0xff] }
 0x773   : > { %2086 = vadd.xlane.f32.xlu0 %v2085_v36  ;;  %2361 = vmatprep.subr.bf16.mxu0 %v12319_v52  ;;  %v12312_v36 = vcombine.low %v1440_v23, %v1448_v24  ;;  %v12331_v52 = vcombine.high %v1457_v25, %v1465_v47  ;;  %v14965_v23 = vld [vmem:[%s17550_s24 + $0x30] sm:$0xff]  }
 0x774   : > { %v14966_v24 = vld [vmem:[%s17550_s24 + $0xb0] sm:$0xff]  }
 0x776   : > { %2362 = vmatpush1.bf16.msra.mxu0 %v12318_v54  ;;  %v12330_v54 = vcombine.low %v1457_v25, %v1465_v47 }
 0x777   : > { %2441 = vmatprep.subr.bf16.mxu0 %v12307_v60  ;;  %v14943_v60 = vld [vmem:[%s17550_s24 + $0x48] sm:$0xff]  }
 0x800   : > { %v2087_v37 = vpop.xlane.xlu0 %2086 }
 0x801   : > { %v2089_v38 = vmul.f32 0.03125, %v2087_v37  ;;  %v12327_v37 = vcombine.high %v1455_v31, %v1463_v32  ;;  %v14971_v31 = vld [vmem:[%s17550_s24 + $0x140] sm:$0xff]  }
 0x802   : > { %v14972_v32 = vld [vmem:[%s17550_s24 + $0x1c0] sm:$0xff]  }
 0x803   : > { %v2090_v39 = vsub.f32 %v2084_v35, %v2089_v38  ;;  %v12310_v35 = vcombine.low %v1439_v21, %v1447_v22  ;;  %v12329_v38 = vcombine.high %v1456_v33, %v1464_v34  ;;  %v14963_v21 = vld [vmem:[%s17550_s24 + $0x70] sm:$0xff]   ;;  %v16110_v33 = vshrl.u32 %v1261_v15, 7 }
 0x804   : > { %v14964_v22 = vld [vmem:[%s17550_s24 + $0xf0] sm:$0xff]  }
 0x805   : > { %v2091_v40 = vmul.f32 %v2090_v39, %v2090_v39  ;;  %v16113_v34 = vsub.s32 0, %v16110_v33  ;;  %vm6680_vm9 = vcmp.gt.s32.totalorder %v15946_v18, %v16110_v33 }
 0x807   : > { %v2092_v41 = vsel %vm1747_vm4, %v2091_v40, 0.0  ;;  %v1449_v40 = vld [vmem:[%s17555_s14 + $0x70] sm:$0xff] }
 0x808   : > { %2093 = vadd.xlane.f32.xlu1 %v2092_v41  ;;  %v1442_v41 = vld [vmem:[%s17555_s14 + $0x38] sm:$0xff] }
 0x809   : > { %v12317_v46 = vcombine.high %v1442_v41, %v1450_v42  ;;  %v12316_v51 = vcombine.low %v1442_v41, %v1450_v42 }
 0x895   : > { %v2094_v1 = vpop.xlane.xlu1 %2093 }
 0x896   : > { %v2095_v2 = vmul.f32 0.03125, %v2094_v1  ;;  %v14948_v1 = vld [vmem:[%s17550_s24 + $0xd0] sm:$0xff]  }
 0x898   : > { %v2096_v4 = vadd.f32 1e-05, %v2095_v2  ;;  %v14949_v2 = vld [vmem:[%s17550_s24 + $0x10] sm:$0xff]  }
 0x89a   : > { %15485 = vrsqrt.f32 %v2096_v4  ;;  %v14950_v4 = vld [vmem:[%s17550_s24 + $0x90] sm:$0xff]  }
 0x8a4   : > { %v15486_v5 = vpop.eup %15485 }
 0x8a5   : > { %v2098_v7 = vmul.f32 %v15486_v5, %v2090_v39  ;;  %v1441_v39 = vld [vmem:[%s17555_s14 + $0x30] sm:$0xff]  ;;  %v14951_v5 = vld [vmem:[%s17550_s24 + $0x58] sm:$0xff]  }
 0x8a6   : > { %v12315_v45 = vcombine.high %v1441_v39, %v1449_v40  ;;  %v12314_v50 = vcombine.low %v1441_v39, %v1449_v40 }
 0x8a7   : > { %v2105_v9 = vmul.f32 %v12300_v6, %v2098_v7  ;;  %v14952_v6 = vld [vmem:[%s17550_s24 + $0xd8] sm:$0xff]  }
 0x8a8   : > { %v14953_v7 = vld [vmem:[%s17550_s24 + $0x18] sm:$0xff]  }
 0x8a9   : > { %v16031_v14 = vadd.f32 %v12301_v8, %v2105_v9  ;;  %v14954_v8 = vld [vmem:[%s17550_s24 + $0x98] sm:$0xff]   ;;  %v14955_v9 = vld [vmem:[%s17550_s24 + $0x60] sm:$0xff]  }
 0x8ab   : > { %v16035_v17 = vpack.c.bf16 %v16031_v14, %v16031_v14 }
 0x8ad   : > { %12334 = vmatmul.mubr.msk.bf16.vlgmr.msra.gmra.mrb[16].mxu0 %vm1747_vm4, %v16035_v17  ;;  %12335 = vmatmul.mubr.msk.bf16.vlgmr.msra.gmra.mrb[16].mxu1 %vm1747_vm4, %v16035_v17 }
 0x8ae   : > { %2442 = vmatpush1.bf16.msra.mxu0 %v12306_v62  ;;  %2483 = vmatpush1.bf16.msra.mxu1 %v12308_v63  ;;  %v14945_v62 = vld [vmem:[%s17550_s24 + $0x8] sm:$0xff]  }
 0x8af   : > { %2443 = vmatprep.subr.bf16.mxu0 %v12323_v19  ;;  %2484 = vmatprep.subr.bf16.mxu1 %v12325_v20  ;;  %v14946_v63 = vld [vmem:[%s17550_s24 + $0x88] sm:$0xff]  }
 0x8b0   : > { %2473 = vmatprep.mubr.bf16.mxu0 %v15654_v3  ;;  %2514 = vmatprep.mubr.bf16.mxu1 %v15654_v3  ;;  %v14961_v19 = vld [vmem:[%s17550_s24 + $0x28] sm:$0xff]  }
 0x8b1   : > { %v14962_v20 = vld [vmem:[%s17550_s24 + $0xa8] sm:$0xff]  }
 0x8b2   : > { %2444 = vmatpush1.bf16.msra.mxu0 %v12322_v26  ;;  %2485 = vmatpush1.bf16.msra.mxu1 %v12324_v27  ;;  %v14967_v26 = vld [vmem:[%s17550_s24 + $0x78] sm:$0xff]  }
 0x8b3   : > { %2523 = vmatprep.subr.bf16.mxu0 %v12311_v29  ;;  %2564 = vmatprep.subr.bf16.mxu1 %v12313_v30  ;;  %v14968_v27 = vld [vmem:[%s17550_s24 + $0xf8] sm:$0xff]  }
 0x8b4   : > { %v14969_v29 = vld [vmem:[%s17550_s24 + $0x38] sm:$0xff]  }
 0x8b5   : > { %12336 = vmatmul.mubr.msk.bf16.vlgmr.msra.gmra.mrb[20].mxu0 %vm1747_vm4, %v16035_v17  ;;  %12337 = vmatmul.mubr.msk.bf16.vlgmr.msra.gmra.mrb[20].mxu1 %vm1747_vm4, %v16035_v17  ;;  %v14970_v30 = vld [vmem:[%s17550_s24 + $0xb8] sm:$0xff]  }
 0x8b6   : > { %2524 = vmatpush1.bf16.msra.mxu0 %v12310_v35  ;;  %2565 = vmatpush1.bf16.msra.mxu1 %v12312_v36  ;;  %v16116_v35 = vsub.s32 2, %v16110_v33  ;;  %v16119_v36 = vld [vmem:[%s17553_s19] sm:$0xff] }
 0x8b7   : > { %2525 = vmatprep.subr.bf16.mxu0 %v12327_v37  ;;  %2566 = vmatprep.subr.bf16.mxu1 %v12329_v38  ;;  %v16122_v37 = vsub.s32 1, %v16110_v33  ;;  %v16125_v38 = vsub.s32 3, %v16110_v33  ;;  %v2119_v39 = vrot.slane %v16119_v36, %v16113_v34 }
 0x8b8   : > { %2555 = vmatprep.mubr.bf16.mxu0 %v15654_v3  ;;  %2596 = vmatprep.mubr.bf16.mxu1 %v15654_v3  ;;  %v2127_v15 = vrot.slane %v16119_v36, %v16116_v35 }
 0x8b9   : > { %v2123_v40 = vrot.slane %v16119_v36, %v16122_v37  ;;  %v2131_v41 = vrot.slane %v16119_v36, %v16125_v38 }
 0x8ba   : > { %2526 = vmatpush1.bf16.msra.mxu0 %v12326_v43  ;;  %2567 = vmatpush1.bf16.msra.mxu1 %v12328_v44 }
 0x8bb   : > { %2605 = vmatprep.subr.bf16.mxu0 %v12315_v45  ;;  %2646 = vmatprep.subr.bf16.mxu1 %v12317_v46 }
 0x8bd   : > { %12338 = vmatmul.mubr.msk.bf16.vlgmr.msra.gmra.mrb[24].mxu0 %vm1747_vm4, %v16035_v17  ;;  %12339 = vmatmul.mubr.msk.bf16.vlgmr.msra.gmra.mrb[24].mxu1 %vm1747_vm4, %v16035_v17 }
 0x8be   : > { %2606 = vmatpush1.bf16.msra.mxu0 %v12314_v50  ;;  %2647 = vmatpush1.bf16.msra.mxu1 %v12316_v51  ;;  %v16136_v51 = vsub.s32 5, %v16110_v33 }
 0x8bf   : > { %2607 = vmatprep.subr.bf16.mxu0 %v12331_v52  ;;  %2648 = vmatprep.subr.bf16.mxu1 %v12333_v53  ;;  %v16139_v52 = vsub.s32 7, %v16110_v33 }
 0x8c0   : > { %2637 = vmatprep.mubr.bf16.mxu0 %v15654_v3  ;;  %2678 = vmatprep.mubr.bf16.mxu1 %v15654_v3 }
 0x8c2   : > { %2608 = vmatpush1.bf16.msra.mxu0 %v12330_v54  ;;  %2649 = vmatpush1.bf16.msra.mxu1 %v12332_v55 }
 0x8c3   : > { %13735 = vmatprep.subr.bf16.mxu0 %v14939_v56  ;;  %13757 = vmatprep.subr.bf16.mxu1 %v14940_v57 }
 0x8c5   : > { %12340 = vmatmul.mubr.msk.bf16.vlgmr.msra.gmra.mrb[28].mxu0 %vm1747_vm4, %v16035_v17  ;;  %12341 = vmatmul.mubr.msk.bf16.vlgmr.msra.gmra.mrb[28].mxu1 %vm1747_vm4, %v16035_v17  ;;  %v14960_v17 = vld [vmem:[%s17550_s24 + $0xe8] sm:$0xff]  }
 0x8c6   : > { %13736 = vmatpush3.bf16.msra.mxu0 %v14941_v58  ;;  %13758 = vmatpush3.bf16.msra.mxu1 %v14942_v59 }
 0x8c7   : > { %13737 = vmatprep.subr.bf16.mxu0 %v14943_v60  ;;  %13759 = vmatprep.subr.bf16.mxu1 %v14944_v61  ;;  %v2139_v61 = vrot.slane %v16119_v36, %v16136_v51 }
 0x8ca   : > { %13738 = vmatpush3.bf16.msra.mxu0 %v14945_v62  ;;  %13760 = vmatpush3.bf16.msra.mxu1 %v14946_v63  ;;  %v2147_v62 = vrot.slane %v16119_v36, %v16139_v52  ;;  %v14973_v63 = vld [vmem:[%s17550_s24 + $0x100] sm:$0xff]  }
 0x8cb   : > { %13739 = vmatprep.subr.bf16.mxu0 %v14947_v0  ;;  %13761 = vmatprep.subr.bf16.mxu1 %v14948_v1  ;;  %v14974_v0 = vld [vmem:[%s17550_s24 + $0x180] sm:$0xff]  }
 0x8ce   : > { %13740 = vmatpush3.bf16.msra.mxu0 %v14949_v2  ;;  %13762 = vmatpush3.bf16.msra.mxu1 %v14950_v4  ;;  %v14975_v4 = vld [vmem:[%s17550_s24 + $0x148] sm:$0xff]  }
 0x8cf   : > { %13741 = vmatprep.subr.bf16.mxu0 %v14951_v5  ;;  %13763 = vmatprep.subr.bf16.mxu1 %v14952_v6  ;;  %v14976_v5 = vld [vmem:[%s17550_s24 + $0x1c8] sm:$0xff]  }
 0x8d2   : > { %13742 = vmatpush3.bf16.msra.mxu0 %v14953_v7  ;;  %13764 = vmatpush3.bf16.msra.mxu1 %v14954_v8 }
 0x8d3   : > { %13743 = vmatprep.subr.bf16.mxu0 %v14955_v9  ;;  %13765 = vmatprep.subr.bf16.mxu1 %v14956_v10 }
 0x8d6   : > { %13744 = vmatpush3.bf16.msra.mxu0 %v14957_v11  ;;  %13766 = vmatpush3.bf16.msra.mxu1 %v14958_v12 }
 0x8d7   : > { %13745 = vmatprep.subr.bf16.mxu0 %v14959_v13  ;;  %13767 = vmatprep.subr.bf16.mxu1 %v14960_v17  ;;  %v14977_v17 = vld [vmem:[%s17550_s24 + $0x108] sm:$0xff]  }
 0x8da   : > { %13746 = vmatpush3.bf16.msra.mxu0 %v14961_v19  ;;  %13768 = vmatpush3.bf16.msra.mxu1 %v14962_v20  ;;  %v14978_v19 = vld [vmem:[%s17550_s24 + $0x188] sm:$0xff]  }
 0x8db   : > { %13747 = vmatprep.subr.bf16.mxu0 %v14963_v21  ;;  %13769 = vmatprep.subr.bf16.mxu1 %v14964_v22  ;;  %v14979_v22 = vld [vmem:[%s17550_s24 + $0x150] sm:$0xff]  }
 0x8de   : > { %13748 = vmatpush3.bf16.msra.mxu0 %v14965_v23  ;;  %13770 = vmatpush3.bf16.msra.mxu1 %v14966_v24  ;;  %v14980_v23 = vld [vmem:[%s17550_s24 + $0x1d0] sm:$0xff]  }
 0x8df   : > { %13749 = vmatprep.subr.bf16.mxu0 %v14967_v26  ;;  %13771 = vmatprep.subr.bf16.mxu1 %v14968_v27 }
 0x8e2   : > { %13750 = vmatpush3.bf16.msra.mxu0 %v14969_v29  ;;  %13772 = vmatpush3.bf16.msra.mxu1 %v14970_v30  ;;  %v14981_v30 = vld [vmem:[%s17550_s24 + $0x110] sm:$0xff]  }
 0x8e3   : > { %13779 = vmatprep.subr.bf16.mxu0 %v14971_v31  ;;  %13801 = vmatprep.subr.bf16.mxu1 %v14972_v32  ;;  %v14982_v31 = vld [vmem:[%s17550_s24 + $0x190] sm:$0xff]   ;;  %v14983_v32 = vld [vmem:[%s17550_s24 + $0x158] sm:$0xff]  }
 0x980   : > { %v2393_v42 = vpop.f32.mrb[16].mxu0  ;;  %v2434_v43 = vpop.f32.mrb[16].mxu1 }
 0x981   : > { %v2394_v44 = vadd.f32 %v2393_v42, %v2119_v39  ;;  %v2435_v45 = vadd.f32 %v2434_v43, %v2127_v15  ;;  %v2395_v46 = vpop.f32.mrb[17].mxu0  ;;  %v2436_v25 = vpop.f32.mrb[17].mxu1  ;;  %v14984_v39 = vld [vmem:[%s17550_s24 + $0x1d8] sm:$0xff]  }
 0x982   : > { %v2396_v47 = vadd.f32 %v2395_v46, %v2123_v40  ;;  %v2437_v48 = vadd.f32 %v2436_v25, %v2131_v41  ;;  %v2397_v49 = vpop.f32.mrb[18].mxu0  ;;  %v2438_v50 = vpop.f32.mrb[18].mxu1  ;;  %v14986_v46 = vld [vmem:[%s17550_s24 + $0x198] sm:$0xff]   ;;  %v16168_v25 = vsub.s32 6, %v16110_v33 }
 0x983   : > { %v2687_v53 = vmax.f32 %v2394_v44, 0.0  ;;  %v2689_v54 = vmax.f32 %v2435_v45, 0.0  ;;  %v2398_v55 = vpop.f32.mrb[19].mxu0  ;;  %v2439_v56 = vpop.f32.mrb[19].mxu1  ;;  %v14985_v45 = vld [vmem:[%s17550_s24 + $0x118] sm:$0xff]   ;;  %v14987_v49 = vld [vmem:[%s17550_s24 + $0x160] sm:$0xff]  }
 0x984   : > { %v2688_v57 = vmax.f32 %v2396_v47, 0.0  ;;  %v2690_v58 = vmax.f32 %v2437_v48, 0.0  ;;  %v14988_v50 = vld [vmem:[%s17550_s24 + $0x1e0] sm:$0xff]  }
 0x985   : > { %v2703_v1 = vpack.c.bf16 %v2687_v53, %v2687_v53  ;;  %v2705_v2 = vpack.c.bf16 %v2689_v54, %v2689_v54  ;;  %v16173_v53 = vld [vmem:[%s17553_s19 + $0x8] sm:$0xff]  ;;  %v14989_v55 = vld [vmem:[%s17550_s24 + $0x120] sm:$0xff]  }
 0x986   : > { %v2704_v59 = vpack.c.bf16 %v2688_v57, %v2688_v57  ;;  %v2706_v60 = vpack.c.bf16 %v2690_v58, %v2690_v58  ;;  %v2175_v54 = vrot.slane %v16173_v53, %v16168_v25  ;;  %v14990_v56 = vld [vmem:[%s17550_s24 + $0x1a0] sm:$0xff]   ;;  %v16180_v57 = vsub.s32 4, %v16110_v33  ;;  %v14991_v58 = vld [vmem:[%s17550_s24 + $0x168] sm:$0xff]  }
 0x988   : > { %v16149_v6 = vpop.f32.mrb[20].mxu0  ;;  %v16151_v7 = vpop.f32.mrb[20].mxu1  ;;  %3525 = vmatprep.mubr.bf16.mxu0 %v2704_v59  ;;  %3565 = vmatprep.mubr.bf16.mxu1 %v2706_v60  ;;  %v14992_v59 = vld [vmem:[%s17550_s24 + $0x1e8] sm:$0xff]  }
 0x989   : > { %v2477_v8 = vpop.f32.mrb[21].mxu0  ;;  %v2518_v9 = vpop.f32.mrb[21].mxu1  ;;  %3526 = vmatmul.mubr.bf16.vlgmr.msra.gmra.mrb[32].mxu0 %v2703_v1  ;;  %3566 = vmatmul.mubr.bf16.vlgmr.msra.gmra.mrb[32].mxu1 %v2705_v2 }
 0x98a   : > { %v2478_v10 = vadd.f32 %v2477_v8, %v2139_v61  ;;  %v2519_v11 = vadd.f32 %v2518_v9, %v2147_v62  ;;  %13780 = vmatpush3.bf16.msra.mxu0 %v14973_v63  ;;  %13802 = vmatpush3.bf16.msra.mxu1 %v14974_v0  ;;  %v2479_v12 = vpop.f32.mrb[22].mxu0  ;;  %v2520_v13 = vpop.f32.mrb[22].mxu1  ;;  %v2135_v8 = vrot.slane %v16119_v36, %v16180_v57 }
 0x98b   : > { %v2480_v20 = vpop.f32.mrb[23].mxu0  ;;  %v2521_v21 = vpop.f32.mrb[23].mxu1  ;;  %13781 = vmatprep.subr.bf16.mxu0 %v14975_v4  ;;  %13803 = vmatprep.subr.bf16.mxu1 %v14976_v5  ;;  %v14993_v4 = vld [vmem:[%s17550_s24 + $0x128] sm:$0xff]   ;;  %v2143_v9 = vrot.slane %v16119_v36, %v16168_v25  ;;  %v14995_v12 = vld [vmem:[%s17550_s24 + $0x170] sm:$0xff]  }
 0x98c   : > { %v2692_v24 = vmax.f32 %v2478_v10, 0.0  ;;  %v2694_v26 = vmax.f32 %v2519_v11, 0.0  ;;  %v14994_v5 = vld [vmem:[%s17550_s24 + $0x1a8] sm:$0xff]   ;;  %v14996_v13 = vld [vmem:[%s17550_s24 + $0x1f0] sm:$0xff]   ;;  %v2476_v21 = vadd.f32 %v16149_v6, %v2135_v8  ;;  %v15003_v6 = vld [vmem:[%s17550_s24 + $0x240] sm:$0xff]  }
 0x98d   : > { %v14997_v20 = vld [vmem:[%s17550_s24 + $0x130] sm:$0xff]   ;;  %v15020_v8 = vld [vmem:[%s17550_s24 + $0x2e0] sm:$0xff]  }
 0x98e   : > { %v2708_v27 = vpack.c.bf16 %v2692_v24, %v2692_v24  ;;  %v2710_v29 = vpack.c.bf16 %v2694_v26, %v2694_v26  ;;  %13782 = vmatpush3.bf16.msra.mxu0 %v14977_v17  ;;  %13804 = vmatpush3.bf16.msra.mxu1 %v14978_v19  ;;  %v2155_v17 = vrot.slane %v16173_v53, %v16122_v37  ;;  %v14998_v36 = vld [vmem:[%s17550_s24 + $0x1b0] sm:$0xff]   ;;  %v15000_v24 = vld [vmem:[%s17550_s24 + $0x1f8] sm:$0xff]  }
 0x98f   : > { %13783 = vmatprep.subr.bf16.mxu0 %v14979_v22  ;;  %13805 = vmatprep.subr.bf16.mxu1 %v14980_v23  ;;  %v2163_v19 = vrot.slane %v16173_v53, %v16125_v38  ;;  %v2517_v22 = vadd.f32 %v16151_v7, %v2143_v9  ;;  %v14999_v23 = vld [vmem:[%s17550_s24 + $0x178] sm:$0xff]   ;;  %v15004_v7 = vld [vmem:[%s17550_s24 + $0x2c0] sm:$0xff]  }
 0x990   : > { %v16161_v15 = vpop.f32.mrb[24].mxu0  ;;  %v16163_v40 = vpop.f32.mrb[24].mxu1  ;;  %3605 = vmatprep.mubr.bf16.mxu0 %v2708_v27  ;;  %3645 = vmatprep.mubr.bf16.mxu1 %v2710_v29  ;;  %v15001_v29 = vld [vmem:[%s17550_s24 + $0x138] sm:$0xff]   ;;  %v15021_v9 = vld [vmem:[%s17550_s24 + $0x220] sm:$0xff]  }
 0x991   : > { %v2559_v41 = vpop.f32.mrb[25].mxu0  ;;  %v2600_v42 = vpop.f32.mrb[25].mxu1 }
 0x992   : > { %13784 = vmatpush3.bf16.msra.mxu0 %v14981_v30  ;;  %13806 = vmatpush3.bf16.msra.mxu1 %v14982_v31  ;;  %v2561_v43 = vpop.f32.mrb[26].mxu0  ;;  %v2602_v44 = vpop.f32.mrb[26].mxu1  ;;  %v2560_v26 = vadd.f32 %v2559_v41, %v2155_v17  ;;  %v2601_v27 = vadd.f32 %v2600_v42, %v2163_v19  ;;  %v15002_v30 = vld [vmem:[%s17550_s24 + $0x1b8] sm:$0xff]   ;;  %v2691_v31 = vmax.f32 %v2476_v21, 0.0  ;;  %v15005_v41 = vld [vmem:[%s17550_s24 + $0x200] sm:$0xff]   ;;  %v2151_v17 = vrot.slane %v16173_v53, %v16113_v34  ;;  %v15026_v19 = vld [vmem:[%s17550_s24 + $0x2a8] sm:$0xff]  }
 0x993   : > { %v2562_v47 = vpop.f32.mrb[27].mxu0  ;;  %v2603_v48 = vpop.f32.mrb[27].mxu1  ;;  %13785 = vmatprep.subr.bf16.mxu0 %v14983_v32  ;;  %13807 = vmatprep.subr.bf16.mxu1 %v14984_v39  ;;  %v2693_v32 = vmax.f32 %v2517_v22, 0.0  ;;  %v15028_v21 = vld [vmem:[%s17550_s24 + $0x2f0] sm:$0xff]   ;;  %v2171_v22 = vrot.slane %v16173_v53, %v16136_v51 }
 0x994   : > { %v2696_v39 = vmax.f32 %v2560_v26, 0.0  ;;  %v2698_v43 = vmax.f32 %v2601_v27, 0.0  ;;  %v2707_v42 = vpack.c.bf16 %v2691_v31, %v2691_v31  ;;  %v15007_v47 = vld [vmem:[%s17550_s24 + $0x248] sm:$0xff]   ;;  %v2558_v26 = vadd.f32 %v16161_v15, %v2151_v17  ;;  %v15030_v27 = vld [vmem:[%s17550_s24 + $0x2b0] sm:$0xff]   ;;  %v15032_v31 = vld [vmem:[%s17550_s24 + $0x2f8] sm:$0xff]  }
 0x995   : > { %v2709_v44 = vpack.c.bf16 %v2693_v32, %v2693_v32  ;;  %v15008_v48 = vld [vmem:[%s17550_s24 + $0x2c8] sm:$0xff]   ;;  %v15034_v15 = vld [vmem:[%s17550_s24 + $0x2b8] sm:$0xff]  }
 0x996   : > { %13786 = vmatpush3.bf16.msra.mxu0 %v14985_v45  ;;  %13808 = vmatpush3.bf16.msra.mxu1 %v14986_v46  ;;  %v15006_v45 = vld [vmem:[%s17550_s24 + $0x280] sm:$0xff]   ;;  %v2712_v46 = vpack.c.bf16 %v2696_v39, %v2696_v39  ;;  %v2695_v39 = vmax.f32 %v2558_v26, 0.0  ;;  %v15057_v17 = vld [vmem:[%s17550_s24 + $0x328] sm:$0xff]   ;;  %v15063_v26 = vld [vmem:[%s17550_s24 + $0x378] sm:$0xff]  }
 0x997   : > { %13787 = vmatprep.subr.bf16.mxu0 %v14987_v49  ;;  %13809 = vmatprep.subr.bf16.mxu1 %v14988_v50  ;;  %v2714_v49 = vpack.c.bf16 %v2698_v43, %v2698_v43  ;;  %v15009_v50 = vld [vmem:[%s17550_s24 + $0x208] sm:$0xff]   ;;  %v15035_v43 = vld [vmem:[%s17550_s24 + $0x340] sm:$0xff]  }
 0x998   : > { %v16184_v60 = vpop.f32.mrb[28].mxu0  ;;  %v2680_v61 = vpop.f32.mrb[28].mxu1 }
 0x999   : > { %v16186_v62 = vadd.f32 %v2680_v61, %v2175_v54  ;;  %v16188_v63 = vpop.f32.mrb[29].mxu0  ;;  %v16190_v0 = vpop.f32.mrb[29].mxu1  ;;  %v15010_v54 = vld [vmem:[%s17550_s24 + $0x288] sm:$0xff]   ;;  %v15015_v61 = vld [vmem:[%s17550_s24 + $0x258] sm:$0xff]  }
 0x99a   : > { %13788 = vmatpush3.bf16.msra.mxu0 %v14989_v55  ;;  %13810 = vmatpush3.bf16.msra.mxu1 %v14990_v56  ;;  %v2643_v1 = vpop.f32.mrb[30].mxu0  ;;  %v2684_v2 = vpop.f32.mrb[30].mxu1  ;;  %v15011_v55 = vld [vmem:[%s17550_s24 + $0x250] sm:$0xff]   ;;  %v2642_v32 = vadd.f32 %v16188_v63, %v2171_v22  ;;  %v15037_v63 = vld [vmem:[%s17550_s24 + $0x300] sm:$0xff]  }
 0x99b   : > { %v2644_v10 = vpop.f32.mrb[31].mxu0  ;;  %v2685_v11 = vpop.f32.mrb[31].mxu1  ;;  %13789 = vmatprep.subr.bf16.mxu0 %v14991_v58  ;;  %13811 = vmatprep.subr.bf16.mxu1 %v14992_v59  ;;  %v15012_v56 = vld [vmem:[%s17550_s24 + $0x2d0] sm:$0xff]   ;;  %v15016_v1 = vld [vmem:[%s17550_s24 + $0x2d8] sm:$0xff]  }
 0x99c   : > { %v15013_v58 = vld [vmem:[%s17550_s24 + $0x210] sm:$0xff]   ;;  %v15017_v2 = vld [vmem:[%s17550_s24 + $0x218] sm:$0xff]   ;;  %v15022_v10 = vld [vmem:[%s17550_s24 + $0x2a0] sm:$0xff]  }
 0x99d   : > { %v15014_v59 = vld [vmem:[%s17550_s24 + $0x290] sm:$0xff]   ;;  %v15023_v11 = vld [vmem:[%s17550_s24 + $0x268] sm:$0xff]  }
 0x99e   : > { %13790 = vmatpush3.bf16.msra.mxu0 %v14993_v4  ;;  %13812 = vmatpush3.bf16.msra.mxu1 %v14994_v5  ;;  %v15018_v4 = vld [vmem:[%s17550_s24 + $0x298] sm:$0xff]   ;;  %v15019_v5 = vld [vmem:[%s17550_s24 + $0x260] sm:$0xff]   ;;  %v15061_v22 = vld [vmem:[%s17550_s24 + $0x330] sm:$0xff]  }
 0x99f   : > { %13791 = vmatprep.subr.bf16.mxu0 %v14995_v12  ;;  %13813 = vmatprep.subr.bf16.mxu1 %v14996_v13  ;;  %v15024_v12 = vld [vmem:[%s17550_s24 + $0x2e8] sm:$0xff]  }
 0x9a0   : > { %v15025_v13 = vld [vmem:[%s17550_s24 + $0x228] sm:$0xff]  }
 0x9a2   : > { %13792 = vmatpush3.bf16.msra.mxu0 %v14997_v20  ;;  %13814 = vmatpush3.bf16.msra.mxu1 %v14998_v36  ;;  %v15027_v20 = vld [vmem:[%s17550_s24 + $0x270] sm:$0xff]   ;;  %v2159_v36 = vrot.slane %v16173_v53, %v16116_v35 }
 0x9a3   : > { %13793 = vmatprep.subr.bf16.mxu0 %v14999_v23  ;;  %13815 = vmatprep.subr.bf16.mxu1 %v15000_v24  ;;  %v2179_v23 = vrot.slane %v16173_v53, %v16139_v52  ;;  %v15029_v24 = vld [vmem:[%s17550_s24 + $0x230] sm:$0xff]  }
 0x9a6   : > { %13794 = vmatpush3.bf16.msra.mxu0 %v15001_v29  ;;  %13816 = vmatpush3.bf16.msra.mxu1 %v15002_v30  ;;  %v15031_v29 = vld [vmem:[%s17550_s24 + $0x278] sm:$0xff]   ;;  %v2599_v30 = vadd.f32 %v16163_v40, %v2159_v36  ;;  %v15036_v40 = vld [vmem:[%s17550_s24 + $0x3c0] sm:$0xff]   ;;  %v15059_v36 = vld [vmem:[%s17550_s24 + $0x370] sm:$0xff]  }
 0x9a7   : > { %13823 = vmatprep.subr.bf16.mxu0 %v15003_v6  ;;  %13845 = vmatprep.subr.bf16.mxu1 %v15004_v7  ;;  %v2683_v6 = vadd.f32 %v16190_v0, %v2179_v23  ;;  %v15033_v7 = vld [vmem:[%s17550_s24 + $0x238] sm:$0xff]   ;;  %v15038_v0 = vld [vmem:[%s17550_s24 + $0x380] sm:$0xff]  }
 0x9a9   : > { %3606 = vmatmul.mubr.bf16.vlgmr.msra.gmra.mrb[36].mxu0 %v2707_v42  ;;  %3646 = vmatmul.mubr.bf16.vlgmr.msra.gmra.mrb[36].mxu1 %v2709_v44  ;;  %v2700_v42 = vmax.f32 %v2642_v32, 0.0  ;;  %v2702_v44 = vmax.f32 %v2683_v6, 0.0 }
 0x9aa   : > { %13824 = vmatpush3.bf16.msra.mxu0 %v15005_v41  ;;  %3685 = vmatprep.mubr.bf16.mxu0 %v2712_v46  ;;  %v2697_v41 = vmax.f32 %v2599_v30, 0.0  ;;  %v15066_v30 = vld [vmem:[%s17550_s24 + $0x3b8] sm:$0xff]  }
 0x9ab   : > { %13846 = vmatpush3.bf16.msra.mxu1 %v15006_v45  ;;  %3725 = vmatprep.mubr.bf16.mxu1 %v2714_v49  ;;  %v2711_v45 = vpack.c.bf16 %v2695_v39, %v2695_v39  ;;  %v15040_v49 = vld [vmem:[%s17550_s24 + $0x3c8] sm:$0xff]  }
 0x9ac   : > { %13825 = vmatprep.subr.bf16.mxu0 %v15007_v47  ;;  %13847 = vmatprep.subr.bf16.mxu1 %v15008_v48  ;;  %v2713_v46 = vpack.c.bf16 %v2697_v41, %v2697_v41  ;;  %v15039_v47 = vld [vmem:[%s17550_s24 + $0x348] sm:$0xff]   ;;  %v2716_v48 = vpack.c.bf16 %v2700_v42, %v2700_v42 }
 0x9ae   : > { %13826 = vmatpush3.bf16.msra.mxu0 %v15009_v50  ;;  %v2718_v50 = vpack.c.bf16 %v2702_v44, %v2702_v44 }
 0x9af   : > { %13848 = vmatpush3.bf16.msra.mxu1 %v15010_v54  ;;  %13827 = vmatprep.subr.bf16.mxu0 %v15011_v55  ;;  %v15041_v54 = vld [vmem:[%s17550_s24 + $0x308] sm:$0xff]  }
 0x9b0   : > { %13849 = vmatprep.subr.bf16.mxu1 %v15012_v56  ;;  %v15042_v55 = vld [vmem:[%s17550_s24 + $0x388] sm:$0xff]   ;;  %v15043_v56 = vld [vmem:[%s17550_s24 + $0x350] sm:$0xff]  }
 0x9b2   : > { %13828 = vmatpush3.bf16.msra.mxu0 %v15013_v58  ;;  %v15044_v58 = vld [vmem:[%s17550_s24 + $0x3d0] sm:$0xff]  }
 0x9b3   : > { %13850 = vmatpush3.bf16.msra.mxu1 %v15014_v59  ;;  %13829 = vmatprep.subr.bf16.mxu0 %v15015_v61  ;;  %v15045_v59 = vld [vmem:[%s17550_s24 + $0x310] sm:$0xff]  }
 0x9b4   : > { %13851 = vmatprep.subr.bf16.mxu1 %v15016_v1  ;;  %v15046_v61 = vld [vmem:[%s17550_s24 + $0x390] sm:$0xff]   ;;  %v15047_v1 = vld [vmem:[%s17550_s24 + $0x358] sm:$0xff]  }
 0x9b6   : > { %13830 = vmatpush3.bf16.msra.mxu0 %v15017_v2  ;;  %v15048_v2 = vld [vmem:[%s17550_s24 + $0x3d8] sm:$0xff]  }
 0x9b7   : > { %13852 = vmatpush3.bf16.msra.mxu1 %v15018_v4  ;;  %13831 = vmatprep.subr.bf16.mxu0 %v15019_v5  ;;  %v15049_v4 = vld [vmem:[%s17550_s24 + $0x318] sm:$0xff]  }
 0x9b8   : > { %13853 = vmatprep.subr.bf16.mxu1 %v15020_v8  ;;  %v15050_v5 = vld [vmem:[%s17550_s24 + $0x398] sm:$0xff]   ;;  %v15051_v8 = vld [vmem:[%s17550_s24 + $0x360] sm:$0xff]  }
 0x9ba   : > { %13832 = vmatpush3.bf16.msra.mxu0 %v15021_v9  ;;  %v15052_v9 = vld [vmem:[%s17550_s24 + $0x3e0] sm:$0xff]  }
 0x9bb   : > { %13854 = vmatpush3.bf16.msra.mxu1 %v15022_v10  ;;  %13833 = vmatprep.subr.bf16.mxu0 %v15023_v11  ;;  %v15053_v10 = vld [vmem:[%s17550_s24 + $0x320] sm:$0xff]  }
 0x9bc   : > { %13855 = vmatprep.subr.bf16.mxu1 %v15024_v12  ;;  %v15054_v11 = vld [vmem:[%s17550_s24 + $0x3a0] sm:$0xff]   ;;  %v15055_v12 = vld [vmem:[%s17550_s24 + $0x368] sm:$0xff]  }
 0x9be   : > { %13834 = vmatpush3.bf16.msra.mxu0 %v15025_v13  ;;  %v15056_v13 = vld [vmem:[%s17550_s24 + $0x3e8] sm:$0xff]  }
 0x9bf   : > { %13856 = vmatpush3.bf16.msra.mxu1 %v15026_v19  ;;  %13835 = vmatprep.subr.bf16.mxu0 %v15027_v20  ;;  %v2167_v19 = vrot.slane %v16173_v53, %v16180_v57  ;;  %v15058_v20 = vld [vmem:[%s17550_s24 + $0x3a8] sm:$0xff]   ;;  %v15065_v53 = vld [vmem:[%s17550_s24 + $0x338] sm:$0xff]  }
 0x9c0   : > { %13857 = vmatprep.subr.bf16.mxu1 %v15028_v21  ;;  %v15060_v21 = vld [vmem:[%s17550_s24 + $0x3f0] sm:$0xff]  }
 0x9c1   : > { %v2640_v23 = vadd.f32 %v16184_v60, %v2167_v19 }
 0x9c2   : > { %13836 = vmatpush3.bf16.msra.mxu0 %v15029_v24  ;;  %v15062_v24 = vld [vmem:[%s17550_s24 + $0x3b0] sm:$0xff]  }
 0x9c3   : > { %13858 = vmatpush3.bf16.msra.mxu1 %v15030_v27  ;;  %13837 = vmatprep.subr.bf16.mxu0 %v15031_v29  ;;  %v15064_v27 = vld [vmem:[%s17550_s24 + $0x3f8] sm:$0xff]   ;;  %v2699_v29 = vmax.f32 %v2640_v23, 0.0 }
 0x9c4   : > { %13859 = vmatprep.subr.bf16.mxu1 %v15032_v31  ;;  %v2701_v31 = vmax.f32 %v16186_v62, 0.0  ;;  %v12342_v62 = vld [vmem:[%s17547_s30] ss:$0 sm:$0xff] }
 0x9c5   : > { %v2715_v32 = vpack.c.bf16 %v2699_v29, %v2699_v29 }
 0x9c6   : > { %13838 = vmatpush3.bf16.msra.mxu0 %v15033_v7  ;;  %v2717_v60 = vpack.c.bf16 %v2701_v31, %v2701_v31 }
 0x9c7   : > { %13860 = vmatpush3.bf16.msra.mxu1 %v15034_v15  ;;  %13867 = vmatprep.subr.bf16.mxu0 %v15035_v43 }
 0x9c8   : > { %13889 = vmatprep.subr.bf16.mxu1 %v15036_v40 }
 0x9c9   : > { %3686 = vmatmul.mubr.bf16.vlgmr.msra.gmra.mrb[40].mxu0 %v2711_v45 }
 0x9ca   : > { %3726 = vmatmul.mubr.bf16.vlgmr.msra.gmra.mrb[40].mxu1 %v2713_v46  ;;  %13868 = vmatpush3.bf16.msra.mxu0 %v15037_v63 }
 0x9cb   : > { %3765 = vmatprep.mubr.bf16.mxu0 %v2716_v48  ;;  %13890 = vmatpush3.bf16.msra.mxu1 %v15038_v0 }
 0x9cc   : > { %3805 = vmatprep.mubr.bf16.mxu1 %v2718_v50  ;;  %13869 = vmatprep.subr.bf16.mxu0 %v15039_v47 }
 0x9cd   : > { %13891 = vmatprep.subr.bf16.mxu1 %v15040_v49 }
 0x9ce   : > { %13870 = vmatpush3.bf16.msra.mxu0 %v15041_v54 }
 0x9cf   : > { %13892 = vmatpush3.bf16.msra.mxu1 %v15042_v55  ;;  %13871 = vmatprep.subr.bf16.mxu0 %v15043_v56 }
 0x9d0   : > { %13893 = vmatprep.subr.bf16.mxu1 %v15044_v58 }
 0x9d2   : > { %13872 = vmatpush3.bf16.msra.mxu0 %v15045_v59 }
 0x9d3   : > { %13894 = vmatpush3.bf16.msra.mxu1 %v15046_v61  ;;  %13873 = vmatprep.subr.bf16.mxu0 %v15047_v1 }
 0x9d4   : > { %13895 = vmatprep.subr.bf16.mxu1 %v15048_v2 }
 0x9d6   : > { %13874 = vmatpush3.bf16.msra.mxu0 %v15049_v4 }
 0x9d7   : > { %13896 = vmatpush3.bf16.msra.mxu1 %v15050_v5  ;;  %13875 = vmatprep.subr.bf16.mxu0 %v15051_v8 }
 0x9d8   : > { %13897 = vmatprep.subr.bf16.mxu1 %v15052_v9 }
 0x9da   : > { %13876 = vmatpush3.bf16.msra.mxu0 %v15053_v10 }
 0x9db   : > { %13898 = vmatpush3.bf16.msra.mxu1 %v15054_v11  ;;  %13877 = vmatprep.subr.bf16.mxu0 %v15055_v12 }
 0x9dc   : > { %13899 = vmatprep.subr.bf16.mxu1 %v15056_v13 }
 0x9de   : > { %13878 = vmatpush3.bf16.msra.mxu0 %v15057_v17 }
 0x9df   : > { %13900 = vmatpush3.bf16.msra.mxu1 %v15058_v20  ;;  %13879 = vmatprep.subr.bf16.mxu0 %v15059_v36 }
 0x9e0   : > { %13901 = vmatprep.subr.bf16.mxu1 %v15060_v21 }
 0x9e2   : > { %13880 = vmatpush3.bf16.msra.mxu0 %v15061_v22 }
 0x9e3   : > { %13902 = vmatpush3.bf16.msra.mxu1 %v15062_v24  ;;  %13881 = vmatprep.subr.bf16.mxu0 %v15063_v26 }
 0x9e4   : > { %13903 = vmatprep.subr.bf16.mxu1 %v15064_v27 }
 0x9e6   : > { %13882 = vmatpush3.bf16.msra.mxu0 %v15065_v53 }
 0x9e7   : > { %13904 = vmatpush3.bf16.msra.mxu1 %v15066_v30  ;;  %14596 = vmatprep.subr.bf16.mxu0 %v15657_v16 }
 0x9e8   : > { %14604 = vmatprep.subr.bf16.mxu1 %v15657_v16 }
 0x9e9   : > { %3766 = vmatmul.mubr.bf16.vlgmr.msra.gmra.mrb[44].mxu0 %v2715_v32 }
 0x9ea   : > { %3806 = vmatmul.mubr.bf16.vlgmr.msra.gmra.mrb[44].mxu1 %v2717_v60  ;;  %14600 = vmatprep.mubr.msk.bf16.mxu0 %vm15656_vm0, %v15657_v16 }
 0x9eb   : > { %14606 = vmatprep.mubr.msk.bf16.mxu1 %vm15656_vm0, %v15657_v16 }
 0xa5c   : > { %v13751_v6 = vpop.f32.mrb[32].mxu0  ;;  %v13773_v7 = vpop.f32.mrb[32].mxu1 }
 0xa5d   : > { %v13752_v39 = vpop.f32.mrb[33].mxu0  ;;  %v13774_v15 = vpop.f32.mrb[33].mxu1 }
 0xa5e   : > { %v13753_v43 = vadd.f32 %v13752_v39, %v13751_v6  ;;  %v13775_v41 = vadd.f32 %v13774_v15, %v13773_v7  ;;  %v13754_v40 = vpop.f32.mrb[34].mxu0  ;;  %v13776_v42 = vpop.f32.mrb[34].mxu1 }
 0xa5f   : > { %v13755_v44 = vpop.f32.mrb[35].mxu0  ;;  %v13777_v63 = vpop.f32.mrb[35].mxu1  ;;  %v15068_v40 = vld [vmem:[%s17554_s17 + $0x18] sm:$0xff]  }
 0xa60   : > { %v3528_v45 = vadd.f32 %v13753_v43, %v12342_v62 }
 0xa62   : > { %v3568_v0 = vadd.f32 %v13775_v41, %v3528_v45  ;;  %v15067_v41 = vld [vmem:[%s17554_s17 + $0x10] sm:$0xff]   ;;  %v12471_v45 = vld [vmem:[%s17552_s6] ss:$0 sm:$0xff]  ;;  %s17580_s17 = sld [smem:[#allocation26_spill]] }
 0xa63   : > { %14597 = vmatpush3.bf16.msra.mxu0 %v15067_v41 }
 0xa64   : > { %14598 = vmatprep.subr.bf16.mxu0 %v15657_v16 }
 0xa67   : > { %14599 = vmatpush3.bf16.msra.mxu0 %v15068_v40 }
 0xa68   : > { %14610 = vmatprep.subr.bf16.mxu0 %v15657_v16 }
 0xa7c   : > { %v13795_v46 = vpop.f32.mrb[36].mxu0  ;;  %v13817_v47 = vpop.f32.mrb[36].mxu1 }
 0xa7d   : > { %v13796_v48 = vpop.f32.mrb[37].mxu0  ;;  %v13818_v49 = vpop.f32.mrb[37].mxu1 }
 0xa7e   : > { %v13797_v50 = vadd.f32 %v13796_v48, %v13795_v46  ;;  %v13819_v54 = vadd.f32 %v13818_v49, %v13817_v47  ;;  %v13798_v55 = vpop.f32.mrb[38].mxu0  ;;  %v13820_v56 = vpop.f32.mrb[38].mxu1  ;;  %v12472_v46 = vld [vmem:[%s17570_s2] ss:$0 sm:$0xff] }
 0xa7f   : > { %v13799_v58 = vpop.f32.mrb[39].mxu0  ;;  %v13821_v59 = vpop.f32.mrb[39].mxu1 }
 0xa80   : > { %v3608_v61 = vadd.f32 %v13797_v50, %v3568_v0  ;;  %v12778_v50 = vld [vmem:[%s17551_s21 + $0x1] ss:$0 sm:$0xff]  ;;  %s17584_s21 = sld [smem:[#allocation29_spill]] }
 0xa82   : > { %v3648_v1 = vadd.f32 %v13819_v54, %v3608_v61 }
 0xa9c   : > { %v13839_v2 = vpop.f32.mrb[40].mxu0 }
 0xa9d   : > { %v13861_v4 = vpop.f32.mrb[40].mxu1  ;;  %v13840_v5 = vpop.f32.mrb[41].mxu0 }
 0xa9e   : > { %v13841_v8 = vadd.f32 %v13840_v5, %v13839_v2  ;;  %v13862_v9 = vpop.f32.mrb[41].mxu1  ;;  %v13842_v10 = vpop.f32.mrb[42].mxu0 }
 0xa9f   : > { %v13863_v11 = vadd.f32 %v13862_v9, %v13861_v4  ;;  %v13864_v12 = vpop.f32.mrb[42].mxu1  ;;  %v13843_v13 = vpop.f32.mrb[43].mxu0 }
 0xaa0   : > { %v3688_v17 = vadd.f32 %v13841_v8, %v3648_v1  ;;  %v13865_v19 = vpop.f32.mrb[43].mxu1 }
 0xaa2   : > { %v3728_v20 = vadd.f32 %v13863_v11, %v3688_v17 }
 0xabc   : > { %v13883_v36 = vpop.f32.mrb[44].mxu0 }
 0xabd   : > { %v13905_v21 = vpop.f32.mrb[44].mxu1  ;;  %v13884_v22 = vpop.f32.mrb[45].mxu0 }
 0xabe   : > { %v13885_v23 = vadd.f32 %v13884_v22, %v13883_v36  ;;  %v13906_v24 = vpop.f32.mrb[45].mxu1  ;;  %v13886_v26 = vpop.f32.mrb[46].mxu0 }
 0xabf   : > { %v13907_v27 = vadd.f32 %v13906_v24, %v13905_v21  ;;  %v13908_v53 = vpop.f32.mrb[46].mxu1  ;;  %v13887_v29 = vpop.f32.mrb[47].mxu0 }
 0xac0   : > { %v3768_v30 = vadd.f32 %v13885_v23, %v3728_v20  ;;  %v13909_v31 = vpop.f32.mrb[47].mxu1 }
 0xac2   : > { %v3808_v32 = vadd.f32 %v13907_v27, %v3768_v30 }
 0xac4   : > { %v3813_v60 = vadd.f32 %v3808_v32, %v16031_v14 }
 0xac6   : > { %v3814_v6 = vsel %vm1747_vm4, %v3813_v60, 0.0 }
 0xac7   : > { %3815 = vadd.xlane.f32.xlu0 %v3814_v6 }
 0xb54   : > { %v3816_v7 = vpop.xlane.xlu0 %3815 }
 0xb55   : > { %v3817_v62 = vmul.f32 0.03125, %v3816_v7 }
 0xb57   : > { %v3818_v39 = vsub.f32 %v3813_v60, %v3817_v62 }
 0xb59   : > { %v3819_v15 = vmul.f32 %v3818_v39, %v3818_v39 }
 0xb5b   : > { %v3820_v43 = vsel %vm1747_vm4, %v3819_v15, 0.0 }
 0xb5c   : > { %3821 = vadd.xlane.f32.xlu0 %v3820_v43 }
 0xbe9   : > { %v3822_v14 = vpop.xlane.xlu0 %3821 }
 0xbea   : > { %v3823_v42 = vmul.f32 0.03125, %v3822_v14 }
 0xbec   : > { %v3824_v44 = vadd.f32 1e-05, %v3823_v42 }
 0xbee   : > { %15487 = vrsqrt.f32 %v3824_v44 }
 0xbf8   : > { %v15488_v63 = vpop.eup %15487 }
 0xbf9   : > { %v3826_v0 = vmul.f32 %v15488_v63, %v3818_v39  ;;  %v15069_v63 = vld [vmem:[%s17549_s25 + $0x10] sm:$0xff]  }
 0xbfb   : > { %v3833_v47 = vmul.f32 %v12471_v45, %v3826_v0  ;;  %v15070_v45 = vld [vmem:[%s17549_s25 + $0x18] sm:$0xff]   ;;  %s17586_s25 = sld [smem:[#allocation28_spill]] }
 0xbfd   : > { %v16308_v48 = vadd.f32 %v12472_v46, %v3833_v47 }
 0xbff   : > { %v4158_v49 = vpack.c.bf16 %v16308_v48, %v16308_v48 }
 0xc01   : > { %14601 = vmatmul.mubr.msk.bf16.vlgmr.msra.gmra.mrb[48].mxu0 %vm1747_vm4, %v4158_v49 }
 0xc02   : > { %14612 = vmatprep.mubr.msk.bf16.mxu0 %vm15656_vm0, %v15657_v16 }
 0xcd4   : > { %v4214_v54 = vpop.f32.mrb[48].mxu0 }
 0xcd5   : > { %v4215_v55 = vadd.f32 %v12778_v50, %v4214_v54  ;;  %v14602_v56 = vpop.f32.mrb[49].mxu0 }
 0xcd6   : > { %v4217_v58 = vpop.f32.mrb[50].mxu0 }
 0xcd7   : > { %v4220_v59 = vpack.c.bf16 %v4215_v55, %v4215_v55  ;;  %v14603_v61 = vpop.f32.mrb[51].mxu0 }
 0xcd9   : > { %4333 = vrot.lane.b32.xlu0 %v4220_v59, %s17478_s22  ;;  %4222 = vrot.lane.b32.xlu1 %v4220_v59, %s17476_s16  ;;  %s17572_s16 = smov 64   ;;  %s17573_s22 = smov 48  }
 0xcdd   : > { %4331 = vrot.lane.b32.xlu1 %v4220_v59, %s17571_s23 }
 0xd4b   : > { %v4223_v1 = vpop.permute.xlu1 %4222  ;;  %v4334_v4 = vpop.permute.xlu0 %4333 }
 0xd4c   : > { %v4228_v2 = vsel %vm1795_vm5, %v4223_v1, 0  ;;  %v4339_v5 = vsel %vm1795_vm5, %v4334_v4, 0  ;;  %v12786_v1 = vld [vmem:[%s17548_s29 + $0x1] ss:$0 sm:$0xff]  ;;  %s17589_s29 = sld [smem:[#allocation33_spill]] }
 0xd4d   : > { %14605 = vmatpush3.bf16.xpose.msra.mxu1 %v4228_v2 }
 0xd4e   : > { %14616 = vmatprep.subr.bf16.mxu1 %v15657_v16 }
 0xd4f   : > { %v4332_v8 = vpop.permute.xlu1 %4331 }
 0xd54   : > { %14607 = vmatmul.mubr.msk.bf16.vlgmr.msra.gmra.mrb[48].mxu1 %vm1795_vm5, %v4220_v59 }
 0xd55   : > { %14617 = vmatpush3.bf16.xpose.msra.mxu1 %v4339_v5  ;;  %14618 = vmatprep.mubr.msk.bf16.mxu1 %vm15656_vm0, %v15657_v16 }
 0xd56   : > { %14628 = vmatprep.subr.bf16.mxu1 %v15657_v16 }
 0xd5c   : > { %14619 = vmatmul.mubr.msk.bf16.vlgmr.msra.gmra.mrb[52].mxu1 %vm1795_vm5, %v4332_v8 }
 0xd5d   : > { %14632 = vmatprep.mubr.msk.bf16.mxu1 %vm15656_vm0, %v15657_v16  ;;  %14629 = vmatpush3.bf16.msra.mxu1 %v15069_v63 }
 0xd5e   : > { %14630 = vmatprep.subr.bf16.mxu1 %v15657_v16 }
 0xd61   : > { %14631 = vmatpush3.bf16.msra.mxu1 %v15070_v45 }
 0xe27   : > { %v4264_v9 = vpop.f32.mrb[48].mxu1 }
 0xe28   : > { %v14608_v10 = vpop.f32.mrb[49].mxu1  ;;  %v4270_v11 = vsel %vm1842_vm6, %v4264_v9, -inf }
 0xe29   : > { %4271 = vmax.xlane.f32.xlu1 %v4270_v11  ;;  %v4267_v12 = vpop.f32.mrb[50].mxu1 }
 0xe2a   : > { %v14609_v13 = vpop.f32.mrb[51].mxu1 }
 0xe2f   : > { %v4375_v17 = vpop.f32.mrb[52].mxu1 }
 0xe30   : > { %v14620_v19 = vpop.f32.mrb[53].mxu1  ;;  %v4381_v20 = vsel %vm1842_vm6, %v4375_v17, -inf }
 0xe31   : > { %4382 = vmax.xlane.f32.xlu0 %v4381_v20  ;;  %v4378_v36 = vpop.f32.mrb[54].mxu1 }
 0xe32   : > { %v14621_v21 = vpop.f32.mrb[55].mxu1  ;;  %v12485_v36 = vld [vmem:[%s17555_s14 + $0x100] sm:$0xff] }
 0xe33   : > { %v12493_v21 = vld [vmem:[%s17555_s14 + $0x140] sm:$0xff] }
 0xeb6   : > { %v4272_v22 = vpop.xlane.xlu1 %4271 }
 0xeb7   : > { %v4273_v23 = vsub.f32 %v4264_v9, %v4272_v22  ;;  %v12486_v22 = vld [vmem:[%s17555_s14 + $0x108] sm:$0xff] }
 0xeb9   : > { %v4274_v24 = vmul.f32 1.442695, %v4273_v23  ;;  %v12793_v23 = vcombine.high %v12485_v36, %v12493_v21 }
 0xebb   : > { %15489 = vpow2.f32 %v4274_v24  ;;  %v12494_v24 = vld [vmem:[%s17555_s14 + $0x148] sm:$0xff] }
 0xebe   : > { %v4383_v26 = vpop.xlane.xlu0 %4382 }
 0xebf   : > { %v4384_v27 = vsub.f32 %v4375_v17, %v4383_v26  ;;  %v12794_v26 = vcombine.low %v12486_v22, %v12494_v24 }
 0xec1   : > { %v4385_v53 = vmul.f32 1.442695, %v4384_v27  ;;  %v12795_v27 = vcombine.high %v12486_v22, %v12494_v24 }
 0xec3   : > { %15491 = vpow2.f32 %v4385_v53  ;;  %4824 = vmatprep.subr.bf16.mxu1 %v12795_v27  ;;  %v12501_v53 = vld [vmem:[%s17555_s14 + $0x180] sm:$0xff]  ;;  %v12492_v27 = vld [vmem:[%s17555_s14 + $0x138] sm:$0xff] }
 0xec5   : > { %v15490_v29 = vpop.eup %15489 }
 0xec6   : > { %v4276_v30 = vsel %vm1842_vm6, %v15490_v29, 0.0 }
 0xec7   : > { %4277 = vadd.xlane.f32.xlu0 %v4276_v30  ;;  %v12502_v30 = vld [vmem:[%s17555_s14 + $0x188] sm:$0xff] }
 0xecd   : > { %v15492_v31 = vpop.eup %15491 }
 0xece   : > { %v4387_v32 = vsel %vm1842_vm6, %v15492_v31, 0.0 }
 0xecf   : > { %4388 = vadd.xlane.f32.xlu1 %v4387_v32  ;;  %v12510_v32 = vld [vmem:[%s17555_s14 + $0x1c8] sm:$0xff] }
 0xedd   : > { %4282 = vrot.lane.b32.xlu0 %v4220_v59, %s17572_s16 }
 0xee0   : > { %4393 = vrot.lane.b32.xlu1 %v4220_v59, %s17573_s22 }
 0xf54   : > { %v4278_v60 = vpop.xlane.xlu0 %4277 }
 0xf55   : > { %15493 = vrcp.f32 %v4278_v60 }
 0xf58   : > { %v4283_v6 = vpop.permute.xlu0 %4282 }
 0xf59   : > { %v4288_v7 = vsel %vm1860_vm7, %v4283_v6, 0  ;;  %v12810_v6 = vcombine.low %v12502_v30, %v12510_v32 }
 0xf5a   : > { %14611 = vmatpush3.bf16.msra.mxu0 %v4288_v7  ;;  %v12811_v7 = vcombine.high %v12502_v30, %v12510_v32 }
 0xf5b   : > { %14622 = vmatprep.subr.bf16.mxu0 %v15657_v16 }
 0xf5c   : > { %v4389_v62 = vpop.xlane.xlu1 %4388 }
 0xf5d   : > { %15495 = vrcp.f32 %v4389_v62  ;;  %v12487_v62 = vld [vmem:[%s17555_s14 + $0x110] sm:$0xff] }
 0xf5f   : > { %v15494_v39 = vpop.eup %15493 }
 0xf60   : > { %v4280_v15 = vmul.f32 %v15494_v39, %v15490_v29  ;;  %v4394_v43 = vpop.permute.xlu1 %4393  ;;  %v12509_v29 = vld [vmem:[%s17555_s14 + $0x1c0] sm:$0xff]  ;;  %v12495_v39 = vld [vmem:[%s17555_s14 + $0x150] sm:$0xff] }
 0xf61   : > { %v4399_v40 = vsel %vm1860_vm7, %v4394_v43, 0  ;;  %v12808_v60 = vcombine.low %v12501_v53, %v12509_v29  ;;  %v12796_v43 = vcombine.low %v12487_v62, %v12495_v39 }
 0xf62   : > { %v4281_v41 = vpack.c.bf16 %v4280_v15, %v4280_v15  ;;  %v12488_v15 = vld [vmem:[%s17555_s14 + $0x118] sm:$0xff] }
 0xf64   : > { %14613 = vmatmul.mubr.msk.bf16.vlgmr.msra.gmra.mrb[52].mxu0 %vm1842_vm6, %v4281_v41  ;;  %v12797_v41 = vcombine.high %v12487_v62, %v12495_v39  ;;  %v12516_v62 = vld [vmem:[%s17555_s14 + $0x1f8] sm:$0xff] }
 0xf65   : > { %14623 = vmatpush3.bf16.msra.mxu0 %v4399_v40  ;;  %14624 = vmatprep.mubr.msk.bf16.mxu0 %vm15656_vm0, %v15657_v16  ;;  %v12496_v40 = vld [vmem:[%s17555_s14 + $0x158] sm:$0xff] }
 0xf66   : > { %4783 = vmatprep.subr.bf16.mxu0 %v12793_v23 }
 0xf67   : > { %v15496_v14 = vpop.eup %15495 }
 0xf68   : > { %v4391_v42 = vmul.f32 %v15496_v14, %v15492_v31  ;;  %v12809_v31 = vcombine.high %v12501_v53, %v12509_v29  ;;  %v12798_v14 = vcombine.low %v12488_v15, %v12496_v40  ;;  %v12500_v53 = vld [vmem:[%s17555_s14 + $0x178] sm:$0xff] }
 0xf69   : > { %v12807_v32 = vcombine.high %v12492_v27, %v12500_v53 }
 0xf6a   : > { %v4392_v44 = vpack.c.bf16 %v4391_v42, %v4391_v42  ;;  %v12799_v42 = vcombine.high %v12488_v15, %v12496_v40  ;;  %v12806_v15 = vcombine.low %v12492_v27, %v12500_v53  ;;  %v16452_v27 = vld [vmem:[%s17553_s19 + $0x10] sm:$0xff] }
 0xf6b   : > { %v4543_v53 = vrot.slane %v16452_v27, %v16113_v34 }
 0xf6c   : > { %14625 = vmatmul.mubr.msk.bf16.vlgmr.msra.gmra.mrb[56].mxu0 %vm1842_vm6, %v4392_v44 }
 0xf6d   : > { %4815 = vmatprep.mubr.bf16.mxu0 %v15654_v3 }
0x1037   : > { %v4324_v0 = vpop.f32.mrb[52].mxu0 }
0x1038   : > { %4330 = vst.msk [vmem:[#allocation2] sm:$0xff] %vm1795_vm5, %v4324_v0  ;;  %v14614_v46 = vpop.f32.mrb[53].mxu0 }
0x1039   : > { %v4327_v47 = vpop.f32.mrb[54].mxu0  ;;  %v12790_v46 = vld [vmem:[%s17558_s3 + $0x1] ss:$0 sm:$0xff]  ;;  %s17575_s3 = sld [smem:[#allocation23_spill]] }
0x103a   : > { %v14615_v49 = vpop.f32.mrb[55].mxu0 }
0x103b   : > { %v12791_v49 = vld [vmem:[%s17557_s8 + $0x1] ss:$0 sm:$0xff]  ;;  %s17576_s8 = sld [smem:[#allocation24_spill]] }
0x103f   : > { %v4435_v50 = vpop.f32.mrb[56].mxu0 }
0x1040   : > { %4442 = vrot.lane.b32.xlu1 %v4435_v50, %s17574_s5  ;;  %v14626_v54 = vpop.f32.mrb[57].mxu0 }
0x1041   : > { %v4438_v55 = vpop.f32.mrb[58].mxu0  ;;  %v12503_v54 = vld [vmem:[%s17555_s14 + $0x190] sm:$0xff] }
0x1042   : > { %v14627_v56 = vpop.f32.mrb[59].mxu0  ;;  %v12511_v55 = vld [vmem:[%s17555_s14 + $0x1d0] sm:$0xff] }
0x1043   : > { %v12504_v56 = vld [vmem:[%s17555_s14 + $0x198] sm:$0xff] }
0x10b2   : > { %v4443_v58 = vpop.permute.xlu1 %4442 }
0x10b3   : > { %4445 = vst.msk [vmem:[#allocation2] sm:$0xff] %vm2019_vm8, %v4443_v58  ;;  %v12512_v58 = vld [vmem:[%s17555_s14 + $0x1d8] sm:$0xff] }
0x10ba   : > { %v4446_v59 = vld [vmem:[#allocation2] sm:$0xff] }
0x10bb   : > { %v4447_v61 = vpack.c.bf16 %v4446_v59, %v4446_v59 }
0x10bd   : > { %14633 = vmatmul.mubr.msk.bf16.vlgmr.msra.gmra.mrb[56].mxu1 %vm1747_vm4, %v4447_v61 }
0x10be   : > { %4856 = vmatprep.mubr.bf16.mxu1 %v15654_v3  ;;  %4825 = vmatpush1.bf16.msra.mxu1 %v12794_v26  ;;  %v12499_v26 = vld [vmem:[%s17555_s14 + $0x170] sm:$0xff] }
0x10bf   : > { %4826 = vmatprep.subr.bf16.mxu1 %v12811_v7  ;;  %v12508_v7 = vld [vmem:[%s17555_s14 + $0x1b8] sm:$0xff] }
0x10c2   : > { %4827 = vmatpush1.bf16.msra.mxu1 %v12810_v6  ;;  %v12515_v6 = vld [vmem:[%s17555_s14 + $0x1f0] sm:$0xff] }
0x10c3   : > { %4906 = vmatprep.subr.bf16.mxu1 %v12799_v42  ;;  %v15071_v42 = vld [vmem:[%s17550_s24 + $0x440] sm:$0xff]  }
0x1190   : > { %v4503_v2 = vpop.f32.mrb[56].mxu1 }
0x1191   : > { %v4504_v4 = vadd.f32 %v12786_v1, %v4503_v2  ;;  %v14634_v5 = vpop.f32.mrb[57].mxu1  ;;  %v12813_v1 = vcombine.high %v12503_v54, %v12511_v55  ;;  %v12815_v2 = vcombine.high %v12504_v56, %v12512_v58 }
0x1192   : > { %v4506_v8 = vpop.f32.mrb[58].mxu1  ;;  %v12497_v5 = vld [vmem:[%s17555_s14 + $0x160] sm:$0xff] }
0x1193   : > { %v14635_v9 = vpop.f32.mrb[59].mxu1  ;;  %v4509_v10 = vadd.f32 %v4504_v4, %v16308_v48  ;;  %v12792_v48 = vcombine.low %v12485_v36, %v12493_v21  ;;  %v12489_v4 = vld [vmem:[%s17555_s14 + $0x120] sm:$0xff]  ;;  %v12490_v8 = vld [vmem:[%s17555_s14 + $0x128] sm:$0xff] }
0x1194   : > { %v12498_v9 = vld [vmem:[%s17555_s14 + $0x168] sm:$0xff]  ;;  %v12800_v21 = vcombine.low %v12489_v4, %v12497_v5 }
0x1195   : > { %v4510_v11 = vsel %vm1747_vm4, %v4509_v10, 0.0  ;;  %4784 = vmatpush1.bf16.msra.mxu0 %v12792_v48  ;;  %v12514_v36 = vld [vmem:[%s17555_s14 + $0x1e8] sm:$0xff]  ;;  %v12802_v22 = vcombine.low %v12490_v8, %v12498_v9  ;;  %v12491_v48 = vld [vmem:[%s17555_s14 + $0x130] sm:$0xff] }
0x1196   : > { %4511 = vadd.xlane.f32.xlu0 %v4510_v11  ;;  %4785 = vmatprep.subr.bf16.mxu0 %v12809_v31  ;;  %v12814_v11 = vcombine.low %v12504_v56, %v12512_v58  ;;  %v12805_v31 = vcombine.high %v12491_v48, %v12499_v26  ;;  %v12804_v39 = vcombine.low %v12491_v48, %v12499_v26  ;;  %v15082_v56 = vld [vmem:[%s17550_s24 + $0x490] sm:$0xff]   ;;  %v15083_v58 = vld [vmem:[%s17550_s24 + $0x458] sm:$0xff]   ;;  %v15103_v48 = vld [vmem:[%s17550_s24 + $0x540] sm:$0xff]  }
0x1197   : > { %v15104_v26 = vld [vmem:[%s17550_s24 + $0x5c0] sm:$0xff]  }
0x1199   : > { %4786 = vmatpush1.bf16.msra.mxu0 %v12808_v60  ;;  %v12507_v60 = vld [vmem:[%s17555_s14 + $0x1b0] sm:$0xff] }
0x119a   : > { %4865 = vmatprep.subr.bf16.mxu0 %v12797_v41  ;;  %v12823_v41 = vcombine.high %v12508_v7, %v12516_v62  ;;  %v12820_v40 = vcombine.low %v12507_v60, %v12515_v6 }
0x1223   : > { %v4512_v12 = vpop.xlane.xlu0 %4511 }
0x1224   : > { %v4513_v13 = vmul.f32 0.03125, %v4512_v12  ;;  %v12801_v12 = vcombine.high %v12489_v4, %v12497_v5  ;;  %v15087_v4 = vld [vmem:[%s17550_s24 + $0x460] sm:$0xff]  }
0x1225   : > { %v15088_v5 = vld [vmem:[%s17550_s24 + $0x4e0] sm:$0xff]  }
0x1226   : > { %v4514_v17 = vsub.f32 %v4509_v10, %v4513_v13  ;;  %v12812_v10 = vcombine.low %v12503_v54, %v12511_v55  ;;  %v12803_v13 = vcombine.high %v12490_v8, %v12498_v9  ;;  %v15080_v54 = vld [vmem:[%s17550_s24 + $0x4d0] sm:$0xff]   ;;  %v15089_v8 = vld [vmem:[%s17550_s24 + $0x420] sm:$0xff]  }
0x1227   : > { %v15081_v55 = vld [vmem:[%s17550_s24 + $0x410] sm:$0xff]   ;;  %v15090_v9 = vld [vmem:[%s17550_s24 + $0x4a0] sm:$0xff]  }
0x1228   : > { %v4515_v19 = vmul.f32 %v4514_v17, %v4514_v17 }
0x122a   : > { %v4516_v20 = vsel %vm1747_vm4, %v4515_v19, 0.0  ;;  %v12513_v19 = vld [vmem:[%s17555_s14 + $0x1e0] sm:$0xff] }
0x122b   : > { %4517 = vadd.xlane.f32.xlu1 %v4516_v20  ;;  %v12506_v20 = vld [vmem:[%s17555_s14 + $0x1a8] sm:$0xff] }
0x122c   : > { %v12819_v24 = vcombine.high %v12506_v20, %v12514_v36  ;;  %v12818_v30 = vcombine.low %v12506_v20, %v12514_v36  ;;  %v15097_v20 = vld [vmem:[%s17550_s24 + $0x430] sm:$0xff]  }
0x122d   : > { %v15098_v36 = vld [vmem:[%s17550_s24 + $0x4b0] sm:$0xff]  }
0x12b8   : > { %v4518_v44 = vpop.xlane.xlu1 %4517 }
0x12b9   : > { %v4519_v63 = vmul.f32 0.03125, %v4518_v44  ;;  %v15072_v44 = vld [vmem:[%s17550_s24 + $0x4c0] sm:$0xff]  }
0x12bb   : > { %v4520_v45 = vadd.f32 1e-05, %v4519_v63  ;;  %v15073_v63 = vld [vmem:[%s17550_s24 + $0x400] sm:$0xff]  }
0x12bd   : > { %15497 = vrsqrt.f32 %v4520_v45  ;;  %v15074_v45 = vld [vmem:[%s17550_s24 + $0x480] sm:$0xff]  }
0x12c7   : > { %v15498_v0 = vpop.eup %15497 }
0x12c8   : > { %v4522_v47 = vmul.f32 %v15498_v0, %v4514_v17  ;;  %v12505_v17 = vld [vmem:[%s17555_s14 + $0x1a0] sm:$0xff]  ;;  %v15075_v0 = vld [vmem:[%s17550_s24 + $0x448] sm:$0xff]   ;;  %s17579_s14 = sld [smem:[#allocation25_spill]] }
0x12c9   : > { %v12817_v23 = vcombine.high %v12505_v17, %v12513_v19  ;;  %v12816_v29 = vcombine.low %v12505_v17, %v12513_v19  ;;  %v15095_v17 = vld [vmem:[%s17550_s24 + $0x470] sm:$0xff]  }
0x12ca   : > { %v4529_v50 = vmul.f32 %v12790_v46, %v4522_v47  ;;  %v15076_v46 = vld [vmem:[%s17550_s24 + $0x4c8] sm:$0xff]   ;;  %v15096_v19 = vld [vmem:[%s17550_s24 + $0x4f0] sm:$0xff]  }
0x12cb   : > { %v15077_v47 = vld [vmem:[%s17550_s24 + $0x408] sm:$0xff]  }
0x12cc   : > { %v16373_v59 = vadd.f32 %v12791_v49, %v4529_v50  ;;  %v15078_v49 = vld [vmem:[%s17550_s24 + $0x488] sm:$0xff]   ;;  %v15079_v50 = vld [vmem:[%s17550_s24 + $0x450] sm:$0xff]  }
0x12ce   : > { %v16377_v61 = vpack.c.bf16 %v16373_v59, %v16373_v59 }
0x12d0   : > { %12824 = vmatmul.mubr.msk.bf16.vlgmr.msra.gmra.mrb[60].mxu0 %vm1747_vm4, %v16377_v61  ;;  %12825 = vmatmul.mubr.msk.bf16.vlgmr.msra.gmra.mrb[60].mxu1 %vm1747_vm4, %v16377_v61 }
0x12d1   : > { %4866 = vmatpush1.bf16.msra.mxu0 %v12796_v43  ;;  %4907 = vmatpush1.bf16.msra.mxu1 %v12798_v14  ;;  %v12821_v43 = vcombine.high %v12507_v60, %v12515_v6  ;;  %v12822_v14 = vcombine.low %v12508_v7, %v12516_v62 }
0x12d2   : > { %4867 = vmatprep.subr.bf16.mxu0 %v12813_v1  ;;  %4908 = vmatprep.subr.bf16.mxu1 %v12815_v2  ;;  %v15085_v1 = vld [vmem:[%s17550_s24 + $0x418] sm:$0xff]  }
0x12d3   : > { %4897 = vmatprep.mubr.bf16.mxu0 %v15654_v3  ;;  %4938 = vmatprep.mubr.bf16.mxu1 %v15654_v3  ;;  %v15086_v2 = vld [vmem:[%s17550_s24 + $0x498] sm:$0xff]  }
0x12d5   : > { %4868 = vmatpush1.bf16.msra.mxu0 %v12812_v10  ;;  %4909 = vmatpush1.bf16.msra.mxu1 %v12814_v11  ;;  %v15091_v10 = vld [vmem:[%s17550_s24 + $0x468] sm:$0xff]  }
0x12d6   : > { %4947 = vmatprep.subr.bf16.mxu0 %v12801_v12  ;;  %4988 = vmatprep.subr.bf16.mxu1 %v12803_v13  ;;  %v15092_v11 = vld [vmem:[%s17550_s24 + $0x4e8] sm:$0xff]  }
0x12d7   : > { %v15093_v12 = vld [vmem:[%s17550_s24 + $0x428] sm:$0xff]  }
0x12d8   : > { %12826 = vmatmul.mubr.msk.bf16.vlgmr.msra.gmra.mrb[64].mxu0 %vm1747_vm4, %v16377_v61  ;;  %12827 = vmatmul.mubr.msk.bf16.vlgmr.msra.gmra.mrb[64].mxu1 %vm1747_vm4, %v16377_v61  ;;  %v15094_v13 = vld [vmem:[%s17550_s24 + $0x4a8] sm:$0xff]  }
0x12d9   : > { %4948 = vmatpush1.bf16.msra.mxu0 %v12800_v21  ;;  %4989 = vmatpush1.bf16.msra.mxu1 %v12802_v22  ;;  %v15099_v21 = vld [vmem:[%s17550_s24 + $0x478] sm:$0xff]  }
0x12da   : > { %4949 = vmatprep.subr.bf16.mxu0 %v12817_v23  ;;  %4990 = vmatprep.subr.bf16.mxu1 %v12819_v24  ;;  %v15100_v22 = vld [vmem:[%s17550_s24 + $0x4f8] sm:$0xff]  }
0x12db   : > { %4979 = vmatprep.mubr.bf16.mxu0 %v15654_v3  ;;  %5020 = vmatprep.mubr.bf16.mxu1 %v15654_v3  ;;  %v15101_v23 = vld [vmem:[%s17550_s24 + $0x438] sm:$0xff]  }
0x12dc   : > { %v15102_v24 = vld [vmem:[%s17550_s24 + $0x4b8] sm:$0xff]  }
0x12dd   : > { %4950 = vmatpush1.bf16.msra.mxu0 %v12816_v29  ;;  %4991 = vmatpush1.bf16.msra.mxu1 %v12818_v30  ;;  %v4551_v29 = vrot.slane %v16452_v27, %v16116_v35  ;;  %v4547_v30 = vrot.slane %v16452_v27, %v16122_v37 }
0x12de   : > { %5029 = vmatprep.subr.bf16.mxu0 %v12805_v31  ;;  %5070 = vmatprep.subr.bf16.mxu1 %v12807_v32  ;;  %v4555_v31 = vrot.slane %v16452_v27, %v16125_v38 }
0x12e0   : > { %12828 = vmatmul.mubr.msk.bf16.vlgmr.msra.gmra.mrb[68].mxu0 %vm1747_vm4, %v16377_v61  ;;  %12829 = vmatmul.mubr.msk.bf16.vlgmr.msra.gmra.mrb[68].mxu1 %vm1747_vm4, %v16377_v61 }
0x12e1   : > { %5030 = vmatpush1.bf16.msra.mxu0 %v12804_v39  ;;  %5071 = vmatpush1.bf16.msra.mxu1 %v12806_v15 }
0x12e2   : > { %5031 = vmatprep.subr.bf16.mxu0 %v12821_v43  ;;  %5072 = vmatprep.subr.bf16.mxu1 %v12823_v41 }
0x12e3   : > { %5061 = vmatprep.mubr.bf16.mxu0 %v15654_v3  ;;  %5102 = vmatprep.mubr.bf16.mxu1 %v15654_v3 }
0x12e5   : > { %5032 = vmatpush1.bf16.msra.mxu0 %v12820_v40  ;;  %5073 = vmatpush1.bf16.msra.mxu1 %v12822_v14 }
0x12e6   : > { %13925 = vmatprep.subr.bf16.mxu0 %v15071_v42  ;;  %13947 = vmatprep.subr.bf16.mxu1 %v15072_v44 }
0x12e8   : > { %12830 = vmatmul.mubr.msk.bf16.vlgmr.msra.gmra.mrb[72].mxu0 %vm1747_vm4, %v16377_v61  ;;  %12831 = vmatmul.mubr.msk.bf16.vlgmr.msra.gmra.mrb[72].mxu1 %vm1747_vm4, %v16377_v61  ;;  %v15084_v61 = vld [vmem:[%s17550_s24 + $0x4d8] sm:$0xff]  }
0x12e9   : > { %13926 = vmatpush3.bf16.msra.mxu0 %v15073_v63  ;;  %13948 = vmatpush3.bf16.msra.mxu1 %v15074_v45 }
0x12ea   : > { %13927 = vmatprep.subr.bf16.mxu0 %v15075_v0  ;;  %13949 = vmatprep.subr.bf16.mxu1 %v15076_v46 }
0x12ed   : > { %13928 = vmatpush3.bf16.msra.mxu0 %v15077_v47  ;;  %13950 = vmatpush3.bf16.msra.mxu1 %v15078_v49  ;;  %v4563_v49 = vrot.slane %v16452_v27, %v16136_v51 }
0x12ee   : > { %13929 = vmatprep.subr.bf16.mxu0 %v15079_v50  ;;  %13951 = vmatprep.subr.bf16.mxu1 %v15080_v54  ;;  %v4571_v50 = vrot.slane %v16452_v27, %v16139_v52  ;;  %v15105_v54 = vld [vmem:[%s17550_s24 + $0x500] sm:$0xff]  }
0x12f1   : > { %13930 = vmatpush3.bf16.msra.mxu0 %v15081_v55  ;;  %13952 = vmatpush3.bf16.msra.mxu1 %v15082_v56  ;;  %v15106_v55 = vld [vmem:[%s17550_s24 + $0x580] sm:$0xff]  }
0x12f2   : > { %13931 = vmatprep.subr.bf16.mxu0 %v15083_v58  ;;  %13953 = vmatprep.subr.bf16.mxu1 %v15084_v61  ;;  %v15107_v61 = vld [vmem:[%s17550_s24 + $0x548] sm:$0xff]  }
0x12f5   : > { %13932 = vmatpush3.bf16.msra.mxu0 %v15085_v1  ;;  %13954 = vmatpush3.bf16.msra.mxu1 %v15086_v2  ;;  %v15108_v1 = vld [vmem:[%s17550_s24 + $0x5c8] sm:$0xff]  }
0x12f6   : > { %13933 = vmatprep.subr.bf16.mxu0 %v15087_v4  ;;  %13955 = vmatprep.subr.bf16.mxu1 %v15088_v5 }
0x12f9   : > { %13934 = vmatpush3.bf16.msra.mxu0 %v15089_v8  ;;  %13956 = vmatpush3.bf16.msra.mxu1 %v15090_v9 }
0x12fa   : > { %13935 = vmatprep.subr.bf16.mxu0 %v15091_v10  ;;  %13957 = vmatprep.subr.bf16.mxu1 %v15092_v11 }
0x12fd   : > { %13936 = vmatpush3.bf16.msra.mxu0 %v15093_v12  ;;  %13958 = vmatpush3.bf16.msra.mxu1 %v15094_v13  ;;  %v15109_v13 = vld [vmem:[%s17550_s24 + $0x508] sm:$0xff]  }
0x12fe   : > { %13937 = vmatprep.subr.bf16.mxu0 %v15095_v17  ;;  %13959 = vmatprep.subr.bf16.mxu1 %v15096_v19  ;;  %v15110_v17 = vld [vmem:[%s17550_s24 + $0x588] sm:$0xff]  }
0x1301   : > { %13938 = vmatpush3.bf16.msra.mxu0 %v15097_v20  ;;  %13960 = vmatpush3.bf16.msra.mxu1 %v15098_v36  ;;  %v15111_v36 = vld [vmem:[%s17550_s24 + $0x550] sm:$0xff]  }
0x1302   : > { %13939 = vmatprep.subr.bf16.mxu0 %v15099_v21  ;;  %13961 = vmatprep.subr.bf16.mxu1 %v15100_v22  ;;  %v15112_v21 = vld [vmem:[%s17550_s24 + $0x5d0] sm:$0xff]  }
0x1305   : > { %13940 = vmatpush3.bf16.msra.mxu0 %v15101_v23  ;;  %13962 = vmatpush3.bf16.msra.mxu1 %v15102_v24 }
0x1306   : > { %13969 = vmatprep.subr.bf16.mxu0 %v15103_v48  ;;  %13991 = vmatprep.subr.bf16.mxu1 %v15104_v26  ;;  %v15113_v26 = vld [vmem:[%s17550_s24 + $0x510] sm:$0xff]  }
0x13a3   : > { %v4817_v32 = vpop.f32.mrb[60].mxu0  ;;  %v4858_v60 = vpop.f32.mrb[60].mxu1 }
0x13a4   : > { %v4818_v6 = vadd.f32 %v4817_v32, %v4543_v53  ;;  %v4859_v7 = vadd.f32 %v4858_v60, %v4551_v29  ;;  %v4819_v62 = vpop.f32.mrb[61].mxu0  ;;  %v4860_v39 = vpop.f32.mrb[61].mxu1  ;;  %v15114_v53 = vld [vmem:[%s17550_s24 + $0x590] sm:$0xff]   ;;  %v15115_v29 = vld [vmem:[%s17550_s24 + $0x558] sm:$0xff]  }
0x13a5   : > { %v4820_v15 = vadd.f32 %v4819_v62, %v4547_v30  ;;  %v4861_v43 = vadd.f32 %v4860_v39, %v4555_v31  ;;  %v4821_v41 = vpop.f32.mrb[62].mxu0  ;;  %v4862_v40 = vpop.f32.mrb[62].mxu1  ;;  %v15116_v30 = vld [vmem:[%s17550_s24 + $0x5d8] sm:$0xff]  }
0x13a6   : > { %v5111_v14 = vmax.f32 %v4818_v6, 0.0  ;;  %v5113_v42 = vmax.f32 %v4859_v7, 0.0  ;;  %v4822_v44 = vpop.f32.mrb[63].mxu0  ;;  %v4863_v63 = vpop.f32.mrb[63].mxu1  ;;  %v15117_v39 = vld [vmem:[%s17550_s24 + $0x518] sm:$0xff]   ;;  %v15119_v40 = vld [vmem:[%s17550_s24 + $0x560] sm:$0xff]  }
0x13a7   : > { %v5112_v45 = vmax.f32 %v4820_v15, 0.0  ;;  %v5114_v0 = vmax.f32 %v4861_v43, 0.0  ;;  %v15118_v15 = vld [vmem:[%s17550_s24 + $0x598] sm:$0xff]   ;;  %v15121_v63 = vld [vmem:[%s17550_s24 + $0x520] sm:$0xff]  }
0x13a8   : > { %v5127_v56 = vpack.c.bf16 %v5111_v14, %v5111_v14  ;;  %v5129_v58 = vpack.c.bf16 %v5113_v42, %v5113_v42  ;;  %v15120_v14 = vld [vmem:[%s17550_s24 + $0x5e0] sm:$0xff]   ;;  %v16491_v42 = vld [vmem:[%s17553_s19 + $0x18] sm:$0xff]  ;;  %s17581_s19 = sld [smem:[#allocation31_spill]] }
0x13a9   : > { %v5128_v46 = vpack.c.bf16 %v5112_v45, %v5112_v45  ;;  %v5130_v47 = vpack.c.bf16 %v5114_v0, %v5114_v0  ;;  %v4599_v44 = vrot.slane %v16491_v42, %v16168_v25  ;;  %v15122_v45 = vld [vmem:[%s17550_s24 + $0x5a0] sm:$0xff]   ;;  %v15123_v0 = vld [vmem:[%s17550_s24 + $0x568] sm:$0xff]  }
0x13ab   : > { %v16470_v2 = vpop.f32.mrb[64].mxu0  ;;  %v16472_v4 = vpop.f32.mrb[64].mxu1  ;;  %5949 = vmatprep.mubr.bf16.mxu0 %v5128_v46  ;;  %5989 = vmatprep.mubr.bf16.mxu1 %v5130_v47  ;;  %v15124_v46 = vld [vmem:[%s17550_s24 + $0x5e8] sm:$0xff]  }
0x13ac   : > { %v4901_v5 = vpop.f32.mrb[65].mxu0  ;;  %v4942_v8 = vpop.f32.mrb[65].mxu1  ;;  %5950 = vmatmul.mubr.bf16.vlgmr.msra.gmra.mrb[76].mxu0 %v5127_v56  ;;  %5990 = vmatmul.mubr.bf16.vlgmr.msra.gmra.mrb[76].mxu1 %v5129_v58 }
0x13ad   : > { %v4902_v9 = vadd.f32 %v4901_v5, %v4563_v49  ;;  %v4943_v10 = vadd.f32 %v4942_v8, %v4571_v50  ;;  %13970 = vmatpush3.bf16.msra.mxu0 %v15105_v54  ;;  %13992 = vmatpush3.bf16.msra.mxu1 %v15106_v55  ;;  %v4903_v11 = vpop.f32.mrb[66].mxu0  ;;  %v4944_v12 = vpop.f32.mrb[66].mxu1  ;;  %v4559_v5 = vrot.slane %v16452_v27, %v16180_v57 }
0x13ae   : > { %v4904_v19 = vpop.f32.mrb[67].mxu0  ;;  %v4945_v20 = vpop.f32.mrb[67].mxu1  ;;  %13971 = vmatprep.subr.bf16.mxu0 %v15107_v61  ;;  %13993 = vmatprep.subr.bf16.mxu1 %v15108_v1  ;;  %v15125_v61 = vld [vmem:[%s17550_s24 + $0x528] sm:$0xff]   ;;  %v4567_v8 = vrot.slane %v16452_v27, %v16168_v25  ;;  %v15127_v11 = vld [vmem:[%s17550_s24 + $0x570] sm:$0xff]  }
0x13af   : > { %v5116_v22 = vmax.f32 %v4902_v9, 0.0  ;;  %v5118_v23 = vmax.f32 %v4943_v10, 0.0  ;;  %v15126_v1 = vld [vmem:[%s17550_s24 + $0x5a8] sm:$0xff]   ;;  %v15128_v12 = vld [vmem:[%s17550_s24 + $0x5f0] sm:$0xff]   ;;  %v4900_v20 = vadd.f32 %v16470_v2, %v4559_v5  ;;  %v15135_v2 = vld [vmem:[%s17550_s24 + $0x640] sm:$0xff]  }
0x13b0   : > { %v15129_v19 = vld [vmem:[%s17550_s24 + $0x530] sm:$0xff]   ;;  %v15152_v5 = vld [vmem:[%s17550_s24 + $0x6e0] sm:$0xff]  }
0x13b1   : > { %v5132_v24 = vpack.c.bf16 %v5116_v22, %v5116_v22  ;;  %v5134_v48 = vpack.c.bf16 %v5118_v23, %v5118_v23  ;;  %13972 = vmatpush3.bf16.msra.mxu0 %v15109_v13  ;;  %13994 = vmatpush3.bf16.msra.mxu1 %v15110_v17  ;;  %v4579_v13 = vrot.slane %v16491_v42, %v16122_v37  ;;  %v15130_v27 = vld [vmem:[%s17550_s24 + $0x5b0] sm:$0xff]   ;;  %v15132_v22 = vld [vmem:[%s17550_s24 + $0x5f8] sm:$0xff]  }
0x13b2   : > { %13973 = vmatprep.subr.bf16.mxu0 %v15111_v36  ;;  %13995 = vmatprep.subr.bf16.mxu1 %v15112_v21  ;;  %v4587_v17 = vrot.slane %v16491_v42, %v16125_v38  ;;  %v4941_v36 = vadd.f32 %v16472_v4, %v4567_v8  ;;  %v15131_v21 = vld [vmem:[%s17550_s24 + $0x578] sm:$0xff]   ;;  %v15136_v4 = vld [vmem:[%s17550_s24 + $0x6c0] sm:$0xff]  }
0x13b3   : > { %v16482_v31 = vpop.f32.mrb[68].mxu0  ;;  %v16484_v32 = vpop.f32.mrb[68].mxu1  ;;  %6029 = vmatprep.mubr.bf16.mxu0 %v5132_v24  ;;  %6069 = vmatprep.mubr.bf16.mxu1 %v5134_v48  ;;  %v15133_v48 = vld [vmem:[%s17550_s24 + $0x538] sm:$0xff]   ;;  %v15153_v8 = vld [vmem:[%s17550_s24 + $0x620] sm:$0xff]  }
0x13b4   : > { %v4983_v60 = vpop.f32.mrb[69].mxu0  ;;  %v5024_v6 = vpop.f32.mrb[69].mxu1 }
0x13b5   : > { %13974 = vmatpush3.bf16.msra.mxu0 %v15113_v26  ;;  %13996 = vmatpush3.bf16.msra.mxu1 %v15114_v53  ;;  %v4985_v7 = vpop.f32.mrb[70].mxu0  ;;  %v5026_v62 = vpop.f32.mrb[70].mxu1  ;;  %v4984_v23 = vadd.f32 %v4983_v60, %v4579_v13  ;;  %v5025_v24 = vadd.f32 %v5024_v6, %v4587_v17  ;;  %v15134_v26 = vld [vmem:[%s17550_s24 + $0x5b8] sm:$0xff]   ;;  %v5115_v53 = vmax.f32 %v4900_v20, 0.0  ;;  %v15137_v60 = vld [vmem:[%s17550_s24 + $0x600] sm:$0xff]   ;;  %v4575_v13 = vrot.slane %v16491_v42, %v16113_v34  ;;  %v15158_v17 = vld [vmem:[%s17550_s24 + $0x6a8] sm:$0xff]  }
0x13b6   : > { %v4986_v43 = vpop.f32.mrb[71].mxu0  ;;  %v5027_v41 = vpop.f32.mrb[71].mxu1  ;;  %13975 = vmatprep.subr.bf16.mxu0 %v15115_v29  ;;  %13997 = vmatprep.subr.bf16.mxu1 %v15116_v30  ;;  %v5117_v29 = vmax.f32 %v4941_v36, 0.0  ;;  %v15160_v20 = vld [vmem:[%s17550_s24 + $0x6f0] sm:$0xff]   ;;  %v4595_v36 = vrot.slane %v16491_v42, %v16136_v51 }
0x13b7   : > { %v5120_v30 = vmax.f32 %v4984_v23, 0.0  ;;  %v5122_v7 = vmax.f32 %v5025_v24, 0.0  ;;  %v5131_v6 = vpack.c.bf16 %v5115_v53, %v5115_v53  ;;  %v15139_v43 = vld [vmem:[%s17550_s24 + $0x648] sm:$0xff]   ;;  %v4982_v23 = vadd.f32 %v16482_v31, %v4575_v13  ;;  %v15162_v24 = vld [vmem:[%s17550_s24 + $0x6b0] sm:$0xff]   ;;  %v15164_v53 = vld [vmem:[%s17550_s24 + $0x6f8] sm:$0xff]  }
0x13b8   : > { %v5133_v62 = vpack.c.bf16 %v5117_v29, %v5117_v29  ;;  %v15140_v41 = vld [vmem:[%s17550_s24 + $0x6c8] sm:$0xff]   ;;  %v15166_v31 = vld [vmem:[%s17550_s24 + $0x6b8] sm:$0xff]  }
0x13b9   : > { %13976 = vmatpush3.bf16.msra.mxu0 %v15117_v39  ;;  %13998 = vmatpush3.bf16.msra.mxu1 %v15118_v15  ;;  %v15138_v39 = vld [vmem:[%s17550_s24 + $0x680] sm:$0xff]   ;;  %v5136_v15 = vpack.c.bf16 %v5120_v30, %v5120_v30  ;;  %v5119_v30 = vmax.f32 %v4982_v23, 0.0  ;;  %v15189_v13 = vld [vmem:[%s17550_s24 + $0x728] sm:$0xff]   ;;  %v15195_v23 = vld [vmem:[%s17550_s24 + $0x778] sm:$0xff]  }
0x13ba   : > { %13977 = vmatprep.subr.bf16.mxu0 %v15119_v40  ;;  %13999 = vmatprep.subr.bf16.mxu1 %v15120_v14  ;;  %v5138_v40 = vpack.c.bf16 %v5122_v7, %v5122_v7  ;;  %v15141_v14 = vld [vmem:[%s17550_s24 + $0x608] sm:$0xff]   ;;  %v15167_v7 = vld [vmem:[%s17550_s24 + $0x740] sm:$0xff]  }
0x13bb   : > { %v16499_v47 = vpop.f32.mrb[72].mxu0  ;;  %v5104_v49 = vpop.f32.mrb[72].mxu1 }
0x13bc   : > { %v16501_v50 = vadd.f32 %v5104_v49, %v4599_v44  ;;  %v16503_v54 = vpop.f32.mrb[73].mxu0  ;;  %v16505_v55 = vpop.f32.mrb[73].mxu1  ;;  %v15142_v44 = vld [vmem:[%s17550_s24 + $0x688] sm:$0xff]   ;;  %v15147_v49 = vld [vmem:[%s17550_s24 + $0x658] sm:$0xff]  }
0x13bd   : > { %13978 = vmatpush3.bf16.msra.mxu0 %v15121_v63  ;;  %14000 = vmatpush3.bf16.msra.mxu1 %v15122_v45  ;;  %v5067_v56 = vpop.f32.mrb[74].mxu0  ;;  %v5108_v58 = vpop.f32.mrb[74].mxu1  ;;  %v15143_v63 = vld [vmem:[%s17550_s24 + $0x650] sm:$0xff]   ;;  %v5066_v29 = vadd.f32 %v16503_v54, %v4595_v36  ;;  %v15169_v54 = vld [vmem:[%s17550_s24 + $0x700] sm:$0xff]  }
0x13be   : > { %v5068_v9 = vpop.f32.mrb[75].mxu0  ;;  %v5109_v10 = vpop.f32.mrb[75].mxu1  ;;  %13979 = vmatprep.subr.bf16.mxu0 %v15123_v0  ;;  %14001 = vmatprep.subr.bf16.mxu1 %v15124_v46  ;;  %v15144_v45 = vld [vmem:[%s17550_s24 + $0x6d0] sm:$0xff]   ;;  %v15148_v56 = vld [vmem:[%s17550_s24 + $0x6d8] sm:$0xff]  }
0x13bf   : > { %v15145_v0 = vld [vmem:[%s17550_s24 + $0x610] sm:$0xff]   ;;  %v15149_v58 = vld [vmem:[%s17550_s24 + $0x618] sm:$0xff]   ;;  %v15154_v9 = vld [vmem:[%s17550_s24 + $0x6a0] sm:$0xff]  }
0x13c0   : > { %v15146_v46 = vld [vmem:[%s17550_s24 + $0x690] sm:$0xff]   ;;  %v15155_v10 = vld [vmem:[%s17550_s24 + $0x668] sm:$0xff]  }
0x13c1   : > { %13980 = vmatpush3.bf16.msra.mxu0 %v15125_v61  ;;  %14002 = vmatpush3.bf16.msra.mxu1 %v15126_v1  ;;  %v15150_v61 = vld [vmem:[%s17550_s24 + $0x698] sm:$0xff]   ;;  %v15151_v1 = vld [vmem:[%s17550_s24 + $0x660] sm:$0xff]   ;;  %v15193_v36 = vld [vmem:[%s17550_s24 + $0x730] sm:$0xff]  }
0x13c2   : > { %13981 = vmatprep.subr.bf16.mxu0 %v15127_v11  ;;  %14003 = vmatprep.subr.bf16.mxu1 %v15128_v12  ;;  %v15156_v11 = vld [vmem:[%s17550_s24 + $0x6e8] sm:$0xff]  }
0x13c3   : > { %v15157_v12 = vld [vmem:[%s17550_s24 + $0x628] sm:$0xff]  }
0x13c5   : > { %13982 = vmatpush3.bf16.msra.mxu0 %v15129_v19  ;;  %14004 = vmatpush3.bf16.msra.mxu1 %v15130_v27  ;;  %v15159_v19 = vld [vmem:[%s17550_s24 + $0x670] sm:$0xff]   ;;  %v4583_v27 = vrot.slane %v16491_v42, %v16116_v35 }
0x13c6   : > { %13983 = vmatprep.subr.bf16.mxu0 %v15131_v21  ;;  %14005 = vmatprep.subr.bf16.mxu1 %v15132_v22  ;;  %v4603_v21 = vrot.slane %v16491_v42, %v16139_v52  ;;  %v15161_v22 = vld [vmem:[%s17550_s24 + $0x630] sm:$0xff]  }
0x13c9   : > { %13984 = vmatpush3.bf16.msra.mxu0 %v15133_v48  ;;  %14006 = vmatpush3.bf16.msra.mxu1 %v15134_v26  ;;  %v15163_v48 = vld [vmem:[%s17550_s24 + $0x678] sm:$0xff]   ;;  %v5023_v26 = vadd.f32 %v16484_v32, %v4583_v27  ;;  %v15168_v32 = vld [vmem:[%s17550_s24 + $0x7c0] sm:$0xff]   ;;  %v15191_v27 = vld [vmem:[%s17550_s24 + $0x770] sm:$0xff]  }
0x13ca   : > { %14013 = vmatprep.subr.bf16.mxu0 %v15135_v2  ;;  %14035 = vmatprep.subr.bf16.mxu1 %v15136_v4  ;;  %v5107_v2 = vadd.f32 %v16505_v55, %v4603_v21  ;;  %v15165_v4 = vld [vmem:[%s17550_s24 + $0x638] sm:$0xff]   ;;  %v15170_v55 = vld [vmem:[%s17550_s24 + $0x780] sm:$0xff]  }
0x13cc   : > { %6030 = vmatmul.mubr.bf16.vlgmr.msra.gmra.mrb[80].mxu0 %v5131_v6  ;;  %6070 = vmatmul.mubr.bf16.vlgmr.msra.gmra.mrb[80].mxu1 %v5133_v62  ;;  %v5124_v6 = vmax.f32 %v5066_v29, 0.0  ;;  %v5126_v62 = vmax.f32 %v5107_v2, 0.0  ;;  %v15199_v29 = vld [vmem:[%s17575_s3] sm:$0xff]  }
0x13cd   : > { %14014 = vmatpush3.bf16.msra.mxu0 %v15137_v60  ;;  %6109 = vmatprep.mubr.bf16.mxu0 %v5136_v15  ;;  %v5121_v60 = vmax.f32 %v5023_v26, 0.0  ;;  %v15198_v26 = vld [vmem:[%s17550_s24 + $0x7b8] sm:$0xff]  }
0x13ce   : > { %14036 = vmatpush3.bf16.msra.mxu1 %v15138_v39  ;;  %6149 = vmatprep.mubr.bf16.mxu1 %v5138_v40  ;;  %v5135_v39 = vpack.c.bf16 %v5119_v30, %v5119_v30  ;;  %v15172_v40 = vld [vmem:[%s17550_s24 + $0x7c8] sm:$0xff]  }
0x13cf   : > { %14015 = vmatprep.subr.bf16.mxu0 %v15139_v43  ;;  %14037 = vmatprep.subr.bf16.mxu1 %v15140_v41  ;;  %v5137_v15 = vpack.c.bf16 %v5121_v60, %v5121_v60  ;;  %v15171_v43 = vld [vmem:[%s17550_s24 + $0x748] sm:$0xff]   ;;  %v5140_v41 = vpack.c.bf16 %v5124_v6, %v5124_v6 }
0x13d1   : > { %14016 = vmatpush3.bf16.msra.mxu0 %v15141_v14  ;;  %v5142_v14 = vpack.c.bf16 %v5126_v62, %v5126_v62 }
0x13d2   : > { %14038 = vmatpush3.bf16.msra.mxu1 %v15142_v44  ;;  %14017 = vmatprep.subr.bf16.mxu0 %v15143_v63  ;;  %v15173_v44 = vld [vmem:[%s17550_s24 + $0x708] sm:$0xff]  }
0x13d3   : > { %14039 = vmatprep.subr.bf16.mxu1 %v15144_v45  ;;  %v15174_v63 = vld [vmem:[%s17550_s24 + $0x788] sm:$0xff]   ;;  %v15175_v45 = vld [vmem:[%s17550_s24 + $0x750] sm:$0xff]  }
0x13d5   : > { %14018 = vmatpush3.bf16.msra.mxu0 %v15145_v0  ;;  %v15176_v0 = vld [vmem:[%s17550_s24 + $0x7d0] sm:$0xff]  }
0x13d6   : > { %14040 = vmatpush3.bf16.msra.mxu1 %v15146_v46  ;;  %14019 = vmatprep.subr.bf16.mxu0 %v15147_v49  ;;  %v15177_v46 = vld [vmem:[%s17550_s24 + $0x710] sm:$0xff]  }
0x13d7   : > { %14041 = vmatprep.subr.bf16.mxu1 %v15148_v56  ;;  %v15178_v49 = vld [vmem:[%s17550_s24 + $0x790] sm:$0xff]   ;;  %v15179_v56 = vld [vmem:[%s17550_s24 + $0x758] sm:$0xff]  }
0x13d9   : > { %14020 = vmatpush3.bf16.msra.mxu0 %v15149_v58  ;;  %v15180_v58 = vld [vmem:[%s17550_s24 + $0x7d8] sm:$0xff]  }
0x13da   : > { %14042 = vmatpush3.bf16.msra.mxu1 %v15150_v61  ;;  %14021 = vmatprep.subr.bf16.mxu0 %v15151_v1  ;;  %v15181_v61 = vld [vmem:[%s17550_s24 + $0x718] sm:$0xff]  }
0x13db   : > { %14043 = vmatprep.subr.bf16.mxu1 %v15152_v5  ;;  %v15182_v1 = vld [vmem:[%s17550_s24 + $0x798] sm:$0xff]   ;;  %v15183_v5 = vld [vmem:[%s17550_s24 + $0x760] sm:$0xff]  }
0x13dd   : > { %14022 = vmatpush3.bf16.msra.mxu0 %v15153_v8  ;;  %v15184_v8 = vld [vmem:[%s17550_s24 + $0x7e0] sm:$0xff]  }
0x13de   : > { %14044 = vmatpush3.bf16.msra.mxu1 %v15154_v9  ;;  %14023 = vmatprep.subr.bf16.mxu0 %v15155_v10  ;;  %v15185_v9 = vld [vmem:[%s17550_s24 + $0x720] sm:$0xff]  }
0x13df   : > { %14045 = vmatprep.subr.bf16.mxu1 %v15156_v11  ;;  %v15186_v10 = vld [vmem:[%s17550_s24 + $0x7a0] sm:$0xff]   ;;  %v15187_v11 = vld [vmem:[%s17550_s24 + $0x768] sm:$0xff]  }
0x13e1   : > { %14024 = vmatpush3.bf16.msra.mxu0 %v15157_v12  ;;  %v15188_v12 = vld [vmem:[%s17550_s24 + $0x7e8] sm:$0xff]  }
0x13e2   : > { %14046 = vmatpush3.bf16.msra.mxu1 %v15158_v17  ;;  %14025 = vmatprep.subr.bf16.mxu0 %v15159_v19  ;;  %v4591_v17 = vrot.slane %v16491_v42, %v16180_v57  ;;  %v15190_v19 = vld [vmem:[%s17550_s24 + $0x7a8] sm:$0xff]   ;;  %v15197_v42 = vld [vmem:[%s17550_s24 + $0x738] sm:$0xff]  }
0x13e3   : > { %14047 = vmatprep.subr.bf16.mxu1 %v15160_v20  ;;  %v15192_v20 = vld [vmem:[%s17550_s24 + $0x7f0] sm:$0xff]  }
0x13e4   : > { %v5064_v21 = vadd.f32 %v16499_v47, %v4591_v17 }
0x13e5   : > { %14026 = vmatpush3.bf16.msra.mxu0 %v15161_v22  ;;  %v15194_v22 = vld [vmem:[%s17550_s24 + $0x7b0] sm:$0xff]  }
0x13e6   : > { %14048 = vmatpush3.bf16.msra.mxu1 %v15162_v24  ;;  %14027 = vmatprep.subr.bf16.mxu0 %v15163_v48  ;;  %v15196_v24 = vld [vmem:[%s17550_s24 + $0x7f8] sm:$0xff]   ;;  %v5123_v48 = vmax.f32 %v5064_v21, 0.0  ;;  %s17585_s24 = sld [smem:[#allocation27_spill]] }
0x13e7   : > { %14049 = vmatprep.subr.bf16.mxu1 %v15164_v53  ;;  %v5125_v53 = vmax.f32 %v16501_v50, 0.0  ;;  %v6616_v50 = vpack.c.bf16 %v15969_v28, %v15969_v28 }
0x13e8   : > { %v5139_v47 = vpack.c.bf16 %v5123_v48, %v5123_v48 }
0x13e9   : > { %14028 = vmatpush3.bf16.msra.mxu0 %v15165_v4  ;;  %v5141_v2 = vpack.c.bf16 %v5125_v53, %v5125_v53  ;;  %v15200_v4 = vld [vmem:[%s17575_s3 + $0x8] sm:$0xff]  }
0x13ea   : > { %14050 = vmatpush3.bf16.msra.mxu1 %v15166_v31  ;;  %14057 = vmatprep.subr.bf16.mxu0 %v15167_v7  ;;  %v12832_v7 = vld [vmem:[%s17547_s30 + $0x1] ss:$0 sm:$0xff]  ;;  %s17590_s30 = sld [smem:[#allocation34_spill]] }
0x13eb   : > { %14079 = vmatprep.subr.bf16.mxu1 %v15168_v32 }
0x13ec   : > { %6110 = vmatmul.mubr.bf16.vlgmr.msra.gmra.mrb[84].mxu0 %v5135_v39 }
0x13ed   : > { %6150 = vmatmul.mubr.bf16.vlgmr.msra.gmra.mrb[84].mxu1 %v5137_v15  ;;  %14058 = vmatpush3.bf16.msra.mxu0 %v15169_v54 }
0x13ee   : > { %6189 = vmatprep.mubr.bf16.mxu0 %v5140_v41  ;;  %14080 = vmatpush3.bf16.msra.mxu1 %v15170_v55 }
0x13ef   : > { %6229 = vmatprep.mubr.bf16.mxu1 %v5142_v14  ;;  %14059 = vmatprep.subr.bf16.mxu0 %v15171_v43 }
0x13f0   : > { %14081 = vmatprep.subr.bf16.mxu1 %v15172_v40 }
0x13f1   : > { %14060 = vmatpush3.bf16.msra.mxu0 %v15173_v44 }
0x13f2   : > { %14082 = vmatpush3.bf16.msra.mxu1 %v15174_v63  ;;  %14061 = vmatprep.subr.bf16.mxu0 %v15175_v45 }
0x13f3   : > { %14083 = vmatprep.subr.bf16.mxu1 %v15176_v0 }
0x13f5   : > { %14062 = vmatpush3.bf16.msra.mxu0 %v15177_v46 }
0x13f6   : > { %14084 = vmatpush3.bf16.msra.mxu1 %v15178_v49  ;;  %14063 = vmatprep.subr.bf16.mxu0 %v15179_v56 }
0x13f7   : > { %14085 = vmatprep.subr.bf16.mxu1 %v15180_v58 }
0x13f9   : > { %14064 = vmatpush3.bf16.msra.mxu0 %v15181_v61 }
0x13fa   : > { %14086 = vmatpush3.bf16.msra.mxu1 %v15182_v1  ;;  %14065 = vmatprep.subr.bf16.mxu0 %v15183_v5 }
0x13fb   : > { %14087 = vmatprep.subr.bf16.mxu1 %v15184_v8 }
0x13fd   : > { %14066 = vmatpush3.bf16.msra.mxu0 %v15185_v9 }
0x13fe   : > { %14088 = vmatpush3.bf16.msra.mxu1 %v15186_v10  ;;  %14067 = vmatprep.subr.bf16.mxu0 %v15187_v11 }
0x13ff   : > { %14089 = vmatprep.subr.bf16.mxu1 %v15188_v12 }
0x1401   : > { %14068 = vmatpush3.bf16.msra.mxu0 %v15189_v13 }
0x1402   : > { %14090 = vmatpush3.bf16.msra.mxu1 %v15190_v19  ;;  %14069 = vmatprep.subr.bf16.mxu0 %v15191_v27 }
0x1403   : > { %14091 = vmatprep.subr.bf16.mxu1 %v15192_v20 }
0x1405   : > { %14070 = vmatpush3.bf16.msra.mxu0 %v15193_v36 }
0x1406   : > { %14092 = vmatpush3.bf16.msra.mxu1 %v15194_v22  ;;  %14071 = vmatprep.subr.bf16.mxu0 %v15195_v23 }
0x1407   : > { %14093 = vmatprep.subr.bf16.mxu1 %v15196_v24 }
0x1409   : > { %14072 = vmatpush3.bf16.msra.mxu0 %v15197_v42 }
0x140a   : > { %14094 = vmatpush3.bf16.msra.mxu1 %v15198_v26  ;;  %14636 = vmatprep.subr.bf16.mxu0 %v15657_v16 }
0x140b   : > { %14644 = vmatprep.subr.bf16.mxu1 %v15657_v16 }
0x140c   : > { %6190 = vmatmul.mubr.bf16.vlgmr.msra.gmra.mrb[88].mxu0 %v5139_v47 }
0x140d   : > { %6230 = vmatmul.mubr.bf16.vlgmr.msra.gmra.mrb[88].mxu1 %v5141_v2  ;;  %14637 = vmatpush3.bf16.msra.mxu0 %v15199_v29 }
0x140e   : > { %14638 = vmatprep.subr.bf16.mxu0 %v15657_v16  ;;  %14640 = vmatprep.mubr.msk.bf16.mxu0 %vm15656_vm0, %v15657_v16 }
0x140f   : > { %14646 = vmatprep.mubr.msk.bf16.mxu1 %vm15656_vm0, %v15657_v16 }
0x1411   : > { %14639 = vmatpush3.bf16.msra.mxu0 %v15200_v4 }
0x1412   : > { %14650 = vmatprep.subr.bf16.mxu0 %v15657_v16 }
0x1414   : > { %14641 = vmatmul.mubr.msk.bf16.vlgmr.msra.gmra.mrb[92].mxu0 %vm1747_vm4, %v6616_v50  ;;  %v12965_v50 = vld [vmem:[%s17576_s8] ss:$0 sm:$0xff] }
0x1415   : > { %14652 = vmatprep.mubr.msk.bf16.mxu0 %vm15656_vm0, %v15657_v16 }
0x147f   : > { %v13941_v30 = vpop.f32.mrb[76].mxu0  ;;  %v13963_v31 = vpop.f32.mrb[76].mxu1 }
0x1480   : > { %v13942_v60 = vpop.f32.mrb[77].mxu0  ;;  %v13964_v32 = vpop.f32.mrb[77].mxu1 }
0x1481   : > { %v13943_v6 = vadd.f32 %v13942_v60, %v13941_v30  ;;  %v13965_v62 = vadd.f32 %v13964_v32, %v13963_v31  ;;  %v13944_v54 = vpop.f32.mrb[78].mxu0  ;;  %v13966_v39 = vpop.f32.mrb[78].mxu1 }
0x1482   : > { %v13945_v55 = vpop.f32.mrb[79].mxu0  ;;  %v13967_v15 = vpop.f32.mrb[79].mxu1 }
0x1483   : > { %v5952_v43 = vadd.f32 %v13943_v6, %v12832_v7 }
0x1485   : > { %v5992_v41 = vadd.f32 %v13965_v62, %v5952_v43  ;;  %v16640_v43 = vsel %vm6680_vm9, -1e+30, %v15657_v16 }
0x149f   : > { %v13985_v40 = vpop.f32.mrb[80].mxu0  ;;  %v14007_v14 = vpop.f32.mrb[80].mxu1 }
0x14a0   : > { %v13986_v44 = vpop.f32.mrb[81].mxu0  ;;  %v14008_v63 = vpop.f32.mrb[81].mxu1 }
0x14a1   : > { %v13987_v45 = vadd.f32 %v13986_v44, %v13985_v40  ;;  %v14009_v0 = vadd.f32 %v14008_v63, %v14007_v14  ;;  %v13988_v46 = vpop.f32.mrb[82].mxu0  ;;  %v14010_v49 = vpop.f32.mrb[82].mxu1 }
0x14a2   : > { %v13989_v56 = vpop.f32.mrb[83].mxu0  ;;  %v14011_v58 = vpop.f32.mrb[83].mxu1 }
0x14a3   : > { %v6032_v61 = vadd.f32 %v13987_v45, %v5992_v41 }
0x14a5   : > { %v6072_v1 = vadd.f32 %v14009_v0, %v6032_v61 }
0x14bf   : > { %v14029_v5 = vpop.f32.mrb[84].mxu0 }
0x14c0   : > { %v14051_v8 = vpop.f32.mrb[84].mxu1  ;;  %v14030_v9 = vpop.f32.mrb[85].mxu0 }
0x14c1   : > { %v14031_v10 = vadd.f32 %v14030_v9, %v14029_v5  ;;  %v14052_v11 = vpop.f32.mrb[85].mxu1  ;;  %v14032_v12 = vpop.f32.mrb[86].mxu0 }
0x14c2   : > { %v14053_v13 = vadd.f32 %v14052_v11, %v14051_v8  ;;  %v14054_v17 = vpop.f32.mrb[86].mxu1  ;;  %v14033_v19 = vpop.f32.mrb[87].mxu0 }
0x14c3   : > { %v6112_v27 = vadd.f32 %v14031_v10, %v6072_v1  ;;  %v14055_v20 = vpop.f32.mrb[87].mxu1 }
0x14c5   : > { %v6152_v36 = vadd.f32 %v14053_v13, %v6112_v27 }
0x14df   : > { %v14073_v21 = vpop.f32.mrb[88].mxu0 }
0x14e0   : > { %v14095_v22 = vpop.f32.mrb[88].mxu1  ;;  %v14074_v23 = vpop.f32.mrb[89].mxu0 }
0x14e1   : > { %v14075_v24 = vadd.f32 %v14074_v23, %v14073_v21  ;;  %v14096_v42 = vpop.f32.mrb[89].mxu1  ;;  %v14076_v48 = vpop.f32.mrb[90].mxu0 }
0x14e2   : > { %v14097_v26 = vadd.f32 %v14096_v42, %v14095_v22  ;;  %v14098_v53 = vpop.f32.mrb[90].mxu1  ;;  %v14077_v29 = vpop.f32.mrb[91].mxu0 }
0x14e3   : > { %v6192_v47 = vadd.f32 %v14075_v24, %v6152_v36  ;;  %v14099_v2 = vpop.f32.mrb[91].mxu1  ;;  %v15201_v29 = vld [vmem:[%s17579_s14] sm:$0xff]  }
0x14e5   : > { %v6232_v4 = vadd.f32 %v14097_v26, %v6192_v47  ;;  %v15202_v47 = vld [vmem:[%s17579_s14 + $0x8] sm:$0xff]  }
0x14e7   : > { %v6672_v30 = vpop.f32.mrb[92].mxu0  ;;  %v6237_v17 = vadd.f32 %v6232_v4, %v16373_v59 }
0x14e8   : > { %v6673_v31 = vadd.f32 %v12965_v50, %v6672_v30  ;;  %v14642_v7 = vpop.f32.mrb[93].mxu0 }
0x14e9   : > { %v6675_v60 = vpop.f32.mrb[94].mxu0  ;;  %v6238_v19 = vsel %vm1747_vm4, %v6237_v17, 0.0 }
0x14ea   : > { %v6682_v32 = vpack.c.bf16 %v6673_v31, %v6673_v31  ;;  %v14643_v6 = vpop.f32.mrb[95].mxu0 }
0x14ec   : > { %6795 = vrot.lane.b32.xlu1 %v6682_v32, %s17577_s9  ;;  %6684 = vrot.lane.b32.xlu0 %v6682_v32, %s17578_s13 }
0x14f0   : > { %6793 = vrot.lane.b32.xlu0 %v6682_v32, %s17571_s23 }
0x155e   : > { %v6685_v62 = vpop.permute.xlu0 %6684  ;;  %v6796_v39 = vpop.permute.xlu1 %6795 }
0x155f   : > { %v6690_v54 = vsel %vm1795_vm5, %v6685_v62, 0  ;;  %v6801_v55 = vsel %vm1795_vm5, %v6796_v39, 0 }
0x1560   : > { %14645 = vmatpush3.bf16.xpose.msra.mxu1 %v6690_v54 }
0x1561   : > { %14656 = vmatprep.subr.bf16.mxu1 %v15657_v16 }
0x1562   : > { %v6794_v15 = vpop.permute.xlu0 %6793 }
0x1567   : > { %14647 = vmatmul.mubr.msk.bf16.vlgmr.msra.gmra.mrb[92].mxu1 %vm1795_vm5, %v6682_v32 }
0x1568   : > { %14657 = vmatpush3.bf16.xpose.msra.mxu1 %v6801_v55  ;;  %14658 = vmatprep.mubr.msk.bf16.mxu1 %vm15656_vm0, %v15657_v16 }
0x1569   : > { %14668 = vmatprep.subr.bf16.mxu1 %v15657_v16 }
0x156f   : > { %14659 = vmatmul.mubr.msk.bf16.vlgmr.msra.gmra.mrb[96].mxu1 %vm1795_vm5, %v6794_v15 }
0x1570   : > { %14672 = vmatprep.mubr.msk.bf16.mxu1 %vm15656_vm0, %v15657_v16  ;;  %14669 = vmatpush3.bf16.msra.mxu1 %v15201_v29 }
0x1571   : > { %14670 = vmatprep.subr.bf16.mxu1 %v15657_v16 }
0x1574   : > { %14671 = vmatpush3.bf16.msra.mxu1 %v15202_v47 }
0x1575   : > { %14684 = vmatprep.subr.bf16.mxu1 %v15657_v16 }
0x163a   : > { %v6726_v41 = vpop.f32.mrb[92].mxu1 }
0x163b   : > { %v6727_v40 = vadd.f32 %v6726_v41, %v16640_v43  ;;  %v14648_v14 = vpop.f32.mrb[93].mxu1 }
0x163c   : > { %v6729_v44 = vpop.f32.mrb[94].mxu1 }
0x163d   : > { %v14649_v63 = vpop.f32.mrb[95].mxu1  ;;  %v6732_v45 = vsel %vm1842_vm6, %v6727_v40, -inf }
0x163e   : > { %6733 = vmax.xlane.f32.xlu1 %v6732_v45 }
0x1642   : > { %v6837_v0 = vpop.f32.mrb[96].mxu1 }
0x1643   : > { %v6838_v46 = vadd.f32 %v6837_v0, %v16640_v43  ;;  %v14660_v49 = vpop.f32.mrb[97].mxu1  ;;  %v12961_v0 = vld [vmem:[%s17552_s6 + $0x1] ss:$0 sm:$0xff]  ;;  %s17583_s6 = sld [smem:[#allocation22_spill]] }
0x1644   : > { %v6840_v56 = vpop.f32.mrb[98].mxu1  ;;  %v12962_v49 = vld [vmem:[%s17570_s2 + $0x1] ss:$0 sm:$0xff]  ;;  %s17582_s2 = sld [smem:[#allocation21_spill]] }
0x1645   : > { %v14661_v58 = vpop.f32.mrb[99].mxu1  ;;  %v6843_v18 = vsel %vm1842_vm6, %v6838_v46, -inf }
0x1646   : > { %6844 = vmax.xlane.f32.xlu0 %v6843_v18 }
0x1649   : > { %v12964_v47 = vld [vmem:[%s17583_s6] ss:$0 sm:$0xff]  ;;  %s17588_s6 = sld [smem:[#allocation30_spill]] }
0x16cb   : > { %v6734_v33 = vpop.xlane.xlu1 %6733 }
0x16cc   : > { %v6735_v61 = vsub.f32 %v6727_v40, %v6734_v33  ;;  %v12973_v33 = vld [vmem:[%s17580_s17] ss:$0 sm:$0xff] }
0x16ce   : > { %v6736_v1 = vmul.f32 1.442695, %v6735_v61 }
0x16d0   : > { %15499 = vpow2.f32 %v6736_v1 }
0x16d3   : > { %v6845_v5 = vpop.xlane.xlu0 %6844 }
0x16d4   : > { %v6846_v8 = vsub.f32 %v6838_v46, %v6845_v5 }
0x16d6   : > { %v6847_v9 = vmul.f32 1.442695, %v6846_v8 }
0x16d8   : > { %15501 = vpow2.f32 %v6847_v9 }
0x16da   : > { %v15500_v10 = vpop.eup %15499 }
0x16db   : > { %v6738_v11 = vsel %vm1842_vm6, %v15500_v10, 0.0 }
0x16dc   : > { %6739 = vadd.xlane.f32.xlu0 %v6738_v11 }
0x16e2   : > { %v15502_v12 = vpop.eup %15501 }
0x16e3   : > { %v6849_v13 = vsel %vm1842_vm6, %v15502_v12, 0.0 }
0x16e4   : > { %6850 = vadd.xlane.f32.xlu1 %v6849_v13 }
0x16f2   : > { %6744 = vrot.lane.b32.xlu0 %v6682_v32, %s17572_s16 }
0x16f5   : > { %6855 = vrot.lane.b32.xlu1 %v6682_v32, %s17573_s22 }
0x1711   : > { %6239 = vadd.xlane.f32.xlu0 %v6238_v19 }
0x1769   : > { %v6740_v27 = vpop.xlane.xlu0 %6739 }
0x176a   : > { %15503 = vrcp.f32 %v6740_v27 }
0x176d   : > { %v6745_v20 = vpop.permute.xlu0 %6744 }
0x176e   : > { %v6750_v36 = vsel %vm1860_vm7, %v6745_v20, 0  ;;  %v15203_v20 = vld [vmem:[%s17581_s19] sm:$0xff]  }
0x176f   : > { %14651 = vmatpush3.bf16.msra.mxu0 %v6750_v36  ;;  %v15204_v36 = vld [vmem:[%s17581_s19 + $0x8] sm:$0xff]  }
0x1770   : > { %14662 = vmatprep.subr.bf16.mxu0 %v15657_v16 }
0x1771   : > { %v6851_v21 = vpop.xlane.xlu1 %6850 }
0x1772   : > { %15505 = vrcp.f32 %v6851_v21 }
0x1774   : > { %v15504_v22 = vpop.eup %15503 }
0x1775   : > { %v6742_v23 = vmul.f32 %v15504_v22, %v15500_v10  ;;  %v6856_v24 = vpop.permute.xlu1 %6855 }
0x1776   : > { %v6861_v59 = vsel %vm1860_vm7, %v6856_v24, 0 }
0x1777   : > { %v6743_v42 = vpack.c.bf16 %v6742_v23, %v6742_v23 }
0x1779   : > { %14653 = vmatmul.mubr.msk.bf16.vlgmr.msra.gmra.mrb[96].mxu0 %vm1842_vm6, %v6743_v42 }
0x177a   : > { %14663 = vmatpush3.bf16.msra.mxu0 %v6861_v59  ;;  %14664 = vmatprep.mubr.msk.bf16.mxu0 %vm15656_vm0, %v15657_v16 }
0x177b   : > { %14676 = vmatprep.subr.bf16.mxu0 %v15657_v16 }
0x177c   : > { %v15506_v48 = vpop.eup %15505 }
0x177d   : > { %v6853_v26 = vmul.f32 %v15506_v48, %v15502_v12 }
0x177f   : > { %v6854_v53 = vpack.c.bf16 %v6853_v26, %v6853_v26 }
0x1781   : > { %14665 = vmatmul.mubr.msk.bf16.vlgmr.msra.gmra.mrb[100].mxu0 %vm1842_vm6, %v6854_v53  ;;  %v12963_v53 = vld [vmem:[%s17582_s2] ss:$0 sm:$0xff]  ;;  %s17587_s2 = sld [smem:[#allocation32_spill]] }
0x1782   : > { %14680 = vmatprep.mubr.msk.bf16.mxu0 %vm15656_vm0, %v15657_v16 }
0x179e   : > { %v6240_v6 = vpop.xlane.xlu0 %6239 }
0x179f   : > { %v6241_v62 = vmul.f32 0.03125, %v6240_v6 }
0x17a1   : > { %v6242_v54 = vsub.f32 %v6237_v17, %v6241_v62  ;;  %v12977_v62 = vld [vmem:[%s17585_s24] ss:$0 sm:$0xff] }
0x17a3   : > { %v6243_v39 = vmul.f32 %v6242_v54, %v6242_v54 }
0x17a5   : > { %v6244_v55 = vsel %vm1747_vm4, %v6243_v39, 0.0  ;;  %v12978_v39 = vld [vmem:[%s17586_s25] ss:$0 sm:$0xff] }
0x184c   : > { %v6786_v2 = vpop.f32.mrb[96].mxu0 }
0x184d   : > { %6792 = vst.msk [vmem:[#allocation2] sm:$0xff] %vm1795_vm5, %v6786_v2  ;;  %v14654_v4 = vpop.f32.mrb[97].mxu0 }
0x184e   : > { %v6789_v50 = vpop.f32.mrb[98].mxu0 }
0x184f   : > { %v14655_v30 = vpop.f32.mrb[99].mxu0 }
0x1850   : > { %v15205_v30 = vld [vmem:[%s17584_s21] sm:$0xff]  }
0x1851   : > { %14677 = vmatpush3.bf16.msra.mxu0 %v15205_v30 }
0x1852   : > { %14678 = vmatprep.subr.bf16.mxu0 %v15657_v16 }
0x1854   : > { %v6897_v31 = vpop.f32.mrb[100].mxu0 }
0x1855   : > { %6904 = vrot.lane.b32.xlu1 %v6897_v31, %s17574_s5  ;;  %v14666_v7 = vpop.f32.mrb[101].mxu0  ;;  %v15206_v31 = vld [vmem:[%s17584_s21 + $0x8] sm:$0xff]  }
0x1856   : > { %v6900_v60 = vpop.f32.mrb[102].mxu0  ;;  %14679 = vmatpush3.bf16.msra.mxu0 %v15206_v31 }
0x1857   : > { %v14667_v32 = vpop.f32.mrb[103].mxu0  ;;  %14692 = vmatprep.subr.bf16.mxu0 %v15657_v16 }
0x1879   : > { %6245 = vadd.xlane.f32.xlu1 %v6244_v55 }
0x18c7   : > { %v6905_v15 = vpop.permute.xlu1 %6904 }
0x18c8   : > { %6907 = vst.msk [vmem:[#allocation2] sm:$0xff] %vm2019_vm8, %v6905_v15 }
0x18cf   : > { %v6908_v41 = vld [vmem:[#allocation2] sm:$0xff] }
0x18d0   : > { %v6909_v40 = vpack.c.bf16 %v6908_v41, %v6908_v41 }
0x18d2   : > { %14673 = vmatmul.mubr.msk.bf16.vlgmr.msra.gmra.mrb[100].mxu1 %vm1747_vm4, %v6909_v40  ;;  %v12983_v40 = vld [vmem:[%s17587_s2] ss:$0 sm:$0xff] }
0x18d3   : > { %14688 = vmatprep.mubr.msk.bf16.mxu1 %vm15656_vm0, %v15657_v16  ;;  %14685 = vmatpush3.bf16.msra.mxu1 %v15203_v20 }
0x18d4   : > { %14686 = vmatprep.subr.bf16.mxu1 %v15657_v16 }
0x18d7   : > { %14687 = vmatpush3.bf16.msra.mxu1 %v15204_v36 }
0x18d8   : > { %14698 = vmatprep.subr.bf16.mxu1 %v15657_v16 }
0x1906   : > { %v6246_v14 = vpop.xlane.xlu1 %6245 }
0x1907   : > { %v6247_v44 = vmul.f32 0.03125, %v6246_v14 }
0x1909   : > { %v6248_v63 = vadd.f32 1e-05, %v6247_v44 }
0x190b   : > { %15507 = vrsqrt.f32 %v6248_v63 }
0x1915   : > { %v15508_v45 = vpop.eup %15507 }
0x1916   : > { %v6250_v46 = vmul.f32 %v15508_v45, %v6242_v54 }
0x1918   : > { %v6257_v56 = vmul.f32 %v12961_v0, %v6250_v46 }
0x191a   : > { %v6264_v58 = vadd.f32 %v12962_v49, %v6257_v56  ;;  %v12979_v56 = vld [vmem:[%s17588_s6] ss:$0 sm:$0xff] }
0x191c   : > { %v6267_v18 = vsel %vm1747_vm4, %v6264_v58, 0.0 }
0x191d   : > { %6268 = vadd.xlane.f32.xlu0 %v6267_v18 }
0x19a5   : > { %v6965_v61 = vpop.f32.mrb[100].mxu1 }
0x19a6   : > { %v6966_v1 = vadd.f32 %v12973_v33, %v6965_v61  ;;  %v14674_v5 = vpop.f32.mrb[101].mxu1 }
0x19a7   : > { %v6968_v8 = vpop.f32.mrb[102].mxu1 }
0x19a8   : > { %v14675_v9 = vpop.f32.mrb[103].mxu1  ;;  %v6971_v10 = vadd.f32 %v6966_v1, %v15969_v28 }
0x19aa   : > { %v6269_v11 = vpop.xlane.xlu0 %6268  ;;  %v6972_v12 = vsel %vm1747_vm4, %v6971_v10, 0.0 }
0x19ab   : > { %v6270_v13 = vmul.f32 0.03125, %v6269_v11  ;;  %6973 = vadd.xlane.f32.xlu0 %v6972_v12 }
0x19ad   : > { %v6271_v17 = vsub.f32 %v6264_v58, %v6270_v13 }
0x19af   : > { %v6272_v19 = vmul.f32 %v6271_v17, %v6271_v17 }
0x19b1   : > { %v6273_v27 = vsel %vm1747_vm4, %v6272_v19, 0.0 }
0x19b2   : > { %6274 = vadd.xlane.f32.xlu1 %v6273_v27 }
0x1a38   : > { %v6974_v28 = vpop.xlane.xlu0 %6973 }
0x1a39   : > { %v6975_v21 = vmul.f32 0.03125, %v6974_v28 }
0x1a3b   : > { %v6976_v22 = vsub.f32 %v6971_v10, %v6975_v21 }
0x1a3d   : > { %v6977_v23 = vmul.f32 %v6976_v22, %v6976_v22 }
0x1a3f   : > { %v6275_v24 = vpop.xlane.xlu1 %6274  ;;  %v6978_v42 = vsel %vm1747_vm4, %v6977_v23, 0.0 }
0x1a40   : > { %v6276_v59 = vmul.f32 0.03125, %v6275_v24  ;;  %6979 = vadd.xlane.f32.xlu0 %v6978_v42 }
0x1a42   : > { %v6277_v48 = vadd.f32 1e-05, %v6276_v59 }
0x1a44   : > { %15509 = vrsqrt.f32 %v6277_v48 }
0x1a4e   : > { %v15510_v26 = vpop.eup %15509 }
0x1a4f   : > { %v6279_v29 = vmul.f32 %v15510_v26, %v6271_v17 }
0x1a51   : > { %v6286_v2 = vmul.f32 %v12963_v53, %v6279_v29 }
0x1a53   : > { %v6293_v4 = vadd.f32 %v12964_v47, %v6286_v2 }
0x1a55   : > { %v16687_v50 = vpack.c.bf16 %v6293_v4, %v6293_v4 }
0x1a57   : > { %14689 = vmatmul.mubr.msk.bf16.vlgmr.msra.gmra.mrb[104].mxu1 %vm1747_vm4, %v16687_v50 }
0x1a58   : > { %14700 = vmatprep.mubr.msk.bf16.mxu1 %vm15656_vm0, %v15657_v16 }
0x1acd   : > { %v6980_v7 = vpop.xlane.xlu0 %6979 }
0x1ace   : > { %v6981_v60 = vmul.f32 0.03125, %v6980_v7 }
0x1ad0   : > { %v6982_v32 = vadd.f32 1e-05, %v6981_v60 }
0x1ad2   : > { %15511 = vrsqrt.f32 %v6982_v32 }
0x1adc   : > { %v15512_v6 = vpop.eup %15511 }
0x1add   : > { %v6984_v54 = vmul.f32 %v15512_v6, %v6976_v22 }
0x1adf   : > { %v6991_v55 = vmul.f32 %v12977_v62, %v6984_v54 }
0x1ae1   : > { %v16699_v15 = vadd.f32 %v12978_v39, %v6991_v55 }
0x1ae3   : > { %v6999_v41 = vpack.c.bf16 %v16699_v15, %v16699_v15 }
0x1ae5   : > { %14681 = vmatmul.mubr.msk.bf16.vlgmr.msra.gmra.mrb[104].mxu0 %vm1747_vm4, %v6999_v41 }
0x1ae6   : > { %14694 = vmatprep.mubr.msk.bf16.mxu0 %vm15656_vm0, %v15657_v16 }
0x1b2a   : > { %v7117_v14 = vpop.f32.mrb[104].mxu1 }
0x1b2b   : > { %v7118_v44 = vadd.f32 %v12983_v40, %v7117_v14  ;;  %v14690_v63 = vpop.f32.mrb[105].mxu1 }
0x1b2c   : > { %v7120_v45 = vpop.f32.mrb[106].mxu1  ;;  %v15207_v63 = vld [vmem:[%s17589_s29] sm:$0xff]  }
0x1b2d   : > { %v7124_v0 = vpack.c.bf16 %v7118_v44, %v7118_v44  ;;  %v14691_v46 = vpop.f32.mrb[107].mxu1  ;;  %v15208_v45 = vld [vmem:[%s17589_s29 + $0x8] sm:$0xff]  }
0x1b2f   : > { %7236 = vrot.lane.b32.xlu1 %v7124_v0, %s17571_s23  ;;  %v7129_v49 = vsel %vm1795_vm5, %v7124_v0, 0 }
0x1b30   : > { %14693 = vmatpush3.bf16.xpose.msra.mxu0 %v7129_v49 }
0x1b31   : > { %14704 = vmatprep.subr.bf16.mxu0 %v15657_v16 }
0x1ba1   : > { %v7237_v61 = vpop.permute.xlu1 %7236 }
0x1ba2   : > { %v7242_v9 = vsel %vm1795_vm5, %v7237_v61, 0  ;;  %v12991_v61 = vld [vmem:[%s17590_s30] ss:$0 sm:$0xff] }
0x1bb8   : > { %v7055_v58 = vpop.f32.mrb[104].mxu0 }
0x1bb9   : > { %v7056_v18 = vadd.f32 %v12979_v56, %v7055_v58  ;;  %v14682_v33 = vpop.f32.mrb[105].mxu0 }
0x1bba   : > { %v7058_v1 = vpop.f32.mrb[106].mxu0 }
0x1bbb   : > { %v7123_v5 = vpack.c.bf16 %v7056_v18, %v7056_v18  ;;  %v14683_v8 = vpop.f32.mrb[107].mxu0 }
0x1bbd   : > { %7234 = vrot.lane.b32.xlu0 %v7123_v5, %s17571_s23  ;;  %14695 = vmatmul.mubr.msk.bf16.vlgmr.msra.gmra.mrb[108].mxu0 %vm1795_vm5, %v7123_v5 }
0x1bbe   : > { %14705 = vmatpush3.bf16.xpose.msra.mxu0 %v7242_v9  ;;  %14706 = vmatprep.mubr.msk.bf16.mxu0 %vm15656_vm0, %v15657_v16 }
0x1bbf   : > { %14716 = vmatprep.subr.bf16.mxu0 %v15657_v16 }
0x1c2f   : > { %v7235_v10 = vpop.permute.xlu0 %7234 }
0x1c30   : > { %14707 = vmatmul.mubr.msk.bf16.vlgmr.msra.gmra.mrb[112].mxu0 %vm1795_vm5, %v7235_v10 }
0x1c31   : > { %14720 = vmatprep.mubr.msk.bf16.mxu0 %vm15656_vm0, %v15657_v16  ;;  %14717 = vmatpush3.bf16.msra.mxu0 %v15207_v63  ;;  %v12996_v63 = vld [vmem:[%s17594_s1] ss:$0 sm:$0xff] }
0x1c32   : > { %14718 = vmatprep.subr.bf16.mxu0 %v15657_v16 }
0x1c35   : > { %14719 = vmatpush3.bf16.msra.mxu0 %v15208_v45 }
0x1c90   : > { %v7165_v11 = vpop.f32.mrb[108].mxu0 }
0x1c91   : > { %v14696_v12 = vpop.f32.mrb[109].mxu0  ;;  %v7171_v13 = vsel %vm1842_vm6, %v7165_v11, -inf }
0x1c92   : > { %7172 = vmax.xlane.f32.xlu1 %v7171_v13  ;;  %v7168_v17 = vpop.f32.mrb[110].mxu0 }
0x1c93   : > { %v14697_v19 = vpop.f32.mrb[111].mxu0 }
0x1d03   : > { %v7278_v27 = vpop.f32.mrb[112].mxu0 }
0x1d04   : > { %v14708_v20 = vpop.f32.mrb[113].mxu0  ;;  %v7284_v36 = vsel %vm1842_vm6, %v7278_v27, -inf }
0x1d05   : > { %7285 = vmax.xlane.f32.xlu0 %v7284_v36  ;;  %v7281_v28 = vpop.f32.mrb[114].mxu0  ;;  %v6323_v36 = vld [vmem:[%s17591_s26] sm:$0xff] }
0x1d06   : > { %v14709_v21 = vpop.f32.mrb[115].mxu0  ;;  %v6331_v28 = vld [vmem:[%s17591_s26 + $0x40] sm:$0xff] }
0x1d07   : > { %v6324_v21 = vld [vmem:[%s17591_s26 + $0x8] sm:$0xff] }
0x1d1f   : > { %v7173_v22 = vpop.xlane.xlu1 %7172 }
0x1d20   : > { %v7174_v23 = vsub.f32 %v7165_v11, %v7173_v22  ;;  %v12998_v22 = vcombine.high %v6323_v36, %v6331_v28 }
0x1d22   : > { %v7175_v24 = vmul.f32 1.442695, %v7174_v23  ;;  %v6332_v23 = vld [vmem:[%s17591_s26 + $0x48] sm:$0xff] }
0x1d24   : > { %15513 = vpow2.f32 %v7175_v24  ;;  %v12999_v24 = vcombine.low %v6324_v21, %v6332_v23 }
0x1d2e   : > { %v15514_v42 = vpop.eup %15513 }
0x1d2f   : > { %v7177_v59 = vsel %vm1842_vm6, %v15514_v42, 0.0 }
0x1d30   : > { %7178 = vadd.xlane.f32.xlu1 %v7177_v59  ;;  %v6339_v59 = vld [vmem:[%s17591_s26 + $0x80] sm:$0xff] }
0x1d41   : > { %7184 = vrot.lane.b32.xlu1 %v7124_v0, %s17578_s13 }
0x1d92   : > { %v7286_v48 = vpop.xlane.xlu0 %7285 }
0x1d93   : > { %v7287_v26 = vsub.f32 %v7278_v27, %v7286_v48  ;;  %v6347_v48 = vld [vmem:[%s17591_s26 + $0xc0] sm:$0xff] }
0x1d95   : > { %v7288_v53 = vmul.f32 1.442695, %v7287_v26  ;;  %v6340_v26 = vld [vmem:[%s17591_s26 + $0x88] sm:$0xff] }
0x1d97   : > { %15515 = vpow2.f32 %v7288_v53  ;;  %v13014_v53 = vcombine.high %v6339_v59, %v6347_v48 }
0x1da1   : > { %v15516_v29 = vpop.eup %15515 }
0x1da2   : > { %v7290_v47 = vsel %vm1842_vm6, %v15516_v29, 0.0 }
0x1da3   : > { %7291 = vadd.xlane.f32.xlu0 %v7290_v47  ;;  %v13013_v47 = vcombine.low %v6339_v59, %v6347_v48 }
0x1db9   : > { %7296 = vrot.lane.b32.xlu0 %v7124_v0, %s17577_s9 }
0x1dbd   : > { %v7179_v2 = vpop.xlane.xlu1 %7178 }
0x1dbe   : > { %15517 = vrcp.f32 %v7179_v2 }
0x1dc1   : > { %v7185_v4 = vpop.permute.xlu1 %7184 }
0x1dc2   : > { %v7190_v30 = vsel %vm1860_vm7, %v7185_v4, 0 }
0x1dc3   : > { %14699 = vmatpush3.bf16.msra.mxu1 %v7190_v30  ;;  %v6325_v30 = vld [vmem:[%s17591_s26 + $0x10] sm:$0xff] }
0x1dc4   : > { %14710 = vmatprep.subr.bf16.mxu1 %v15657_v16 }
0x1dc8   : > { %v15518_v31 = vpop.eup %15517 }
0x1dc9   : > { %v7181_v7 = vmul.f32 %v15518_v31, %v15514_v42  ;;  %v13000_v42 = vcombine.high %v6324_v21, %v6332_v23  ;;  %v6333_v31 = vld [vmem:[%s17591_s26 + $0x50] sm:$0xff] }
0x1dca   : > { %v6329_v23 = vld [vmem:[%s17591_s26 + $0x30] sm:$0xff] }
0x1dcb   : > { %v7182_v60 = vpack.c.bf16 %v7181_v7, %v7181_v7  ;;  %7727 = vmatprep.subr.bf16.mxu0 %v13000_v42  ;;  %v6326_v7 = vld [vmem:[%s17591_s26 + $0x18] sm:$0xff] }
0x1dcc   : > { %v6338_v42 = vld [vmem:[%s17591_s26 + $0x78] sm:$0xff] }
0x1dcd   : > { %14701 = vmatmul.mubr.msk.bf16.vlgmr.msra.gmra.mrb[108].mxu1 %vm1842_vm6, %v7182_v60  ;;  %v13001_v60 = vcombine.low %v6325_v30, %v6333_v31 }
0x1dce   : > { %14712 = vmatprep.mubr.msk.bf16.mxu1 %vm15656_vm0, %v15657_v16 }
0x1e30   : > { %v7292_v32 = vpop.xlane.xlu0 %7291 }
0x1e31   : > { %15519 = vrcp.f32 %v7292_v32  ;;  %v13002_v32 = vcombine.high %v6325_v30, %v6333_v31 }
0x1e34   : > { %v7297_v6 = vpop.permute.xlu0 %7296 }
0x1e35   : > { %v7302_v62 = vsel %vm1860_vm7, %v7297_v6, 0  ;;  %v6334_v6 = vld [vmem:[%s17591_s26 + $0x58] sm:$0xff] }
0x1e36   : > { %14711 = vmatpush3.bf16.msra.mxu1 %v7302_v62  ;;  %v13003_v62 = vcombine.low %v6326_v7, %v6334_v6 }
0x1e37   : > { %7686 = vmatprep.subr.bf16.mxu1 %v12998_v22 }
0x1e3b   : > { %v15520_v54 = vpop.eup %15519 }
0x1e3c   : > { %v7294_v39 = vmul.f32 %v15520_v54, %v15516_v29  ;;  %v6348_v29 = vld [vmem:[%s17591_s26 + $0xc8] sm:$0xff]  ;;  %v13004_v54 = vcombine.high %v6326_v7, %v6334_v6 }
0x1e3d   : > { %v13015_v2 = vcombine.low %v6340_v26, %v6348_v29  ;;  %v13016_v4 = vcombine.high %v6340_v26, %v6348_v29  ;;  %v6345_v29 = vld [vmem:[%s17591_s26 + $0xb0] sm:$0xff] }
0x1e3e   : > { %v7295_v55 = vpack.c.bf16 %v7294_v39, %v7294_v39 }
0x1e40   : > { %14713 = vmatmul.mubr.msk.bf16.vlgmr.msra.gmra.mrb[112].mxu1 %vm1842_vm6, %v7295_v55 }
0x1e41   : > { %7718 = vmatprep.mubr.bf16.mxu1 %v15654_v3 }
0x1ea0   : > { %v7226_v41 = vpop.f32.mrb[108].mxu1 }
0x1ea1   : > { %7232 = vst.msk [vmem:[#allocation2] sm:$0xff] %vm1795_vm5, %v7226_v41  ;;  %v14702_v40 = vpop.f32.mrb[109].mxu1 }
0x1ea2   : > { %v7229_v14 = vpop.f32.mrb[110].mxu1 }
0x1ea3   : > { %v14703_v44 = vpop.f32.mrb[111].mxu1  ;;  %v12995_v14 = vld [vmem:[%s17592_s11] ss:$0 sm:$0xff]  ;;  %s17595_s11 = sld [smem:[#allocation39_spill]] }
0x1ea9   : > { %s17596_s28 = smov %s17595_s11 }
0x1f13   : > { %v7338_v0 = vpop.f32.mrb[112].mxu1 }
0x1f14   : > { %7345 = vrot.lane.b32.xlu1 %v7338_v0, %s17574_s5  ;;  %v14714_v46 = vpop.f32.mrb[113].mxu1  ;;  %v6341_v0 = vld [vmem:[%s17591_s26 + $0x90] sm:$0xff] }
0x1f15   : > { %v7341_v49 = vpop.f32.mrb[114].mxu1  ;;  %v6349_v46 = vld [vmem:[%s17591_s26 + $0xd0] sm:$0xff] }
0x1f16   : > { %v14715_v56 = vpop.f32.mrb[115].mxu1  ;;  %v6342_v49 = vld [vmem:[%s17591_s26 + $0x98] sm:$0xff] }
0x1f17   : > { %v6350_v56 = vld [vmem:[%s17591_s26 + $0xd8] sm:$0xff] }
0x1f86   : > { %v7346_v58 = vpop.permute.xlu1 %7345 }
0x1f87   : > { %7348 = vst.msk [vmem:[#allocation2] sm:$0xff] %vm2019_vm8, %v7346_v58 }
0x1f8e   : > { %v7349_v18 = vld [vmem:[#allocation2] sm:$0xff] }
0x1f8f   : > { %v7350_v33 = vpack.c.bf16 %v7349_v18, %v7349_v18 }
0x1f91   : > { %14721 = vmatmul.mubr.msk.bf16.vlgmr.msra.gmra.mrb[116].mxu0 %vm1747_vm4, %v7350_v33  ;;  %v13018_v33 = vcombine.high %v6341_v0, %v6349_v46 }
0x1f92   : > { %7759 = vmatprep.mubr.bf16.mxu0 %v15654_v3  ;;  %7728 = vmatpush1.bf16.msra.mxu0 %v12999_v24  ;;  %v6330_v24 = vld [vmem:[%s17591_s26 + $0x38] sm:$0xff] }
0x1f93   : > { %7729 = vmatprep.subr.bf16.mxu0 %v13016_v4  ;;  %v6354_v4 = vld [vmem:[%s17591_s26 + $0xf8] sm:$0xff]  ;;  %v13011_v31 = vcombine.low %v6330_v24, %v6338_v42 }
0x1f96   : > { %7730 = vmatpush1.bf16.msra.mxu0 %v13015_v2  ;;  %v6346_v2 = vld [vmem:[%s17591_s26 + $0xb8] sm:$0xff] }
0x1f97   : > { %7809 = vmatprep.subr.bf16.mxu0 %v13004_v54  ;;  %v13027_v6 = vcombine.low %v6346_v2, %v6354_v4  ;;  %v15210_v54 = vld [vmem:[%s17596_s28 + $0xc0] sm:$0xff]  }
0x2064   : > { %v7406_v1 = vpop.f32.mrb[116].mxu0 }
0x2065   : > { %v7407_v5 = vadd.f32 %v12991_v61, %v7406_v1  ;;  %v14722_v8 = vpop.f32.mrb[117].mxu0  ;;  %v13020_v61 = vcombine.high %v6342_v49, %v6350_v56  ;;  %v6327_v1 = vld [vmem:[%s17591_s26 + $0x20] sm:$0xff] }
0x2066   : > { %v7409_v9 = vpop.f32.mrb[118].mxu0  ;;  %v6328_v8 = vld [vmem:[%s17591_s26 + $0x28] sm:$0xff] }
0x2067   : > { %v14723_v10 = vpop.f32.mrb[119].mxu0  ;;  %v7412_v11 = vadd.f32 %v7407_v5, %v16699_v15  ;;  %v12997_v15 = vcombine.low %v6323_v36, %v6331_v28  ;;  %v6335_v5 = vld [vmem:[%s17591_s26 + $0x60] sm:$0xff]  ;;  %v6336_v9 = vld [vmem:[%s17591_s26 + $0x68] sm:$0xff] }
0x2068   : > { %v13017_v10 = vcombine.low %v6341_v0, %v6349_v46  ;;  %v13005_v36 = vcombine.low %v6327_v1, %v6335_v5  ;;  %v13007_v28 = vcombine.low %v6328_v8, %v6336_v9  ;;  %v15219_v0 = vld [vmem:[%s17596_s28 + $0x10] sm:$0xff]  }
0x2069   : > { %v7413_v12 = vsel %vm1747_vm4, %v7412_v11, 0.0  ;;  %7687 = vmatpush1.bf16.msra.mxu1 %v12997_v15  ;;  %v6337_v15 = vld [vmem:[%s17591_s26 + $0x70] sm:$0xff] }
0x206a   : > { %7414 = vadd.xlane.f32.xlu1 %v7413_v12  ;;  %7688 = vmatprep.subr.bf16.mxu1 %v13014_v53  ;;  %v13006_v12 = vcombine.high %v6327_v1, %v6335_v5  ;;  %v13010_v26 = vcombine.high %v6329_v23, %v6337_v15  ;;  %v13012_v53 = vcombine.high %v6330_v24, %v6338_v42  ;;  %v15220_v46 = vld [vmem:[%s17596_s28 + $0x90] sm:$0xff]   ;;  %v15226_v1 = vld [vmem:[%s17596_s28 + $0xe0] sm:$0xff]  }
0x206b   : > { %v13009_v30 = vcombine.low %v6329_v23, %v6337_v15  ;;  %v15227_v5 = vld [vmem:[%s17596_s28 + $0x20] sm:$0xff]  }
0x206c   : > { %v15242_v23 = vld [vmem:[%s17596_s28 + $0x1c0] sm:$0xff]  }
0x206d   : > { %7689 = vmatpush1.bf16.msra.mxu1 %v13013_v47  ;;  %v6353_v47 = vld [vmem:[%s17591_s26 + $0xf0] sm:$0xff] }
0x206e   : > { %7768 = vmatprep.subr.bf16.mxu1 %v13002_v32  ;;  %v13026_v7 = vcombine.high %v6345_v29, %v6353_v47  ;;  %v13025_v32 = vcombine.low %v6345_v29, %v6353_v47 }
0x20f7   : > { %v7415_v13 = vpop.xlane.xlu1 %7414 }
0x20f8   : > { %v7416_v17 = vmul.f32 0.03125, %v7415_v13  ;;  %v13008_v13 = vcombine.high %v6328_v8, %v6336_v9  ;;  %v15228_v8 = vld [vmem:[%s17596_s28 + $0xa0] sm:$0xff]   ;;  %v15229_v9 = vld [vmem:[%s17596_s28 + $0x68] sm:$0xff]  }
0x20fa   : > { %v7417_v19 = vsub.f32 %v7412_v11, %v7416_v17  ;;  %v13019_v11 = vcombine.low %v6342_v49, %v6350_v56  ;;  %v6343_v17 = vld [vmem:[%s17591_s26 + $0xa0] sm:$0xff]  ;;  %v15221_v49 = vld [vmem:[%s17596_s28 + $0x58] sm:$0xff]  }
0x20fb   : > { %v15222_v56 = vld [vmem:[%s17596_s28 + $0xd8] sm:$0xff]  }
0x20fc   : > { %v7418_v27 = vmul.f32 %v7417_v19, %v7417_v19 }
0x20fe   : > { %v7419_v20 = vsel %vm1747_vm4, %v7418_v27, 0.0  ;;  %v6344_v27 = vld [vmem:[%s17591_s26 + $0xa8] sm:$0xff] }
0x20ff   : > { %7420 = vadd.xlane.f32.xlu0 %v7419_v20  ;;  %v6352_v20 = vld [vmem:[%s17591_s26 + $0xe8] sm:$0xff] }
0x2100   : > { %v13024_v22 = vcombine.high %v6344_v27, %v6352_v20  ;;  %v13023_v48 = vcombine.low %v6344_v27, %v6352_v20  ;;  %v15236_v27 = vld [vmem:[%s17596_s28 + $0xb0] sm:$0xff]   ;;  %v15237_v20 = vld [vmem:[%s17596_s28 + $0x78] sm:$0xff]  }
0x218c   : > { %v7421_v39 = vpop.xlane.xlu0 %7420 }
0x218d   : > { %v7422_v55 = vmul.f32 0.03125, %v7421_v39  ;;  %v15211_v39 = vld [vmem:[%s17596_s28] sm:$0xff]  }
0x218f   : > { %v7423_v41 = vadd.f32 1e-05, %v7422_v55  ;;  %v15212_v55 = vld [vmem:[%s17596_s28 + $0x80] sm:$0xff]  }
0x2191   : > { %15521 = vrsqrt.f32 %v7423_v41  ;;  %v15213_v41 = vld [vmem:[%s17596_s28 + $0x48] sm:$0xff]  }
0x219b   : > { %v15522_v40 = vpop.eup %15521 }
0x219c   : > { %v7425_v44 = vmul.f32 %v15522_v40, %v7417_v19  ;;  %v6351_v19 = vld [vmem:[%s17591_s26 + $0xe0] sm:$0xff]  ;;  %v15214_v40 = vld [vmem:[%s17596_s28 + $0xc8] sm:$0xff]  }
0x219d   : > { %v13022_v21 = vcombine.high %v6343_v17, %v6351_v19  ;;  %v13021_v59 = vcombine.low %v6343_v17, %v6351_v19  ;;  %v15234_v17 = vld [vmem:[%s17596_s28 + $0xf0] sm:$0xff]  }
0x219e   : > { %v7432_v45 = vmul.f32 %v12995_v14, %v7425_v44  ;;  %v15215_v14 = vld [vmem:[%s17596_s28 + $0x8] sm:$0xff]   ;;  %v15235_v19 = vld [vmem:[%s17596_s28 + $0x30] sm:$0xff]  }
0x219f   : > { %v15216_v44 = vld [vmem:[%s17596_s28 + $0x88] sm:$0xff]  }
0x21a0   : > { %v16764_v58 = vadd.f32 %v12996_v63, %v7432_v45  ;;  %v15217_v63 = vld [vmem:[%s17596_s28 + $0x50] sm:$0xff]  }
0x21a1   : > { %v15218_v45 = vld [vmem:[%s17596_s28 + $0xd0] sm:$0xff]  }
0x21a2   : > { %v16768_v18 = vpack.c.bf16 %v16764_v58, %v16764_v58 }
0x21a4   : > { %13029 = vmatmul.mubr.msk.bf16.vlgmr.msra.gmra.mrb[116].mxu1 %vm1747_vm4, %v16768_v18  ;;  %13030 = vmatmul.mubr.msk.bf16.vlgmr.msra.gmra.mrb[120].mxu0 %vm1747_vm4, %v16768_v18 }
0x21a5   : > { %7769 = vmatpush1.bf16.msra.mxu1 %v13001_v60  ;;  %7810 = vmatpush1.bf16.msra.mxu0 %v13003_v62  ;;  %v13028_v60 = vcombine.high %v6346_v2, %v6354_v4  ;;  %v15209_v62 = vld [vmem:[%s17595_s11 + $0x40] sm:$0xff]   ;;  %s17597_s11 = sld [smem:[#allocation38_spill]] }
0x21a6   : > { %7770 = vmatprep.subr.bf16.mxu1 %v13018_v33  ;;  %7811 = vmatprep.subr.bf16.mxu0 %v13020_v61  ;;  %v15224_v33 = vld [vmem:[%s17596_s28 + $0x98] sm:$0xff]   ;;  %v15225_v61 = vld [vmem:[%s17596_s28 + $0x60] sm:$0xff]  }
0x21a7   : > { %7800 = vmatprep.mubr.bf16.mxu1 %v15654_v3  ;;  %7841 = vmatprep.mubr.bf16.mxu0 %v15654_v3 }
0x21a9   : > { %7771 = vmatpush1.bf16.msra.mxu1 %v13017_v10  ;;  %7812 = vmatpush1.bf16.msra.mxu0 %v13019_v11  ;;  %v15230_v10 = vld [vmem:[%s17596_s28 + $0xe8] sm:$0xff]  }
0x21aa   : > { %7850 = vmatprep.subr.bf16.mxu1 %v13006_v12  ;;  %7891 = vmatprep.subr.bf16.mxu0 %v13008_v13  ;;  %v15231_v11 = vld [vmem:[%s17596_s28 + $0x28] sm:$0xff]   ;;  %v15233_v13 = vld [vmem:[%s17596_s28 + $0x70] sm:$0xff]  }
0x21ab   : > { %v15232_v12 = vld [vmem:[%s17596_s28 + $0xa8] sm:$0xff]   ;;  %s17598_s4 = smov %s17597_s11  ;;  %v16843_v15 = vld [vmem:[%s17597_s11] sm:$0xff]  ;;  %s17599_s11 = sld [smem:[#allocation40_spill]] }
0x21ac   : > { %13031 = vmatmul.mubr.msk.bf16.vlgmr.msra.gmra.mrb[120].mxu1 %vm1747_vm4, %v16768_v18  ;;  %13032 = vmatmul.mubr.msk.bf16.vlgmr.msra.gmra.mrb[124].mxu0 %vm1747_vm4, %v16768_v18  ;;  %v7446_v24 = vrot.slane %v16843_v15, %v16113_v34  ;;  %v7454_v42 = vrot.slane %v16843_v15, %v16116_v35 }
0x21ad   : > { %7851 = vmatpush1.bf16.msra.mxu1 %v13005_v36  ;;  %7892 = vmatpush1.bf16.msra.mxu0 %v13007_v28  ;;  %v15238_v36 = vld [vmem:[%s17596_s28 + $0xf8] sm:$0xff]  }
0x21ae   : > { %7852 = vmatprep.subr.bf16.mxu1 %v13022_v21  ;;  %7893 = vmatprep.subr.bf16.mxu0 %v13024_v22  ;;  %v15239_v28 = vld [vmem:[%s17596_s28 + $0x38] sm:$0xff]   ;;  %v15241_v22 = vld [vmem:[%s17596_s28 + $0x140] sm:$0xff]  }
0x21af   : > { %7882 = vmatprep.mubr.bf16.mxu1 %v15654_v3  ;;  %7923 = vmatprep.mubr.bf16.mxu0 %v15654_v3  ;;  %v15240_v21 = vld [vmem:[%s17596_s28 + $0xb8] sm:$0xff]  }
0x21b1   : > { %7853 = vmatpush1.bf16.msra.mxu1 %v13021_v59  ;;  %7894 = vmatpush1.bf16.msra.mxu0 %v13023_v48  ;;  %v7450_v59 = vrot.slane %v16843_v15, %v16122_v37  ;;  %v7458_v48 = vrot.slane %v16843_v15, %v16125_v38  ;;  %s17600_s0 = smov %s17599_s11 }
0x21b2   : > { %7932 = vmatprep.subr.bf16.mxu1 %v13010_v26  ;;  %7973 = vmatprep.subr.bf16.mxu0 %v13012_v53 }
0x21b4   : > { %13033 = vmatmul.mubr.msk.bf16.vlgmr.msra.gmra.mrb[124].mxu1 %vm1747_vm4, %v16768_v18  ;;  %13034 = vmatmul.mubr.msk.bf16.vlgmr.msra.gmra.mrb[128].mxu0 %vm1747_vm4, %v16768_v18 }
0x21b5   : > { %7933 = vmatpush1.bf16.msra.mxu1 %v13009_v30  ;;  %7974 = vmatpush1.bf16.msra.mxu0 %v13011_v31 }
0x21b6   : > { %7934 = vmatprep.subr.bf16.mxu1 %v13026_v7  ;;  %7975 = vmatprep.subr.bf16.mxu0 %v13028_v60 }
0x21b7   : > { %7964 = vmatprep.mubr.bf16.mxu1 %v15654_v3  ;;  %8005 = vmatprep.mubr.bf16.mxu0 %v15654_v3 }
0x21b9   : > { %7935 = vmatpush1.bf16.msra.mxu1 %v13025_v32  ;;  %7976 = vmatpush1.bf16.msra.mxu0 %v13027_v6 }
0x21ba   : > { %14132 = vmatprep.subr.bf16.mxu1 %v15209_v62  ;;  %14154 = vmatprep.subr.bf16.mxu0 %v15210_v54 }
0x21bc   : > { %13035 = vmatmul.mubr.msk.bf16.vlgmr.msra.gmra.mrb[128].mxu1 %vm1747_vm4, %v16768_v18  ;;  %13036 = vmatmul.mubr.msk.bf16.vlgmr.msra.gmra.mrb[132].mxu0 %vm1747_vm4, %v16768_v18  ;;  %v15223_v18 = vld [vmem:[%s17596_s28 + $0x18] sm:$0xff]  }
0x21bd   : > { %14133 = vmatpush3.bf16.msra.mxu1 %v15211_v39  ;;  %14155 = vmatpush3.bf16.msra.mxu0 %v15212_v55 }
0x21be   : > { %14134 = vmatprep.subr.bf16.mxu1 %v15213_v41  ;;  %14156 = vmatprep.subr.bf16.mxu0 %v15214_v40 }
0x21c1   : > { %14135 = vmatpush3.bf16.msra.mxu1 %v15215_v14  ;;  %14157 = vmatpush3.bf16.msra.mxu0 %v15216_v44  ;;  %v7466_v14 = vrot.slane %v16843_v15, %v16136_v51  ;;  %v7474_v44 = vrot.slane %v16843_v15, %v16139_v52 }
0x21c2   : > { %14136 = vmatprep.subr.bf16.mxu1 %v15217_v63  ;;  %14158 = vmatprep.subr.bf16.mxu0 %v15218_v45  ;;  %v15243_v63 = vld [vmem:[%s17596_s28 + $0x100] sm:$0xff]  }
0x21c3   : > { %v15244_v45 = vld [vmem:[%s17596_s28 + $0x180] sm:$0xff]  }
0x21c5   : > { %14137 = vmatpush3.bf16.msra.mxu1 %v15219_v0  ;;  %14159 = vmatpush3.bf16.msra.mxu0 %v15220_v46 }
0x21c6   : > { %14138 = vmatprep.subr.bf16.mxu1 %v15221_v49  ;;  %14160 = vmatprep.subr.bf16.mxu0 %v15222_v56  ;;  %v15245_v49 = vld [vmem:[%s17596_s28 + $0x148] sm:$0xff]  }
0x21c7   : > { %v15246_v56 = vld [vmem:[%s17596_s28 + $0x1c8] sm:$0xff]  }
0x21c9   : > { %14139 = vmatpush3.bf16.msra.mxu1 %v15223_v18  ;;  %14161 = vmatpush3.bf16.msra.mxu0 %v15224_v33 }
0x21ca   : > { %14140 = vmatprep.subr.bf16.mxu1 %v15225_v61  ;;  %14162 = vmatprep.subr.bf16.mxu0 %v15226_v1 }
0x21cd   : > { %14141 = vmatpush3.bf16.msra.mxu1 %v15227_v5  ;;  %14163 = vmatpush3.bf16.msra.mxu0 %v15228_v8 }
0x21ce   : > { %14142 = vmatprep.subr.bf16.mxu1 %v15229_v9  ;;  %14164 = vmatprep.subr.bf16.mxu0 %v15230_v10 }
0x21d1   : > { %14143 = vmatpush3.bf16.msra.mxu1 %v15231_v11  ;;  %14165 = vmatpush3.bf16.msra.mxu0 %v15232_v12  ;;  %v15247_v11 = vld [vmem:[%s17596_s28 + $0x108] sm:$0xff]  }
0x21d2   : > { %14144 = vmatprep.subr.bf16.mxu1 %v15233_v13  ;;  %14166 = vmatprep.subr.bf16.mxu0 %v15234_v17  ;;  %v15248_v12 = vld [vmem:[%s17596_s28 + $0x188] sm:$0xff]  }
0x21d5   : > { %14145 = vmatpush3.bf16.msra.mxu1 %v15235_v19  ;;  %14167 = vmatpush3.bf16.msra.mxu0 %v15236_v27  ;;  %v15249_v19 = vld [vmem:[%s17596_s28 + $0x150] sm:$0xff]  }
0x21d6   : > { %14146 = vmatprep.subr.bf16.mxu1 %v15237_v20  ;;  %14168 = vmatprep.subr.bf16.mxu0 %v15238_v36  ;;  %v15250_v27 = vld [vmem:[%s17596_s28 + $0x1d0] sm:$0xff]  }
0x21d9   : > { %14147 = vmatpush3.bf16.msra.mxu1 %v15239_v28  ;;  %14169 = vmatpush3.bf16.msra.mxu0 %v15240_v21 }
0x21da   : > { %14176 = vmatprep.subr.bf16.mxu1 %v15241_v22  ;;  %14198 = vmatprep.subr.bf16.mxu0 %v15242_v23  ;;  %v15251_v22 = vld [vmem:[%s17596_s28 + $0x110] sm:$0xff]  }
0x21db   : > { %v15252_v23 = vld [vmem:[%s17596_s28 + $0x190] sm:$0xff]  }
0x2277   : > { %v7720_v26 = vpop.f32.mrb[116].mxu1  ;;  %v7761_v53 = vpop.f32.mrb[120].mxu0 }
0x2278   : > { %v7721_v29 = vadd.f32 %v7720_v26, %v7446_v24  ;;  %v7762_v47 = vadd.f32 %v7761_v53, %v7454_v42  ;;  %v7722_v2 = vpop.f32.mrb[117].mxu1  ;;  %v7763_v4 = vpop.f32.mrb[121].mxu0  ;;  %v15253_v24 = vld [vmem:[%s17596_s28 + $0x158] sm:$0xff]  }
0x2279   : > { %v7723_v30 = vadd.f32 %v7722_v2, %v7450_v59  ;;  %v7764_v31 = vadd.f32 %v7763_v4, %v7458_v48  ;;  %v7724_v7 = vpop.f32.mrb[118].mxu1  ;;  %v7765_v60 = vpop.f32.mrb[122].mxu0  ;;  %v15254_v42 = vld [vmem:[%s17596_s28 + $0x1d8] sm:$0xff]  }
0x227a   : > { %v8014_v32 = vmax.f32 %v7721_v29, 0.0  ;;  %v8016_v6 = vmax.f32 %v7762_v47, 0.0  ;;  %v7725_v62 = vpop.f32.mrb[119].mxu1  ;;  %v7766_v54 = vpop.f32.mrb[123].mxu0  ;;  %v15255_v2 = vld [vmem:[%s17596_s28 + $0x118] sm:$0xff]   ;;  %v15257_v7 = vld [vmem:[%s17596_s28 + $0x160] sm:$0xff]  }
0x227b   : > { %v8015_v39 = vmax.f32 %v7723_v30, 0.0  ;;  %v8017_v55 = vmax.f32 %v7764_v31, 0.0  ;;  %v15256_v4 = vld [vmem:[%s17596_s28 + $0x198] sm:$0xff]   ;;  %v15258_v60 = vld [vmem:[%s17596_s28 + $0x1e0] sm:$0xff]  }
0x227c   : > { %v8030_v0 = vpack.c.bf16 %v8014_v32, %v8014_v32  ;;  %v8032_v46 = vpack.c.bf16 %v8016_v6, %v8016_v6  ;;  %v16882_v32 = vld [vmem:[%s17598_s4 + $0x8] sm:$0xff]  ;;  %v15259_v62 = vld [vmem:[%s17596_s28 + $0x120] sm:$0xff]  }
0x227d   : > { %v8031_v41 = vpack.c.bf16 %v8015_v39, %v8015_v39  ;;  %v8033_v40 = vpack.c.bf16 %v8017_v55, %v8017_v55  ;;  %v7502_v6 = vrot.slane %v16882_v32, %v16168_v25  ;;  %v15260_v54 = vld [vmem:[%s17596_s28 + $0x1a0] sm:$0xff]   ;;  %v15261_v39 = vld [vmem:[%s17596_s28 + $0x168] sm:$0xff]  }
0x227e   : > { %v15262_v55 = vld [vmem:[%s17596_s28 + $0x1e8] sm:$0xff]  }
0x227f   : > { %v16861_v18 = vpop.f32.mrb[120].mxu1  ;;  %v16863_v33 = vpop.f32.mrb[124].mxu0  ;;  %8852 = vmatprep.mubr.bf16.mxu1 %v8031_v41  ;;  %8892 = vmatprep.mubr.bf16.mxu0 %v8033_v40 }
0x2280   : > { %v7804_v61 = vpop.f32.mrb[121].mxu1  ;;  %v7845_v1 = vpop.f32.mrb[125].mxu0  ;;  %8853 = vmatmul.mubr.bf16.vlgmr.msra.gmra.mrb[132].mxu1 %v8030_v0  ;;  %8893 = vmatmul.mubr.bf16.vlgmr.msra.gmra.mrb[136].mxu0 %v8032_v46  ;;  %v15263_v46 = vld [vmem:[%s17596_s28 + $0x128] sm:$0xff]  }
0x2281   : > { %v7805_v5 = vadd.f32 %v7804_v61, %v7466_v14  ;;  %v7846_v8 = vadd.f32 %v7845_v1, %v7474_v44  ;;  %14177 = vmatpush3.bf16.msra.mxu1 %v15243_v63  ;;  %14199 = vmatpush3.bf16.msra.mxu0 %v15244_v45  ;;  %v7806_v9 = vpop.f32.mrb[122].mxu1  ;;  %v7847_v10 = vpop.f32.mrb[126].mxu0  ;;  %v7470_v61 = vrot.slane %v16843_v15, %v16168_v25 }
0x2282   : > { %v7807_v13 = vpop.f32.mrb[123].mxu1  ;;  %v7848_v17 = vpop.f32.mrb[127].mxu0  ;;  %14178 = vmatprep.subr.bf16.mxu1 %v15245_v49  ;;  %14200 = vmatprep.subr.bf16.mxu0 %v15246_v56  ;;  %v15264_v49 = vld [vmem:[%s17596_s28 + $0x1a8] sm:$0xff]   ;;  %v7462_v56 = vrot.slane %v16843_v15, %v16180_v57  ;;  %v15266_v9 = vld [vmem:[%s17596_s28 + $0x1f0] sm:$0xff]   ;;  %v7482_v10 = vrot.slane %v16882_v32, %v16122_v37 }
0x2283   : > { %v8019_v20 = vmax.f32 %v7805_v5, 0.0  ;;  %v8021_v36 = vmax.f32 %v7846_v8, 0.0  ;;  %v15265_v8 = vld [vmem:[%s17596_s28 + $0x170] sm:$0xff]   ;;  %v7844_v17 = vadd.f32 %v16863_v33, %v7470_v61  ;;  %v15274_v33 = vld [vmem:[%s17596_s28 + $0x2c0] sm:$0xff]  }
0x2284   : > { %v15268_v15 = vld [vmem:[%s17596_s28 + $0x1b0] sm:$0xff]   ;;  %v7803_v13 = vadd.f32 %v16861_v18, %v7462_v56  ;;  %v15273_v18 = vld [vmem:[%s17596_s28 + $0x240] sm:$0xff]  }
0x2285   : > { %v8035_v28 = vpack.c.bf16 %v8019_v20, %v8019_v20  ;;  %v8037_v21 = vpack.c.bf16 %v8021_v36, %v8021_v36  ;;  %14179 = vmatpush3.bf16.msra.mxu1 %v15247_v11  ;;  %14201 = vmatpush3.bf16.msra.mxu0 %v15248_v12  ;;  %v7490_v11 = vrot.slane %v16882_v32, %v16125_v38  ;;  %v15267_v12 = vld [vmem:[%s17596_s28 + $0x130] sm:$0xff]   ;;  %v15291_v56 = vld [vmem:[%s17596_s28 + $0x220] sm:$0xff]  }
0x2286   : > { %14180 = vmatprep.subr.bf16.mxu1 %v15249_v19  ;;  %14202 = vmatprep.subr.bf16.mxu0 %v15250_v27  ;;  %v15269_v19 = vld [vmem:[%s17596_s28 + $0x178] sm:$0xff]   ;;  %v15292_v61 = vld [vmem:[%s17596_s28 + $0x2a0] sm:$0xff]  }
0x2287   : > { %v16873_v59 = vpop.f32.mrb[124].mxu1  ;;  %v16875_v48 = vpop.f32.mrb[128].mxu0  ;;  %8932 = vmatprep.mubr.bf16.mxu1 %v8035_v28  ;;  %8972 = vmatprep.mubr.bf16.mxu0 %v8037_v21  ;;  %v15270_v27 = vld [vmem:[%s17596_s28 + $0x1f8] sm:$0xff]  }
0x2288   : > { %v7886_v26 = vpop.f32.mrb[125].mxu1  ;;  %v7927_v53 = vpop.f32.mrb[129].mxu0  ;;  %v15271_v28 = vld [vmem:[%s17596_s28 + $0x138] sm:$0xff]  }
0x2289   : > { %14181 = vmatpush3.bf16.msra.mxu1 %v15251_v22  ;;  %14203 = vmatpush3.bf16.msra.mxu0 %v15252_v23  ;;  %v7888_v29 = vpop.f32.mrb[126].mxu1  ;;  %v7929_v47 = vpop.f32.mrb[130].mxu0  ;;  %v7887_v20 = vadd.f32 %v7886_v26, %v7482_v10  ;;  %v7928_v36 = vadd.f32 %v7927_v53, %v7490_v11  ;;  %v15272_v21 = vld [vmem:[%s17596_s28 + $0x1b8] sm:$0xff]   ;;  %v8018_v22 = vmax.f32 %v7803_v13, 0.0  ;;  %v8020_v23 = vmax.f32 %v7844_v17, 0.0  ;;  %v15275_v26 = vld [vmem:[%s17596_s28 + $0x200] sm:$0xff]  }
0x228a   : > { %v7889_v30 = vpop.f32.mrb[127].mxu1  ;;  %v7930_v31 = vpop.f32.mrb[131].mxu0  ;;  %14182 = vmatprep.subr.bf16.mxu1 %v15253_v24  ;;  %14204 = vmatprep.subr.bf16.mxu0 %v15254_v42  ;;  %v15276_v47 = vld [vmem:[%s17596_s28 + $0x280] sm:$0xff]   ;;  %v15296_v10 = vld [vmem:[%s17596_s28 + $0x2a8] sm:$0xff]   ;;  %v15297_v11 = vld [vmem:[%s17596_s28 + $0x270] sm:$0xff]   ;;  %v7498_v13 = vrot.slane %v16882_v32, %v16136_v51  ;;  %v7506_v17 = vrot.slane %v16882_v32, %v16139_v52 }
0x228b   : > { %v8023_v24 = vmax.f32 %v7887_v20, 0.0  ;;  %v8025_v42 = vmax.f32 %v7928_v36, 0.0  ;;  %v8034_v53 = vpack.c.bf16 %v8018_v22, %v8018_v22  ;;  %v8036_v29 = vpack.c.bf16 %v8020_v23, %v8020_v23  ;;  %v15278_v30 = vld [vmem:[%s17596_s28 + $0x2c8] sm:$0xff]   ;;  %v15300_v20 = vld [vmem:[%s17596_s28 + $0x2b0] sm:$0xff]   ;;  %v15301_v36 = vld [vmem:[%s17596_s28 + $0x278] sm:$0xff]  }
0x228d   : > { %14183 = vmatpush3.bf16.msra.mxu1 %v15255_v2  ;;  %14205 = vmatpush3.bf16.msra.mxu0 %v15256_v4  ;;  %v8039_v2 = vpack.c.bf16 %v8023_v24, %v8023_v24  ;;  %v15277_v4 = vld [vmem:[%s17596_s28 + $0x248] sm:$0xff]   ;;  %v8041_v31 = vpack.c.bf16 %v8025_v42, %v8025_v42  ;;  %v15305_v24 = vld [vmem:[%s17596_s28 + $0x340] sm:$0xff]  }
0x228e   : > { %14184 = vmatprep.subr.bf16.mxu1 %v15257_v7  ;;  %14206 = vmatprep.subr.bf16.mxu0 %v15258_v60  ;;  %v15279_v7 = vld [vmem:[%s17596_s28 + $0x208] sm:$0xff]  }
0x228f   : > { %v16890_v41 = vpop.f32.mrb[128].mxu1  ;;  %v8007_v40 = vpop.f32.mrb[132].mxu0  ;;  %v15280_v60 = vld [vmem:[%s17596_s28 + $0x288] sm:$0xff]  }
0x2290   : > { %v16892_v14 = vadd.f32 %v8007_v40, %v7502_v6  ;;  %v16894_v44 = vpop.f32.mrb[129].mxu1  ;;  %v16896_v63 = vpop.f32.mrb[133].mxu0  ;;  %v15281_v6 = vld [vmem:[%s17596_s28 + $0x250] sm:$0xff]   ;;  %v15286_v40 = vld [vmem:[%s17596_s28 + $0x2d8] sm:$0xff]  }
0x2291   : > { %14185 = vmatpush3.bf16.msra.mxu1 %v15259_v62  ;;  %14207 = vmatpush3.bf16.msra.mxu0 %v15260_v54  ;;  %v7970_v45 = vpop.f32.mrb[130].mxu1  ;;  %v8011_v0 = vpop.f32.mrb[134].mxu0  ;;  %v15282_v62 = vld [vmem:[%s17596_s28 + $0x2d0] sm:$0xff]   ;;  %v7969_v22 = vadd.f32 %v16894_v44, %v7498_v13  ;;  %v8010_v23 = vadd.f32 %v16896_v63, %v7506_v17  ;;  %v15307_v44 = vld [vmem:[%s17596_s28 + $0x300] sm:$0xff]  }
0x2292   : > { %v7971_v1 = vpop.f32.mrb[131].mxu1  ;;  %v8012_v5 = vpop.f32.mrb[135].mxu0  ;;  %14186 = vmatprep.subr.bf16.mxu1 %v15261_v39  ;;  %14208 = vmatprep.subr.bf16.mxu0 %v15262_v55  ;;  %v15283_v54 = vld [vmem:[%s17596_s28 + $0x210] sm:$0xff]   ;;  %v15285_v55 = vld [vmem:[%s17596_s28 + $0x258] sm:$0xff]   ;;  %v15308_v63 = vld [vmem:[%s17596_s28 + $0x380] sm:$0xff]  }
0x2293   : > { %v15284_v39 = vld [vmem:[%s17596_s28 + $0x290] sm:$0xff]   ;;  %v15287_v45 = vld [vmem:[%s17596_s28 + $0x218] sm:$0xff]   ;;  %v15293_v1 = vld [vmem:[%s17596_s28 + $0x268] sm:$0xff]  }
0x2294   : > { %v15288_v0 = vld [vmem:[%s17596_s28 + $0x298] sm:$0xff]   ;;  %v15294_v5 = vld [vmem:[%s17596_s28 + $0x2e8] sm:$0xff]   ;;  %v15332_v17 = vld [vmem:[%s17596_s28 + $0x3b0] sm:$0xff]  }
0x2295   : > { %14187 = vmatpush3.bf16.msra.mxu1 %v15263_v46  ;;  %14209 = vmatpush3.bf16.msra.mxu0 %v15264_v49  ;;  %v15289_v46 = vld [vmem:[%s17596_s28 + $0x260] sm:$0xff]  }
0x2296   : > { %14188 = vmatprep.subr.bf16.mxu1 %v15265_v8  ;;  %14210 = vmatprep.subr.bf16.mxu0 %v15266_v9  ;;  %v15290_v49 = vld [vmem:[%s17596_s28 + $0x2e0] sm:$0xff]   ;;  %v15295_v8 = vld [vmem:[%s17596_s28 + $0x228] sm:$0xff]   ;;  %v7478_v9 = vrot.slane %v16882_v32, %v16113_v34 }
0x2299   : > { %14189 = vmatpush3.bf16.msra.mxu1 %v15267_v12  ;;  %14211 = vmatpush3.bf16.msra.mxu0 %v15268_v15  ;;  %v7486_v12 = vrot.slane %v16882_v32, %v16116_v35  ;;  %v15298_v15 = vld [vmem:[%s17596_s28 + $0x2f0] sm:$0xff]  }
0x229a   : > { %14190 = vmatprep.subr.bf16.mxu1 %v15269_v19  ;;  %14212 = vmatprep.subr.bf16.mxu0 %v15270_v27  ;;  %v15299_v19 = vld [vmem:[%s17596_s28 + $0x230] sm:$0xff]   ;;  %v7885_v27 = vadd.f32 %v16873_v59, %v7478_v9  ;;  %v15304_v59 = vld [vmem:[%s17596_s28 + $0x2b8] sm:$0xff]   ;;  %v7494_v9 = vrot.slane %v16882_v32, %v16180_v57 }
0x229b   : > { %v15335_v32 = vld [vmem:[%s17596_s28 + $0x338] sm:$0xff]  }
0x229c   : > { %v7967_v13 = vadd.f32 %v16890_v41, %v7494_v9 }
0x229d   : > { %14191 = vmatpush3.bf16.msra.mxu1 %v15271_v28  ;;  %14213 = vmatpush3.bf16.msra.mxu0 %v15272_v21  ;;  %v7926_v28 = vadd.f32 %v16875_v48, %v7486_v12  ;;  %v15302_v21 = vld [vmem:[%s17596_s28 + $0x2f8] sm:$0xff]   ;;  %v15306_v48 = vld [vmem:[%s17596_s28 + $0x3c0] sm:$0xff]   ;;  %v15330_v12 = vld [vmem:[%s17596_s28 + $0x3f0] sm:$0xff]  }
0x229e   : > { %14220 = vmatprep.subr.bf16.mxu1 %v15273_v18  ;;  %14242 = vmatprep.subr.bf16.mxu0 %v15274_v33  ;;  %v15303_v18 = vld [vmem:[%s17596_s28 + $0x238] sm:$0xff]   ;;  %v8022_v33 = vmax.f32 %v7885_v27, 0.0 }
0x229f   : > { %v8024_v42 = vmax.f32 %v7926_v28, 0.0  ;;  %v15334_v27 = vld [vmem:[%s17596_s28 + $0x3f8] sm:$0xff]   ;;  %v8028_v28 = vmax.f32 %v16892_v14, 0.0  ;;  %v13037_v14 = vld [vmem:[%s17599_s11] ss:$0 sm:$0xff]  ;;  %s17601_s11 = sld [smem:[#allocation41_spill]] }
0x22a0   : > { %8933 = vmatmul.mubr.bf16.vlgmr.msra.gmra.mrb[136].mxu1 %v8034_v53  ;;  %8973 = vmatmul.mubr.bf16.vlgmr.msra.gmra.mrb[140].mxu0 %v8036_v29  ;;  %v8029_v53 = vmax.f32 %v8010_v23, 0.0  ;;  %v8038_v29 = vpack.c.bf16 %v8022_v33, %v8022_v33 }
0x22a1   : > { %14221 = vmatpush3.bf16.msra.mxu1 %v15275_v26  ;;  %9012 = vmatprep.mubr.bf16.mxu1 %v8039_v2  ;;  %v8027_v26 = vmax.f32 %v7969_v22, 0.0  ;;  %v15309_v2 = vld [vmem:[%s17596_s28 + $0x348] sm:$0xff]   ;;  %v8044_v41 = vpack.c.bf16 %v8028_v28, %v8028_v28 }
0x22a2   : > { %14243 = vmatpush3.bf16.msra.mxu0 %v15276_v47  ;;  %9052 = vmatprep.mubr.bf16.mxu0 %v8041_v31  ;;  %v8040_v47 = vpack.c.bf16 %v8024_v42, %v8024_v42  ;;  %v8045_v31 = vpack.c.bf16 %v8029_v53, %v8029_v53 }
0x22a3   : > { %14222 = vmatprep.subr.bf16.mxu1 %v15277_v4  ;;  %14244 = vmatprep.subr.bf16.mxu0 %v15278_v30  ;;  %v8043_v4 = vpack.c.bf16 %v8027_v26, %v8027_v26  ;;  %v15310_v30 = vld [vmem:[%s17596_s28 + $0x3c8] sm:$0xff]  }
0x22a5   : > { %14223 = vmatpush3.bf16.msra.mxu1 %v15279_v7  ;;  %v15311_v7 = vld [vmem:[%s17596_s28 + $0x308] sm:$0xff]   ;;  %s17602_s27 = smov %s17601_s11 }
0x22a6   : > { %14245 = vmatpush3.bf16.msra.mxu0 %v15280_v60  ;;  %14224 = vmatprep.subr.bf16.mxu1 %v15281_v6  ;;  %v15312_v60 = vld [vmem:[%s17596_s28 + $0x388] sm:$0xff]   ;;  %v15313_v6 = vld [vmem:[%s17596_s28 + $0x350] sm:$0xff]  }
0x22a7   : > { %14246 = vmatprep.subr.bf16.mxu0 %v15282_v62  ;;  %v15314_v62 = vld [vmem:[%s17596_s28 + $0x3d0] sm:$0xff]  }
0x22a9   : > { %14225 = vmatpush3.bf16.msra.mxu1 %v15283_v54  ;;  %v15315_v54 = vld [vmem:[%s17596_s28 + $0x310] sm:$0xff]  }
0x22aa   : > { %14247 = vmatpush3.bf16.msra.mxu0 %v15284_v39  ;;  %14226 = vmatprep.subr.bf16.mxu1 %v15285_v55  ;;  %v15316_v39 = vld [vmem:[%s17596_s28 + $0x390] sm:$0xff]   ;;  %v15317_v55 = vld [vmem:[%s17596_s28 + $0x358] sm:$0xff]  }
0x22ab   : > { %14248 = vmatprep.subr.bf16.mxu0 %v15286_v40  ;;  %v15318_v40 = vld [vmem:[%s17596_s28 + $0x3d8] sm:$0xff]  }
0x22ad   : > { %14227 = vmatpush3.bf16.msra.mxu1 %v15287_v45  ;;  %v15319_v45 = vld [vmem:[%s17596_s28 + $0x318] sm:$0xff]  }
0x22ae   : > { %14249 = vmatpush3.bf16.msra.mxu0 %v15288_v0  ;;  %14228 = vmatprep.subr.bf16.mxu1 %v15289_v46  ;;  %v15320_v0 = vld [vmem:[%s17596_s28 + $0x398] sm:$0xff]   ;;  %v15321_v46 = vld [vmem:[%s17596_s28 + $0x360] sm:$0xff]  }
0x22af   : > { %14250 = vmatprep.subr.bf16.mxu0 %v15290_v49  ;;  %v15322_v49 = vld [vmem:[%s17596_s28 + $0x3e0] sm:$0xff]  }
0x22b1   : > { %14229 = vmatpush3.bf16.msra.mxu1 %v15291_v56  ;;  %v15323_v56 = vld [vmem:[%s17596_s28 + $0x320] sm:$0xff]  }
0x22b2   : > { %14251 = vmatpush3.bf16.msra.mxu0 %v15292_v61  ;;  %14230 = vmatprep.subr.bf16.mxu1 %v15293_v1  ;;  %v15324_v61 = vld [vmem:[%s17596_s28 + $0x3a0] sm:$0xff]   ;;  %v15325_v1 = vld [vmem:[%s17596_s28 + $0x368] sm:$0xff]  }
0x22b3   : > { %14252 = vmatprep.subr.bf16.mxu0 %v15294_v5  ;;  %v15326_v5 = vld [vmem:[%s17596_s28 + $0x3e8] sm:$0xff]  }
0x22b5   : > { %14231 = vmatpush3.bf16.msra.mxu1 %v15295_v8  ;;  %v15327_v8 = vld [vmem:[%s17596_s28 + $0x328] sm:$0xff]  }
0x22b6   : > { %14253 = vmatpush3.bf16.msra.mxu0 %v15296_v10  ;;  %14232 = vmatprep.subr.bf16.mxu1 %v15297_v11  ;;  %v15328_v10 = vld [vmem:[%s17596_s28 + $0x3a8] sm:$0xff]   ;;  %v15329_v11 = vld [vmem:[%s17596_s28 + $0x370] sm:$0xff]  }
0x22b7   : > { %14254 = vmatprep.subr.bf16.mxu0 %v15298_v15  ;;  %v15331_v15 = vld [vmem:[%s17596_s28 + $0x330] sm:$0xff]  }
0x22b9   : > { %14233 = vmatpush3.bf16.msra.mxu1 %v15299_v19  ;;  %v15333_v19 = vld [vmem:[%s17596_s28 + $0x378] sm:$0xff]  }
0x22ba   : > { %14255 = vmatpush3.bf16.msra.mxu0 %v15300_v20  ;;  %14234 = vmatprep.subr.bf16.mxu1 %v15301_v36  ;;  %v8026_v20 = vmax.f32 %v7967_v13, 0.0  ;;  %v15336_v36 = vld [vmem:[%s17596_s28 + $0x3b8] sm:$0xff]  }
0x22bb   : > { %14256 = vmatprep.subr.bf16.mxu0 %v15302_v21 }
0x22bc   : > { %v8042_v21 = vpack.c.bf16 %v8026_v20, %v8026_v20 }
0x22bd   : > { %14235 = vmatpush3.bf16.msra.mxu1 %v15303_v18 }
0x22be   : > { %14257 = vmatpush3.bf16.msra.mxu0 %v15304_v59  ;;  %14264 = vmatprep.subr.bf16.mxu1 %v15305_v24 }
0x22bf   : > { %14286 = vmatprep.subr.bf16.mxu0 %v15306_v48 }
0x22c0   : > { %9013 = vmatmul.mubr.bf16.vlgmr.msra.gmra.mrb[140].mxu1 %v8038_v29 }
0x22c1   : > { %9053 = vmatmul.mubr.bf16.vlgmr.msra.gmra.mrb[144].mxu0 %v8040_v47  ;;  %14265 = vmatpush3.bf16.msra.mxu1 %v15307_v44 }
0x22c2   : > { %9092 = vmatprep.mubr.bf16.mxu1 %v8043_v4  ;;  %14287 = vmatpush3.bf16.msra.mxu0 %v15308_v63 }
0x22c3   : > { %9132 = vmatprep.mubr.bf16.mxu0 %v8045_v31  ;;  %14266 = vmatprep.subr.bf16.mxu1 %v15309_v2 }
0x22c4   : > { %14288 = vmatprep.subr.bf16.mxu0 %v15310_v30 }
0x22c5   : > { %14267 = vmatpush3.bf16.msra.mxu1 %v15311_v7 }
0x22c6   : > { %14289 = vmatpush3.bf16.msra.mxu0 %v15312_v60  ;;  %14268 = vmatprep.subr.bf16.mxu1 %v15313_v6 }
0x22c7   : > { %14290 = vmatprep.subr.bf16.mxu0 %v15314_v62 }
0x22c9   : > { %14269 = vmatpush3.bf16.msra.mxu1 %v15315_v54 }
0x22ca   : > { %14291 = vmatpush3.bf16.msra.mxu0 %v15316_v39  ;;  %14270 = vmatprep.subr.bf16.mxu1 %v15317_v55 }
0x22cb   : > { %14292 = vmatprep.subr.bf16.mxu0 %v15318_v40 }
0x22cd   : > { %14271 = vmatpush3.bf16.msra.mxu1 %v15319_v45 }
0x22ce   : > { %14293 = vmatpush3.bf16.msra.mxu0 %v15320_v0  ;;  %14272 = vmatprep.subr.bf16.mxu1 %v15321_v46 }
0x22cf   : > { %14294 = vmatprep.subr.bf16.mxu0 %v15322_v49 }
0x22d1   : > { %14273 = vmatpush3.bf16.msra.mxu1 %v15323_v56 }
0x22d2   : > { %14295 = vmatpush3.bf16.msra.mxu0 %v15324_v61  ;;  %14274 = vmatprep.subr.bf16.mxu1 %v15325_v1 }
0x22d3   : > { %14296 = vmatprep.subr.bf16.mxu0 %v15326_v5 }
0x22d5   : > { %14275 = vmatpush3.bf16.msra.mxu1 %v15327_v8 }
0x22d6   : > { %14297 = vmatpush3.bf16.msra.mxu0 %v15328_v10  ;;  %14276 = vmatprep.subr.bf16.mxu1 %v15329_v11 }
0x22d7   : > { %14298 = vmatprep.subr.bf16.mxu0 %v15330_v12 }
0x22d9   : > { %14277 = vmatpush3.bf16.msra.mxu1 %v15331_v15 }
0x22da   : > { %14299 = vmatpush3.bf16.msra.mxu0 %v15332_v17  ;;  %14278 = vmatprep.subr.bf16.mxu1 %v15333_v19 }
0x22db   : > { %14300 = vmatprep.subr.bf16.mxu0 %v15334_v27 }
0x22dd   : > { %14279 = vmatpush3.bf16.msra.mxu1 %v15335_v32 }
0x22de   : > { %14301 = vmatpush3.bf16.msra.mxu0 %v15336_v36  ;;  %14724 = vmatprep.subr.bf16.mxu1 %v15657_v16 }
0x22df   : > { %14732 = vmatprep.subr.bf16.mxu0 %v15657_v16 }
0x22e0   : > { %9093 = vmatmul.mubr.bf16.vlgmr.msra.gmra.mrb[144].mxu1 %v8042_v21 }
0x22e1   : > { %9133 = vmatmul.mubr.bf16.vlgmr.msra.gmra.mrb[148].mxu0 %v8044_v41  ;;  %14728 = vmatprep.mubr.msk.bf16.mxu1 %vm15656_vm0, %v15657_v16 }
0x22e2   : > { %14734 = vmatprep.mubr.msk.bf16.mxu0 %vm15656_vm0, %v15657_v16 }
0x2353   : > { %v14148_v22 = vpop.f32.mrb[132].mxu1  ;;  %v14170_v23 = vpop.f32.mrb[136].mxu0 }
0x2354   : > { %v14149_v18 = vpop.f32.mrb[133].mxu1  ;;  %v14171_v33 = vpop.f32.mrb[137].mxu0 }
0x2355   : > { %v14150_v59 = vadd.f32 %v14149_v18, %v14148_v22  ;;  %v14172_v24 = vadd.f32 %v14171_v33, %v14170_v23  ;;  %v14151_v42 = vpop.f32.mrb[134].mxu1  ;;  %v14173_v48 = vpop.f32.mrb[138].mxu0 }
0x2356   : > { %v14152_v26 = vpop.f32.mrb[135].mxu1  ;;  %v14174_v53 = vpop.f32.mrb[139].mxu0 }
0x2357   : > { %v8855_v44 = vadd.f32 %v14150_v59, %v13037_v14  ;;  %v15337_v59 = vld [vmem:[%s17575_s3 + $0x10] sm:$0xff]   ;;  %v13166_v53 = vld [vmem:[%s17601_s11] ss:$0 sm:$0xff] }
0x2358   : > { %14725 = vmatpush3.bf16.msra.mxu1 %v15337_v59 }
0x2359   : > { %v8895_v29 = vadd.f32 %v14172_v24, %v8855_v44  ;;  %v15338_v24 = vld [vmem:[%s17575_s3 + $0x18] sm:$0xff]   ;;  %14726 = vmatprep.subr.bf16.mxu1 %v15657_v16 }
0x235c   : > { %14727 = vmatpush3.bf16.msra.mxu1 %v15338_v24 }
0x235d   : > { %14738 = vmatprep.subr.bf16.mxu1 %v15657_v16 }
0x2373   : > { %v14192_v63 = vpop.f32.mrb[136].mxu1  ;;  %v14214_v47 = vpop.f32.mrb[140].mxu0 }
0x2374   : > { %v14193_v2 = vpop.f32.mrb[137].mxu1  ;;  %v14215_v4 = vpop.f32.mrb[141].mxu0 }
0x2375   : > { %v14194_v30 = vadd.f32 %v14193_v2, %v14192_v63  ;;  %v14216_v31 = vadd.f32 %v14215_v4, %v14214_v47  ;;  %v14195_v7 = vpop.f32.mrb[138].mxu1  ;;  %v14217_v60 = vpop.f32.mrb[142].mxu0  ;;  %v13490_v4 = vld [vmem:[%s17576_s8 + $0x1] ss:$0 sm:$0xff] }
0x2376   : > { %v14196_v6 = vpop.f32.mrb[139].mxu1  ;;  %v14218_v62 = vpop.f32.mrb[143].mxu0 }
0x2377   : > { %v8935_v54 = vadd.f32 %v14194_v30, %v8895_v29  ;;  %v13167_v29 = vld [vmem:[%s17603_s7] ss:$0 sm:$0xff]  ;;  %s17608_s7 = sld [smem:[#allocation49_spill]] }
0x2379   : > { %v8975_v39 = vadd.f32 %v14216_v31, %v8935_v54 }
0x2393   : > { %v14236_v55 = vpop.f32.mrb[140].mxu1 }
0x2394   : > { %v14258_v40 = vpop.f32.mrb[144].mxu0  ;;  %v14237_v45 = vpop.f32.mrb[141].mxu1 }
0x2395   : > { %v14238_v0 = vadd.f32 %v14237_v45, %v14236_v55  ;;  %v14259_v46 = vpop.f32.mrb[145].mxu0  ;;  %v14239_v49 = vpop.f32.mrb[142].mxu1 }
0x2396   : > { %v14260_v56 = vadd.f32 %v14259_v46, %v14258_v40  ;;  %v14261_v61 = vpop.f32.mrb[146].mxu0  ;;  %v14240_v1 = vpop.f32.mrb[143].mxu1 }
0x2397   : > { %v9015_v5 = vadd.f32 %v14238_v0, %v8975_v39  ;;  %v14262_v8 = vpop.f32.mrb[147].mxu0 }
0x2399   : > { %v9055_v9 = vadd.f32 %v14260_v56, %v9015_v5 }
0x23b3   : > { %v14280_v10 = vpop.f32.mrb[144].mxu1 }
0x23b4   : > { %v14302_v11 = vpop.f32.mrb[148].mxu0  ;;  %v14281_v12 = vpop.f32.mrb[145].mxu1 }
0x23b5   : > { %v14282_v15 = vadd.f32 %v14281_v12, %v14280_v10  ;;  %v14303_v13 = vpop.f32.mrb[149].mxu0  ;;  %v14283_v17 = vpop.f32.mrb[146].mxu1 }
0x23b6   : > { %v14304_v19 = vadd.f32 %v14303_v13, %v14302_v11  ;;  %v14305_v27 = vpop.f32.mrb[150].mxu0  ;;  %v14284_v32 = vpop.f32.mrb[147].mxu1 }
0x23b7   : > { %v9095_v20 = vadd.f32 %v14282_v15, %v9055_v9  ;;  %v14306_v36 = vpop.f32.mrb[151].mxu0 }
0x23b9   : > { %v9135_v28 = vadd.f32 %v14304_v19, %v9095_v20 }
0x23bb   : > { %v9140_v21 = vadd.f32 %v9135_v28, %v16764_v58 }
0x23bd   : > { %v9141_v41 = vsel %vm1747_vm4, %v9140_v21, 0.0 }
0x23be   : > { %9142 = vadd.xlane.f32.xlu0 %v9141_v41 }
0x244b   : > { %v9143_v22 = vpop.xlane.xlu0 %9142 }
0x244c   : > { %v9144_v23 = vmul.f32 0.03125, %v9143_v22 }
0x244e   : > { %v9145_v14 = vsub.f32 %v9140_v21, %v9144_v23 }
0x2450   : > { %v9146_v18 = vmul.f32 %v9145_v14, %v9145_v14 }
0x2452   : > { %v9147_v33 = vsel %vm1747_vm4, %v9146_v18, 0.0 }
0x2453   : > { %9148 = vadd.xlane.f32.xlu1 %v9147_v33 }
0x24e0   : > { %v9149_v58 = vpop.xlane.xlu1 %9148 }
0x24e1   : > { %v9150_v42 = vmul.f32 0.03125, %v9149_v58 }
0x24e3   : > { %v9151_v48 = vadd.f32 1e-05, %v9150_v42 }
0x24e5   : > { %15523 = vrsqrt.f32 %v9151_v48 }
0x24ef   : > { %v15524_v26 = vpop.eup %15523 }
0x24f0   : > { %v9153_v44 = vmul.f32 %v15524_v26, %v9145_v14  ;;  %v15339_v26 = vld [vmem:[%s17579_s14 + $0x10] sm:$0xff]  }
0x24f2   : > { %v9160_v63 = vmul.f32 %v13166_v53, %v9153_v44  ;;  %v15340_v53 = vld [vmem:[%s17579_s14 + $0x18] sm:$0xff]  }
0x24f4   : > { %v17014_v47 = vadd.f32 %v13167_v29, %v9160_v63 }
0x24f6   : > { %v9510_v2 = vpack.c.bf16 %v17014_v47, %v17014_v47 }
0x24f8   : > { %14729 = vmatmul.mubr.msk.bf16.vlgmr.msra.gmra.mrb[148].mxu1 %vm1747_vm4, %v9510_v2 }
0x24f9   : > { %14740 = vmatprep.mubr.msk.bf16.mxu1 %vm15656_vm0, %v15657_v16 }
0x25cb   : > { %v9566_v30 = vpop.f32.mrb[148].mxu1 }
0x25cc   : > { %v9567_v31 = vadd.f32 %v13490_v4, %v9566_v30  ;;  %v14730_v7 = vpop.f32.mrb[149].mxu1 }
0x25cd   : > { %v9569_v60 = vpop.f32.mrb[150].mxu1 }
0x25ce   : > { %v9572_v6 = vpack.c.bf16 %v9567_v31, %v9567_v31  ;;  %v14731_v62 = vpop.f32.mrb[151].mxu1 }
0x25cf   : > { %v15341_v62 = vld [vmem:[%s17581_s19 + $0x10] sm:$0xff]  }
0x25d0   : > { %9685 = vrot.lane.b32.xlu1 %v9572_v6, %s17577_s9  ;;  %9574 = vrot.lane.b32.xlu0 %v9572_v6, %s17578_s13 }
0x25d4   : > { %9683 = vrot.lane.b32.xlu1 %v9572_v6, %s17571_s23 }
0x2642   : > { %v9575_v54 = vpop.permute.xlu0 %9574  ;;  %v9686_v55 = vpop.permute.xlu1 %9685 }
0x2643   : > { %v9580_v39 = vsel %vm1795_vm5, %v9575_v54, 0  ;;  %v9691_v40 = vsel %vm1795_vm5, %v9686_v55, 0  ;;  %v13498_v55 = vld [vmem:[%s17580_s17 + $0x1] ss:$0 sm:$0xff] }
0x2644   : > { %14733 = vmatpush3.bf16.xpose.msra.mxu0 %v9580_v39  ;;  %v15342_v39 = vld [vmem:[%s17581_s19 + $0x18] sm:$0xff]  }
0x2645   : > { %14744 = vmatprep.subr.bf16.mxu0 %v15657_v16 }
0x2646   : > { %v9684_v45 = vpop.permute.xlu1 %9683 }
0x264b   : > { %14735 = vmatmul.mubr.msk.bf16.vlgmr.msra.gmra.mrb[152].mxu0 %vm1795_vm5, %v9572_v6 }
0x264c   : > { %14745 = vmatpush3.bf16.xpose.msra.mxu0 %v9691_v40  ;;  %14746 = vmatprep.mubr.msk.bf16.mxu0 %vm15656_vm0, %v15657_v16 }
0x264d   : > { %14756 = vmatprep.subr.bf16.mxu0 %v15657_v16 }
0x2653   : > { %14747 = vmatmul.mubr.msk.bf16.vlgmr.msra.gmra.mrb[156].mxu0 %vm1795_vm5, %v9684_v45 }
0x2654   : > { %14760 = vmatprep.mubr.msk.bf16.mxu0 %vm15656_vm0, %v15657_v16  ;;  %14757 = vmatpush3.bf16.msra.mxu0 %v15339_v26 }
0x2655   : > { %14758 = vmatprep.subr.bf16.mxu0 %v15657_v16 }
0x2658   : > { %14759 = vmatpush3.bf16.msra.mxu0 %v15340_v53 }
0x2659   : > { %14772 = vmatprep.subr.bf16.mxu0 %v15657_v16 }
0x271e   : > { %v9616_v0 = vpop.f32.mrb[152].mxu0 }
0x271f   : > { %v9617_v46 = vadd.f32 %v9616_v0, %v16640_v43  ;;  %v14736_v49 = vpop.f32.mrb[153].mxu0 }
0x2720   : > { %v9619_v56 = vpop.f32.mrb[154].mxu0 }
0x2721   : > { %v14737_v61 = vpop.f32.mrb[155].mxu0  ;;  %v9622_v1 = vsel %vm1842_vm6, %v9617_v46, -inf }
0x2722   : > { %9623 = vmax.xlane.f32.xlu0 %v9622_v1 }
0x2726   : > { %v9727_v5 = vpop.f32.mrb[156].mxu0 }
0x2727   : > { %v9728_v8 = vadd.f32 %v9727_v5, %v16640_v43  ;;  %v14748_v9 = vpop.f32.mrb[157].mxu0 }
0x2728   : > { %v9730_v10 = vpop.f32.mrb[158].mxu0 }
0x2729   : > { %v14749_v11 = vpop.f32.mrb[159].mxu0  ;;  %v9733_v12 = vsel %vm1842_vm6, %v9728_v8, -inf }
0x272a   : > { %9734 = vmax.xlane.f32.xlu1 %v9733_v12 }
0x273b   : > { %9634 = vrot.lane.b32.xlu1 %v9572_v6, %s17572_s16  ;;  %s17609_s16 = sld [smem:[#allocation46_spill]] }
0x27af   : > { %v9624_v15 = vpop.xlane.xlu0 %9623 }
0x27b0   : > { %v9625_v13 = vsub.f32 %v9617_v46, %v9624_v15 }
0x27b2   : > { %v9626_v17 = vmul.f32 1.442695, %v9625_v13  ;;  %v13508_v13 = vld [vmem:[%s17587_s2 + $0x1] ss:$0 sm:$0xff] }
0x27b4   : > { %15525 = vpow2.f32 %v9626_v17 }
0x27b7   : > { %v9735_v19 = vpop.xlane.xlu1 %9734 }
0x27b8   : > { %v9736_v27 = vsub.f32 %v9728_v8, %v9735_v19  ;;  %v15343_v19 = vld [vmem:[%s17584_s21 + $0x10] sm:$0xff]  }
0x27ba   : > { %v9737_v32 = vmul.f32 1.442695, %v9736_v27  ;;  %v15344_v27 = vld [vmem:[%s17584_s21 + $0x18] sm:$0xff]  }
0x27bb   : > { %v9635_v20 = vpop.permute.xlu1 %9634 }
0x27bc   : > { %15527 = vpow2.f32 %v9737_v32  ;;  %v9640_v36 = vsel %vm1860_vm7, %v9635_v20, 0 }
0x27bd   : > { %14739 = vmatpush3.bf16.msra.mxu1 %v9640_v36 }
0x27be   : > { %v15526_v43 = vpop.eup %15525  ;;  %14750 = vmatprep.subr.bf16.mxu1 %v15657_v16 }
0x27bf   : > { %v9628_v28 = vsel %vm1842_vm6, %v15526_v43, 0.0 }
0x27c0   : > { %9629 = vadd.xlane.f32.xlu0 %v9628_v28  ;;  %v13502_v28 = vld [vmem:[%s17585_s24 + $0x1] ss:$0 sm:$0xff] }
0x27c6   : > { %v15528_v21 = vpop.eup %15527 }
0x27c7   : > { %v9739_v41 = vsel %vm1842_vm6, %v15528_v21, 0.0 }
0x27c8   : > { %9740 = vadd.xlane.f32.xlu0 %v9739_v41  ;;  %v13503_v41 = vld [vmem:[%s17586_s25 + $0x1] ss:$0 sm:$0xff] }
0x27de   : > { %9745 = vrot.lane.b32.xlu0 %v9572_v6, %s17573_s22  ;;  %s1240_s22 = sand.u32 1, %s15603_s10  }
0x284d   : > { %v9630_v22 = vpop.xlane.xlu0 %9629 }
0x284e   : > { %15529 = vrcp.f32 %v9630_v22 }
0x2855   : > { %v9741_v23 = vpop.xlane.xlu0 %9740 }
0x2856   : > { %15531 = vrcp.f32 %v9741_v23 }
0x2858   : > { %v15530_v14 = vpop.eup %15529 }
0x2859   : > { %v9632_v18 = vmul.f32 %v15530_v14, %v15526_v43  ;;  %v9746_v33 = vpop.permute.xlu0 %9745 }
0x285a   : > { %v9751_v24 = vsel %vm1860_vm7, %v9746_v33, 0  ;;  %v13504_v33 = vld [vmem:[%s17588_s6 + $0x1] ss:$0 sm:$0xff] }
0x285b   : > { %v9633_v59 = vpack.c.bf16 %v9632_v18, %v9632_v18 }
0x285d   : > { %14741 = vmatmul.mubr.msk.bf16.vlgmr.msra.gmra.mrb[152].mxu1 %vm1842_vm6, %v9633_v59 }
0x285e   : > { %14751 = vmatpush3.bf16.msra.mxu1 %v9751_v24  ;;  %14752 = vmatprep.mubr.msk.bf16.mxu1 %vm15656_vm0, %v15657_v16 }
0x285f   : > { %14764 = vmatprep.subr.bf16.mxu1 %v15657_v16 }
0x2860   : > { %v15532_v58 = vpop.eup %15531 }
0x2861   : > { %v9743_v42 = vmul.f32 %v15532_v58, %v15528_v21 }
0x2863   : > { %v9744_v48 = vpack.c.bf16 %v9743_v42, %v9743_v42 }
0x2865   : > { %14753 = vmatmul.mubr.msk.bf16.vlgmr.msra.gmra.mrb[156].mxu1 %vm1842_vm6, %v9744_v48 }
0x2866   : > { %14768 = vmatprep.mubr.msk.bf16.mxu1 %vm15656_vm0, %v15657_v16  ;;  %14765 = vmatpush3.bf16.msra.mxu1 %v15343_v19 }
0x2867   : > { %14766 = vmatprep.subr.bf16.mxu1 %v15657_v16 }
0x286a   : > { %14767 = vmatpush3.bf16.msra.mxu1 %v15344_v27 }
0x286b   : > { %14780 = vmatprep.subr.bf16.mxu1 %v15657_v16 }
0x2930   : > { %v9676_v44 = vpop.f32.mrb[152].mxu1 }
0x2931   : > { %9682 = vst.msk [vmem:[#allocation2] sm:$0xff] %vm1795_vm5, %v9676_v44  ;;  %v14742_v29 = vpop.f32.mrb[153].mxu1 }
0x2932   : > { %v9679_v63 = vpop.f32.mrb[154].mxu1 }
0x2933   : > { %v14743_v2 = vpop.f32.mrb[155].mxu1 }
0x2938   : > { %v9787_v4 = vpop.f32.mrb[156].mxu1 }
0x2939   : > { %9794 = vrot.lane.b32.xlu1 %v9787_v4, %s17574_s5  ;;  %v14754_v30 = vpop.f32.mrb[157].mxu1 }
0x293a   : > { %v9790_v31 = vpop.f32.mrb[158].mxu1 }
0x293b   : > { %v14755_v7 = vpop.f32.mrb[159].mxu1 }
0x29ab   : > { %v9795_v60 = vpop.permute.xlu1 %9794 }
0x29ac   : > { %9797 = vst.msk [vmem:[#allocation2] sm:$0xff] %vm2019_vm8, %v9795_v60 }
0x29b3   : > { %v9798_v6 = vld [vmem:[#allocation2] sm:$0xff] }
0x29b4   : > { %v9799_v54 = vpack.c.bf16 %v9798_v6, %v9798_v6 }
0x29b6   : > { %14761 = vmatmul.mubr.msk.bf16.vlgmr.msra.gmra.mrb[160].mxu0 %vm1747_vm4, %v9799_v54 }
0x29b7   : > { %14773 = vmatpush3.bf16.msra.mxu0 %v15341_v62  ;;  %14776 = vmatprep.mubr.msk.bf16.mxu0 %vm15656_vm0, %v15657_v16 }
0x29b8   : > { %14774 = vmatprep.subr.bf16.mxu0 %v15657_v16 }
0x29bb   : > { %14775 = vmatpush3.bf16.msra.mxu0 %v15342_v39 }
0x29bc   : > { %14786 = vmatprep.subr.bf16.mxu0 %v15657_v16 }
0x29be   : > { %14777 = vmatmul.mubr.msk.bf16.vlgmr.msra.gmra.mrb[164].mxu0 %vm1747_vm4, %v16687_v50 }
0x29bf   : > { %14788 = vmatprep.mubr.msk.bf16.mxu0 %vm15656_vm0, %v15657_v16 }
0x2a89   : > { %v9855_v40 = vpop.f32.mrb[160].mxu0 }
0x2a8a   : > { %v9856_v45 = vadd.f32 %v13498_v55, %v9855_v40  ;;  %v14762_v0 = vpop.f32.mrb[161].mxu0 }
0x2a8b   : > { %v9858_v46 = vpop.f32.mrb[162].mxu0 }
0x2a8c   : > { %v14763_v49 = vpop.f32.mrb[163].mxu0  ;;  %v9861_v56 = vadd.f32 %v9856_v45, %v17014_v47 }
0x2a8e   : > { %v9862_v61 = vsel %vm1747_vm4, %v9861_v56, 0.0 }
0x2a8f   : > { %9863 = vadd.xlane.f32.xlu1 %v9862_v61 }
0x2a91   : > { %v10003_v1 = vpop.f32.mrb[164].mxu0 }
0x2a92   : > { %v14778_v5 = vpop.f32.mrb[165].mxu0  ;;  %v10004_v17 = vadd.f32 %v13508_v13, %v10003_v1 }
0x2a93   : > { %v10006_v50 = vpop.f32.mrb[166].mxu0 }
0x2a94   : > { %v14779_v8 = vpop.f32.mrb[167].mxu0  ;;  %v17076_v47 = vpack.c.bf16 %v10004_v17, %v10004_v17 }
0x2a96   : > { %v10015_v18 = vsel %vm1795_vm5, %v17076_v47, 0 }
0x2b1c   : > { %v9864_v9 = vpop.xlane.xlu1 %9863 }
0x2b1d   : > { %v9865_v10 = vmul.f32 0.03125, %v9864_v9 }
0x2b1f   : > { %v9866_v11 = vsub.f32 %v9861_v56, %v9865_v10 }
0x2b21   : > { %v9867_v12 = vmul.f32 %v9866_v11, %v9866_v11 }
0x2b23   : > { %v9868_v15 = vsel %vm1747_vm4, %v9867_v12, 0.0 }
0x2b24   : > { %9869 = vadd.xlane.f32.xlu0 %v9868_v15 }
0x2b3a   : > { %10122 = vrot.lane.b32.xlu0 %v17076_v47, %s17571_s23 }
0x2bb1   : > { %v9870_v32 = vpop.xlane.xlu0 %9869 }
0x2bb2   : > { %v9871_v20 = vmul.f32 0.03125, %v9870_v32 }
0x2bb4   : > { %v9872_v36 = vadd.f32 1e-05, %v9871_v20 }
0x2bb5   : > { %v10123_v42 = vpop.permute.xlu0 %10122 }
0x2bb6   : > { %15533 = vrsqrt.f32 %v9872_v36  ;;  %v10128_v44 = vsel %vm1795_vm5, %v10123_v42, 0 }
0x2bc0   : > { %v15534_v43 = vpop.eup %15533 }
0x2bc1   : > { %v9874_v21 = vmul.f32 %v15534_v43, %v9866_v11  ;;  %v15345_v43 = vld [vmem:[%s17589_s29 + $0x10] sm:$0xff]  }
0x2bc3   : > { %v9881_v22 = vmul.f32 %v13502_v28, %v9874_v21  ;;  %v15346_v28 = vld [vmem:[%s17589_s29 + $0x18] sm:$0xff]  }
0x2bc5   : > { %v17086_v23 = vadd.f32 %v13503_v41, %v9881_v22 }
0x2bc7   : > { %v9889_v14 = vpack.c.bf16 %v17086_v23, %v17086_v23 }
0x2bc9   : > { %14769 = vmatmul.mubr.msk.bf16.vlgmr.msra.gmra.mrb[160].mxu1 %vm1747_vm4, %v9889_v14 }
0x2bca   : > { %14781 = vmatpush3.bf16.xpose.msra.mxu1 %v10015_v18  ;;  %14782 = vmatprep.mubr.msk.bf16.mxu1 %vm15656_vm0, %v15657_v16 }
0x2bcb   : > { %14792 = vmatprep.subr.bf16.mxu1 %v15657_v16 }
0x2c9c   : > { %v9945_v59 = vpop.f32.mrb[160].mxu1 }
0x2c9d   : > { %v9946_v24 = vadd.f32 %v13504_v33, %v9945_v59  ;;  %v14770_v58 = vpop.f32.mrb[161].mxu1 }
0x2c9e   : > { %v9948_v48 = vpop.f32.mrb[162].mxu1 }
0x2c9f   : > { %v10009_v26 = vpack.c.bf16 %v9946_v24, %v9946_v24  ;;  %v14771_v53 = vpop.f32.mrb[163].mxu1  ;;  %v13516_v24 = vld [vmem:[%s17590_s30 + $0x1] ss:$0 sm:$0xff] }
0x2ca1   : > { %10120 = vrot.lane.b32.xlu1 %v10009_v26, %s17571_s23  ;;  %14783 = vmatmul.mubr.msk.bf16.vlgmr.msra.gmra.mrb[164].mxu1 %vm1795_vm5, %v10009_v26  ;;  %s12281_s23 = sshll.u32 %s1240_s22, 3 }
0x2ca2   : > { %14793 = vmatpush3.bf16.xpose.msra.mxu1 %v10128_v44  ;;  %14794 = vmatprep.mubr.msk.bf16.mxu1 %vm15656_vm0, %v15657_v16 }
0x2ca3   : > { %14804 = vmatprep.subr.bf16.mxu1 %v15657_v16 }
0x2d13   : > { %v10121_v29 = vpop.permute.xlu1 %10120 }
0x2d14   : > { %14795 = vmatmul.mubr.msk.bf16.vlgmr.msra.gmra.mrb[168].mxu1 %vm1795_vm5, %v10121_v29 }
0x2d15   : > { %14808 = vmatprep.mubr.msk.bf16.mxu1 %vm15656_vm0, %v15657_v16  ;;  %14805 = vmatpush3.bf16.msra.mxu1 %v15345_v43  ;;  %v13215_v43 = vld [vmem:[%s17591_s26 + $0x190] sm:$0xff] }
0x2d16   : > { %14806 = vmatprep.subr.bf16.mxu1 %v15657_v16 }
0x2d19   : > { %14807 = vmatpush3.bf16.msra.mxu1 %v15346_v28  ;;  %v13223_v28 = vld [vmem:[%s17591_s26 + $0x1d0] sm:$0xff] }
0x2d74   : > { %v10051_v63 = vpop.f32.mrb[164].mxu1 }
0x2d75   : > { %v14784_v2 = vpop.f32.mrb[165].mxu1  ;;  %v10057_v4 = vsel %vm1842_vm6, %v10051_v63, -inf }
0x2d76   : > { %10058 = vmax.xlane.f32.xlu1 %v10057_v4  ;;  %v10054_v30 = vpop.f32.mrb[166].mxu1 }
0x2d77   : > { %v14785_v31 = vpop.f32.mrb[167].mxu1 }
0x2de7   : > { %v10164_v7 = vpop.f32.mrb[168].mxu1 }
0x2de8   : > { %v14796_v60 = vpop.f32.mrb[169].mxu1  ;;  %v10170_v6 = vsel %vm1842_vm6, %v10164_v7, -inf }
0x2de9   : > { %10171 = vmax.xlane.f32.xlu0 %v10170_v6  ;;  %v10167_v62 = vpop.f32.mrb[170].mxu1  ;;  %v13205_v60 = vld [vmem:[%s17591_s26 + $0x140] sm:$0xff]  ;;  %v13198_v6 = vld [vmem:[%s17591_s26 + $0x108] sm:$0xff] }
0x2dea   : > { %v14797_v54 = vpop.f32.mrb[171].mxu1 }
0x2deb   : > { %v13206_v54 = vld [vmem:[%s17591_s26 + $0x148] sm:$0xff] }
0x2e03   : > { %v10059_v39 = vpop.xlane.xlu1 %10058 }
0x2e04   : > { %v10060_v55 = vsub.f32 %v10051_v63, %v10059_v39  ;;  %v13524_v39 = vcombine.low %v13198_v6, %v13206_v54 }
0x2e06   : > { %v10061_v40 = vmul.f32 1.442695, %v10060_v55  ;;  %v13525_v55 = vcombine.high %v13198_v6, %v13206_v54  ;;  %v13203_v6 = vld [vmem:[%s17591_s26 + $0x130] sm:$0xff]  ;;  %v13204_v54 = vld [vmem:[%s17591_s26 + $0x138] sm:$0xff] }
0x2e08   : > { %15535 = vpow2.f32 %v10061_v40  ;;  %10613 = vmatprep.subr.bf16.mxu1 %v13525_v55  ;;  %v13213_v40 = vld [vmem:[%s17591_s26 + $0x180] sm:$0xff] }
0x2e12   : > { %v15536_v45 = vpop.eup %15535 }
0x2e13   : > { %v10063_v0 = vsel %vm1842_vm6, %v15536_v45, 0.0 }
0x2e14   : > { %10064 = vadd.xlane.f32.xlu0 %v10063_v0  ;;  %v13214_v0 = vld [vmem:[%s17591_s26 + $0x188] sm:$0xff] }
0x2e2a   : > { %10070 = vrot.lane.b32.xlu0 %v17076_v47, %s17578_s13  ;;  %s17607_s13 = sld [smem:[#allocation45_spill]] }
0x2e76   : > { %v10172_v46 = vpop.xlane.xlu0 %10171 }
0x2e77   : > { %v10173_v49 = vsub.f32 %v10164_v7, %v10172_v46  ;;  %v13197_v7 = vld [vmem:[%s17591_s26 + $0x100] sm:$0xff] }
0x2e78   : > { %v13523_v62 = vcombine.high %v13197_v7, %v13205_v60 }
0x2e79   : > { %v10174_v56 = vmul.f32 1.442695, %v10173_v49  ;;  %v13222_v49 = vld [vmem:[%s17591_s26 + $0x1c8] sm:$0xff] }
0x2e7b   : > { %15537 = vpow2.f32 %v10174_v56 }
0x2e85   : > { %v15538_v61 = vpop.eup %15537 }
0x2e86   : > { %v10176_v1 = vsel %vm1842_vm6, %v15538_v61, 0.0 }
0x2e87   : > { %10177 = vadd.xlane.f32.xlu1 %v10176_v1  ;;  %v13541_v1 = vcombine.high %v13214_v0, %v13222_v49 }
0x2e98   : > { %10182 = vrot.lane.b32.xlu1 %v17076_v47, %s17577_s9  ;;  %s17606_s9 = sld [smem:[#allocation44_spill]] }
0x2ea1   : > { %v10065_v5 = vpop.xlane.xlu0 %10064 }
0x2ea2   : > { %15539 = vrcp.f32 %v10065_v5  ;;  %v13199_v5 = vld [vmem:[%s17591_s26 + $0x110] sm:$0xff] }
0x2ea5   : > { %v10071_v50 = vpop.permute.xlu0 %10070 }
0x2ea6   : > { %v10076_v8 = vsel %vm1860_vm7, %v10071_v50, 0  ;;  %v13207_v50 = vld [vmem:[%s17591_s26 + $0x150] sm:$0xff] }
0x2ea7   : > { %14787 = vmatpush3.bf16.msra.mxu0 %v10076_v8  ;;  %v13200_v8 = vld [vmem:[%s17591_s26 + $0x118] sm:$0xff] }
0x2ea8   : > { %14798 = vmatprep.subr.bf16.mxu0 %v15657_v16 }
0x2eac   : > { %v15540_v9 = vpop.eup %15539 }
0x2ead   : > { %v10067_v10 = vmul.f32 %v15540_v9, %v15536_v45  ;;  %v13221_v45 = vld [vmem:[%s17591_s26 + $0x1c0] sm:$0xff]  ;;  %v13526_v9 = vcombine.low %v13199_v5, %v13207_v50 }
0x2eae   : > { %v13539_v46 = vcombine.high %v13213_v40, %v13221_v45  ;;  %v13538_v56 = vcombine.low %v13213_v40, %v13221_v45 }
0x2eaf   : > { %v10068_v11 = vpack.c.bf16 %v10067_v10, %v10067_v10  ;;  %v13527_v10 = vcombine.high %v13199_v5, %v13207_v50 }
0x2eb1   : > { %14789 = vmatmul.mubr.msk.bf16.vlgmr.msra.gmra.mrb[168].mxu0 %vm1842_vm6, %v10068_v11  ;;  %v13208_v11 = vld [vmem:[%s17591_s26 + $0x158] sm:$0xff] }
0x2eb2   : > { %14800 = vmatprep.mubr.msk.bf16.mxu0 %vm15656_vm0, %v15657_v16 }
0x2f14   : > { %v10178_v12 = vpop.xlane.xlu1 %10177 }
0x2f15   : > { %15541 = vrcp.f32 %v10178_v12  ;;  %v13528_v12 = vcombine.low %v13200_v8, %v13208_v11 }
0x2f18   : > { %v10183_v15 = vpop.permute.xlu1 %10182 }
0x2f19   : > { %v10188_v13 = vsel %vm1860_vm7, %v10183_v15, 0  ;;  %v13529_v15 = vcombine.high %v13200_v8, %v13208_v11  ;;  %v15348_v11 = vld [vmem:[%s17596_s28 + $0x4c0] sm:$0xff]  }
0x2f1a   : > { %14799 = vmatpush3.bf16.msra.mxu0 %v10188_v13 }
0x2f1b   : > { %10572 = vmatprep.subr.bf16.mxu0 %v13523_v62  ;;  %v13211_v62 = vld [vmem:[%s17591_s26 + $0x170] sm:$0xff] }
0x2f1c   : > { %v13535_v40 = vcombine.high %v13203_v6, %v13211_v62 }
0x2f1f   : > { %v15542_v17 = vpop.eup %15541 }
0x2f20   : > { %v10180_v47 = vmul.f32 %v15542_v17, %v15538_v61  ;;  %v13540_v61 = vcombine.low %v13214_v0, %v13222_v49  ;;  %v13219_v0 = vld [vmem:[%s17591_s26 + $0x1b0] sm:$0xff]  ;;  %v13220_v49 = vld [vmem:[%s17591_s26 + $0x1b8] sm:$0xff] }
0x2f22   : > { %v10181_v19 = vpack.c.bf16 %v10180_v47, %v10180_v47 }
0x2f24   : > { %14801 = vmatmul.mubr.msk.bf16.vlgmr.msra.gmra.mrb[172].mxu0 %vm1842_vm6, %v10181_v19 }
0x2f25   : > { %10604 = vmatprep.mubr.bf16.mxu0 %v15654_v3 }
0x2f84   : > { %v10112_v27 = vpop.f32.mrb[168].mxu0 }
0x2f85   : > { %10118 = vst.msk [vmem:[#allocation2] sm:$0xff] %vm1795_vm5, %v10112_v27  ;;  %v14790_v32 = vpop.f32.mrb[169].mxu0  ;;  %v13520_v27 = vld [vmem:[%s17593_s18 + $0x1] ss:$0 sm:$0xff] }
0x2f86   : > { %v10115_v20 = vpop.f32.mrb[170].mxu0 }
0x2f87   : > { %v14791_v36 = vpop.f32.mrb[171].mxu0  ;;  %v13521_v20 = vld [vmem:[%s17594_s1 + $0x1] ss:$0 sm:$0xff]  ;;  %s1242_s1 = scalar_lea.vmem [#allocation3], %s12281_s23 }
0x2f88   : > { %s12165_s2 = sshll.u32 %s1242_s1, 4  ;;  %s17409_s2 = int_to_ptr.vmem [resolvable:$true] %s12165_s2 }
0x2ff7   : > { %v10224_v21 = vpop.f32.mrb[172].mxu0 }
0x2ff8   : > { %10231 = vrot.lane.b32.xlu1 %v10224_v21, %s17574_s5  ;;  %v14802_v41 = vpop.f32.mrb[173].mxu0  ;;  %v13216_v21 = vld [vmem:[%s17591_s26 + $0x198] sm:$0xff]  ;;  %s17605_s5 = sld [smem:[#allocation43_spill]] }
0x2ff9   : > { %v10227_v22 = vpop.f32.mrb[174].mxu0  ;;  %v13224_v41 = vld [vmem:[%s17591_s26 + $0x1d8] sm:$0xff] }
0x2ffa   : > { %v14803_v14 = vpop.f32.mrb[175].mxu0 }
0x306a   : > { %v10232_v18 = vpop.permute.xlu1 %10231 }
0x306b   : > { %10234 = vst.msk [vmem:[#allocation2] sm:$0xff] %vm2019_vm8, %v10232_v18  ;;  %v13543_v18 = vcombine.high %v13215_v43, %v13223_v28 }
0x3072   : > { %v10235_v33 = vld [vmem:[#allocation2] sm:$0xff] }
0x3073   : > { %v10236_v59 = vpack.c.bf16 %v10235_v33, %v10235_v33  ;;  %v13545_v33 = vcombine.high %v13216_v21, %v13224_v41 }
0x3075   : > { %14809 = vmatmul.mubr.msk.bf16.vlgmr.msra.gmra.mrb[172].mxu1 %vm1747_vm4, %v10236_v59  ;;  %v13201_v59 = vld [vmem:[%s17591_s26 + $0x120] sm:$0xff] }
0x3076   : > { %10645 = vmatprep.mubr.bf16.mxu1 %v15654_v3  ;;  %10614 = vmatpush1.bf16.msra.mxu1 %v13524_v39 }
0x3077   : > { %10615 = vmatprep.subr.bf16.mxu1 %v13541_v1 }
0x307a   : > { %10616 = vmatpush1.bf16.msra.mxu1 %v13540_v61  ;;  %v13534_v61 = vcombine.low %v13203_v6, %v13211_v62 }
0x307b   : > { %10695 = vmatprep.subr.bf16.mxu1 %v13529_v15  ;;  %v15350_v15 = vld [vmem:[%s17596_s28 + $0x480] sm:$0xff]  }
0x3148   : > { %v10292_v58 = vpop.f32.mrb[172].mxu1 }
0x3149   : > { %v10293_v42 = vadd.f32 %v13516_v24, %v10292_v58  ;;  %v14810_v48 = vpop.f32.mrb[173].mxu1  ;;  %v13209_v24 = vld [vmem:[%s17591_s26 + $0x160] sm:$0xff]  ;;  %v13202_v58 = vld [vmem:[%s17591_s26 + $0x128] sm:$0xff] }
0x314a   : > { %v10295_v26 = vpop.f32.mrb[174].mxu1  ;;  %v13542_v48 = vcombine.low %v13215_v43, %v13223_v28  ;;  %v15360_v43 = vld [vmem:[%s17596_s28 + $0x4d8] sm:$0xff]  }
0x314b   : > { %v14811_v53 = vpop.f32.mrb[175].mxu1  ;;  %v10298_v44 = vadd.f32 %v10293_v42, %v17086_v23  ;;  %v13522_v23 = vcombine.low %v13197_v7, %v13205_v60  ;;  %v13210_v42 = vld [vmem:[%s17591_s26 + $0x168] sm:$0xff]  ;;  %v13544_v26 = vcombine.low %v13216_v21, %v13224_v41  ;;  %v15361_v28 = vld [vmem:[%s17596_s28 + $0x418] sm:$0xff]   ;;  %v15363_v41 = vld [vmem:[%s17596_s28 + $0x460] sm:$0xff]  }
0x314c   : > { %v13531_v53 = vcombine.high %v13201_v59, %v13209_v24  ;;  %v15362_v21 = vld [vmem:[%s17596_s28 + $0x498] sm:$0xff]  }
0x314d   : > { %v10299_v29 = vsel %vm1747_vm4, %v10298_v44, 0.0  ;;  %10573 = vmatpush1.bf16.msra.mxu0 %v13522_v23  ;;  %v13212_v23 = vld [vmem:[%s17591_s26 + $0x178] sm:$0xff] }
0x314e   : > { %10300 = vadd.xlane.f32.xlu0 %v10299_v29  ;;  %10574 = vmatprep.subr.bf16.mxu0 %v13539_v46  ;;  %v13217_v29 = vld [vmem:[%s17591_s26 + $0x1a0] sm:$0xff]  ;;  %v13537_v45 = vcombine.high %v13204_v54, %v13212_v23  ;;  %v13227_v46 = vld [vmem:[%s17591_s26 + $0x1f0] sm:$0xff]  ;;  %v13536_v1 = vcombine.low %v13204_v54, %v13212_v23 }
0x314f   : > { %v13551_v5 = vcombine.high %v13219_v0, %v13227_v46  ;;  %v13550_v8 = vcombine.low %v13219_v0, %v13227_v46 }
0x3151   : > { %10575 = vmatpush1.bf16.msra.mxu0 %v13538_v56  ;;  %v13228_v56 = vld [vmem:[%s17591_s26 + $0x1f8] sm:$0xff] }
0x3152   : > { %10654 = vmatprep.subr.bf16.mxu0 %v13527_v10  ;;  %v13553_v50 = vcombine.high %v13220_v49, %v13228_v56  ;;  %v15347_v10 = vld [vmem:[%s17596_s28 + $0x440] sm:$0xff]  }
0x31db   : > { %v10301_v63 = vpop.xlane.xlu0 %10300 }
0x31dc   : > { %v10302_v2 = vmul.f32 0.03125, %v10301_v63  ;;  %v13225_v63 = vld [vmem:[%s17591_s26 + $0x1e0] sm:$0xff] }
0x31dd   : > { %v13547_v7 = vcombine.high %v13217_v29, %v13225_v63  ;;  %v13546_v39 = vcombine.low %v13217_v29, %v13225_v63  ;;  %v15375_v29 = vld [vmem:[%s17596_s28 + $0x478] sm:$0xff]  }
0x31de   : > { %v10303_v4 = vsub.f32 %v10298_v44, %v10302_v2  ;;  %v13533_v44 = vcombine.high %v13202_v58, %v13210_v42  ;;  %v13218_v2 = vld [vmem:[%s17591_s26 + $0x1a8] sm:$0xff]  ;;  %v15376_v63 = vld [vmem:[%s17596_s28 + $0x4f8] sm:$0xff]  }
0x31e0   : > { %v10304_v30 = vmul.f32 %v10303_v4, %v10303_v4 }
0x31e2   : > { %v10305_v31 = vsel %vm1747_vm4, %v10304_v30, 0.0  ;;  %v13530_v30 = vcombine.low %v13201_v59, %v13209_v24  ;;  %v15367_v59 = vld [vmem:[%s17596_s28 + $0x468] sm:$0xff]  }
0x31e3   : > { %10306 = vadd.xlane.f32.xlu1 %v10305_v31  ;;  %v13532_v31 = vcombine.low %v13202_v58, %v13210_v42  ;;  %v15368_v24 = vld [vmem:[%s17596_s28 + $0x4e8] sm:$0xff]  }
0x31e4   : > { %v15369_v58 = vld [vmem:[%s17596_s28 + $0x428] sm:$0xff]  }
0x31e5   : > { %v15370_v42 = vld [vmem:[%s17596_s28 + $0x4a8] sm:$0xff]  }
0x3270   : > { %v10307_v13 = vpop.xlane.xlu1 %10306 }
0x3271   : > { %v10308_v17 = vmul.f32 0.03125, %v10307_v13  ;;  %v15351_v13 = vld [vmem:[%s17596_s28 + $0x448] sm:$0xff]  }
0x3273   : > { %v10309_v47 = vadd.f32 1e-05, %v10308_v17  ;;  %v15352_v17 = vld [vmem:[%s17596_s28 + $0x4c8] sm:$0xff]  }
0x3275   : > { %15543 = vrsqrt.f32 %v10309_v47  ;;  %v15354_v47 = vld [vmem:[%s17596_s28 + $0x488] sm:$0xff]  }
0x327f   : > { %v15544_v19 = vpop.eup %15543 }
0x3280   : > { %v10311_v32 = vmul.f32 %v15544_v19, %v10303_v4  ;;  %v13226_v4 = vld [vmem:[%s17591_s26 + $0x1e8] sm:$0xff]  ;;  %v15355_v19 = vld [vmem:[%s17596_s28 + $0x450] sm:$0xff]  }
0x3281   : > { %v13549_v60 = vcombine.high %v13218_v2, %v13226_v4  ;;  %v13548_v55 = vcombine.low %v13218_v2, %v13226_v4  ;;  %v15377_v2 = vld [vmem:[%s17596_s28 + $0x438] sm:$0xff]  }
0x3282   : > { %v10318_v36 = vmul.f32 %v13520_v27, %v10311_v32  ;;  %v15356_v27 = vld [vmem:[%s17596_s28 + $0x4d0] sm:$0xff]   ;;  %v15378_v4 = vld [vmem:[%s17596_s28 + $0x4b8] sm:$0xff]  }
0x3283   : > { %v15357_v32 = vld [vmem:[%s17596_s28 + $0x410] sm:$0xff]  }
0x3284   : > { %v17152_v22 = vadd.f32 %v13521_v20, %v10318_v36  ;;  %v15358_v20 = vld [vmem:[%s17596_s28 + $0x490] sm:$0xff]   ;;  %v15359_v36 = vld [vmem:[%s17596_s28 + $0x458] sm:$0xff]  }
0x3286   : > { %v17156_v14 = vpack.c.bf16 %v17152_v22, %v17152_v22 }
0x3288   : > { %13554 = vmatmul.mubr.msk.bf16.vlgmr.msra.gmra.mrb[176].mxu0 %vm1747_vm4, %v17156_v14  ;;  %13555 = vmatmul.mubr.msk.bf16.vlgmr.msra.gmra.mrb[176].mxu1 %vm1747_vm4, %v17156_v14 }
0x3289   : > { %10655 = vmatpush1.bf16.msra.mxu0 %v13526_v9  ;;  %10696 = vmatpush1.bf16.msra.mxu1 %v13528_v12  ;;  %v13552_v9 = vcombine.low %v13220_v49, %v13228_v56  ;;  %v15349_v12 = vld [vmem:[%s17596_s28 + $0x400] sm:$0xff]  }
0x328a   : > { %10656 = vmatprep.subr.bf16.mxu0 %v13543_v18  ;;  %10697 = vmatprep.subr.bf16.mxu1 %v13545_v33  ;;  %v15365_v18 = vld [vmem:[%s17596_s28 + $0x420] sm:$0xff]  }
0x328b   : > { %10686 = vmatprep.mubr.bf16.mxu0 %v15654_v3  ;;  %10727 = vmatprep.mubr.bf16.mxu1 %v15654_v3  ;;  %v15366_v33 = vld [vmem:[%s17596_s28 + $0x4a0] sm:$0xff]  }
0x328d   : > { %10657 = vmatpush1.bf16.msra.mxu0 %v13542_v48  ;;  %10698 = vmatpush1.bf16.msra.mxu1 %v13544_v26  ;;  %v15371_v48 = vld [vmem:[%s17596_s28 + $0x470] sm:$0xff]  }
0x328e   : > { %10736 = vmatprep.subr.bf16.mxu0 %v13531_v53  ;;  %10777 = vmatprep.subr.bf16.mxu1 %v13533_v44  ;;  %v15372_v26 = vld [vmem:[%s17596_s28 + $0x4f0] sm:$0xff]  }
0x328f   : > { %v15373_v53 = vld [vmem:[%s17596_s28 + $0x430] sm:$0xff]  }
0x3290   : > { %13556 = vmatmul.mubr.msk.bf16.vlgmr.msra.gmra.mrb[180].mxu0 %vm1747_vm4, %v17156_v14  ;;  %13557 = vmatmul.mubr.msk.bf16.vlgmr.msra.gmra.mrb[180].mxu1 %vm1747_vm4, %v17156_v14  ;;  %v15374_v44 = vld [vmem:[%s17596_s28 + $0x4b0] sm:$0xff]  }
0x3291   : > { %10737 = vmatpush1.bf16.msra.mxu0 %v13530_v30  ;;  %10778 = vmatpush1.bf16.msra.mxu1 %v13532_v31  ;;  %v15379_v30 = vld [vmem:[%s17596_s28 + $0x540] sm:$0xff]  }
0x3292   : > { %10738 = vmatprep.subr.bf16.mxu0 %v13547_v7  ;;  %10779 = vmatprep.subr.bf16.mxu1 %v13549_v60  ;;  %v15380_v31 = vld [vmem:[%s17596_s28 + $0x5c0] sm:$0xff]   ;;  %v17231_v7 = vld [vmem:[%s17598_s4 + $0x10] sm:$0xff] }
0x3293   : > { %10768 = vmatprep.mubr.bf16.mxu0 %v15654_v3  ;;  %10809 = vmatprep.mubr.bf16.mxu1 %v15654_v3  ;;  %v10332_v60 = vrot.slane %v17231_v7, %v16113_v34  ;;  %v10340_v6 = vrot.slane %v17231_v7, %v16116_v35  ;;  %v10336_v62 = vrot.slane %v17231_v7, %v16122_v37 }
0x3294   : > { %v10344_v54 = vrot.slane %v17231_v7, %v16125_v38 }
0x3295   : > { %10739 = vmatpush1.bf16.msra.mxu0 %v13546_v39  ;;  %10780 = vmatpush1.bf16.msra.mxu1 %v13548_v55 }
0x3296   : > { %10818 = vmatprep.subr.bf16.mxu0 %v13535_v40  ;;  %10859 = vmatprep.subr.bf16.mxu1 %v13537_v45 }
0x3298   : > { %13558 = vmatmul.mubr.msk.bf16.vlgmr.msra.gmra.mrb[184].mxu0 %vm1747_vm4, %v17156_v14  ;;  %13559 = vmatmul.mubr.msk.bf16.vlgmr.msra.gmra.mrb[184].mxu1 %vm1747_vm4, %v17156_v14 }
0x3299   : > { %10819 = vmatpush1.bf16.msra.mxu0 %v13534_v61  ;;  %10860 = vmatpush1.bf16.msra.mxu1 %v13536_v1 }
0x329a   : > { %10820 = vmatprep.subr.bf16.mxu0 %v13551_v5  ;;  %10861 = vmatprep.subr.bf16.mxu1 %v13553_v50 }
0x329b   : > { %10850 = vmatprep.mubr.bf16.mxu0 %v15654_v3  ;;  %10891 = vmatprep.mubr.bf16.mxu1 %v15654_v3  ;;  %v15353_v3 = vld [vmem:[%s17596_s28 + $0x408] sm:$0xff]  }
0x329d   : > { %10821 = vmatpush1.bf16.msra.mxu0 %v13550_v8  ;;  %10862 = vmatpush1.bf16.msra.mxu1 %v13552_v9 }
0x329e   : > { %14339 = vmatprep.subr.bf16.mxu0 %v15347_v10  ;;  %14361 = vmatprep.subr.bf16.mxu1 %v15348_v11 }
0x32a0   : > { %13560 = vmatmul.mubr.msk.bf16.vlgmr.msra.gmra.mrb[188].mxu0 %vm1747_vm4, %v17156_v14  ;;  %13561 = vmatmul.mubr.msk.bf16.vlgmr.msra.gmra.mrb[188].mxu1 %vm1747_vm4, %v17156_v14  ;;  %v15364_v14 = vld [vmem:[%s17596_s28 + $0x4e0] sm:$0xff]  }
0x32a1   : > { %14340 = vmatpush3.bf16.msra.mxu0 %v15349_v12  ;;  %14362 = vmatpush3.bf16.msra.mxu1 %v15350_v15  ;;  %v10352_v15 = vrot.slane %v17231_v7, %v16136_v51 }
0x32a2   : > { %14341 = vmatprep.subr.bf16.mxu0 %v15351_v13  ;;  %14363 = vmatprep.subr.bf16.mxu1 %v15352_v17  ;;  %v10360_v13 = vrot.slane %v17231_v7, %v16139_v52  ;;  %v15381_v17 = vld [vmem:[%s17596_s28 + $0x500] sm:$0xff]  }
0x32a5   : > { %14342 = vmatpush3.bf16.msra.mxu0 %v15353_v3  ;;  %14364 = vmatpush3.bf16.msra.mxu1 %v15354_v47  ;;  %v15382_v3 = vld [vmem:[%s17596_s28 + $0x580] sm:$0xff]  }
0x32a6   : > { %14343 = vmatprep.subr.bf16.mxu0 %v15355_v19  ;;  %14365 = vmatprep.subr.bf16.mxu1 %v15356_v27  ;;  %v15383_v27 = vld [vmem:[%s17596_s28 + $0x548] sm:$0xff]  }
0x32a9   : > { %14344 = vmatpush3.bf16.msra.mxu0 %v15357_v32  ;;  %14366 = vmatpush3.bf16.msra.mxu1 %v15358_v20  ;;  %v15384_v32 = vld [vmem:[%s17596_s28 + $0x5c8] sm:$0xff]  }
0x32aa   : > { %14345 = vmatprep.subr.bf16.mxu0 %v15359_v36  ;;  %14367 = vmatprep.subr.bf16.mxu1 %v15360_v43 }
0x32ad   : > { %14346 = vmatpush3.bf16.msra.mxu0 %v15361_v28  ;;  %14368 = vmatpush3.bf16.msra.mxu1 %v15362_v21 }
0x32ae   : > { %14347 = vmatprep.subr.bf16.mxu0 %v15363_v41  ;;  %14369 = vmatprep.subr.bf16.mxu1 %v15364_v14 }
0x32b1   : > { %14348 = vmatpush3.bf16.msra.mxu0 %v15365_v18  ;;  %14370 = vmatpush3.bf16.msra.mxu1 %v15366_v33  ;;  %v15385_v33 = vld [vmem:[%s17596_s28 + $0x508] sm:$0xff]  }
0x32b2   : > { %14349 = vmatprep.subr.bf16.mxu0 %v15367_v59  ;;  %14371 = vmatprep.subr.bf16.mxu1 %v15368_v24  ;;  %v15386_v59 = vld [vmem:[%s17596_s28 + $0x588] sm:$0xff]  }
0x32b5   : > { %14350 = vmatpush3.bf16.msra.mxu0 %v15369_v58  ;;  %14372 = vmatpush3.bf16.msra.mxu1 %v15370_v42  ;;  %v15387_v42 = vld [vmem:[%s17596_s28 + $0x550] sm:$0xff]  }
0x32b6   : > { %14351 = vmatprep.subr.bf16.mxu0 %v15371_v48  ;;  %14373 = vmatprep.subr.bf16.mxu1 %v15372_v26  ;;  %v15388_v48 = vld [vmem:[%s17596_s28 + $0x5d0] sm:$0xff]  }
0x32b9   : > { %14352 = vmatpush3.bf16.msra.mxu0 %v15373_v53  ;;  %14374 = vmatpush3.bf16.msra.mxu1 %v15374_v44 }
0x32ba   : > { %14353 = vmatprep.subr.bf16.mxu0 %v15375_v29  ;;  %14375 = vmatprep.subr.bf16.mxu1 %v15376_v63  ;;  %v15389_v63 = vld [vmem:[%s17596_s28 + $0x510] sm:$0xff]  }
0x32bd   : > { %14354 = vmatpush3.bf16.msra.mxu0 %v15377_v2  ;;  %14376 = vmatpush3.bf16.msra.mxu1 %v15378_v4  ;;  %v15390_v2 = vld [vmem:[%s17596_s28 + $0x590] sm:$0xff]   ;;  %v15391_v4 = vld [vmem:[%s17596_s28 + $0x558] sm:$0xff]  }
0x32be   : > { %14383 = vmatprep.subr.bf16.mxu0 %v15379_v30  ;;  %14405 = vmatprep.subr.bf16.mxu1 %v15380_v31  ;;  %v15392_v30 = vld [vmem:[%s17596_s28 + $0x5d8] sm:$0xff]  }
0x335b   : > { %v10606_v23 = vpop.f32.mrb[176].mxu0  ;;  %v10647_v39 = vpop.f32.mrb[176].mxu1 }
0x335c   : > { %v10607_v55 = vadd.f32 %v10606_v23, %v10332_v60  ;;  %v10648_v40 = vadd.f32 %v10647_v39, %v10340_v6  ;;  %v10608_v45 = vpop.f32.mrb[177].mxu0  ;;  %v10649_v0 = vpop.f32.mrb[177].mxu1  ;;  %v15393_v39 = vld [vmem:[%s17596_s28 + $0x518] sm:$0xff]  }
0x335d   : > { %v10609_v46 = vadd.f32 %v10608_v45, %v10336_v62  ;;  %v10650_v49 = vadd.f32 %v10649_v0, %v10344_v54  ;;  %v10610_v56 = vpop.f32.mrb[178].mxu0  ;;  %v10651_v61 = vpop.f32.mrb[178].mxu1  ;;  %v15395_v0 = vld [vmem:[%s17596_s28 + $0x560] sm:$0xff]  }
0x335e   : > { %v10900_v1 = vmax.f32 %v10607_v55, 0.0  ;;  %v10902_v5 = vmax.f32 %v10648_v40, 0.0  ;;  %v10611_v50 = vpop.f32.mrb[179].mxu0  ;;  %v10652_v8 = vpop.f32.mrb[179].mxu1  ;;  %v15394_v55 = vld [vmem:[%s17596_s28 + $0x598] sm:$0xff]   ;;  %v15397_v61 = vld [vmem:[%s17596_s28 + $0x520] sm:$0xff]  }
0x335f   : > { %v10901_v9 = vmax.f32 %v10609_v46, 0.0  ;;  %v10903_v10 = vmax.f32 %v10650_v49, 0.0  ;;  %v15396_v46 = vld [vmem:[%s17596_s28 + $0x5e0] sm:$0xff]   ;;  %v17270_v49 = vld [vmem:[%s17598_s4 + $0x18] sm:$0xff]  ;;  %v15400_v50 = vld [vmem:[%s17596_s28 + $0x5e8] sm:$0xff]  }
0x3360   : > { %v10916_v47 = vpack.c.bf16 %v10900_v1, %v10900_v1  ;;  %v10918_v19 = vpack.c.bf16 %v10902_v5, %v10902_v5  ;;  %v10388_v56 = vrot.slane %v17270_v49, %v16168_v25  ;;  %v15398_v1 = vld [vmem:[%s17596_s28 + $0x5a0] sm:$0xff]   ;;  %v15399_v5 = vld [vmem:[%s17596_s28 + $0x568] sm:$0xff]  }
0x3361   : > { %v10917_v11 = vpack.c.bf16 %v10901_v9, %v10901_v9  ;;  %v10919_v12 = vpack.c.bf16 %v10903_v10, %v10903_v10 }
0x3363   : > { %v17249_v20 = vpop.f32.mrb[180].mxu0  ;;  %v17251_v36 = vpop.f32.mrb[180].mxu1  ;;  %11738 = vmatprep.mubr.bf16.mxu0 %v10917_v11  ;;  %11778 = vmatprep.mubr.bf16.mxu1 %v10919_v12 }
0x3364   : > { %v10690_v43 = vpop.f32.mrb[181].mxu0  ;;  %v10731_v28 = vpop.f32.mrb[181].mxu1  ;;  %11739 = vmatmul.mubr.bf16.vlgmr.msra.gmra.mrb[192].mxu0 %v10916_v47  ;;  %11779 = vmatmul.mubr.bf16.vlgmr.msra.gmra.mrb[192].mxu1 %v10918_v19  ;;  %v10348_v47 = vrot.slane %v17231_v7, %v16180_v57  ;;  %v10356_v19 = vrot.slane %v17231_v7, %v16168_v25  ;;  %v15406_v25 = vld [vmem:[%s17596_s28 + $0x5b0] sm:$0xff]  }
0x3365   : > { %v10691_v21 = vadd.f32 %v10690_v43, %v10352_v15  ;;  %v10732_v41 = vadd.f32 %v10731_v28, %v10360_v13  ;;  %14384 = vmatpush3.bf16.msra.mxu0 %v15381_v17  ;;  %14406 = vmatpush3.bf16.msra.mxu1 %v15382_v3  ;;  %v10692_v14 = vpop.f32.mrb[182].mxu0  ;;  %v10733_v18 = vpop.f32.mrb[182].mxu1  ;;  %v15401_v17 = vld [vmem:[%s17596_s28 + $0x528] sm:$0xff]   ;;  %v15403_v43 = vld [vmem:[%s17596_s28 + $0x570] sm:$0xff]  }
0x3366   : > { %v10693_v24 = vpop.f32.mrb[183].mxu0  ;;  %v10734_v58 = vpop.f32.mrb[183].mxu1  ;;  %14385 = vmatprep.subr.bf16.mxu0 %v15383_v27  ;;  %14407 = vmatprep.subr.bf16.mxu1 %v15384_v32  ;;  %v15402_v3 = vld [vmem:[%s17596_s28 + $0x5a8] sm:$0xff]   ;;  %v15404_v28 = vld [vmem:[%s17596_s28 + $0x5f0] sm:$0xff]   ;;  %v10689_v7 = vadd.f32 %v17249_v20, %v10348_v47  ;;  %v10730_v18 = vadd.f32 %v17251_v36, %v10356_v19  ;;  %v15411_v20 = vld [vmem:[%s17596_s28 + $0x640] sm:$0xff]  }
0x3367   : > { %v10905_v26 = vmax.f32 %v10691_v21, 0.0  ;;  %v10907_v53 = vmax.f32 %v10732_v41, 0.0  ;;  %v10368_v21 = vrot.slane %v17270_v49, %v16122_v37  ;;  %v10376_v41 = vrot.slane %v17270_v49, %v16125_v38  ;;  %v15405_v14 = vld [vmem:[%s17596_s28 + $0x530] sm:$0xff]   ;;  %v15409_v38 = vld [vmem:[%s17596_s28 + $0x538] sm:$0xff]   ;;  %v15412_v36 = vld [vmem:[%s17596_s28 + $0x6c0] sm:$0xff]  }
0x3368   : > { %v15410_v58 = vld [vmem:[%s17596_s28 + $0x5b8] sm:$0xff]   ;;  %v15434_v47 = vld [vmem:[%s17596_s28 + $0x6a8] sm:$0xff]   ;;  %v15435_v19 = vld [vmem:[%s17596_s28 + $0x670] sm:$0xff]  }
0x3369   : > { %v10921_v44 = vpack.c.bf16 %v10905_v26, %v10905_v26  ;;  %v10923_v29 = vpack.c.bf16 %v10907_v53, %v10907_v53  ;;  %14386 = vmatpush3.bf16.msra.mxu0 %v15385_v33  ;;  %14408 = vmatpush3.bf16.msra.mxu1 %v15386_v59  ;;  %v15407_v33 = vld [vmem:[%s17596_s28 + $0x578] sm:$0xff]  }
0x336a   : > { %14387 = vmatprep.subr.bf16.mxu0 %v15387_v42  ;;  %14409 = vmatprep.subr.bf16.mxu1 %v15388_v48  ;;  %v15408_v59 = vld [vmem:[%s17596_s28 + $0x5f8] sm:$0xff]   ;;  %v10904_v42 = vmax.f32 %v10689_v7, 0.0  ;;  %v10906_v48 = vmax.f32 %v10730_v18, 0.0 }
0x336b   : > { %v17261_v31 = vpop.f32.mrb[184].mxu0  ;;  %v17263_v60 = vpop.f32.mrb[184].mxu1  ;;  %11818 = vmatprep.mubr.bf16.mxu0 %v10921_v44  ;;  %11858 = vmatprep.mubr.bf16.mxu1 %v10923_v29  ;;  %v15413_v44 = vld [vmem:[%s17596_s28 + $0x600] sm:$0xff]   ;;  %v15441_v7 = vld [vmem:[%s17596_s28 + $0x638] sm:$0xff]  }
0x336c   : > { %v10772_v6 = vpop.f32.mrb[185].mxu0  ;;  %v10813_v62 = vpop.f32.mrb[185].mxu1  ;;  %v10920_v29 = vpack.c.bf16 %v10904_v42, %v10904_v42  ;;  %v15447_v42 = vld [vmem:[%s17596_s28 + $0x748] sm:$0xff]  }
0x336d   : > { %14388 = vmatpush3.bf16.msra.mxu0 %v15389_v63  ;;  %14410 = vmatpush3.bf16.msra.mxu1 %v15390_v2  ;;  %v10774_v54 = vpop.f32.mrb[186].mxu0  ;;  %v10815_v23 = vpop.f32.mrb[186].mxu1  ;;  %v10773_v37 = vadd.f32 %v10772_v6, %v10368_v21  ;;  %v10814_v24 = vadd.f32 %v10813_v62, %v10376_v41  ;;  %v10922_v63 = vpack.c.bf16 %v10906_v48, %v10906_v48  ;;  %v15414_v2 = vld [vmem:[%s17596_s28 + $0x680] sm:$0xff]   ;;  %v15416_v6 = vld [vmem:[%s17596_s28 + $0x6c8] sm:$0xff]   ;;  %v15438_v41 = vld [vmem:[%s17596_s28 + $0x6b0] sm:$0xff]  }
0x336e   : > { %v10775_v40 = vpop.f32.mrb[187].mxu0  ;;  %v10816_v45 = vpop.f32.mrb[187].mxu1  ;;  %14389 = vmatprep.subr.bf16.mxu0 %v15391_v4  ;;  %14411 = vmatprep.subr.bf16.mxu1 %v15392_v30  ;;  %v15415_v30 = vld [vmem:[%s17596_s28 + $0x648] sm:$0xff]  }
0x336f   : > { %v10909_v26 = vmax.f32 %v10773_v37, 0.0  ;;  %v10911_v53 = vmax.f32 %v10814_v24, 0.0  ;;  %v15417_v54 = vld [vmem:[%s17596_s28 + $0x608] sm:$0xff]   ;;  %v15421_v40 = vld [vmem:[%s17596_s28 + $0x610] sm:$0xff]  }
0x3370   : > { %v15418_v23 = vld [vmem:[%s17596_s28 + $0x688] sm:$0xff]   ;;  %v15422_v45 = vld [vmem:[%s17596_s28 + $0x690] sm:$0xff]  }
0x3371   : > { %14390 = vmatpush3.bf16.msra.mxu0 %v15393_v39  ;;  %14412 = vmatpush3.bf16.msra.mxu1 %v15394_v55  ;;  %v10925_v4 = vpack.c.bf16 %v10909_v26, %v10909_v26  ;;  %v10927_v62 = vpack.c.bf16 %v10911_v53, %v10911_v53  ;;  %v15419_v39 = vld [vmem:[%s17596_s28 + $0x650] sm:$0xff]   ;;  %v15449_v26 = vld [vmem:[%s17596_s28 + $0x708] sm:$0xff]  }
0x3372   : > { %14391 = vmatprep.subr.bf16.mxu0 %v15395_v0  ;;  %14413 = vmatprep.subr.bf16.mxu1 %v15396_v46  ;;  %v15420_v55 = vld [vmem:[%s17596_s28 + $0x6d0] sm:$0xff]   ;;  %v15423_v0 = vld [vmem:[%s17596_s28 + $0x658] sm:$0xff]   ;;  %v15450_v53 = vld [vmem:[%s17596_s28 + $0x788] sm:$0xff]  }
0x3373   : > { %v17278_v8 = vpop.f32.mrb[188].mxu0  ;;  %v10893_v9 = vpop.f32.mrb[188].mxu1  ;;  %v15424_v46 = vld [vmem:[%s17596_s28 + $0x6d8] sm:$0xff]  }
0x3374   : > { %v17280_v10 = vadd.f32 %v10893_v9, %v10388_v56  ;;  %v17282_v11 = vpop.f32.mrb[189].mxu0  ;;  %v17284_v12 = vpop.f32.mrb[189].mxu1  ;;  %v15425_v56 = vld [vmem:[%s17596_s28 + $0x618] sm:$0xff]   ;;  %v15430_v9 = vld [vmem:[%s17596_s28 + $0x6a0] sm:$0xff]  }
0x3375   : > { %14392 = vmatpush3.bf16.msra.mxu0 %v15397_v61  ;;  %14414 = vmatpush3.bf16.msra.mxu1 %v15398_v1  ;;  %v10856_v15 = vpop.f32.mrb[190].mxu0  ;;  %v10897_v13 = vpop.f32.mrb[190].mxu1  ;;  %v15426_v61 = vld [vmem:[%s17596_s28 + $0x698] sm:$0xff]   ;;  %v15427_v1 = vld [vmem:[%s17596_s28 + $0x660] sm:$0xff]  }
0x3376   : > { %v10857_v27 = vpop.f32.mrb[191].mxu0  ;;  %v10898_v32 = vpop.f32.mrb[191].mxu1  ;;  %14393 = vmatprep.subr.bf16.mxu0 %v15399_v5  ;;  %14415 = vmatprep.subr.bf16.mxu1 %v15400_v50  ;;  %v15428_v5 = vld [vmem:[%s17596_s28 + $0x6e0] sm:$0xff]   ;;  %v15431_v15 = vld [vmem:[%s17596_s28 + $0x668] sm:$0xff]  }
0x3377   : > { %v15429_v50 = vld [vmem:[%s17596_s28 + $0x620] sm:$0xff]   ;;  %v15432_v13 = vld [vmem:[%s17596_s28 + $0x6e8] sm:$0xff]   ;;  %v10372_v27 = vrot.slane %v17270_v49, %v16116_v35  ;;  %v15436_v32 = vld [vmem:[%s17596_s28 + $0x6f0] sm:$0xff]  }
0x3378   : > { %v15439_v35 = vld [vmem:[%s17596_s28 + $0x678] sm:$0xff]  }
0x3379   : > { %14394 = vmatpush3.bf16.msra.mxu0 %v15401_v17  ;;  %14416 = vmatpush3.bf16.msra.mxu1 %v15402_v3  ;;  %v15433_v17 = vld [vmem:[%s17596_s28 + $0x628] sm:$0xff]   ;;  %v10364_v3 = vrot.slane %v17270_v49, %v16113_v34  ;;  %v15437_v34 = vld [vmem:[%s17596_s28 + $0x630] sm:$0xff]  }
0x337a   : > { %14395 = vmatprep.subr.bf16.mxu0 %v15403_v43  ;;  %14417 = vmatprep.subr.bf16.mxu1 %v15404_v28  ;;  %v10384_v43 = vrot.slane %v17270_v49, %v16136_v51  ;;  %v10392_v28 = vrot.slane %v17270_v49, %v16139_v52 }
0x337b   : > { %v10771_v21 = vadd.f32 %v17261_v31, %v10364_v3  ;;  %v15442_v31 = vld [vmem:[%s17596_s28 + $0x6b8] sm:$0xff]   ;;  %v10914_v3 = vmax.f32 %v17280_v10, 0.0 }
0x337c   : > { %v10855_v51 = vadd.f32 %v17282_v11, %v10384_v43  ;;  %v10896_v52 = vadd.f32 %v17284_v12, %v10392_v28  ;;  %v15445_v11 = vld [vmem:[%s17596_s28 + $0x700] sm:$0xff]  }
0x337d   : > { %14396 = vmatpush3.bf16.msra.mxu0 %v15405_v14  ;;  %14418 = vmatpush3.bf16.msra.mxu1 %v15406_v25  ;;  %v10812_v14 = vadd.f32 %v17263_v60, %v10372_v27  ;;  %v15440_v25 = vld [vmem:[%s17596_s28 + $0x6f8] sm:$0xff]   ;;  %v10908_v18 = vmax.f32 %v10771_v21, 0.0  ;;  %v15444_v60 = vld [vmem:[%s17596_s28 + $0x7c0] sm:$0xff]  }
0x337e   : > { %14397 = vmatprep.subr.bf16.mxu0 %v15407_v33  ;;  %14419 = vmatprep.subr.bf16.mxu1 %v15408_v59  ;;  %v15443_v33 = vld [vmem:[%s17596_s28 + $0x740] sm:$0xff]   ;;  %v10913_v37 = vmax.f32 %v10855_v51, 0.0  ;;  %v10915_v24 = vmax.f32 %v10896_v52, 0.0 }
0x337f   : > { %v10910_v59 = vmax.f32 %v10812_v14, 0.0  ;;  %v15446_v12 = vld [vmem:[%s17596_s28 + $0x780] sm:$0xff]  }
0x3380   : > { %v10929_v48 = vpack.c.bf16 %v10913_v37, %v10913_v37 }
0x3381   : > { %14398 = vmatpush3.bf16.msra.mxu0 %v15409_v38  ;;  %14420 = vmatpush3.bf16.msra.mxu1 %v15410_v58  ;;  %v10924_v38 = vpack.c.bf16 %v10908_v18, %v10908_v18  ;;  %v10926_v58 = vpack.c.bf16 %v10910_v59, %v10910_v59 }
0x3382   : > { %14427 = vmatprep.subr.bf16.mxu0 %v15411_v20  ;;  %14449 = vmatprep.subr.bf16.mxu1 %v15412_v36  ;;  %v15448_v20 = vld [vmem:[%s17596_s28 + $0x7c8] sm:$0xff]   ;;  %v10931_v36 = vpack.c.bf16 %v10915_v24, %v10915_v24 }
0x3384   : > { %11819 = vmatmul.mubr.bf16.vlgmr.msra.gmra.mrb[196].mxu0 %v10920_v29  ;;  %11859 = vmatmul.mubr.bf16.vlgmr.msra.gmra.mrb[196].mxu1 %v10922_v63  ;;  %v15452_v29 = vld [vmem:[%s17596_s28 + $0x7d0] sm:$0xff]  }
0x3385   : > { %14428 = vmatpush3.bf16.msra.mxu0 %v15413_v44  ;;  %11898 = vmatprep.mubr.bf16.mxu0 %v10925_v4  ;;  %v15451_v44 = vld [vmem:[%s17596_s28 + $0x750] sm:$0xff]   ;;  %v15455_v4 = vld [vmem:[%s17596_s28 + $0x758] sm:$0xff]  }
0x3386   : > { %14450 = vmatpush3.bf16.msra.mxu1 %v15414_v2  ;;  %11938 = vmatprep.mubr.bf16.mxu1 %v10927_v62  ;;  %v15453_v63 = vld [vmem:[%s17596_s28 + $0x710] sm:$0xff]   ;;  %v15458_v62 = vld [vmem:[%s17596_s28 + $0x798] sm:$0xff]  }
0x3387   : > { %14429 = vmatprep.subr.bf16.mxu0 %v15415_v30  ;;  %14451 = vmatprep.subr.bf16.mxu1 %v15416_v6  ;;  %v15454_v2 = vld [vmem:[%s17596_s28 + $0x790] sm:$0xff]   ;;  %v15456_v30 = vld [vmem:[%s17596_s28 + $0x7d8] sm:$0xff]  }
0x3388   : > { %v15457_v6 = vld [vmem:[%s17596_s28 + $0x718] sm:$0xff]  }
0x3389   : > { %14430 = vmatpush3.bf16.msra.mxu0 %v15417_v54  ;;  %v15459_v54 = vld [vmem:[%s17596_s28 + $0x760] sm:$0xff]  }
0x338a   : > { %14452 = vmatpush3.bf16.msra.mxu1 %v15418_v23  ;;  %14431 = vmatprep.subr.bf16.mxu0 %v15419_v39  ;;  %v15460_v23 = vld [vmem:[%s17596_s28 + $0x7e0] sm:$0xff]  }
0x338b   : > { %14453 = vmatprep.subr.bf16.mxu1 %v15420_v55  ;;  %v15461_v39 = vld [vmem:[%s17596_s28 + $0x720] sm:$0xff]  }
0x338c   : > { %v15462_v55 = vld [vmem:[%s17596_s28 + $0x7a0] sm:$0xff]  }
0x338d   : > { %14432 = vmatpush3.bf16.msra.mxu0 %v15421_v40  ;;  %v15463_v40 = vld [vmem:[%s17596_s28 + $0x768] sm:$0xff]  }
0x338e   : > { %14454 = vmatpush3.bf16.msra.mxu1 %v15422_v45  ;;  %14433 = vmatprep.subr.bf16.mxu0 %v15423_v0  ;;  %v15464_v45 = vld [vmem:[%s17596_s28 + $0x7e8] sm:$0xff]  }
0x338f   : > { %14455 = vmatprep.subr.bf16.mxu1 %v15424_v46  ;;  %v15465_v0 = vld [vmem:[%s17596_s28 + $0x728] sm:$0xff]   ;;  %v10380_v46 = vrot.slane %v17270_v49, %v16180_v57  ;;  %v15473_v57 = vld [vmem:[%s17596_s28 + $0x738] sm:$0xff]  }
0x3391   : > { %14434 = vmatpush3.bf16.msra.mxu0 %v15425_v56  ;;  %v15466_v56 = vld [vmem:[%s17596_s28 + $0x7a8] sm:$0xff]  }
0x3392   : > { %14456 = vmatpush3.bf16.msra.mxu1 %v15426_v61  ;;  %14435 = vmatprep.subr.bf16.mxu0 %v15427_v1  ;;  %v15467_v61 = vld [vmem:[%s17596_s28 + $0x770] sm:$0xff]  }
0x3393   : > { %14457 = vmatprep.subr.bf16.mxu1 %v15428_v5  ;;  %v15468_v1 = vld [vmem:[%s17596_s28 + $0x7f0] sm:$0xff]  }
0x3394   : > { %v15469_v5 = vld [vmem:[%s17596_s28 + $0x730] sm:$0xff]  }
0x3395   : > { %14436 = vmatpush3.bf16.msra.mxu0 %v15429_v50  ;;  %v10853_v50 = vadd.f32 %v17278_v8, %v10380_v46  ;;  %v10930_v8 = vpack.c.bf16 %v10914_v3, %v10914_v3 }
0x3396   : > { %14458 = vmatpush3.bf16.msra.mxu1 %v15430_v9  ;;  %14437 = vmatprep.subr.bf16.mxu0 %v15431_v15  ;;  %v15470_v9 = vld [vmem:[%s17596_s28 + $0x7b0] sm:$0xff]   ;;  %v15471_v15 = vld [vmem:[%s17596_s28 + $0x778] sm:$0xff]  }
0x3397   : > { %14459 = vmatprep.subr.bf16.mxu1 %v15432_v13  ;;  %v15472_v13 = vld [vmem:[%s17596_s28 + $0x7f8] sm:$0xff]   ;;  %v10912_v49 = vmax.f32 %v10853_v50, 0.0 }
0x3399   : > { %14438 = vmatpush3.bf16.msra.mxu0 %v15433_v17  ;;  %v15474_v17 = vld [vmem:[%s17596_s28 + $0x7b8] sm:$0xff]  }
0x339a   : > { %14460 = vmatpush3.bf16.msra.mxu1 %v15434_v47  ;;  %14439 = vmatprep.subr.bf16.mxu0 %v15435_v19  ;;  %v10928_v47 = vpack.c.bf16 %v10912_v49, %v10912_v49 }
0x339b   : > { %14461 = vmatprep.subr.bf16.mxu1 %v15436_v32  ;;  %v13562_v32 = vld [vmem:[%s17600_s0 + $0x1] ss:$0 sm:$0xff]  ;;  %s13700_s0 = sshll.u32 %s17608_s7, 7 }
0x339c   : > { %s17407_s3 = scalar_lea.hbm %s17609_s16, %s13700_s0 }
0x339d   : > { %14440 = vmatpush3.bf16.msra.mxu0 %v15437_v34 }
0x339e   : > { %14462 = vmatpush3.bf16.msra.mxu1 %v15438_v41  ;;  %14441 = vmatprep.subr.bf16.mxu0 %v15439_v35 }
0x339f   : > { %14463 = vmatprep.subr.bf16.mxu1 %v15440_v25 }
0x33a1   : > { %14442 = vmatpush3.bf16.msra.mxu0 %v15441_v7 }
0x33a2   : > { %14464 = vmatpush3.bf16.msra.mxu1 %v15442_v31  ;;  %14471 = vmatprep.subr.bf16.mxu0 %v15443_v33 }
0x33a3   : > { %14493 = vmatprep.subr.bf16.mxu1 %v15444_v60 }
0x33a4   : > { %11899 = vmatmul.mubr.bf16.vlgmr.msra.gmra.mrb[200].mxu0 %v10924_v38 }
0x33a5   : > { %11939 = vmatmul.mubr.bf16.vlgmr.msra.gmra.mrb[200].mxu1 %v10926_v58  ;;  %14472 = vmatpush3.bf16.msra.mxu0 %v15445_v11 }
0x33a6   : > { %11978 = vmatprep.mubr.bf16.mxu0 %v10929_v48  ;;  %14494 = vmatpush3.bf16.msra.mxu1 %v15446_v12 }
0x33a7   : > { %12018 = vmatprep.mubr.bf16.mxu1 %v10931_v36  ;;  %14473 = vmatprep.subr.bf16.mxu0 %v15447_v42 }
0x33a8   : > { %14495 = vmatprep.subr.bf16.mxu1 %v15448_v20 }
0x33a9   : > { %14474 = vmatpush3.bf16.msra.mxu0 %v15449_v26 }
0x33aa   : > { %14496 = vmatpush3.bf16.msra.mxu1 %v15450_v53  ;;  %14475 = vmatprep.subr.bf16.mxu0 %v15451_v44 }
0x33ab   : > { %14497 = vmatprep.subr.bf16.mxu1 %v15452_v29 }
0x33ad   : > { %14476 = vmatpush3.bf16.msra.mxu0 %v15453_v63 }
0x33ae   : > { %14498 = vmatpush3.bf16.msra.mxu1 %v15454_v2  ;;  %14477 = vmatprep.subr.bf16.mxu0 %v15455_v4 }
0x33af   : > { %14499 = vmatprep.subr.bf16.mxu1 %v15456_v30 }
0x33b1   : > { %14478 = vmatpush3.bf16.msra.mxu0 %v15457_v6 }
0x33b2   : > { %14500 = vmatpush3.bf16.msra.mxu1 %v15458_v62  ;;  %14479 = vmatprep.subr.bf16.mxu0 %v15459_v54 }
0x33b3   : > { %14501 = vmatprep.subr.bf16.mxu1 %v15460_v23 }
0x33b5   : > { %14480 = vmatpush3.bf16.msra.mxu0 %v15461_v39 }
0x33b6   : > { %14502 = vmatpush3.bf16.msra.mxu1 %v15462_v55  ;;  %14481 = vmatprep.subr.bf16.mxu0 %v15463_v40 }
0x33b7   : > { %14503 = vmatprep.subr.bf16.mxu1 %v15464_v45 }
0x33b9   : > { %14482 = vmatpush3.bf16.msra.mxu0 %v15465_v0 }
0x33ba   : > { %14504 = vmatpush3.bf16.msra.mxu1 %v15466_v56  ;;  %14483 = vmatprep.subr.bf16.mxu0 %v15467_v61 }
0x33bb   : > { %14505 = vmatprep.subr.bf16.mxu1 %v15468_v1 }
0x33bd   : > { %14484 = vmatpush3.bf16.msra.mxu0 %v15469_v5 }
0x33be   : > { %14506 = vmatpush3.bf16.msra.mxu1 %v15470_v9  ;;  %14485 = vmatprep.subr.bf16.mxu0 %v15471_v15 }
0x33bf   : > { %14507 = vmatprep.subr.bf16.mxu1 %v15472_v13 }
0x33c1   : > { %14486 = vmatpush3.bf16.msra.mxu0 %v15473_v57 }
0x33c2   : > { %14508 = vmatpush3.bf16.msra.mxu1 %v15474_v17  ;;  %14812 = vmatprep.subr.bf16.mxu0 %v15657_v16 }
0x33c4   : > { %11979 = vmatmul.mubr.bf16.vlgmr.msra.gmra.mrb[204].mxu0 %v10928_v47  ;;  %v13691_v47 = vld [vmem:[%s17602_s27 + $0x1] ss:$0 sm:$0xff] }
0x33c5   : > { %12019 = vmatmul.mubr.bf16.vlgmr.msra.gmra.mrb[204].mxu1 %v10930_v8  ;;  %14816 = vmatprep.mubr.msk.bf16.mxu0 %vm15656_vm0, %v15657_v16  ;;  %v13692_v8 = vld [vmem:[%s17604_s12 + $0x1] ss:$0 sm:$0xff] }
0x3437   : > { %v14355_v19 = vpop.f32.mrb[192].mxu0  ;;  %v14377_v27 = vpop.f32.mrb[192].mxu1 }
0x3438   : > { %v14356_v43 = vpop.f32.mrb[193].mxu0  ;;  %v14378_v28 = vpop.f32.mrb[193].mxu1 }
0x3439   : > { %v14357_v34 = vadd.f32 %v14356_v43, %v14355_v19  ;;  %v14379_v21 = vadd.f32 %v14378_v28, %v14377_v27  ;;  %v14358_v10 = vpop.f32.mrb[194].mxu0  ;;  %v14380_v41 = vpop.f32.mrb[194].mxu1 }
0x343a   : > { %v14359_v35 = vpop.f32.mrb[195].mxu0  ;;  %v14381_v14 = vpop.f32.mrb[195].mxu1  ;;  %v15475_v41 = vld [vmem:[%s15868_s20] sm:$0xff]  }
0x343b   : > { %v11741_v25 = vadd.f32 %v14357_v34, %v13562_v32  ;;  %14813 = vmatpush3.bf16.msra.mxu0 %v15475_v41  ;;  %v15476_v35 = vld [vmem:[%s15868_s20 + $0x8] sm:$0xff]  }
0x343c   : > { %14814 = vmatprep.subr.bf16.mxu0 %v15657_v16  ;;  %v13695_v16 = vld [vmem:[%s17607_s13] ss:$0 sm:$0xff]  ;;  %s15664_s13 = smov [#allocation3]  }
0x343d   : > { %v11781_v51 = vadd.f32 %v14379_v21, %v11741_v25  ;;  %s15553_s7 = sshll.u32 %s15664_s13, 4  ;;  %s15554_s7 = int_to_ptr.vmem [resolvable:$false] %s15553_s7 }
0x343e   : > { %s15555_s0 = scalar_lea.vmem %s15554_s7, 256  ;;  %p15556_p0 = scmp.lt.s32.totalorder %s17409_s2, %s15554_s7 }
0x343f   : > { %14815 = vmatpush3.bf16.msra.mxu0 %v15476_v35 }
0x3457   : > { %v14399_v52 = vpop.f32.mrb[196].mxu0  ;;  %v14421_v7 = vpop.f32.mrb[196].mxu1 }
0x3458   : > { %v14400_v18 = vpop.f32.mrb[197].mxu0  ;;  %v14422_v31 = vpop.f32.mrb[197].mxu1 }
0x3459   : > { %v14401_v33 = vadd.f32 %v14400_v18, %v14399_v52  ;;  %v14423_v59 = vadd.f32 %v14422_v31, %v14421_v7  ;;  %v14402_v60 = vpop.f32.mrb[198].mxu0  ;;  %v14424_v37 = vpop.f32.mrb[198].mxu1  ;;  %v13693_v7 = vld [vmem:[%s17605_s5] ss:$0 sm:$0xff]  ;;  %s12152_s5 = scalar_lea.sflag [#allocation4], %s1240_s22 }
0x345a   : > { %v14403_v24 = vpop.f32.mrb[199].mxu0  ;;  %v14425_v11 = vpop.f32.mrb[199].mxu1  ;;  %v13694_v31 = vld [vmem:[%s17606_s9] ss:$0 sm:$0xff]  ;;  %s15549_s9 = scalar_lea.vmem %s17409_s2, 128 }
0x345b   : > { %v11821_v38 = vadd.f32 %v14401_v33, %v11781_v51  ;;  %p15550_p11 = scmp.ne.s32.totalorder %s17409_s2, %s15549_s9  ;;  %p15557_p1 = scmp.lt.s32.totalorder %s15555_s0, %s15549_s9 }
0x345d   : > { %v11861_v12 = vadd.f32 %v14423_v59, %v11821_v38  ;;  %p15551_p12 = pnand %p15550_p11, %p15918_p5  ;;  %p15558_p2 = por %p15557_p1, %p15556_p0 }
0x345f   : > { %p15552_p13 = pneg %p15551_p12 }
0x3461   : > { %p15559_p3 = pnand %p15558_p2, %p15552_p13 }
0x3477   : > { %v14443_v58 = vpop.f32.mrb[200].mxu0 }
0x3478   : > { %v14465_v42 = vpop.f32.mrb[200].mxu1  ;;  %v14444_v48 = vpop.f32.mrb[201].mxu0 }
0x3479   : > { %v14445_v20 = vadd.f32 %v14444_v48, %v14443_v58  ;;  %v14466_v36 = vpop.f32.mrb[201].mxu1  ;;  %v14446_v26 = vpop.f32.mrb[202].mxu0 }
0x347a   : > { %v14467_v53 = vadd.f32 %v14466_v36, %v14465_v42  ;;  %v14468_v44 = vpop.f32.mrb[202].mxu1  ;;  %v14447_v29 = vpop.f32.mrb[203].mxu0 }
0x347b   : > { %v11901_v63 = vadd.f32 %v14445_v20, %v11861_v12  ;;  %v14469_v2 = vpop.f32.mrb[203].mxu1 }
0x347d   : > { %v11941_v4 = vadd.f32 %v14467_v53, %v11901_v63 }
0x3497   : > { %v14487_v30 = vpop.f32.mrb[204].mxu0 }
0x3498   : > { %v14509_v6 = vpop.f32.mrb[204].mxu1  ;;  %v14488_v62 = vpop.f32.mrb[205].mxu0 }
0x3499   : > { %v14489_v54 = vadd.f32 %v14488_v62, %v14487_v30  ;;  %v14510_v23 = vpop.f32.mrb[205].mxu1  ;;  %v14490_v39 = vpop.f32.mrb[206].mxu0 }
0x349a   : > { %v14511_v55 = vadd.f32 %v14510_v23, %v14509_v6  ;;  %v14512_v40 = vpop.f32.mrb[206].mxu1  ;;  %v14491_v45 = vpop.f32.mrb[207].mxu0 }
0x349b   : > { %v11981_v0 = vadd.f32 %v14489_v54, %v11941_v4  ;;  %v14513_v46 = vpop.f32.mrb[207].mxu1 }
0x349d   : > { %v12021_v56 = vadd.f32 %v14511_v55, %v11981_v0 }
0x349f   : > { %v12026_v61 = vadd.f32 %v12021_v56, %v17152_v22 }
0x34a1   : > { %v12027_v1 = vsel %vm1747_vm4, %v12026_v61, 0.0 }
0x34a2   : > { %12028 = vadd.xlane.f32.xlu0 %v12027_v1 }
0x352f   : > { %v12029_v5 = vpop.xlane.xlu0 %12028 }
0x3530   : > { %v12030_v50 = vmul.f32 0.03125, %v12029_v5 }
0x3532   : > { %v12031_v9 = vsub.f32 %v12026_v61, %v12030_v50 }
0x3534   : > { %v12032_v15 = vmul.f32 %v12031_v9, %v12031_v9 }
0x3536   : > { %v12033_v13 = vsel %vm1747_vm4, %v12032_v15, 0.0 }
0x3537   : > { %12034 = vadd.xlane.f32.xlu0 %v12033_v13 }
0x35c4   : > { %v12035_v57 = vpop.xlane.xlu0 %12034 }
0x35c5   : > { %v12036_v49 = vmul.f32 0.03125, %v12035_v57 }
0x35c7   : > { %v12037_v17 = vadd.f32 1e-05, %v12036_v49 }
0x35c9   : > { %15545 = vrsqrt.f32 %v12037_v17 }
0x35d3   : > { %v15546_v3 = vpop.eup %15545 }
0x35d4   : > { %v12039_v22 = vmul.f32 %v15546_v3, %v12031_v9 }
0x35d6   : > { %v12046_v19 = vmul.f32 %v13691_v47, %v12039_v22 }
0x35d8   : > { %v12053_v27 = vadd.f32 %v13692_v8, %v12046_v19 }
0x35da   : > { %v12056_v32 = vsel %vm1747_vm4, %v12053_v27, 0.0 }
0x35db   : > { %12057 = vadd.xlane.f32.xlu1 %v12056_v32 }
0x3668   : > { %v12058_v43 = vpop.xlane.xlu1 %12057 }
0x3669   : > { %v12059_v28 = vmul.f32 0.03125, %v12058_v43 }
0x366b   : > { %v12060_v34 = vsub.f32 %v12053_v27, %v12059_v28 }
0x366d   : > { %v12061_v21 = vmul.f32 %v12060_v34, %v12060_v34 }
0x366f   : > { %v12062_v10 = vsel %vm1747_vm4, %v12061_v21, 0.0 }
0x3670   : > { %12063 = vadd.xlane.f32.xlu0 %v12062_v10 }
0x36fd   : > { %v12064_v14 = vpop.xlane.xlu0 %12063 }
0x36fe   : > { %v12065_v25 = vmul.f32 0.03125, %v12064_v14 }
0x3700   : > { %v12066_v51 = vadd.f32 1e-05, %v12065_v25 }
0x3702   : > { %15547 = vrsqrt.f32 %v12066_v51 }
0x370c   : > { %v15548_v52 = vpop.eup %15547 }
0x370d   : > { %v12068_v18 = vmul.f32 %v15548_v52, %v12060_v34 }
0x370f   : > { %v12075_v33 = vmul.f32 %v13693_v7, %v12068_v18 }
0x3711   : > { %v12082_v59 = vadd.f32 %v13694_v31, %v12075_v33 }
0x3713   : > { %v12088_v60 = vpack.c.bf16 %v12082_v59, %v12082_v59 }
0x3715   : > { %14817 = vmatmul.mubr.msk.bf16.vlgmr.msra.gmra.mrb[208].mxu0 %vm1747_vm4, %v12088_v60 }
0x37e8   : > { %v12144_v37 = vpop.f32.mrb[208].mxu0 }
0x37e9   : > { %v12145_v24 = vadd.f32 %v13695_v16, %v12144_v37  ;;  %v14818_v11 = vpop.f32.mrb[209].mxu0 }
0x37ea   : > { %v12147_v38 = vpop.f32.mrb[210].mxu0 }
0x37eb   : > { %v14819_v12 = vpop.f32.mrb[211].mxu0  ;;  %12150 = vst.msk [vmem:[%s1242_s1] sm:$0xff] %vm1269_vm1, %v12145_v24 }
0x37ec   : > { %15562 = shalt.err (!%p15559_p3)
}
0x37ed   : > { %s15563_s1 = scalar_lea.hbm %s17407_s3, 128  ;;  %s15567_s22 = scalar_lea.hbm %s17609_s16, 256 }
0x37ee   : > { %p15564_p4 = scmp.ne.s32.totalorder %s17407_s3, %s15563_s1  ;;  %p15568_p9 = scmp.lt.u32.totalorder %s17407_s3, %s17609_s16 }
0x37ef   : > { %p15569_p10 = scmp.lt.u32.totalorder %s15567_s22, %s15563_s1  ;;  %p15571_p12 = scmp.lt.u32.totalorder %s15563_s1, %s17407_s3 }
0x37f0   : > { %p15565_p7 = pnand %p15564_p4, %p15918_p5 }
0x37f1   : > { %p15570_p11 = por %p15569_p10, %p15568_p9 }
0x37f2   : > { %p15566_p8 = pneg %p15565_p7 }
0x37f3   : > { %p15572_p0 = por %p15571_p12, %p15570_p11 }
0x37f5   : > { %p15573_p13 = pnand %p15572_p0, %p15566_p8 }
0x37f7   : > { %15576 = shalt.err (!%p15573_p13)
}
0x37f8   : > { %14844 = dma.vmem_to_hbm [thread:$0]  (%p15918_p5), %s17409_s2, 128, %s17407_s3, %s12152_s5  }
0x37f9 PF: > { %s17611_s23 = sld [smem:[#allocation47_spill]]  ;;  %p14850_p1 = scmp.ge.s32.totalorder %s15611_s15, 2 }
0x37fb   : > { %p14847_p2 = pnand %p14850_p1, %p15922_p6 }
0x37ff   : > { %s12177_s13 = sand.u32 1, %s17611_s23  }
0x3800   : > { %s12178_s7 = scalar_lea.sflag [#allocation4], %s12177_s13 }
0x3801   : > { %15594 = dma.done.wait (!%p14847_p2), %s12178_s7, 128  }
0x3802   : > { %15596 = vsyncadd (!%p14847_p2), %s12178_s7, 4294967168  ;;  %s17613_s15 = sld [smem:[#allocation50_spill]]  ;;  %s17614_s0 = sld [smem:[#allocation48_spill]] }
0x3803   : > { %s17615_s11 = sld [smem:[#allocation51_spill]]  ;;  %s17616_s7 = smov %s15603_s10 }
0x3808   : > { %p93_p3 = scmp.ge.s32.totalorder %s17613_s15, 4   ;;  %s17617_s10 = smov %s17614_s0 }
0x380a   :  { %95 = sbr.rel (!%p93_p3) target bundleno = 100 (0x64), region = 295 }
0x3811   :  { %12183 = vsyncpa [#allocation4], 1 }
0x3812   :  { %12185 = vsyncpa [#allocation4 + $0x1], 1 }

</bundles_post_ra>
